<compile_context>
chip_gen: v5e
topology: v5e:2x2
jax: 0.10.0
libtpu: 0.0.40
codegen_flags: <defaults>
</compile_context>

<pallas_src>
import jax
import jax.numpy as jnp
from jax import lax
from jax.experimental import pallas as pl
from jax.experimental.pallas import tpu as pltpu

KSIZE = 7
PAD = (KSIZE - 1) // 2


def _round_up(v, m):
    return (v + m - 1) // m * m


def _band_matrices(weight, W, Wp):
    """Banded Toeplitz matrices encoding the 7 column taps of the 7x7 conv.

    bmat[p, i, cc, c] = w[p, i, cc - c + PAD]  if 0 <= cc - c + PAD < 7
                                                  and cc < W and c < W, else 0,
    so that  out[h, c] = sum_{p,i} (padded_plane[p, h+i, :] @ bmat[p, i])[c]
    reproduces conv2d(cat([avg, max]), w, padding=3) exactly (zero padding on
    both rows -- via the zeroed scratch halo -- and columns -- via the band).
    """
    w3 = weight.reshape(2, KSIZE, KSIZE).astype(jnp.float32)
    cc = jnp.arange(Wp)[:, None]
    c = jnp.arange(Wp)[None, :]
    j = cc - c + PAD
    valid = (j >= 0) & (j < KSIZE) & (cc < W) & (c < W)
    jc = jnp.clip(j, 0, KSIZE - 1)
    taps = w3[:, :, jc]                                    # (2, 7, Wp, Wp)
    return jnp.where(valid[None, None, :, :], taps, 0.0).astype(jnp.float32)


def _make_kernel(BB, C, H, W, HW, Wp, CK):
    """Builds the kernel body; all shape parameters are static Python ints."""
    NC = C // CK
    C_MAIN = NC * CK
    C_TAIL = C - C_MAIN
    UNROLL = min(NC, 4) if NC > 0 else 1

    def kernel(bmat_ref, x_ref, y_ref, att_ref, red_ref, pad_ref):
        # bmat_ref: VMEM (2, 7, Wp, Wp)      banded conv-weight matrices
        # x_ref   : VMEM (BB, C, HW)         lane-dense input block
        # y_ref   : VMEM (BB, C, HW)         att * x
        # att_ref : VMEM (BB, 1, HW)         attention map (flat)
        # red_ref : VMEM (2, HW)             flat avg / max planes
        # pad_ref : VMEM (2, H+2*PAD, Wp)    zero-padded 2-D planes (lane-padded)

        # Zero the whole padded scratch once per grid step: the (H, W) interior
        # is fully rewritten for every image, the row halo and the lane-padding
        # columns >= W must stay zero (the MXU would propagate stale NaNs into
        # valid outputs otherwise).  Safe under megacore grid sharding because
        # it happens every step.
        pad_ref[...] = jnp.zeros_like(pad_ref)

        def per_image(b):
            # ---- channel mean / max, streamed over C in CK-sublane chunks ----
            def red_body(ci, carry):
                s, m = carry
                c0 = pl.multiple_of(ci * CK, CK)
                xi = x_ref[b, pl.ds(c0, CK), :].astype(jnp.float32)
                # Collapse the CK sublanes immediately so the loop carries are
                # (1, HW) and stay vreg-resident even for large H*W.
                return (s + jnp.sum(xi, axis=0, keepdims=True),
                        jnp.maximum(m, jnp.max(xi, axis=0, keepdims=True)))

            s = jnp.zeros((1, HW), jnp.float32)
            m = jnp.full((1, HW), -jnp.inf, jnp.float32)
            if NC > 0:
                s, m = lax.fori_loop(0, NC, red_body, (s, m), unroll=UNROLL)
            if C_TAIL > 0:
                xt = x_ref[b, pl.ds(C_MAIN, C_TAIL), :].astype(jnp.float32)
                s = s + jnp.sum(xt, axis=0, keepdims=True)
                m = jnp.maximum(m, jnp.max(xt, axis=0, keepdims=True))
            red_ref[0:1, :] = s * (1.0 / C)   # mean (sum * 1/C; within f32 tol)
            red_ref[1:2, :] = m

            # ---- scatter the flat planes into the padded 2-D scratch ---------
            # Interior at column 0 (left halo folded into bmat) => every store
            # starts at lane 0.
            # TODO(synk): coalesce into 8-row sublane groups via an in-register
            # (1, 8*W) -> (8, W) reshape once Mosaic reshape support is verified
            # for arbitrary W.
            for h in range(H):
                pad_ref[:, PAD + h, 0:W] = red_ref[:, h * W:(h + 1) * W]

            # ---- 7x7 conv: 14 banded matmuls on the (otherwise idle) MXU -----
            acc = jnp.zeros((H, Wp), jnp.float32)
            for p in range(2):
                for i in range(KSIZE):
                    acc = acc + jnp.dot(
                        pad_ref[p, i:i + H, :], bmat_ref[p, i],
                        preferred_element_type=jnp.float32,
                        precision=lax.Precision.HIGHEST)
            att2 = jax.nn.sigmoid(acc)        # columns >= W are unused (zeros in)

            # ---- flatten the attention back into the lane-dense layout -------
            for h in range(H):
                att_ref[b, 0:1, h * W:(h + 1) * W] = (
                    att2[h:h + 1, 0:W].astype(att_ref.dtype))

            # ---- broadcast multiply, streamed over C (native dtype) ----------
            attv = att_ref[b, 0:1, :]

            def mul_body(ci, carry):
                c0 = pl.multiple_of(ci * CK, CK)
                y_ref[b, pl.ds(c0, CK), :] = (
                    attv * x_ref[b, pl.ds(c0, CK), :]).astype(y_ref.dtype)
                return carry

            if NC > 0:
                lax.fori_loop(0, NC, mul_body, 0, unroll=UNROLL)
            if C_TAIL > 0:
                y_ref[b, pl.ds(C_MAIN, C_TAIL), :] = (
                    attv * x_ref[b, pl.ds(C_MAIN, C_TAIL), :]).astype(y_ref.dtype)

        if BB <= 4:
            for b in range(BB):
                per_image(b)
        else:
            def _b_body(b, carry):
                per_image(b)
                return carry
            lax.fori_loop(0, BB, _b_body, 0)

    return kernel


def spatial_attention(x, weight):
    """x: (B, C, H, W); weight: (1, 2, 7, 7) from nn.Conv2d(2, 1, 7, bias=False)."""
    B, C, H, W = x.shape
    HW = H * W
    Wp = _round_up(W, 128)                   # lane-padded conv width
    # TODO(synk): for very wide images (W > ~384) switch to (Wp, 128)-wide band
    # slabs to bound the 2*7*Wp^2 weight-matrix footprint.
    bmat = _band_matrices(weight, W, Wp)     # (2, 7, Wp, Wp) f32
    x_flat = x.reshape(B, C, HW)             # lane-dense layout for heavy I/O

    # C-chunk size matched to dtype sublane packing (8 f32 / 16 bf16 / 32 int8).
    itemsize = jnp.dtype(x.dtype).itemsize
    CK = max(8, 32 // max(itemsize, 1))

    # VMEM limit and per-step batch-fold budget from the hardware info
    # (v5e/v6e: ~96 MiB limit, ~16 MiB budget; v7x: ~48 MiB, ~8 MiB).
    try:
        info = pltpu.get_tpu_info()
        vmem_cap = int(getattr(info, "vmem_capacity_bytes", 0) or 0)
    except Exception:
        vmem_cap = 0
    if vmem_cap <= 0:
        vmem_cap = 64 * 1024 * 1024          # conservative (v7x per-core VMEM)
    vmem_limit = int(min(max(vmem_cap * 3 // 4, 32 * 1024 * 1024),
                         112 * 1024 * 1024))
    budget = max(vmem_limit // 6, 2 * 1024 * 1024)

    # Images per grid step.  Keep >= 2 grid steps when B >= 2 so the "parallel"
    # axis can shard across both v7x TensorCores.
    per_image_bytes = (2 * C * HW + HW) * itemsize
    max_bb = B if B < 2 else max(1, B // 2)
    BB = 1
    for d in range(max_bb, 0, -1):
        if B % d == 0 and d * per_image_bytes <= budget:
            BB = d
            break
    # TODO(synk): for very large C*H*W add an H-block grid axis with a 3-row
    # conv halo so the resident set is bounded independently of the image size.

    kernel = _make_kernel(BB, C, H, W, HW, Wp, CK)

    out_shapes = (
        jax.ShapeDtypeStruct((B, C, HW), x.dtype),   # att * x (flat)
        jax.ShapeDtypeStruct((B, 1, HW), x.dtype),   # att (flat)
    )

    grid_spec = pltpu.PrefetchScalarGridSpec(
        num_scalar_prefetch=0,
        grid=(B // BB,),
        in_specs=[
            pl.BlockSpec((2, KSIZE, Wp, Wp), lambda g: (0, 0, 0, 0)),  # bmat
            pl.BlockSpec((BB, C, HW), lambda g: (g, 0, 0)),            # x
        ],
        out_specs=[
            pl.BlockSpec((BB, C, HW), lambda g: (g, 0, 0)),            # att * x
            pl.BlockSpec((BB, 1, HW), lambda g: (g, 0, 0)),            # att
        ],
        scratch_shapes=[
            pltpu.VMEM((2, HW), jnp.float32),                  # flat avg / max
            pltpu.VMEM((2, H + 2 * PAD, Wp), jnp.float32),     # padded planes
        ],
    )

    y_flat, att_flat = pl.pallas_call(
        kernel,
        out_shape=out_shapes,
        grid_spec=grid_spec,
        compiler_params=pltpu.CompilerParams(
            dimension_semantics=("parallel",),
            vmem_limit_bytes=vmem_limit),
    )(bmat, x_flat)

    return y_flat.reshape(B, C, H, W), att_flat.reshape(B, 1, H, W)


def _reference(x, weight):
    avg = jnp.mean(x, axis=1, keepdims=True)
    mx = jnp.max(x, axis=1, keepdims=True)
    cat = jnp.concatenate([avg, mx], axis=1)
    conv = lax.conv_general_dilated(
        cat, weight, window_strides=(1, 1), padding="SAME",
        dimension_numbers=("NCHW", "OIHW", "NCHW"),
        precision=lax.Precision.HIGHEST)
    att = jax.nn.sigmoid(conv)
    return att * x, att


if __name__ == "__main__":
    key = jax.random.PRNGKey(0)
    kx, kw = jax.random.split(key)

    B, C, H, W = 2, 4, 16, 16
    x = jax.random.normal(kx, (B, C, H, W), dtype=jnp.float32)
    # Deterministic conv weight, shape matches nn.Conv2d(2, 1, 7, bias=False).
    weight = 0.1 * jax.random.normal(kw, (1, 2, KSIZE, KSIZE), dtype=jnp.float32)

    y, att = spatial_attention(x, weight)
    jax.block_until_ready((y, att))

    y_ref, att_ref = _reference(x, weight)
    assert jnp.allclose(att, att_ref, atol=1e-4, rtol=1e-4), "attention mismatch"
    assert jnp.allclose(y, y_ref, atol=1e-4, rtol=1e-4), "output mismatch"

    print("KERNEL_OK")
</pallas_src>

<mosaic_0001>
module attributes {stable_mosaic.version = 11 : i64} {
  func.func @kernel(%arg0: i32, %arg1: memref<2x7x128x128xf32, #tpu.memory_space<vmem>>, %arg2: memref<1x4x256xf32, #tpu.memory_space<vmem>>, %arg3: memref<1x4x256xf32, #tpu.memory_space<vmem>>, %arg4: memref<1x1x256xf32, #tpu.memory_space<vmem>>, %arg5: memref<2x256xf32, #tpu.memory_space<vmem>>, %arg6: memref<2x22x128xf32, #tpu.memory_space<vmem>>) attributes {dimension_semantics = [#tpu.dimension_semantics<parallel>], iteration_bounds = array<i64: 2>, scalar_prefetch = 0 : i64, scratch_operands = 2 : i64, tpu.core_type = #tpu.core_type<tc>, window_params = [{pipeline_mode = #tpu.pipeline_mode<synchronous>, transform_indices = @transform_0, window_bounds = array<i64: 2, 7, 128, 128>}, {transform_indices = @transform_1, window_bounds = array<i64: 1, 4, 256>}, {transform_indices = @transform_2, window_bounds = array<i64: 1, 4, 256>}, {transform_indices = @transform_3, window_bounds = array<i64: 1, 1, 256>}]} {
    %cst = arith.constant 0.000000e+00 : f32
    %0 = vector.broadcast %cst : f32 to vector<2x22x128xf32>
    %c0 = arith.constant 0 : index
    %c0_0 = arith.constant 0 : index
    %c0_1 = arith.constant 0 : index
    %1 = vector.load %arg6[%c0, %c0_0, %c0_1] : memref<2x22x128xf32, #tpu.memory_space<vmem>>, vector<2x22x128xf32>
    tpu.vector_store %arg6[%c0, %c0_0, %c0_1], %0 {strides = array<i32>} : memref<2x22x128xf32, #tpu.memory_space<vmem>>, vector<2x22x128xf32>,
    %cst_2 = arith.constant 0.000000e+00 : f32
    %2 = vector.broadcast %cst_2 : f32 to vector<1x256xf32>
    %cst_3 = arith.constant 0xFF800000 : f32
    %3 = vector.broadcast %cst_3 : f32 to vector<1x256xf32>
    %c0_4 = arith.constant 0 : index
    %c0_5 = arith.constant 0 : index
    %c0_6 = arith.constant 0 : index
    %4 = vector.load %arg2[%c0_4, %c0_5, %c0_6] : memref<1x4x256xf32, #tpu.memory_space<vmem>>, vector<1x4x256xf32>
    %5 = vector.shape_cast %4 : vector<1x4x256xf32> to vector<4x256xf32>
    %cst_7 = arith.constant dense<0.000000e+00> : vector<256xf32>
    %6 = vector.multi_reduction <add>, %5, %cst_7 [0] : vector<4x256xf32> to vector<256xf32>
    %7 = vector.shape_cast %6 : vector<256xf32> to vector<1x256xf32>
    %8 = arith.addf %2, %7 : vector<1x256xf32>
    %cst_8 = arith.constant dense<0xFF800000> : vector<256xf32>
    %9 = vector.multi_reduction <maximumf>, %5, %cst_8 [0] : vector<4x256xf32> to vector<256xf32>
    %10 = vector.shape_cast %9 : vector<256xf32> to vector<1x256xf32>
    %11 = arith.maximumf %3, %10 : vector<1x256xf32>
    %cst_9 = arith.constant 2.500000e-01 : f32
    %12 = vector.broadcast %cst_9 : f32 to vector<1x256xf32>
    %13 = arith.mulf %8, %12 : vector<1x256xf32>
    %c0_10 = arith.constant 0 : index
    %c0_11 = arith.constant 0 : index
    %14 = vector.load %arg5[%c0_10, %c0_11] : memref<2x256xf32, #tpu.memory_space<vmem>>, vector<1x256xf32>
    tpu.vector_store %arg5[%c0_10, %c0_11], %13 {strides = array<i32>} : memref<2x256xf32, #tpu.memory_space<vmem>>, vector<1x256xf32>,
    %c1 = arith.constant 1 : index
    %c0_12 = arith.constant 0 : index
    %15 = vector.load %arg5[%c1, %c0_12] : memref<2x256xf32, #tpu.memory_space<vmem>>, vector<1x256xf32>
    tpu.vector_store %arg5[%c1, %c0_12], %11 {strides = array<i32>} : memref<2x256xf32, #tpu.memory_space<vmem>>, vector<1x256xf32>,
    %c0_13 = arith.constant 0 : index
    %c0_14 = arith.constant 0 : index
    %16 = vector.load %arg5[%c0_13, %c0_14] : memref<2x256xf32, #tpu.memory_space<vmem>>, vector<2x16xf32>
    %c0_15 = arith.constant 0 : index
    %c3 = arith.constant 3 : index
    %c0_16 = arith.constant 0 : index
    %17 = vector.load %arg6[%c0_15, %c3, %c0_16] : memref<2x22x128xf32, #tpu.memory_space<vmem>>, vector<2x1x16xf32>
    %18 = vector.shape_cast %17 : vector<2x1x16xf32> to vector<2x16xf32>
    %19 = vector.shape_cast %16 : vector<2x16xf32> to vector<2x1x16xf32>
    tpu.vector_store %arg6[%c0_15, %c3, %c0_16], %19 {strides = array<i32>} : memref<2x22x128xf32, #tpu.memory_space<vmem>>, vector<2x1x16xf32>,
    %c0_17 = arith.constant 0 : index
    %c16 = arith.constant 16 : index
    %20 = vector.load %arg5[%c0_17, %c16] : memref<2x256xf32, #tpu.memory_space<vmem>>, vector<2x16xf32>
    %c0_18 = arith.constant 0 : index
    %c4 = arith.constant 4 : index
    %c0_19 = arith.constant 0 : index
    %21 = vector.load %arg6[%c0_18, %c4, %c0_19] : memref<2x22x128xf32, #tpu.memory_space<vmem>>, vector<2x1x16xf32>
    %22 = vector.shape_cast %21 : vector<2x1x16xf32> to vector<2x16xf32>
    %23 = vector.shape_cast %20 : vector<2x16xf32> to vector<2x1x16xf32>
    tpu.vector_store %arg6[%c0_18, %c4, %c0_19], %23 {strides = array<i32>} : memref<2x22x128xf32, #tpu.memory_space<vmem>>, vector<2x1x16xf32>,
    %c0_20 = arith.constant 0 : index
    %c32 = arith.constant 32 : index
    %24 = vector.load %arg5[%c0_20, %c32] : memref<2x256xf32, #tpu.memory_space<vmem>>, vector<2x16xf32>
    %c0_21 = arith.constant 0 : index
    %c5 = arith.constant 5 : index
    %c0_22 = arith.constant 0 : index
    %25 = vector.load %arg6[%c0_21, %c5, %c0_22] : memref<2x22x128xf32, #tpu.memory_space<vmem>>, vector<2x1x16xf32>
    %26 = vector.shape_cast %25 : vector<2x1x16xf32> to vector<2x16xf32>
    %27 = vector.shape_cast %24 : vector<2x16xf32> to vector<2x1x16xf32>
    tpu.vector_store %arg6[%c0_21, %c5, %c0_22], %27 {strides = array<i32>} : memref<2x22x128xf32, #tpu.memory_space<vmem>>, vector<2x1x16xf32>,
    %c0_23 = arith.constant 0 : index
    %c48 = arith.constant 48 : index
    %28 = vector.load %arg5[%c0_23, %c48] : memref<2x256xf32, #tpu.memory_space<vmem>>, vector<2x16xf32>
    %c0_24 = arith.constant 0 : index
    %c6 = arith.constant 6 : index
    %c0_25 = arith.constant 0 : index
    %29 = vector.load %arg6[%c0_24, %c6, %c0_25] : memref<2x22x128xf32, #tpu.memory_space<vmem>>, vector<2x1x16xf32>
    %30 = vector.shape_cast %29 : vector<2x1x16xf32> to vector<2x16xf32>
    %31 = vector.shape_cast %28 : vector<2x16xf32> to vector<2x1x16xf32>
    tpu.vector_store %arg6[%c0_24, %c6, %c0_25], %31 {strides = array<i32>} : memref<2x22x128xf32, #tpu.memory_space<vmem>>, vector<2x1x16xf32>,
    %c0_26 = arith.constant 0 : index
    %c64 = arith.constant 64 : index
    %32 = vector.load %arg5[%c0_26, %c64] : memref<2x256xf32, #tpu.memory_space<vmem>>, vector<2x16xf32>
    %c0_27 = arith.constant 0 : index
    %c7 = arith.constant 7 : index
    %c0_28 = arith.constant 0 : index
    %33 = vector.load %arg6[%c0_27, %c7, %c0_28] : memref<2x22x128xf32, #tpu.memory_space<vmem>>, vector<2x1x16xf32>
    %34 = vector.shape_cast %33 : vector<2x1x16xf32> to vector<2x16xf32>
    %35 = vector.shape_cast %32 : vector<2x16xf32> to vector<2x1x16xf32>
    tpu.vector_store %arg6[%c0_27, %c7, %c0_28], %35 {strides = array<i32>} : memref<2x22x128xf32, #tpu.memory_space<vmem>>, vector<2x1x16xf32>,
    %c0_29 = arith.constant 0 : index
    %c80 = arith.constant 80 : index
    %36 = vector.load %arg5[%c0_29, %c80] : memref<2x256xf32, #tpu.memory_space<vmem>>, vector<2x16xf32>
    %c0_30 = arith.constant 0 : index
    %c8 = arith.constant 8 : index
    %c0_31 = arith.constant 0 : index
    %37 = vector.load %arg6[%c0_30, %c8, %c0_31] : memref<2x22x128xf32, #tpu.memory_space<vmem>>, vector<2x1x16xf32>
    %38 = vector.shape_cast %37 : vector<2x1x16xf32> to vector<2x16xf32>
    %39 = vector.shape_cast %36 : vector<2x16xf32> to vector<2x1x16xf32>
    tpu.vector_store %arg6[%c0_30, %c8, %c0_31], %39 {strides = array<i32>} : memref<2x22x128xf32, #tpu.memory_space<vmem>>, vector<2x1x16xf32>,
    %c0_32 = arith.constant 0 : index
    %c96 = arith.constant 96 : index
    %40 = vector.load %arg5[%c0_32, %c96] : memref<2x256xf32, #tpu.memory_space<vmem>>, vector<2x16xf32>
    %c0_33 = arith.constant 0 : index
    %c9 = arith.constant 9 : index
    %c0_34 = arith.constant 0 : index
    %41 = vector.load %arg6[%c0_33, %c9, %c0_34] : memref<2x22x128xf32, #tpu.memory_space<vmem>>, vector<2x1x16xf32>
    %42 = vector.shape_cast %41 : vector<2x1x16xf32> to vector<2x16xf32>
    %43 = vector.shape_cast %40 : vector<2x16xf32> to vector<2x1x16xf32>
    tpu.vector_store %arg6[%c0_33, %c9, %c0_34], %43 {strides = array<i32>} : memref<2x22x128xf32, #tpu.memory_space<vmem>>, vector<2x1x16xf32>,
    %c0_35 = arith.constant 0 : index
    %c112 = arith.constant 112 : index
    %44 = vector.load %arg5[%c0_35, %c112] : memref<2x256xf32, #tpu.memory_space<vmem>>, vector<2x16xf32>
    %c0_36 = arith.constant 0 : index
    %c10 = arith.constant 10 : index
    %c0_37 = arith.constant 0 : index
    %45 = vector.load %arg6[%c0_36, %c10, %c0_37] : memref<2x22x128xf32, #tpu.memory_space<vmem>>, vector<2x1x16xf32>
    %46 = vector.shape_cast %45 : vector<2x1x16xf32> to vector<2x16xf32>
    %47 = vector.shape_cast %44 : vector<2x16xf32> to vector<2x1x16xf32>
    tpu.vector_store %arg6[%c0_36, %c10, %c0_37], %47 {strides = array<i32>} : memref<2x22x128xf32, #tpu.memory_space<vmem>>, vector<2x1x16xf32>,
    %c0_38 = arith.constant 0 : index
    %c128 = arith.constant 128 : index
    %48 = vector.load %arg5[%c0_38, %c128] : memref<2x256xf32, #tpu.memory_space<vmem>>, vector<2x16xf32>
    %c0_39 = arith.constant 0 : index
    %c11 = arith.constant 11 : index
    %c0_40 = arith.constant 0 : index
    %49 = vector.load %arg6[%c0_39, %c11, %c0_40] : memref<2x22x128xf32, #tpu.memory_space<vmem>>, vector<2x1x16xf32>
    %50 = vector.shape_cast %49 : vector<2x1x16xf32> to vector<2x16xf32>
    %51 = vector.shape_cast %48 : vector<2x16xf32> to vector<2x1x16xf32>
    tpu.vector_store %arg6[%c0_39, %c11, %c0_40], %51 {strides = array<i32>} : memref<2x22x128xf32, #tpu.memory_space<vmem>>, vector<2x1x16xf32>,
    %c0_41 = arith.constant 0 : index
    %c144 = arith.constant 144 : index
    %52 = vector.load %arg5[%c0_41, %c144] : memref<2x256xf32, #tpu.memory_space<vmem>>, vector<2x16xf32>
    %c0_42 = arith.constant 0 : index
    %c12 = arith.constant 12 : index
    %c0_43 = arith.constant 0 : index
    %53 = vector.load %arg6[%c0_42, %c12, %c0_43] : memref<2x22x128xf32, #tpu.memory_space<vmem>>, vector<2x1x16xf32>
    %54 = vector.shape_cast %53 : vector<2x1x16xf32> to vector<2x16xf32>
    %55 = vector.shape_cast %52 : vector<2x16xf32> to vector<2x1x16xf32>
    tpu.vector_store %arg6[%c0_42, %c12, %c0_43], %55 {strides = array<i32>} : memref<2x22x128xf32, #tpu.memory_space<vmem>>, vector<2x1x16xf32>,
    %c0_44 = arith.constant 0 : index
    %c160 = arith.constant 160 : index
    %56 = vector.load %arg5[%c0_44, %c160] : memref<2x256xf32, #tpu.memory_space<vmem>>, vector<2x16xf32>
    %c0_45 = arith.constant 0 : index
    %c13 = arith.constant 13 : index
    %c0_46 = arith.constant 0 : index
    %57 = vector.load %arg6[%c0_45, %c13, %c0_46] : memref<2x22x128xf32, #tpu.memory_space<vmem>>, vector<2x1x16xf32>
    %58 = vector.shape_cast %57 : vector<2x1x16xf32> to vector<2x16xf32>
    %59 = vector.shape_cast %56 : vector<2x16xf32> to vector<2x1x16xf32>
    tpu.vector_store %arg6[%c0_45, %c13, %c0_46], %59 {strides = array<i32>} : memref<2x22x128xf32, #tpu.memory_space<vmem>>, vector<2x1x16xf32>,
    %c0_47 = arith.constant 0 : index
    %c176 = arith.constant 176 : index
    %60 = vector.load %arg5[%c0_47, %c176] : memref<2x256xf32, #tpu.memory_space<vmem>>, vector<2x16xf32>
    %c0_48 = arith.constant 0 : index
    %c14 = arith.constant 14 : index
    %c0_49 = arith.constant 0 : index
    %61 = vector.load %arg6[%c0_48, %c14, %c0_49] : memref<2x22x128xf32, #tpu.memory_space<vmem>>, vector<2x1x16xf32>
    %62 = vector.shape_cast %61 : vector<2x1x16xf32> to vector<2x16xf32>
    %63 = vector.shape_cast %60 : vector<2x16xf32> to vector<2x1x16xf32>
    tpu.vector_store %arg6[%c0_48, %c14, %c0_49], %63 {strides = array<i32>} : memref<2x22x128xf32, #tpu.memory_space<vmem>>, vector<2x1x16xf32>,
    %c0_50 = arith.constant 0 : index
    %c192 = arith.constant 192 : index
    %64 = vector.load %arg5[%c0_50, %c192] : memref<2x256xf32, #tpu.memory_space<vmem>>, vector<2x16xf32>
    %c0_51 = arith.constant 0 : index
    %c15 = arith.constant 15 : index
    %c0_52 = arith.constant 0 : index
    %65 = vector.load %arg6[%c0_51, %c15, %c0_52] : memref<2x22x128xf32, #tpu.memory_space<vmem>>, vector<2x1x16xf32>
    %66 = vector.shape_cast %65 : vector<2x1x16xf32> to vector<2x16xf32>
    %67 = vector.shape_cast %64 : vector<2x16xf32> to vector<2x1x16xf32>
    tpu.vector_store %arg6[%c0_51, %c15, %c0_52], %67 {strides = array<i32>} : memref<2x22x128xf32, #tpu.memory_space<vmem>>, vector<2x1x16xf32>,
    %c0_53 = arith.constant 0 : index
    %c208 = arith.constant 208 : index
    %68 = vector.load %arg5[%c0_53, %c208] : memref<2x256xf32, #tpu.memory_space<vmem>>, vector<2x16xf32>
    %c0_54 = arith.constant 0 : index
    %c16_55 = arith.constant 16 : index
    %c0_56 = arith.constant 0 : index
    %69 = vector.load %arg6[%c0_54, %c16_55, %c0_56] : memref<2x22x128xf32, #tpu.memory_space<vmem>>, vector<2x1x16xf32>
    %70 = vector.shape_cast %69 : vector<2x1x16xf32> to vector<2x16xf32>
    %71 = vector.shape_cast %68 : vector<2x16xf32> to vector<2x1x16xf32>
    tpu.vector_store %arg6[%c0_54, %c16_55, %c0_56], %71 {strides = array<i32>} : memref<2x22x128xf32, #tpu.memory_space<vmem>>, vector<2x1x16xf32>,
    %c0_57 = arith.constant 0 : index
    %c224 = arith.constant 224 : index
    %72 = vector.load %arg5[%c0_57, %c224] : memref<2x256xf32, #tpu.memory_space<vmem>>, vector<2x16xf32>
    %c0_58 = arith.constant 0 : index
    %c17 = arith.constant 17 : index
    %c0_59 = arith.constant 0 : index
    %73 = vector.load %arg6[%c0_58, %c17, %c0_59] : memref<2x22x128xf32, #tpu.memory_space<vmem>>, vector<2x1x16xf32>
    %74 = vector.shape_cast %73 : vector<2x1x16xf32> to vector<2x16xf32>
    %75 = vector.shape_cast %72 : vector<2x16xf32> to vector<2x1x16xf32>
    tpu.vector_store %arg6[%c0_58, %c17, %c0_59], %75 {strides = array<i32>} : memref<2x22x128xf32, #tpu.memory_space<vmem>>, vector<2x1x16xf32>,
    %c0_60 = arith.constant 0 : index
    %c240 = arith.constant 240 : index
    %76 = vector.load %arg5[%c0_60, %c240] : memref<2x256xf32, #tpu.memory_space<vmem>>, vector<2x16xf32>
    %c0_61 = arith.constant 0 : index
    %c18 = arith.constant 18 : index
    %c0_62 = arith.constant 0 : index
    %77 = vector.load %arg6[%c0_61, %c18, %c0_62] : memref<2x22x128xf32, #tpu.memory_space<vmem>>, vector<2x1x16xf32>
    %78 = vector.shape_cast %77 : vector<2x1x16xf32> to vector<2x16xf32>
    %79 = vector.shape_cast %76 : vector<2x16xf32> to vector<2x1x16xf32>
    tpu.vector_store %arg6[%c0_61, %c18, %c0_62], %79 {strides = array<i32>} : memref<2x22x128xf32, #tpu.memory_space<vmem>>, vector<2x1x16xf32>,
    %cst_63 = arith.constant 0.000000e+00 : f32
    %80 = vector.broadcast %cst_63 : f32 to vector<16x128xf32>
    %c0_64 = arith.constant 0 : index
    %c0_65 = arith.constant 0 : index
    %c0_66 = arith.constant 0 : index
    %81 = vector.load %arg6[%c0_64, %c0_65, %c0_66] : memref<2x22x128xf32, #tpu.memory_space<vmem>>, vector<1x16x128xf32>
    %82 = vector.shape_cast %81 : vector<1x16x128xf32> to vector<16x128xf32>
    %c0_67 = arith.constant 0 : index
    %c0_68 = arith.constant 0 : index
    %c0_69 = arith.constant 0 : index
    %c0_70 = arith.constant 0 : index
    %83 = vector.load %arg1[%c0_67, %c0_68, %c0_69, %c0_70] : memref<2x7x128x128xf32, #tpu.memory_space<vmem>>, vector<1x1x128x128xf32>
    %84 = vector.shape_cast %83 : vector<1x1x128x128xf32> to vector<128x128xf32>
    %cst_71 = arith.constant dense<0.000000e+00> : vector<16x128xf32>
    %85 = tpu.matmul %82, %84, %cst_71 {dimension_numbers = #tpu.dot_dimension_numbers<[1], [0], [0], [1], [0, 0, 1, 1], [], []>, precision = #tpu.contract_precision<fp32>} : vector<16x128xf32>, vector<128x128xf32>, vector<16x128xf32> -> vector<16x128xf32>
    %86 = arith.addf %80, %85 : vector<16x128xf32>
    %c0_72 = arith.constant 0 : index
    %c1_73 = arith.constant 1 : index
    %c0_74 = arith.constant 0 : index
    %87 = vector.load %arg6[%c0_72, %c1_73, %c0_74] : memref<2x22x128xf32, #tpu.memory_space<vmem>>, vector<1x16x128xf32>
    %88 = vector.shape_cast %87 : vector<1x16x128xf32> to vector<16x128xf32>
    %c0_75 = arith.constant 0 : index
    %c1_76 = arith.constant 1 : index
    %c0_77 = arith.constant 0 : index
    %c0_78 = arith.constant 0 : index
    %89 = vector.load %arg1[%c0_75, %c1_76, %c0_77, %c0_78] : memref<2x7x128x128xf32, #tpu.memory_space<vmem>>, vector<1x1x128x128xf32>
    %90 = vector.shape_cast %89 : vector<1x1x128x128xf32> to vector<128x128xf32>
    %cst_79 = arith.constant dense<0.000000e+00> : vector<16x128xf32>
    %91 = tpu.matmul %88, %90, %cst_79 {dimension_numbers = #tpu.dot_dimension_numbers<[1], [0], [0], [1], [0, 0, 1, 1], [], []>, precision = #tpu.contract_precision<fp32>} : vector<16x128xf32>, vector<128x128xf32>, vector<16x128xf32> -> vector<16x128xf32>
    %92 = arith.addf %86, %91 : vector<16x128xf32>
    %c0_80 = arith.constant 0 : index
    %c2 = arith.constant 2 : index
    %c0_81 = arith.constant 0 : index
    %93 = vector.load %arg6[%c0_80, %c2, %c0_81] : memref<2x22x128xf32, #tpu.memory_space<vmem>>, vector<1x16x128xf32>
    %94 = vector.shape_cast %93 : vector<1x16x128xf32> to vector<16x128xf32>
    %c0_82 = arith.constant 0 : index
    %c2_83 = arith.constant 2 : index
    %c0_84 = arith.constant 0 : index
    %c0_85 = arith.constant 0 : index
    %95 = vector.load %arg1[%c0_82, %c2_83, %c0_84, %c0_85] : memref<2x7x128x128xf32, #tpu.memory_space<vmem>>, vector<1x1x128x128xf32>
    %96 = vector.shape_cast %95 : vector<1x1x128x128xf32> to vector<128x128xf32>
    %cst_86 = arith.constant dense<0.000000e+00> : vector<16x128xf32>
    %97 = tpu.matmul %94, %96, %cst_86 {dimension_numbers = #tpu.dot_dimension_numbers<[1], [0], [0], [1], [0, 0, 1, 1], [], []>, precision = #tpu.contract_precision<fp32>} : vector<16x128xf32>, vector<128x128xf32>, vector<16x128xf32> -> vector<16x128xf32>
    %98 = arith.addf %92, %97 : vector<16x128xf32>
    %c0_87 = arith.constant 0 : index
    %c3_88 = arith.constant 3 : index
    %c0_89 = arith.constant 0 : index
    %99 = vector.load %arg6[%c0_87, %c3_88, %c0_89] : memref<2x22x128xf32, #tpu.memory_space<vmem>>, vector<1x16x128xf32>
    %100 = vector.shape_cast %99 : vector<1x16x128xf32> to vector<16x128xf32>
    %c0_90 = arith.constant 0 : index
    %c3_91 = arith.constant 3 : index
    %c0_92 = arith.constant 0 : index
    %c0_93 = arith.constant 0 : index
    %101 = vector.load %arg1[%c0_90, %c3_91, %c0_92, %c0_93] : memref<2x7x128x128xf32, #tpu.memory_space<vmem>>, vector<1x1x128x128xf32>
    %102 = vector.shape_cast %101 : vector<1x1x128x128xf32> to vector<128x128xf32>
    %cst_94 = arith.constant dense<0.000000e+00> : vector<16x128xf32>
    %103 = tpu.matmul %100, %102, %cst_94 {dimension_numbers = #tpu.dot_dimension_numbers<[1], [0], [0], [1], [0, 0, 1, 1], [], []>, precision = #tpu.contract_precision<fp32>} : vector<16x128xf32>, vector<128x128xf32>, vector<16x128xf32> -> vector<16x128xf32>
    %104 = arith.addf %98, %103 : vector<16x128xf32>
    %c0_95 = arith.constant 0 : index
    %c4_96 = arith.constant 4 : index
    %c0_97 = arith.constant 0 : index
    %105 = vector.load %arg6[%c0_95, %c4_96, %c0_97] : memref<2x22x128xf32, #tpu.memory_space<vmem>>, vector<1x16x128xf32>
    %106 = vector.shape_cast %105 : vector<1x16x128xf32> to vector<16x128xf32>
    %c0_98 = arith.constant 0 : index
    %c4_99 = arith.constant 4 : index
    %c0_100 = arith.constant 0 : index
    %c0_101 = arith.constant 0 : index
    %107 = vector.load %arg1[%c0_98, %c4_99, %c0_100, %c0_101] : memref<2x7x128x128xf32, #tpu.memory_space<vmem>>, vector<1x1x128x128xf32>
    %108 = vector.shape_cast %107 : vector<1x1x128x128xf32> to vector<128x128xf32>
    %cst_102 = arith.constant dense<0.000000e+00> : vector<16x128xf32>
    %109 = tpu.matmul %106, %108, %cst_102 {dimension_numbers = #tpu.dot_dimension_numbers<[1], [0], [0], [1], [0, 0, 1, 1], [], []>, precision = #tpu.contract_precision<fp32>} : vector<16x128xf32>, vector<128x128xf32>, vector<16x128xf32> -> vector<16x128xf32>
    %110 = arith.addf %104, %109 : vector<16x128xf32>
    %c0_103 = arith.constant 0 : index
    %c5_104 = arith.constant 5 : index
    %c0_105 = arith.constant 0 : index
    %111 = vector.load %arg6[%c0_103, %c5_104, %c0_105] : memref<2x22x128xf32, #tpu.memory_space<vmem>>, vector<1x16x128xf32>
    %112 = vector.shape_cast %111 : vector<1x16x128xf32> to vector<16x128xf32>
    %c0_106 = arith.constant 0 : index
    %c5_107 = arith.constant 5 : index
    %c0_108 = arith.constant 0 : index
    %c0_109 = arith.constant 0 : index
    %113 = vector.load %arg1[%c0_106, %c5_107, %c0_108, %c0_109] : memref<2x7x128x128xf32, #tpu.memory_space<vmem>>, vector<1x1x128x128xf32>
    %114 = vector.shape_cast %113 : vector<1x1x128x128xf32> to vector<128x128xf32>
    %cst_110 = arith.constant dense<0.000000e+00> : vector<16x128xf32>
    %115 = tpu.matmul %112, %114, %cst_110 {dimension_numbers = #tpu.dot_dimension_numbers<[1], [0], [0], [1], [0, 0, 1, 1], [], []>, precision = #tpu.contract_precision<fp32>} : vector<16x128xf32>, vector<128x128xf32>, vector<16x128xf32> -> vector<16x128xf32>
    %116 = arith.addf %110, %115 : vector<16x128xf32>
    %c0_111 = arith.constant 0 : index
    %c6_112 = arith.constant 6 : index
    %c0_113 = arith.constant 0 : index
    %117 = vector.load %arg6[%c0_111, %c6_112, %c0_113] : memref<2x22x128xf32, #tpu.memory_space<vmem>>, vector<1x16x128xf32>
    %118 = vector.shape_cast %117 : vector<1x16x128xf32> to vector<16x128xf32>
    %c0_114 = arith.constant 0 : index
    %c6_115 = arith.constant 6 : index
    %c0_116 = arith.constant 0 : index
    %c0_117 = arith.constant 0 : index
    %119 = vector.load %arg1[%c0_114, %c6_115, %c0_116, %c0_117] : memref<2x7x128x128xf32, #tpu.memory_space<vmem>>, vector<1x1x128x128xf32>
    %120 = vector.shape_cast %119 : vector<1x1x128x128xf32> to vector<128x128xf32>
    %cst_118 = arith.constant dense<0.000000e+00> : vector<16x128xf32>
    %121 = tpu.matmul %118, %120, %cst_118 {dimension_numbers = #tpu.dot_dimension_numbers<[1], [0], [0], [1], [0, 0, 1, 1], [], []>, precision = #tpu.contract_precision<fp32>} : vector<16x128xf32>, vector<128x128xf32>, vector<16x128xf32> -> vector<16x128xf32>
    %122 = arith.addf %116, %121 : vector<16x128xf32>
    %c1_119 = arith.constant 1 : index
    %c0_120 = arith.constant 0 : index
    %c0_121 = arith.constant 0 : index
    %123 = vector.load %arg6[%c1_119, %c0_120, %c0_121] : memref<2x22x128xf32, #tpu.memory_space<vmem>>, vector<1x16x128xf32>
    %124 = vector.shape_cast %123 : vector<1x16x128xf32> to vector<16x128xf32>
    %c1_122 = arith.constant 1 : index
    %c0_123 = arith.constant 0 : index
    %c0_124 = arith.constant 0 : index
    %c0_125 = arith.constant 0 : index
    %125 = vector.load %arg1[%c1_122, %c0_123, %c0_124, %c0_125] : memref<2x7x128x128xf32, #tpu.memory_space<vmem>>, vector<1x1x128x128xf32>
    %126 = vector.shape_cast %125 : vector<1x1x128x128xf32> to vector<128x128xf32>
    %cst_126 = arith.constant dense<0.000000e+00> : vector<16x128xf32>
    %127 = tpu.matmul %124, %126, %cst_126 {dimension_numbers = #tpu.dot_dimension_numbers<[1], [0], [0], [1], [0, 0, 1, 1], [], []>, precision = #tpu.contract_precision<fp32>} : vector<16x128xf32>, vector<128x128xf32>, vector<16x128xf32> -> vector<16x128xf32>
    %128 = arith.addf %122, %127 : vector<16x128xf32>
    %c1_127 = arith.constant 1 : index
    %c1_128 = arith.constant 1 : index
    %c0_129 = arith.constant 0 : index
    %129 = vector.load %arg6[%c1_127, %c1_128, %c0_129] : memref<2x22x128xf32, #tpu.memory_space<vmem>>, vector<1x16x128xf32>
    %130 = vector.shape_cast %129 : vector<1x16x128xf32> to vector<16x128xf32>
    %c1_130 = arith.constant 1 : index
    %c1_131 = arith.constant 1 : index
    %c0_132 = arith.constant 0 : index
    %c0_133 = arith.constant 0 : index
    %131 = vector.load %arg1[%c1_130, %c1_131, %c0_132, %c0_133] : memref<2x7x128x128xf32, #tpu.memory_space<vmem>>, vector<1x1x128x128xf32>
    %132 = vector.shape_cast %131 : vector<1x1x128x128xf32> to vector<128x128xf32>
    %cst_134 = arith.constant dense<0.000000e+00> : vector<16x128xf32>
    %133 = tpu.matmul %130, %132, %cst_134 {dimension_numbers = #tpu.dot_dimension_numbers<[1], [0], [0], [1], [0, 0, 1, 1], [], []>, precision = #tpu.contract_precision<fp32>} : vector<16x128xf32>, vector<128x128xf32>, vector<16x128xf32> -> vector<16x128xf32>
    %134 = arith.addf %128, %133 : vector<16x128xf32>
    %c1_135 = arith.constant 1 : index
    %c2_136 = arith.constant 2 : index
    %c0_137 = arith.constant 0 : index
    %135 = vector.load %arg6[%c1_135, %c2_136, %c0_137] : memref<2x22x128xf32, #tpu.memory_space<vmem>>, vector<1x16x128xf32>
    %136 = vector.shape_cast %135 : vector<1x16x128xf32> to vector<16x128xf32>
    %c1_138 = arith.constant 1 : index
    %c2_139 = arith.constant 2 : index
    %c0_140 = arith.constant 0 : index
    %c0_141 = arith.constant 0 : index
    %137 = vector.load %arg1[%c1_138, %c2_139, %c0_140, %c0_141] : memref<2x7x128x128xf32, #tpu.memory_space<vmem>>, vector<1x1x128x128xf32>
    %138 = vector.shape_cast %137 : vector<1x1x128x128xf32> to vector<128x128xf32>
    %cst_142 = arith.constant dense<0.000000e+00> : vector<16x128xf32>
    %139 = tpu.matmul %136, %138, %cst_142 {dimension_numbers = #tpu.dot_dimension_numbers<[1], [0], [0], [1], [0, 0, 1, 1], [], []>, precision = #tpu.contract_precision<fp32>} : vector<16x128xf32>, vector<128x128xf32>, vector<16x128xf32> -> vector<16x128xf32>
    %140 = arith.addf %134, %139 : vector<16x128xf32>
    %c1_143 = arith.constant 1 : index
    %c3_144 = arith.constant 3 : index
    %c0_145 = arith.constant 0 : index
    %141 = vector.load %arg6[%c1_143, %c3_144, %c0_145] : memref<2x22x128xf32, #tpu.memory_space<vmem>>, vector<1x16x128xf32>
    %142 = vector.shape_cast %141 : vector<1x16x128xf32> to vector<16x128xf32>
    %c1_146 = arith.constant 1 : index
    %c3_147 = arith.constant 3 : index
    %c0_148 = arith.constant 0 : index
    %c0_149 = arith.constant 0 : index
    %143 = vector.load %arg1[%c1_146, %c3_147, %c0_148, %c0_149] : memref<2x7x128x128xf32, #tpu.memory_space<vmem>>, vector<1x1x128x128xf32>
    %144 = vector.shape_cast %143 : vector<1x1x128x128xf32> to vector<128x128xf32>
    %cst_150 = arith.constant dense<0.000000e+00> : vector<16x128xf32>
    %145 = tpu.matmul %142, %144, %cst_150 {dimension_numbers = #tpu.dot_dimension_numbers<[1], [0], [0], [1], [0, 0, 1, 1], [], []>, precision = #tpu.contract_precision<fp32>} : vector<16x128xf32>, vector<128x128xf32>, vector<16x128xf32> -> vector<16x128xf32>
    %146 = arith.addf %140, %145 : vector<16x128xf32>
    %c1_151 = arith.constant 1 : index
    %c4_152 = arith.constant 4 : index
    %c0_153 = arith.constant 0 : index
    %147 = vector.load %arg6[%c1_151, %c4_152, %c0_153] : memref<2x22x128xf32, #tpu.memory_space<vmem>>, vector<1x16x128xf32>
    %148 = vector.shape_cast %147 : vector<1x16x128xf32> to vector<16x128xf32>
    %c1_154 = arith.constant 1 : index
    %c4_155 = arith.constant 4 : index
    %c0_156 = arith.constant 0 : index
    %c0_157 = arith.constant 0 : index
    %149 = vector.load %arg1[%c1_154, %c4_155, %c0_156, %c0_157] : memref<2x7x128x128xf32, #tpu.memory_space<vmem>>, vector<1x1x128x128xf32>
    %150 = vector.shape_cast %149 : vector<1x1x128x128xf32> to vector<128x128xf32>
    %cst_158 = arith.constant dense<0.000000e+00> : vector<16x128xf32>
    %151 = tpu.matmul %148, %150, %cst_158 {dimension_numbers = #tpu.dot_dimension_numbers<[1], [0], [0], [1], [0, 0, 1, 1], [], []>, precision = #tpu.contract_precision<fp32>} : vector<16x128xf32>, vector<128x128xf32>, vector<16x128xf32> -> vector<16x128xf32>
    %152 = arith.addf %146, %151 : vector<16x128xf32>
    %c1_159 = arith.constant 1 : index
    %c5_160 = arith.constant 5 : index
    %c0_161 = arith.constant 0 : index
    %153 = vector.load %arg6[%c1_159, %c5_160, %c0_161] : memref<2x22x128xf32, #tpu.memory_space<vmem>>, vector<1x16x128xf32>
    %154 = vector.shape_cast %153 : vector<1x16x128xf32> to vector<16x128xf32>
    %c1_162 = arith.constant 1 : index
    %c5_163 = arith.constant 5 : index
    %c0_164 = arith.constant 0 : index
    %c0_165 = arith.constant 0 : index
    %155 = vector.load %arg1[%c1_162, %c5_163, %c0_164, %c0_165] : memref<2x7x128x128xf32, #tpu.memory_space<vmem>>, vector<1x1x128x128xf32>
    %156 = vector.shape_cast %155 : vector<1x1x128x128xf32> to vector<128x128xf32>
    %cst_166 = arith.constant dense<0.000000e+00> : vector<16x128xf32>
    %157 = tpu.matmul %154, %156, %cst_166 {dimension_numbers = #tpu.dot_dimension_numbers<[1], [0], [0], [1], [0, 0, 1, 1], [], []>, precision = #tpu.contract_precision<fp32>} : vector<16x128xf32>, vector<128x128xf32>, vector<16x128xf32> -> vector<16x128xf32>
    %158 = arith.addf %152, %157 : vector<16x128xf32>
    %c1_167 = arith.constant 1 : index
    %c6_168 = arith.constant 6 : index
    %c0_169 = arith.constant 0 : index
    %159 = vector.load %arg6[%c1_167, %c6_168, %c0_169] : memref<2x22x128xf32, #tpu.memory_space<vmem>>, vector<1x16x128xf32>
    %160 = vector.shape_cast %159 : vector<1x16x128xf32> to vector<16x128xf32>
    %c1_170 = arith.constant 1 : index
    %c6_171 = arith.constant 6 : index
    %c0_172 = arith.constant 0 : index
    %c0_173 = arith.constant 0 : index
    %161 = vector.load %arg1[%c1_170, %c6_171, %c0_172, %c0_173] : memref<2x7x128x128xf32, #tpu.memory_space<vmem>>, vector<1x1x128x128xf32>
    %162 = vector.shape_cast %161 : vector<1x1x128x128xf32> to vector<128x128xf32>
    %cst_174 = arith.constant dense<0.000000e+00> : vector<16x128xf32>
    %163 = tpu.matmul %160, %162, %cst_174 {dimension_numbers = #tpu.dot_dimension_numbers<[1], [0], [0], [1], [0, 0, 1, 1], [], []>, precision = #tpu.contract_precision<fp32>} : vector<16x128xf32>, vector<128x128xf32>, vector<16x128xf32> -> vector<16x128xf32>
    %164 = arith.addf %158, %163 : vector<16x128xf32>
    %165 = arith.negf %164 : vector<16x128xf32>
    %166 = math.exp %165 : vector<16x128xf32>
    %cst_175 = arith.constant 1.000000e+00 : f32
    %167 = vector.broadcast %cst_175 : f32 to vector<16x128xf32>
    %168 = arith.addf %167, %166 : vector<16x128xf32>
    %169 = arith.divf %167, %168 : vector<16x128xf32>
    %170 = vector.extract_strided_slice %169 {offsets = [0, 0], sizes = [1, 16], strides = [1, 1]} : vector<16x128xf32> to vector<1x16xf32>
    %c0_176 = arith.constant 0 : index
    %c0_177 = arith.constant 0 : index
    %c0_178 = arith.constant 0 : index
    %171 = vector.load %arg4[%c0_176, %c0_177, %c0_178] : memref<1x1x256xf32, #tpu.memory_space<vmem>>, vector<1x1x16xf32>
    %172 = vector.shape_cast %171 : vector<1x1x16xf32> to vector<1x16xf32>
    %173 = vector.shape_cast %170 : vector<1x16xf32> to vector<1x1x16xf32>
    tpu.vector_store %arg4[%c0_176, %c0_177, %c0_178], %173 {strides = array<i32>} : memref<1x1x256xf32, #tpu.memory_space<vmem>>, vector<1x1x16xf32>,
    %174 = vector.extract_strided_slice %169 {offsets = [1, 0], sizes = [1, 16], strides = [1, 1]} : vector<16x128xf32> to vector<1x16xf32>
    %c0_179 = arith.constant 0 : index
    %c0_180 = arith.constant 0 : index
    %c16_181 = arith.constant 16 : index
    %175 = vector.load %arg4[%c0_179, %c0_180, %c16_181] : memref<1x1x256xf32, #tpu.memory_space<vmem>>, vector<1x1x16xf32>
    %176 = vector.shape_cast %175 : vector<1x1x16xf32> to vector<1x16xf32>
    %177 = vector.shape_cast %174 : vector<1x16xf32> to vector<1x1x16xf32>
    tpu.vector_store %arg4[%c0_179, %c0_180, %c16_181], %177 {strides = array<i32>} : memref<1x1x256xf32, #tpu.memory_space<vmem>>, vector<1x1x16xf32>,
    %178 = vector.extract_strided_slice %169 {offsets = [2, 0], sizes = [1, 16], strides = [1, 1]} : vector<16x128xf32> to vector<1x16xf32>
    %c0_182 = arith.constant 0 : index
    %c0_183 = arith.constant 0 : index
    %c32_184 = arith.constant 32 : index
    %179 = vector.load %arg4[%c0_182, %c0_183, %c32_184] : memref<1x1x256xf32, #tpu.memory_space<vmem>>, vector<1x1x16xf32>
    %180 = vector.shape_cast %179 : vector<1x1x16xf32> to vector<1x16xf32>
    %181 = vector.shape_cast %178 : vector<1x16xf32> to vector<1x1x16xf32>
    tpu.vector_store %arg4[%c0_182, %c0_183, %c32_184], %181 {strides = array<i32>} : memref<1x1x256xf32, #tpu.memory_space<vmem>>, vector<1x1x16xf32>,
    %182 = vector.extract_strided_slice %169 {offsets = [3, 0], sizes = [1, 16], strides = [1, 1]} : vector<16x128xf32> to vector<1x16xf32>
    %c0_185 = arith.constant 0 : index
    %c0_186 = arith.constant 0 : index
    %c48_187 = arith.constant 48 : index
    %183 = vector.load %arg4[%c0_185, %c0_186, %c48_187] : memref<1x1x256xf32, #tpu.memory_space<vmem>>, vector<1x1x16xf32>
    %184 = vector.shape_cast %183 : vector<1x1x16xf32> to vector<1x16xf32>
    %185 = vector.shape_cast %182 : vector<1x16xf32> to vector<1x1x16xf32>
    tpu.vector_store %arg4[%c0_185, %c0_186, %c48_187], %185 {strides = array<i32>} : memref<1x1x256xf32, #tpu.memory_space<vmem>>, vector<1x1x16xf32>,
    %186 = vector.extract_strided_slice %169 {offsets = [4, 0], sizes = [1, 16], strides = [1, 1]} : vector<16x128xf32> to vector<1x16xf32>
    %c0_188 = arith.constant 0 : index
    %c0_189 = arith.constant 0 : index
    %c64_190 = arith.constant 64 : index
    %187 = vector.load %arg4[%c0_188, %c0_189, %c64_190] : memref<1x1x256xf32, #tpu.memory_space<vmem>>, vector<1x1x16xf32>
    %188 = vector.shape_cast %187 : vector<1x1x16xf32> to vector<1x16xf32>
    %189 = vector.shape_cast %186 : vector<1x16xf32> to vector<1x1x16xf32>
    tpu.vector_store %arg4[%c0_188, %c0_189, %c64_190], %189 {strides = array<i32>} : memref<1x1x256xf32, #tpu.memory_space<vmem>>, vector<1x1x16xf32>,
    %190 = vector.extract_strided_slice %169 {offsets = [5, 0], sizes = [1, 16], strides = [1, 1]} : vector<16x128xf32> to vector<1x16xf32>
    %c0_191 = arith.constant 0 : index
    %c0_192 = arith.constant 0 : index
    %c80_193 = arith.constant 80 : index
    %191 = vector.load %arg4[%c0_191, %c0_192, %c80_193] : memref<1x1x256xf32, #tpu.memory_space<vmem>>, vector<1x1x16xf32>
    %192 = vector.shape_cast %191 : vector<1x1x16xf32> to vector<1x16xf32>
    %193 = vector.shape_cast %190 : vector<1x16xf32> to vector<1x1x16xf32>
    tpu.vector_store %arg4[%c0_191, %c0_192, %c80_193], %193 {strides = array<i32>} : memref<1x1x256xf32, #tpu.memory_space<vmem>>, vector<1x1x16xf32>,
    %194 = vector.extract_strided_slice %169 {offsets = [6, 0], sizes = [1, 16], strides = [1, 1]} : vector<16x128xf32> to vector<1x16xf32>
    %c0_194 = arith.constant 0 : index
    %c0_195 = arith.constant 0 : index
    %c96_196 = arith.constant 96 : index
    %195 = vector.load %arg4[%c0_194, %c0_195, %c96_196] : memref<1x1x256xf32, #tpu.memory_space<vmem>>, vector<1x1x16xf32>
    %196 = vector.shape_cast %195 : vector<1x1x16xf32> to vector<1x16xf32>
    %197 = vector.shape_cast %194 : vector<1x16xf32> to vector<1x1x16xf32>
    tpu.vector_store %arg4[%c0_194, %c0_195, %c96_196], %197 {strides = array<i32>} : memref<1x1x256xf32, #tpu.memory_space<vmem>>, vector<1x1x16xf32>,
    %198 = vector.extract_strided_slice %169 {offsets = [7, 0], sizes = [1, 16], strides = [1, 1]} : vector<16x128xf32> to vector<1x16xf32>
    %c0_197 = arith.constant 0 : index
    %c0_198 = arith.constant 0 : index
    %c112_199 = arith.constant 112 : index
    %199 = vector.load %arg4[%c0_197, %c0_198, %c112_199] : memref<1x1x256xf32, #tpu.memory_space<vmem>>, vector<1x1x16xf32>
    %200 = vector.shape_cast %199 : vector<1x1x16xf32> to vector<1x16xf32>
    %201 = vector.shape_cast %198 : vector<1x16xf32> to vector<1x1x16xf32>
    tpu.vector_store %arg4[%c0_197, %c0_198, %c112_199], %201 {strides = array<i32>} : memref<1x1x256xf32, #tpu.memory_space<vmem>>, vector<1x1x16xf32>,
    %202 = vector.extract_strided_slice %169 {offsets = [8, 0], sizes = [1, 16], strides = [1, 1]} : vector<16x128xf32> to vector<1x16xf32>
    %c0_200 = arith.constant 0 : index
    %c0_201 = arith.constant 0 : index
    %c128_202 = arith.constant 128 : index
    %203 = vector.load %arg4[%c0_200, %c0_201, %c128_202] : memref<1x1x256xf32, #tpu.memory_space<vmem>>, vector<1x1x16xf32>
    %204 = vector.shape_cast %203 : vector<1x1x16xf32> to vector<1x16xf32>
    %205 = vector.shape_cast %202 : vector<1x16xf32> to vector<1x1x16xf32>
    tpu.vector_store %arg4[%c0_200, %c0_201, %c128_202], %205 {strides = array<i32>} : memref<1x1x256xf32, #tpu.memory_space<vmem>>, vector<1x1x16xf32>,
    %206 = vector.extract_strided_slice %169 {offsets = [9, 0], sizes = [1, 16], strides = [1, 1]} : vector<16x128xf32> to vector<1x16xf32>
    %c0_203 = arith.constant 0 : index
    %c0_204 = arith.constant 0 : index
    %c144_205 = arith.constant 144 : index
    %207 = vector.load %arg4[%c0_203, %c0_204, %c144_205] : memref<1x1x256xf32, #tpu.memory_space<vmem>>, vector<1x1x16xf32>
    %208 = vector.shape_cast %207 : vector<1x1x16xf32> to vector<1x16xf32>
    %209 = vector.shape_cast %206 : vector<1x16xf32> to vector<1x1x16xf32>
    tpu.vector_store %arg4[%c0_203, %c0_204, %c144_205], %209 {strides = array<i32>} : memref<1x1x256xf32, #tpu.memory_space<vmem>>, vector<1x1x16xf32>,
    %210 = vector.extract_strided_slice %169 {offsets = [10, 0], sizes = [1, 16], strides = [1, 1]} : vector<16x128xf32> to vector<1x16xf32>
    %c0_206 = arith.constant 0 : index
    %c0_207 = arith.constant 0 : index
    %c160_208 = arith.constant 160 : index
    %211 = vector.load %arg4[%c0_206, %c0_207, %c160_208] : memref<1x1x256xf32, #tpu.memory_space<vmem>>, vector<1x1x16xf32>
    %212 = vector.shape_cast %211 : vector<1x1x16xf32> to vector<1x16xf32>
    %213 = vector.shape_cast %210 : vector<1x16xf32> to vector<1x1x16xf32>
    tpu.vector_store %arg4[%c0_206, %c0_207, %c160_208], %213 {strides = array<i32>} : memref<1x1x256xf32, #tpu.memory_space<vmem>>, vector<1x1x16xf32>,
    %214 = vector.extract_strided_slice %169 {offsets = [11, 0], sizes = [1, 16], strides = [1, 1]} : vector<16x128xf32> to vector<1x16xf32>
    %c0_209 = arith.constant 0 : index
    %c0_210 = arith.constant 0 : index
    %c176_211 = arith.constant 176 : index
    %215 = vector.load %arg4[%c0_209, %c0_210, %c176_211] : memref<1x1x256xf32, #tpu.memory_space<vmem>>, vector<1x1x16xf32>
    %216 = vector.shape_cast %215 : vector<1x1x16xf32> to vector<1x16xf32>
    %217 = vector.shape_cast %214 : vector<1x16xf32> to vector<1x1x16xf32>
    tpu.vector_store %arg4[%c0_209, %c0_210, %c176_211], %217 {strides = array<i32>} : memref<1x1x256xf32, #tpu.memory_space<vmem>>, vector<1x1x16xf32>,
    %218 = vector.extract_strided_slice %169 {offsets = [12, 0], sizes = [1, 16], strides = [1, 1]} : vector<16x128xf32> to vector<1x16xf32>
    %c0_212 = arith.constant 0 : index
    %c0_213 = arith.constant 0 : index
    %c192_214 = arith.constant 192 : index
    %219 = vector.load %arg4[%c0_212, %c0_213, %c192_214] : memref<1x1x256xf32, #tpu.memory_space<vmem>>, vector<1x1x16xf32>
    %220 = vector.shape_cast %219 : vector<1x1x16xf32> to vector<1x16xf32>
    %221 = vector.shape_cast %218 : vector<1x16xf32> to vector<1x1x16xf32>
    tpu.vector_store %arg4[%c0_212, %c0_213, %c192_214], %221 {strides = array<i32>} : memref<1x1x256xf32, #tpu.memory_space<vmem>>, vector<1x1x16xf32>,
    %222 = vector.extract_strided_slice %169 {offsets = [13, 0], sizes = [1, 16], strides = [1, 1]} : vector<16x128xf32> to vector<1x16xf32>
    %c0_215 = arith.constant 0 : index
    %c0_216 = arith.constant 0 : index
    %c208_217 = arith.constant 208 : index
    %223 = vector.load %arg4[%c0_215, %c0_216, %c208_217] : memref<1x1x256xf32, #tpu.memory_space<vmem>>, vector<1x1x16xf32>
    %224 = vector.shape_cast %223 : vector<1x1x16xf32> to vector<1x16xf32>
    %225 = vector.shape_cast %222 : vector<1x16xf32> to vector<1x1x16xf32>
    tpu.vector_store %arg4[%c0_215, %c0_216, %c208_217], %225 {strides = array<i32>} : memref<1x1x256xf32, #tpu.memory_space<vmem>>, vector<1x1x16xf32>,
    %226 = vector.extract_strided_slice %169 {offsets = [14, 0], sizes = [1, 16], strides = [1, 1]} : vector<16x128xf32> to vector<1x16xf32>
    %c0_218 = arith.constant 0 : index
    %c0_219 = arith.constant 0 : index
    %c224_220 = arith.constant 224 : index
    %227 = vector.load %arg4[%c0_218, %c0_219, %c224_220] : memref<1x1x256xf32, #tpu.memory_space<vmem>>, vector<1x1x16xf32>
    %228 = vector.shape_cast %227 : vector<1x1x16xf32> to vector<1x16xf32>
    %229 = vector.shape_cast %226 : vector<1x16xf32> to vector<1x1x16xf32>
    tpu.vector_store %arg4[%c0_218, %c0_219, %c224_220], %229 {strides = array<i32>} : memref<1x1x256xf32, #tpu.memory_space<vmem>>, vector<1x1x16xf32>,
    %230 = vector.extract_strided_slice %169 {offsets = [15, 0], sizes = [1, 16], strides = [1, 1]} : vector<16x128xf32> to vector<1x16xf32>
    %c0_221 = arith.constant 0 : index
    %c0_222 = arith.constant 0 : index
    %c240_223 = arith.constant 240 : index
    %231 = vector.load %arg4[%c0_221, %c0_222, %c240_223] : memref<1x1x256xf32, #tpu.memory_space<vmem>>, vector<1x1x16xf32>
    %232 = vector.shape_cast %231 : vector<1x1x16xf32> to vector<1x16xf32>
    %233 = vector.shape_cast %230 : vector<1x16xf32> to vector<1x1x16xf32>
    tpu.vector_store %arg4[%c0_221, %c0_222, %c240_223], %233 {strides = array<i32>} : memref<1x1x256xf32, #tpu.memory_space<vmem>>, vector<1x1x16xf32>,
    %c0_224 = arith.constant 0 : index
    %c0_225 = arith.constant 0 : index
    %c0_226 = arith.constant 0 : index
    %234 = vector.load %arg4[%c0_224, %c0_225, %c0_226] : memref<1x1x256xf32, #tpu.memory_space<vmem>>, vector<1x1x256xf32>
    %235 = vector.shape_cast %234 : vector<1x1x256xf32> to vector<1x256xf32>
    %c0_227 = arith.constant 0 : index
    %c0_228 = arith.constant 0 : index
    %c0_229 = arith.constant 0 : index
    %236 = vector.load %arg2[%c0_227, %c0_228, %c0_229] : memref<1x4x256xf32, #tpu.memory_space<vmem>>, vector<1x4x256xf32>
    %237 = vector.shape_cast %236 : vector<1x4x256xf32> to vector<4x256xf32>
    %238 = vector.broadcast %235 : vector<1x256xf32> to vector<4x256xf32>
    %239 = arith.mulf %238, %237 : vector<4x256xf32>
    %c0_230 = arith.constant 0 : index
    %c0_231 = arith.constant 0 : index
    %c0_232 = arith.constant 0 : index
    %240 = vector.load %arg3[%c0_230, %c0_231, %c0_232] : memref<1x4x256xf32, #tpu.memory_space<vmem>>, vector<1x4x256xf32>
    %241 = vector.shape_cast %240 : vector<1x4x256xf32> to vector<4x256xf32>
    %242 = vector.shape_cast %239 : vector<4x256xf32> to vector<1x4x256xf32>
    tpu.vector_store %arg3[%c0_230, %c0_231, %c0_232], %242 {strides = array<i32>} : memref<1x4x256xf32, #tpu.memory_space<vmem>>, vector<1x4x256xf32>,
    return
  }
  func.func @transform_0(%arg0: i32) -> (i32, i32, i32, i32) {
    %c0_i32 = arith.constant 0 : i32
    %c0_i32_0 = arith.constant 0 : i32
    %c0_i32_1 = arith.constant 0 : i32
    %c0_i32_2 = arith.constant 0 : i32
    %c0_i32_3 = arith.constant 0 : i32
    return %c0_i32, %c0_i32_0, %c0_i32_1, %c0_i32_2 : i32, i32, i32, i32
  }
  func.func @transform_1(%arg0: i32) -> (i32, i32, i32) {
    %c0_i32 = arith.constant 0 : i32
    %c0_i32_0 = arith.constant 0 : i32
    %c0_i32_1 = arith.constant 0 : i32
    return %arg0, %c0_i32, %c0_i32_0 : i32, i32, i32
  }
  func.func @transform_2(%arg0: i32) -> (i32, i32, i32) {
    %c0_i32 = arith.constant 0 : i32
    %c0_i32_0 = arith.constant 0 : i32
    %c0_i32_1 = arith.constant 0 : i32
    return %arg0, %c0_i32, %c0_i32_0 : i32, i32, i32
  }
  func.func @transform_3(%arg0: i32) -> (i32, i32, i32) {
    %c0_i32 = arith.constant 0 : i32
    %c0_i32_0 = arith.constant 0 : i32
    %c0_i32_1 = arith.constant 0 : i32
    return %arg0, %c0_i32, %c0_i32_0 : i32, i32, i32
  }
}

</mosaic_0001>

<bundles_post_ra>
// kernel: tpu_custom_call.1
= control target key start
LH: loop header
LB: loop body
LE: loop exit
PB: predicated region body
PF: predicated region fallthrough
CT: control target
= control target key end

     0   :  { %9 = vsyncpa [#allocation5], 0  ;;  %s11525_s0 = inlined_call_operand.hbm [shape: f32[2,7,128,128], index: 0, kind: input, shape index: {}]   ;;  %s11526_s1 = inlined_call_operand.hbm [shape: f32[2,4,256], index: 1, kind: input, shape index: {}]   ;;  %s11527_s2 = inlined_call_operand.hbm [shape: f32[2,4,256], index: 2, kind: output, shape index: {0}]   ;;  %s11528_s3 = inlined_call_operand.hbm [shape: f32[2,1,256], index: 3, kind: output, shape index: {1}]  }
   0x1   :  { %10 = vsyncpa [#allocation8], 0 }
   0x2   :  { %12 = vsyncpa [#allocation8 + $0x1], 0 }
   0x3   :  { %13 = vsyncpa [#allocation6], 0 }
   0x4   :  { %15 = vsyncpa [#allocation6 + $0x1], 0 }
   0x5   :  { %16 = vsyncpa [#allocation11], 0 }
   0x6   :  { %18 = vsyncpa [#allocation11 + $0x1], 0  ;;  %s6779_s12 = smov 0   ;;  %s6781_s13 = smov 0  }
   0x7   :  { %s6783_s14 = smov 0   ;;  %s6785_s15 = smov 0  }
   0x8 LB: > { %s139_s18 = sshll.u32 %s11525_s0, 4  ;;  %s6803_s19 = sadd.s32 4294967295, %s6746_s15   ;;  %s6746_s15 = sphi %s6785_s15, %s12360_s15   ;;  %s6742_s14 = sphi %s6783_s14, %s12359_s14   ;;  %s6738_s13 = sphi %s6781_s13, %s12358_s13   ;;  %s6734_s12 = sphi %s6779_s12, %s12357_s12   ;;  %s140_s18 = int_to_ptr.hbm [resolvable:$true] %s139_s18 }
   0x9   : > { %p6466_p0 = scmp.ge.s32.totalorder %s6746_s15, 1  ;;  %p66_p1 = scmp.eq.s32.totalorder %s6803_s19, 0 }
   0xa   : > { %p128_p2 = scmp.lt.s32.totalorder %s6746_s15, 3  ;;  %s6748_s21 = smov [#allocation4]  }
   0xb   : > { %s141_s22 = sshll.u32 %s6748_s21, 4  ;;  %s6749_s23 = smov 128   ;;  %s142_s22 = int_to_ptr.vmem [resolvable:$true] %s141_s22 }
   0xc   : > { %p6808_p3 = pnand %p6466_p0, %p128_p2  ;;  %s6750_s24 = smov 8  }
   0xd   : > { %s6465_s25 = sadd.s32 4294967294, %s6746_s15   ;;  %s6819_s26 = sadd.s32 1, %s6746_s15  }
   0xe   : > { %p6498_p4 = pneg %p6808_p3  ;;  %s52_s27 = sadd.s32 1, %s6742_s14 }
   0xf   : > { %s49_s28 = ssub.s32 %s6746_s15, %s6819_s26  ;;  %p59_p7 = scmp.ne.s32.totalorder %s6742_s14, %s6738_s13 }
  0x10   : > { %p6499_p6 = pnand %p6498_p4, %p66_p1  ;;  %p50_p8 = scmp.eq.s32.totalorder %s49_s28, 0 }
  0x11   : > { %p60_p9 = scmp.eq.s32.totalorder %s6746_s15, 0  ;;  %p65_p10 = scmp.ne.s32.totalorder %s6738_s13, %s6734_s12 }
  0x12   : > { %6501 = dma.hbm_to_vmem [thread:$0]  (!%p6499_p6), %s140_s18, 28672, %s142_s22, [#allocation5], %s6749_s23, %s6749_s23, %s6750_s24  }
  0x13   : > { %p89_p11 = scmp.eq.s32.totalorder %s6803_s19, 1  ;;  %p6835_p12 = por %p66_p1, %p65_p10 }
  0x14   : > { %s6831_s29 = scalar_select %p50_p8, %s6742_s14, %s52_s27  }
  0x15   : > { %p6839_p13 = por %p89_p11, %p59_p7  ;;  %p95_p0 = scmp.eq.s32.totalorder %s6465_s25, 1 }
  0x16   : > { %p61_p2 = por %p60_p9, %p59_p7  ;;  %s155_s5 = sand.u32 1, %s6742_s14  }
  0x17   : > { %p6844_p4 = por %p95_p0, %p65_p10  ;;  %p6514_p6 = scmp.lt.s32.totalorder %s6746_s15, 2 }
  0x18   : > { %s6469_s7 = sshll.u32 %s155_s5, 3  ;;  %s6486_s8 = sshll.u32 %s6746_s15, 3 }
  0x19   : > { %s164_s11 = scalar_lea.hbm %s11526_s1, %s6486_s8  ;;  %s159_s17 = scalar_lea.vmem [#allocation7], %s6469_s7 }
  0x1a   : > { %s166_s16 = sshll.u32 %s164_s11, 4  ;;  %s168_s18 = sshll.u32 %s159_s17, 4  ;;  %s167_s16 = int_to_ptr.hbm [resolvable:$true] %s166_s16  ;;  %s169_s18 = int_to_ptr.vmem [resolvable:$true] %s168_s18 }
  0x1b   : > { %p6853_p8 = pnand %p6514_p6, %p61_p2  ;;  %s156_s22 = scalar_lea.sflag [#allocation8], %s155_s5 }
  0x1c   : > { %s6614_s23 = sshra.s32 %s167_s16, 4  ;;  %s6621_s28 = scalar_lea.hbm %s11526_s1, 16  ;;  %s6615_s23 = int_to_ptr.hbm [resolvable:$true] %s6614_s23 }
  0x1d   : > { %s6616_s24 = scalar_lea.hbm %s6615_s23, 8  ;;  %p6618_p9 = pneg %p6853_p8 }
  0x1e   : > { %p6617_p7 = scmp.ne.s32.totalorder %s6615_s23, %s6616_s24  ;;  %p6622_p0 = scmp.lt.s32.totalorder %s6615_s23, %s11526_s1 }
  0x1f   : > { %p6623_p2 = scmp.lt.s32.totalorder %s6621_s28, %s6616_s24 }
  0x20   : > { %p6619_p10 = pnand %p6618_p9, %p6617_p7 }
  0x21   : > { %p6624_p6 = por %p6623_p2, %p6622_p0 }
  0x22   : > { %p6620_p11 = pneg %p6619_p10 }
  0x24   : > { %p6625_p5 = pnand %p6624_p6, %p6620_p11 }
  0x26   : > { %6628 = shalt.err (!%p6625_p5)
}
  0x27   : > { %6505 = dma.hbm_to_vmem [thread:$0]  (!%p6853_p8), %s167_s16, 128, %s169_s18, %s156_s22  }
  0x28   : > { %177 = sbr.rel (%p6808_p3) target bundleno = 1336 (0x538), region = 28 }
  0x2d   : > { %6717 = dma.done.wait (%p66_p1), [#allocation5], 28672  }
  0x2e   : > { %6719 = vsyncadd (%p66_p1), [#allocation5], 4294938624  ;;  %s6874_s5 = sand.u32 1, %s6738_s13  }
  0x2f   : > { %s6474_s9 = sshll.u32 %s6874_s5, 3  ;;  %s185_s10 = scalar_lea.sflag [#allocation8], %s6874_s5 }
  0x30   : > { %s6880_s11 = scalar_lea.vmem [#allocation7], %s6474_s9 }
  0x31   : > { %6721 = dma.done.wait (%p6835_p12), %s185_s10, 128  }
  0x32   : > { %6723 = vsyncadd (%p6835_p12), %s185_s10, 4294967168  ;;  %v223_v0 = vld [vmem:[%s6880_s11] sm:$0xff]  ;;  %vm11784_vm0 = vcmask 1043456   ;;  %v11529_v21 = vlaneseq  ;;  %vm271_vm1 = vcmask 1040384   ;;  %vm292_vm3 = vcmask 1042434   ;;  %s6751_s20 = smov 80  }
  0x33   : > { %225 = vst [vmem:[#allocation1] ss:$2 sm:$0xff] %v223_v0  ;;  %vm294_vm4 = vcmask 1041408   ;;  %s6752_s30 = smov 112   ;;  %s6753_s16 = smov 64   ;;  %vm305_vm5 = vcmask 122880  }
  0x34   : > { %vm276_vm2 = vcmp.lt.s32.totalorder %v11529_v21, 256  ;;  %s6754_s17 = smov 96   ;;  %s6755_s18 = smov 48   ;;  %vm296_vm6 = vcmask 1041409   ;;  %vm298_vm7 = vcmask 1043459   ;;  %vm300_vm8 = vcmask 1042433  }
  0x35   : > { %s6756_s21 = smov 16   ;;  %s6757_s22 = smov 32  }
  0x36   : > { %s6476_s23 = sshll.u32 %s6874_s5, 1  ;;  %s6483_s25 = sshll.u32 %s6803_s19, 1 }
  0x37   : > { %s11299_s24 = scalar_lea.vmem [#allocation10], %s6476_s23  ;;  %s6345_s7 = scalar_lea.hbm %s11528_s3, %s6483_s25 }
  0x38   : > { %s6347_s8 = sshll.u32 %s11299_s24, 4  ;;  %s6349_s10 = sshll.u32 %s6345_s7, 4  ;;  %s6348_s8 = int_to_ptr.vmem [resolvable:$true] %s6347_s8  ;;  %s6350_s10 = int_to_ptr.hbm [resolvable:$true] %s6349_s10 }
  0x3a   : > { %v226_v1 = vld.sshfl [vmem:[#allocation1] sm:$0xff pattern:$0x75316420]  ;;  %v227_v2 = vld.sshfl [vmem:[#allocation1 + $0x8] sm:$0xff pattern:$0x75316420] }
  0x3b   : > { %v231_v3 = vsel %vm11784_vm0, %v226_v1, 0.0  ;;  %v238_v4 = vsel %vm11784_vm0, %v227_v2, 0.0  ;;  %247 = vst [vmem:[#allocation1] ss:$2 sm:$0xff] %v223_v0 }
  0x3c   : > { %v232_v5 = vrot.slane %v231_v3, 4  ;;  %v239_v6 = vrot.slane %v238_v4, 4 }
  0x3e   : > { %v233_v7 = vadd.f32 %v232_v5, %v231_v3  ;;  %v240_v8 = vadd.f32 %v239_v6, %v238_v4 }
  0x40   : > { %v234_v9 = vrot.slane %v233_v7, 2  ;;  %v241_v10 = vrot.slane %v240_v8, 2 }
  0x42   : > { %v235_v11 = vadd.f32 %v234_v9, %v233_v7  ;;  %v242_v12 = vadd.f32 %v241_v10, %v240_v8  ;;  %v248_v13 = vld.sshfl [vmem:[#allocation1] sm:$0xff pattern:$0x75316420]  ;;  %v249_v14 = vld.sshfl [vmem:[#allocation1 + $0x8] sm:$0xff pattern:$0x75316420] }
  0x43   : > { %v252_v15 = vsel %vm11784_vm0, %v248_v13, -inf  ;;  %v259_v16 = vsel %vm11784_vm0, %v249_v14, -inf }
  0x44   : > { %v236_v17 = vrot.slane %v235_v11, 1  ;;  %v243_v18 = vrot.slane %v242_v12, 1  ;;  %v253_v19 = vrot.slane %v252_v15, 4  ;;  %v260_v20 = vrot.slane %v259_v16, 4 }
  0x46   : > { %v237_v22 = vadd.f32 %v236_v17, %v235_v11  ;;  %v244_v23 = vadd.f32 %v243_v18, %v242_v12  ;;  %v254_v24 = vmax.f32 %v252_v15, %v253_v19  ;;  %v261_v25 = vmax.f32 %v259_v16, %v260_v20 }
  0x48   : > { %v255_v26 = vrot.slane %v254_v24, 2  ;;  %v262_v27 = vrot.slane %v261_v25, 2  ;;  %v266_v28 = vmul.f32 0.25, %v237_v22  ;;  %v267_v29 = vmul.f32 0.25, %v244_v23 }
  0x4a   : > { %v256_v30 = vmax.f32 %v254_v24, %v255_v26  ;;  %v263_v31 = vmax.f32 %v261_v25, %v262_v27  ;;  %v270_v32 = vrot.slane %v267_v29, 7 }
  0x4c   : > { %v257_v33 = vrot.slane %v256_v30, 1  ;;  %v264_v34 = vrot.slane %v263_v31, 1  ;;  %v272_v35 = vsel %vm271_vm1, %v266_v28, %v270_v32 }
  0x4d   : > { %278 = vst.msk [vmem:[#allocation2] ss:$2 sm:$0x3] %vm276_vm2, %v272_v35 }
  0x4e   : > { %v258_v36 = vmax.f32 %v256_v30, %v257_v33  ;;  %v265_v37 = vmax.f32 %v263_v31, %v264_v34 }
  0x50   : > { %v281_v38 = vrot.slane %v265_v37, 7 }
  0x52   : > { %v282_v39 = vsel %vm271_vm1, %v258_v36, %v281_v38 }
  0x53   : > { %285 = vst.msk [vmem:[#allocation2 + $0x1] ss:$2 sm:$0x3] %vm276_vm2, %v282_v39 }
  0x5a   : > { %v6894_v40 = vld [vmem:[#allocation2] sm:$0x3]  ;;  %v6935_v60 = vld [vmem:[#allocation2 + $0x2] sm:$0x3] }
  0x5b   : > { %11792 = vst [vmem:[#allocation16_spill] sm:$0xff] %v6894_v40  ;;  %v6896_v41 = vld [vmem:[#allocation2] sm:$0x3]  ;;  %v11569_v43 = vrot.slane %v6894_v40, 1  ;;  %v11567_v44 = vrot.slane %v6894_v40, 2  ;;  %v11568_v45 = vrot.slane %v6894_v40, 3 }
  0x5c   : > { %11793 = vst [vmem:[#allocation17_spill] sm:$0xff] %v6896_v41  ;;  %v6898_v42 = vld [vmem:[#allocation2] sm:$0x3]  ;;  %v11554_v46 = vrot.slane %v6896_v41, 1  ;;  %v11552_v48 = vrot.slane %v6896_v41, 2  ;;  %v11553_v49 = vrot.slane %v6896_v41, 3 }
  0x5d   : > { %11794 = vst [vmem:[#allocation18_spill] sm:$0xff] %v6898_v42  ;;  %v6904_v47 = vld [vmem:[#allocation2] sm:$0x3]  ;;  %v11545_v50 = vrot.slane %v6898_v42, 1  ;;  %v11543_v51 = vrot.slane %v6898_v42, 2  ;;  %v357_v52 = vsel %vm271_vm1, %v6894_v40, %v11569_v43  ;;  %v358_v53 = vsel %vm292_vm3, %v11567_v44, %v11568_v45  ;;  %v655_v44 = vld [vmem:[#allocation4 + $0x90] sm:$0xff] }
  0x5e   : > { %11795 = vst [vmem:[#allocation19_spill] sm:$0xff] %v6904_v47  ;;  %v313_v54 = vsel %vm271_vm1, %v6896_v41, %v11554_v46  ;;  %v11544_v55 = vrot.slane %v6898_v42, 3  ;;  %v359_v56 = vsel %vm294_vm4, %v357_v52, %v358_v53  ;;  %v314_v57 = vsel %vm292_vm3, %v11552_v48, %v11553_v49  ;;  %v6944_v1 = vld [vmem:[#allocation2] sm:$0x3]  ;;  %v6969_v16 = vld [vmem:[#allocation2 + $0x2] sm:$0x3] }
  0x5f   : > { %v379_v58 = vsel %vm271_vm1, %v6898_v42, %v11545_v50  ;;  %v11572_v59 = vrot.slane %v6904_v47, 1  ;;  %11796 = vst [vmem:[#allocation20_spill] sm:$0xff] %v6935_v60  ;;  %v364_v61 = vperm.slane %v359_v56, 0  ;;  %v315_v62 = vsel %vm294_vm4, %v313_v54, %v314_v57  ;;  %v6951_v5 = vld [vmem:[#allocation2] sm:$0x3] }
  0x60   : > { %v380_v63 = vsel %vm292_vm3, %v11543_v51, %v11544_v55  ;;  %v11570_v0 = vrot.slane %v6904_v47, 2  ;;  %11797 = vst [vmem:[#allocation21_spill] sm:$0xff] %v6944_v1  ;;  %v320_v2 = vperm.slane %v315_v62, 0  ;;  %v11571_v3 = vrot.slane %v6904_v47, 3  ;;  %v6980_v20 = vld [vmem:[#allocation2 + $0x2] sm:$0x3] }
  0x61   : > { %v335_v4 = vsel %vm271_vm1, %v6904_v47, %v11572_v59  ;;  %11798 = vst [vmem:[#allocation22_spill] sm:$0xff] %v6951_v5  ;;  %366 = vrot.lane.b32.xlu1 %v364_v61, %s6751_s20  ;;  %v381_v6 = vsel %vm294_vm4, %v379_v58, %v380_v63  ;;  %v11560_v7 = vrot.slane %v6935_v60, 1  ;;  %v11558_v8 = vrot.slane %v6935_v60, 2  ;;  %v6988_v26 = vld [vmem:[#allocation2] sm:$0x3]  ;;  %v663_v51 = vld [vmem:[#allocation4 + $0xd0] sm:$0xff] }
  0x62   : > { %v11559_v9 = vrot.slane %v6935_v60, 3  ;;  %322 = vrot.lane.b32.xlu0 %v320_v2, %s6752_s30  ;;  %v336_v10 = vsel %vm292_vm3, %v11570_v0, %v11571_v3  ;;  %v11542_v11 = vrot.slane %v6944_v1, 1  ;;  %v11540_v12 = vrot.slane %v6944_v1, 2  ;;  %11799 = vst [vmem:[#allocation23_spill] sm:$0xff] %v6969_v16  ;;  %v7016_v39 = vld [vmem:[#allocation2 + $0x2] sm:$0x3] }
  0x63   : > { %v11541_v13 = vrot.slane %v6944_v1, 3  ;;  %v337_v14 = vsel %vm294_vm4, %v335_v4, %v336_v10  ;;  %v11566_v15 = vrot.slane %v6951_v5, 1  ;;  %v386_v17 = vperm.slane %v381_v6, 0  ;;  %11800 = vst [vmem:[#allocation24_spill] sm:$0xff] %v6980_v20  ;;  %v7026_v57 = vld [vmem:[#allocation2 + $0x2] sm:$0x3] }
  0x64   : > { %v483_v18 = vsel %vm271_vm1, %v6935_v60, %v11560_v7  ;;  %v484_v19 = vsel %vm292_vm3, %v11558_v8, %v11559_v9  ;;  %v342_v22 = vperm.slane %v337_v14, 0  ;;  %v445_v23 = vsel %vm271_vm1, %v6944_v1, %v11542_v11  ;;  %11801 = vst [vmem:[#allocation25_spill] sm:$0xff] %v6988_v26  ;;  %v7050_v14 = vld [vmem:[#allocation2 + $0x2] sm:$0x3]  ;;  %v660_v8 = vld [vmem:[#allocation4 + $0xb8] sm:$0xff]  ;;  %v1813_v47 = vld [vmem:[#allocation4 + $0x1a0] sm:$0xff] }
  0x65   : > { %v11564_v24 = vrot.slane %v6951_v5, 2  ;;  %v11565_v25 = vrot.slane %v6951_v5, 3  ;;  %v446_v27 = vsel %vm292_vm3, %v11540_v12, %v11541_v13  ;;  %v401_v28 = vsel %vm271_vm1, %v6951_v5, %v11566_v15  ;;  %11802 = vst [vmem:[#allocation26_spill] sm:$0xff] %v7016_v39  ;;  %v664_v12 = vld [vmem:[#allocation4 + $0xd8] sm:$0xff]  ;;  %v658_v7 = vld [vmem:[#allocation4 + $0xa8] sm:$0xff]  ;;  %v1815_v5 = vld [vmem:[#allocation4 + $0x1b0] sm:$0xff] }
  0x66   : > { %v11549_v29 = vrot.slane %v6969_v16, 1  ;;  %v11546_v30 = vrot.slane %v6969_v16, 2  ;;  %v11548_v32 = vrot.slane %v6969_v16, 3  ;;  %v11533_v33 = vrot.slane %v6980_v20, 1  ;;  %11803 = vst [vmem:[#allocation27_spill] sm:$0xff] %v7026_v57  ;;  %v654_v0 = vld [vmem:[#allocation4 + $0x88] sm:$0xff] }
  0x67   : > { %v402_v31 = vsel %vm292_vm3, %v11564_v24, %v11565_v25  ;;  %v11531_v34 = vrot.slane %v6980_v20, 2  ;;  %v11532_v37 = vrot.slane %v6980_v20, 3  ;;  %v11563_v38 = vrot.slane %v6988_v26, 1  ;;  %11804 = vst [vmem:[#allocation28_spill] sm:$0xff] %v7050_v14  ;;  %v1814_v40 = vld [vmem:[#allocation4 + $0x1a8] sm:$0xff] }
  0x68   : > { %v403_v35 = vsel %vm294_vm4, %v401_v28, %v402_v31  ;;  %v549_v36 = vsel %vm271_vm1, %v6969_v16, %v11549_v29  ;;  %v485_v52 = vsel %vm294_vm4, %v483_v18, %v484_v19  ;;  %v550_v54 = vsel %vm292_vm3, %v11546_v30, %v11548_v32 }
  0x69   : > { %388 = vrot.lane.b32.xlu1 %v386_v17, %s6753_s16  ;;  %v408_v53 = vperm.slane %v403_v35, 0  ;;  %v11561_v56 = vrot.slane %v6988_v26, 2  ;;  %v447_v58 = vsel %vm294_vm4, %v445_v23, %v446_v27  ;;  %v527_v61 = vsel %vm271_vm1, %v6980_v20, %v11533_v33  ;;  %v7062_v35 = vld [vmem:[#allocation2 + $0x2] sm:$0x3] }
  0x6a   : > { %344 = vrot.lane.b32.xlu0 %v342_v22, %s6754_s17  ;;  %v11562_v62 = vrot.slane %v6988_v26, 3  ;;  %v423_v63 = vsel %vm271_vm1, %v6988_v26, %v11563_v38  ;;  %v7041_v2 = vsel %vm294_vm4, %v549_v36, %v550_v54  ;;  %v528_v4 = vsel %vm292_vm3, %v11531_v34, %v11532_v37  ;;  %11805 = vst [vmem:[#allocation29_spill] sm:$0xff] %v7062_v35 }
  0x6b   : > { %410 = vrot.lane.b32.xlu2 %v408_v53, %s6755_s18  ;;  %v11536_v6 = vrot.slane %v7016_v39, 1  ;;  %v11534_v10 = vrot.slane %v7016_v39, 2  ;;  %v490_v17 = vperm.slane %v485_v52, 0  ;;  %v11535_v19 = vrot.slane %v7016_v39, 3 }
  0x6c   : > { %v424_v18 = vsel %vm292_vm3, %v11561_v56, %v11562_v62  ;;  %v11537_v22 = vrot.slane %v7026_v57, 1  ;;  %v452_v23 = vperm.slane %v447_v58, 0  ;;  %v11538_v28 = vrot.slane %v7026_v57, 2  ;;  %v657_v56 = vld [vmem:[#allocation4 + $0xa0] sm:$0xff] }
  0x6d   : > { %v425_v27 = vsel %vm294_vm4, %v423_v63, %v424_v18  ;;  %v11539_v31 = vrot.slane %v7026_v57, 3  ;;  %v556_v36 = vperm.slane %v7041_v2, 0  ;;  %v7066_v52 = vsel %vm294_vm4, %v527_v61, %v528_v4  ;;  %v668_v61 = vld [vmem:[#allocation4 + $0xf8] sm:$0xff]  ;;  %v667_v4 = vld [vmem:[#allocation4 + $0xf0] sm:$0xff] }
  0x6e   : > { %v615_v53 = vsel %vm271_vm1, %v7016_v39, %v11536_v6  ;;  %v11557_v54 = vrot.slane %v7050_v14, 1  ;;  %v430_v58 = vperm.slane %v425_v27, 0  ;;  %v616_v63 = vsel %vm292_vm3, %v11534_v10, %v11535_v19  ;;  %v666_v10 = vld [vmem:[#allocation4 + $0xe8] sm:$0xff]  ;;  %v665_v19 = vld [vmem:[#allocation4 + $0xe0] sm:$0xff] }
  0x6f   : > { %v11555_v18 = vrot.slane %v7050_v14, 2  ;;  %v11556_v21 = vrot.slane %v7050_v14, 3  ;;  %v593_v34 = vsel %vm271_vm1, %v7026_v57, %v11537_v22  ;;  %v594_v27 = vsel %vm292_vm3, %v11538_v28, %v11539_v31 }
  0x70   : > { %v505_v37 = vsel %vm271_vm1, %v7050_v14, %v11557_v54  ;;  %v11547_v33 = vrot.slane %v7062_v35, 1  ;;  %v534_v6 = vperm.slane %v7066_v52, 0  ;;  %v11550_v28 = vrot.slane %v7062_v35, 2 }
  0x71   : > { %492 = vrot.lane.b32.xlu1 %v490_v17, %s6752_s30  ;;  %v506_v22 = vsel %vm292_vm3, %v11555_v18, %v11556_v21  ;;  %v11551_v31 = vrot.slane %v7062_v35, 3  ;;  %v7105_v13 = vsel %vm294_vm4, %v615_v53, %v616_v63  ;;  %v7108_v52 = vand.u32 4294901760, %v668_v61 }
  0x72   : > { %454 = vrot.lane.b32.xlu0 %v452_v23, %s6756_s21  ;;  %v507_v17 = vsel %vm294_vm4, %v505_v37, %v506_v22  ;;  %v7110_v11 = vand.u32 4294901760, %v667_v4  ;;  %v7114_v55 = vsel %vm294_vm4, %v593_v34, %v594_v27  ;;  %v571_v23 = vsel %vm271_vm1, %v7062_v35, %v11547_v33  ;;  %v662_v37 = vld [vmem:[#allocation4 + $0xc8] sm:$0xff] }
  0x73   : > { %432 = vrot.lane.b32.xlu2 %v430_v58, %s6757_s22  ;;  %v7120_v53 = vand.u32 4294901760, %v666_v10  ;;  %v7122_v63 = vand.u32 4294901760, %v665_v19  ;;  %v512_v22 = vperm.slane %v507_v17, 0  ;;  %v7125_v50 = vsub.f32 %v668_v61, %v7108_v52  ;;  %883 = vmatpush.msra.mxu3 %v7108_v52  ;;  %v661_v58 = vld [vmem:[#allocation4 + $0xc0] sm:$0xff] }
  0x74   : > { %v7128_v30 = vsub.f32 %v667_v4, %v7110_v11  ;;  %670 = vmatpush.msra.mxu0 %v7108_v52  ;;  %v7132_v34 = vand.u32 4294901760, %v664_v12  ;;  %v572_v27 = vsel %vm292_vm3, %v11550_v28, %v11551_v31  ;;  %v7145_v4 = vand.u32 4294901760, %v663_v51 }
  0x75   : > { %v7140_v17 = vsub.f32 %v666_v10, %v7120_v53  ;;  %v7143_v61 = vsub.f32 %v665_v19, %v7122_v63  ;;  %v11582_v33 = vand.u32 4294901760, %v7125_v50  ;;  %825 = vmatpush.msra.mxu2 %v7125_v50  ;;  %885 = vmatpush.msra.mxu3 %v7110_v11  ;;  %v7154_v28 = vand.u32 4294901760, %v662_v37 }
  0x76   : > { %v11581_v32 = vand.u32 4294901760, %v7128_v30  ;;  %v7152_v29 = vsub.f32 %v664_v12, %v7132_v34  ;;  %672 = vmatpush.msra.mxu0 %v7110_v11  ;;  %v7160_v31 = vsub.f32 %v663_v51, %v7145_v4  ;;  %v7162_v48 = vand.u32 4294901760, %v661_v58 }
  0x77   : > { %v11579_v10 = vand.u32 4294901760, %v7140_v17  ;;  %v11578_v19 = vand.u32 4294901760, %v7143_v61  ;;  %v721_v49 = vsub.f32 %v7125_v50, %v11582_v33  ;;  %828 = vmatpush.msra.mxu2 %v7128_v30  ;;  %887 = vmatpush.msra.mxu3 %v7120_v53  ;;  %v7174_v18 = vsub.f32 %v662_v37, %v7154_v28  ;;  %v659_v37 = vld [vmem:[#allocation4 + $0xb0] sm:$0xff] }
  0x78   : > { %v727_v12 = vsub.f32 %v7128_v30, %v11581_v32  ;;  %v11577_v46 = vand.u32 4294901760, %v7152_v29  ;;  %674 = vmatpush.msra.mxu0 %v7120_v53  ;;  %v7187_v54 = vsub.f32 %v661_v58, %v7162_v48  ;;  %v622_v62 = vperm.slane %v7105_v13, 0 }
  0x79   : > { %558 = vrot.lane.b32.xlu1 %v556_v36, %s6753_s16  ;;  %v733_v51 = vsub.f32 %v7140_v17, %v11579_v10  ;;  %v739_v21 = vsub.f32 %v7143_v61, %v11578_v19  ;;  %v722_v9 = vand.u32 4294901760, %v721_v49  ;;  %831 = vmatpush.msra.mxu2 %v7140_v17  ;;  %v11575_v36 = vand.u32 4294901760, %v7160_v31  ;;  %v656_v49 = vld [vmem:[#allocation4 + $0x98] sm:$0xff] }
  0x7a   : > { %536 = vrot.lane.b32.xlu0 %v534_v6, %s6751_s20  ;;  %v728_v2 = vand.u32 4294901760, %v727_v12  ;;  %v600_v38 = vperm.slane %v7114_v55, 0  ;;  %v573_v58 = vsel %vm294_vm4, %v571_v23, %v572_v27  ;;  %v745_v6 = vsub.f32 %v7152_v29, %v11577_v46  ;;  %889 = vmatpush.msra.mxu3 %v7122_v63 }
  0x7b   : > { %514 = vrot.lane.b32.xlu2 %v512_v22, %s6754_s17  ;;  %723 = vmatpush.msra.mxu1 %v722_v9  ;;  %v734_v12 = vand.u32 4294901760, %v733_v51  ;;  %v11574_v24 = vand.u32 4294901760, %v7174_v18  ;;  %v7202_v13 = vand.u32 4294901760, %v660_v8  ;;  %v7204_v55 = vand.u32 4294901760, %v659_v37 }
  0x7c   : > { %834 = vmatpush.msra.mxu2 %v7143_v61  ;;  %v740_v22 = vand.u32 4294901760, %v739_v21  ;;  %891 = vmatpush.msra.mxu3 %v7132_v34  ;;  %v11573_v23 = vand.u32 4294901760, %v7187_v54  ;;  %v7209_v27 = vand.u32 4294901760, %v658_v7  ;;  %v7211_v25 = vand.u32 4294901760, %v657_v56 }
  0x7d   : > { %676 = vmatpush.msra.mxu0 %v7122_v63  ;;  %729 = vmatpush.msra.mxu1 %v728_v2  ;;  %v751_v9 = vsub.f32 %v7160_v31, %v11575_v36  ;;  %v7218_v51 = vsub.f32 %v660_v8, %v7202_v13  ;;  %v7221_v21 = vsub.f32 %v659_v37, %v7204_v55  ;;  %v7223_v15 = vand.u32 4294901760, %v656_v49 }
  0x7e   : > { %837 = vmatpush.msra.mxu2 %v7152_v29  ;;  %v578_v45 = vperm.slane %v573_v58, 0  ;;  %893 = vmatpush.msra.mxu3 %v7145_v4  ;;  %v746_v2 = vand.u32 4294901760, %v745_v6  ;;  %v757_v43 = vsub.f32 %v7174_v18, %v11574_v24  ;;  %v7233_v37 = vsub.f32 %v658_v7, %v7209_v27  ;;  %v648_v24 = vld [vmem:[#allocation4 + $0x70] sm:$0xff] }
  0x7f   : > { %678 = vmatpush.msra.mxu0 %v7132_v34  ;;  %735 = vmatpush.msra.mxu1 %v734_v12  ;;  %v11576_v8 = vand.u32 4294901760, %v7218_v51  ;;  %v763_v58 = vsub.f32 %v7187_v54, %v11573_v23  ;;  %v7241_v6 = vsub.f32 %v657_v56, %v7211_v25  ;;  %v7243_v12 = vand.u32 4294901760, %v655_v44  ;;  %v649_v56 = vld [vmem:[#allocation4 + $0x78] sm:$0xff] }
  0x80   : > { %840 = vmatpush.msra.mxu2 %v7160_v31  ;;  %895 = vmatpush.msra.mxu3 %v7154_v28  ;;  %v752_v3 = vand.u32 4294901760, %v751_v9  ;;  %v11580_v7 = vand.u32 4294901760, %v7221_v21  ;;  %v7248_v59 = vsub.f32 %v656_v49, %v7223_v15  ;;  %v7252_v23 = vand.u32 4294901760, %v654_v0 }
  0x81   : > { %624 = vrot.lane.b32.xlu1 %v622_v62, %s6756_s21  ;;  %741 = vmatpush.msra.mxu1 %v740_v22  ;;  %v653_v62 = vld [vmem:[#allocation4 + $0x80] sm:$0xff]  ;;  %v758_v36 = vand.u32 4294901760, %v757_v43  ;;  %v11583_v49 = vand.u32 4294901760, %v7233_v37  ;;  %v764_v22 = vand.u32 4294901760, %v763_v58  ;;  %v7263_v9 = vsub.f32 %v655_v44, %v7243_v12  ;;  %v647_v43 = vld [vmem:[#allocation4 + $0x68] sm:$0xff] }
  0x82   : > { %602 = vrot.lane.b32.xlu0 %v600_v38, %s6757_s22  ;;  %843 = vmatpush.msra.mxu2 %v7174_v18  ;;  %v769_v38 = vsub.f32 %v7218_v51, %v11576_v8  ;;  %v775_v8 = vsub.f32 %v7221_v21, %v11580_v7  ;;  %v7272_v46 = vand.u32 4294901760, %v649_v56  ;;  %v7274_v19 = vand.u32 4294901760, %v648_v24  ;;  %v7290_v58 = vld [vmem:[#allocation2 + $0x2] sm:$0x3] }
  0x83   : > { %580 = vrot.lane.b32.xlu2 %v578_v45, %s6755_s18  ;;  %747 = vmatpush.msra.mxu1 %v746_v2  ;;  %v11590_v45 = vand.u32 4294901760, %v7241_v6  ;;  %v7265_v2 = vand.u32 4294901760, %v653_v62  ;;  %v7279_v44 = vsub.f32 %v654_v0, %v7252_v23  ;;  %v781_v7 = vsub.f32 %v7233_v37, %v11583_v49  ;;  %11806 = vst [vmem:[#allocation30_spill] sm:$0xff] %v7290_v58  ;;  %v645_v49 = vld [vmem:[#allocation4 + $0x58] sm:$0xff] }
  0x84   : > { %680 = vmatpush.msra.mxu0 %v7145_v4  ;;  %846 = vmatpush.msra.mxu2 %v7187_v54  ;;  %v770_v10 = vand.u32 4294901760, %v769_v38  ;;  %v7286_v32 = vsub.f32 %v649_v56, %v7272_v46  ;;  %v7288_v33 = vand.u32 4294901760, %v647_v43  ;;  %v7302_v56 = vsub.f32 %v648_v24, %v7274_v19 }
  0x85   : > { %897 = vmatpush.msra.mxu3 %v7162_v48  ;;  %753 = vmatpush.msra.mxu1 %v752_v3  ;;  %v646_v3 = vld [vmem:[#allocation4 + $0x60] sm:$0xff]  ;;  %v787_v0 = vsub.f32 %v7241_v6, %v11590_v45  ;;  %v7299_v38 = vsub.f32 %v653_v62, %v7265_v2  ;;  %v776_v57 = vand.u32 4294901760, %v775_v8  ;;  %v11807_v20 = vand.u32 4294901760, %v7248_v59 }
  0x86   : > { %682 = vmatpush.msra.mxu0 %v7154_v28  ;;  %849 = vmatpush.msra.mxu2 %v7218_v51  ;;  %v7308_v45 = vand.u32 4294901760, %v646_v3  ;;  %v782_v8 = vand.u32 4294901760, %v781_v7  ;;  %v7319_v35 = vand.u32 4294901760, %v645_v49  ;;  %v11808_v62 = vand.u32 4294901760, %v7263_v9 }
  0x87   : > { %899 = vmatpush.msra.mxu3 %v7202_v13  ;;  %759 = vmatpush.msra.mxu1 %v758_v36  ;;  %v793_v39 = vsub.f32 %v7248_v59, %v11807_v20  ;;  %v11599_v36 = vrot.slane %v7290_v58, 1  ;;  %v7317_v20 = vsub.f32 %v647_v43, %v7288_v33  ;;  %v788_v42 = vand.u32 4294901760, %v787_v0 }
  0x88   : > { %684 = vmatpush.msra.mxu0 %v7162_v48  ;;  %852 = vmatpush.msra.mxu2 %v7221_v21  ;;  %v799_v1 = vsub.f32 %v7263_v9, %v11808_v62  ;;  %v7336_v16 = vsub.f32 %v646_v3, %v7308_v45  ;;  %v11809_v24 = vand.u32 4294901760, %v7279_v44  ;;  %v11811_v62 = vrot.slane %v7290_v58, 2 }
  0x89   : > { %901 = vmatpush.msra.mxu3 %v7204_v55  ;;  %765 = vmatpush.msra.mxu1 %v764_v22  ;;  %v6758_v22 = vmov 0.0   ;;  %v467_v7 = vsel %vm271_vm1, %v7290_v58, %v11599_v36  ;;  %v794_v43 = vand.u32 4294901760, %v793_v39  ;;  %v11810_v39 = vand.u32 4294901760, %v7286_v32 }
  0x8a   : > { %686 = vmatpush.msra.mxu0 %v7202_v13  ;;  %855 = vmatpush.msra.mxu2 %v7233_v37  ;;  %218 = vst [vmem:[#allocation3 + $0x8] sm:$0xff] %v6758_v22  ;;  %v805_v36 = vsub.f32 %v7279_v44, %v11809_v24  ;;  %v1104_v0 = vand.u32 4294901760, %v7317_v20  ;;  %v7354_v24 = vsub.f32 %v645_v49, %v7319_v35 }
  0x8b   : > { %903 = vmatpush.msra.mxu3 %v7209_v27  ;;  %771 = vmatpush.msra.mxu1 %v770_v10  ;;  %217 = vst [vmem:[#allocation3] sm:$0xff] %v6758_v22  ;;  %v11602_v10 = vrot.slane %v7290_v58, 3 }
  0x8c   : > { %688 = vmatpush.msra.mxu0 %v7204_v55  ;;  %858 = vmatpush.msra.mxu2 %v7241_v6  ;;  %219 = vst [vmem:[#allocation3 + $0x10] sm:$0x3f] %v6758_v22 }
  0x8d   : > { %905 = vmatpush.msra.mxu3 %v7211_v25  ;;  %777 = vmatpush.msra.mxu1 %v776_v57  ;;  %v1093_v57 = vsub.f32 %v7286_v32, %v11810_v39  ;;  %v468_v3 = vsel %vm292_vm3, %v11811_v62, %v11602_v10  ;;  %220 = vst [vmem:[#allocation3 + $0x18] sm:$0xff] %v6758_v22  ;;  %v11812_v39 = vand.u32 4294901760, %v7302_v56  ;;  %v11813_v10 = vand.u32 4294901760, %v7299_v38 }
  0x8e   : > { %690 = vmatpush.msra.mxu0 %v7209_v27  ;;  %861 = vmatpush.msra.mxu2 %v7248_v59  ;;  %v469_v41 = vsel %vm294_vm4, %v467_v7, %v468_v3  ;;  %221 = vst [vmem:[#allocation3 + $0x20] sm:$0xff] %v6758_v22  ;;  %v1110_v7 = vand.u32 4294901760, %v7336_v16 }
  0x8f   : > { %907 = vmatpush.msra.mxu3 %v7223_v15  ;;  %783 = vmatpush.msra.mxu1 %v782_v8  ;;  %v1099_v62 = vsub.f32 %v7302_v56, %v11812_v39  ;;  %476 = vst.msk [vmem:[#allocation3 + $0xb] sm:$0x1] %vm305_vm5, %v469_v41  ;;  %v800_v8 = vand.u32 4294901760, %v799_v1  ;;  %v811_v49 = vsub.f32 %v7299_v38, %v11813_v10  ;;  %v1094_v3 = vand.u32 4294901760, %v1093_v57 }
  0x90   : > { %692 = vmatpush.msra.mxu0 %v7211_v25  ;;  %864 = vmatpush.msra.mxu2 %v7263_v9  ;;  %222 = vst [vmem:[#allocation3 + $0x28] sm:$0x3f] %v6758_v22  ;;  %v806_v39 = vand.u32 4294901760, %v805_v36  ;;  %v1105_v41 = vsub.f32 %v7317_v20, %v1104_v0  ;;  %v1111_v36 = vsub.f32 %v7336_v16, %v1110_v7 }
  0x91   : > { %909 = vmatpush.msra.mxu3 %v7243_v12  ;;  %789 = vmatpush.msra.mxu1 %v788_v42  ;;  %v1116_v42 = vand.u32 4294901760, %v7354_v24  ;;  %v1100_v1 = vand.u32 4294901760, %v1099_v62  ;;  %v812_v22 = vand.u32 4294901760, %v811_v49  ;;  %v11814_v62 = vand.u32 4294901760, %v7125_v50 }
  0x92   : > { %694 = vmatpush.msra.mxu0 %v7223_v15  ;;  %867 = vmatpush.msra.mxu2 %v7279_v44  ;;  %v1106_v10 = vand.u32 4294901760, %v1105_v41  ;;  %v1112_v57 = vand.u32 4294901760, %v1111_v36  ;;  %v11816_v50 = vand.u32 4294901760, %v7140_v17  ;;  %v7451_v41 = vld [vmem:[#allocation2] sm:$0x3] }
  0x93   : > { %911 = vmatpush.msra.mxu3 %v7252_v23  ;;  %795 = vmatpush.msra.mxu1 %v794_v43  ;;  %v1117_v43 = vsub.f32 %v7354_v24, %v1116_v42  ;;  %11826 = vst [vmem:[#allocation31_spill] sm:$0xff] %v7451_v41  ;;  %v11604_v36 = vrot.slane %v7451_v41, 3 }
  0x94   : > { %696 = vmatpush.msra.mxu0 %v7243_v12  ;;  %870 = vmatpush.msra.mxu2 %v7299_v38 }
  0x95   : > { %913 = vmatpush.msra.mxu3 %v7265_v2  ;;  %801 = vmatpush.msra.mxu1 %v800_v8  ;;  %v644_v8 = vld [vmem:[#allocation4 + $0x50] sm:$0xff]  ;;  %v1118_v49 = vand.u32 4294901760, %v1117_v43 }
  0x96   : > { %1042 = vmatpush.msrb.mxu2 %v7272_v46  ;;  %698 = vmatpush.msra.mxu0 %v7252_v23 }
  0x97   : > { %1095 = vmatpush.msrb.mxu3 %v1094_v3  ;;  %807 = vmatpush.msra.mxu1 %v806_v39  ;;  %v11815_v3 = vand.u32 4294901760, %v7128_v30  ;;  %v7396_v39 = vand.u32 4294901760, %v644_v8  ;;  %v11818_v30 = vand.u32 4294901760, %v7152_v29  ;;  %v11822_v29 = vand.u32 4294901760, %v7218_v51 }
  0x98   : > { %1044 = vmatpush.msrb.mxu2 %v7274_v19  ;;  %700 = vmatpush.msra.mxu0 %v7265_v2 }
  0x99   : > { %1101 = vmatpush.msrb.mxu3 %v1100_v1  ;;  %813 = vmatpush.msra.mxu1 %v812_v22  ;;  %v640_v1 = vld [vmem:[#allocation4 + $0x30] sm:$0xff]  ;;  %v11603_v22 = vrot.slane %v7451_v41, 2 }
  0x9a   : > { %1046 = vmatpush.msrb.mxu2 %v7288_v33  ;;  %930 = vmatpush.msrb.mxu0 %v11814_v62  ;;  %v7464_v62 = vand.u32 4294901760, %v640_v1 }
  0x9b   : > { %1001 = vmatpush.msrb.mxu1 %v7108_v52  ;;  %1107 = vmatpush.msrb.mxu3 %v1106_v10  ;;  %v11819_v52 = vand.u32 4294901760, %v7160_v31  ;;  %v11823_v31 = vand.u32 4294901760, %v7221_v21 }
  0x9c   : > { %1048 = vmatpush.msrb.mxu2 %v7308_v45  ;;  %934 = vmatpush.msrb.mxu0 %v11815_v3  ;;  %v293_v3 = vsel %vm292_vm3, %v11603_v22, %v11604_v36 }
  0x9d   : > { %1003 = vmatpush.msrb.mxu1 %v7110_v11  ;;  %1113 = vmatpush.msrb.mxu3 %v1112_v57  ;;  %v11817_v11 = vand.u32 4294901760, %v7143_v61 }
  0x9e   : > { %1050 = vmatpush.msrb.mxu2 %v7319_v35  ;;  %938 = vmatpush.msrb.mxu0 %v11816_v50 }
  0x9f   : > { %1005 = vmatpush.msrb.mxu1 %v7120_v53  ;;  %1119 = vmatpush.msrb.mxu3 %v1118_v49  ;;  %v11820_v53 = vand.u32 4294901760, %v7174_v18  ;;  %v7426_v18 = vsub.f32 %v644_v8, %v7396_v39  ;;  %v11828_v8 = vand.u32 4294901760, %v7263_v9 }
  0xa0   : > { %1052 = vmatpush.msrb.mxu2 %v7396_v39  ;;  %942 = vmatpush.msrb.mxu0 %v11817_v11 }
  0xa1   : > { %1007 = vmatpush.msrb.mxu1 %v7122_v63  ;;  %v11821_v63 = vand.u32 4294901760, %v7187_v54  ;;  %v11824_v54 = vand.u32 4294901760, %v7233_v37  ;;  %v1122_v17 = vand.u32 4294901760, %v7426_v18 }
  0xa2   : > { %946 = vmatpush.msrb.mxu0 %v11818_v30 }
  0xa3   : > { %1009 = vmatpush.msrb.mxu1 %v7132_v34  ;;  %v643_v34 = vld [vmem:[#allocation4 + $0x48] sm:$0xff] }
  0xa4   : > { %950 = vmatpush.msrb.mxu0 %v11819_v52  ;;  %v638_v52 = vld [vmem:[#allocation4 + $0x20] sm:$0xff] }
  0xa5   : > { %1011 = vmatpush.msrb.mxu1 %v7145_v4 }
  0xa6   : > { %954 = vmatpush.msrb.mxu0 %v11820_v53  ;;  %v7492_v53 = vsub.f32 %v640_v1, %v7464_v62 }
  0xa7   : > { %1013 = vmatpush.msrb.mxu1 %v7154_v28  ;;  %v7423_v28 = vand.u32 4294901760, %v643_v34 }
  0xa8   : > { %958 = vmatpush.msrb.mxu0 %v11821_v63  ;;  %v7494_v63 = vand.u32 4294901760, %v638_v52 }
  0xa9   : > { %1015 = vmatpush.msrb.mxu1 %v7162_v48  ;;  %v642_v48 = vld [vmem:[#allocation4 + $0x40] sm:$0xff]  ;;  %1054 = vmatpush.msrb.mxu2 %v7423_v28  ;;  %v7436_v4 = vsub.f32 %v643_v34, %v7423_v28  ;;  %v11829_v34 = vand.u32 4294901760, %v7279_v44  ;;  %v11830_v44 = vand.u32 4294901760, %v7299_v38  ;;  %v635_v38 = vld [vmem:[#allocation4 + $0x8] sm:$0xff] }
  0xaa   : > { %962 = vmatpush.msrb.mxu0 %v11822_v29  ;;  %v7433_v61 = vand.u32 4294901760, %v642_v48 }
  0xab   : > { %1017 = vmatpush.msrb.mxu1 %v7202_v13  ;;  %v641_v13 = vld [vmem:[#allocation4 + $0x38] sm:$0xff]  ;;  %v1128_v51 = vand.u32 4294901760, %v7436_v4 }
  0xac   : > { %966 = vmatpush.msrb.mxu0 %v11823_v31  ;;  %1056 = vmatpush.msrb.mxu2 %v7433_v61  ;;  %v7446_v21 = vand.u32 4294901760, %v641_v13  ;;  %v7449_v37 = vsub.f32 %v642_v48, %v7433_v61 }
  0xad   : > { %1019 = vmatpush.msrb.mxu1 %v7204_v55  ;;  %v11825_v55 = vand.u32 4294901760, %v7241_v6  ;;  %v11605_v6 = vrot.slane %v7451_v41, 1  ;;  %v1129_v43 = vsub.f32 %v7436_v4, %v1128_v51 }
  0xae   : > { %970 = vmatpush.msrb.mxu0 %v11824_v54  ;;  %1058 = vmatpush.msrb.mxu2 %v7446_v21  ;;  %v1134_v57 = vand.u32 4294901760, %v7449_v37  ;;  %v1146_v54 = vand.u32 4294901760, %v7492_v53 }
  0xaf   : > { %1021 = vmatpush.msrb.mxu1 %v7209_v27  ;;  %v1123_v27 = vsub.f32 %v7426_v18, %v1122_v17  ;;  %v291_v49 = vsel %vm271_vm1, %v7451_v41, %v11605_v6 }
  0xb0   : > { %974 = vmatpush.msrb.mxu0 %v11825_v55  ;;  %v295_v11 = vsel %vm294_vm4, %v291_v49, %v293_v3  ;;  %v1135_v9 = vsub.f32 %v7449_v37, %v1134_v57  ;;  %1060 = vmatpush.msrb.mxu2 %v7464_v62 }
  0xb1   : > { %1023 = vmatpush.msrb.mxu1 %v7211_v25  ;;  %v11827_v25 = vand.u32 4294901760, %v7248_v59  ;;  %v1124_v10 = vand.u32 4294901760, %v1123_v27  ;;  %v7467_v59 = vsub.f32 %v641_v13, %v7446_v21  ;;  %306 = vst.msk [vmem:[#allocation3 + $0x3] sm:$0x1] %vm305_vm5, %v295_v11  ;;  %v7510_v27 = vsub.f32 %v638_v52, %v7494_v63 }
  0xb2   : > { %v1136_v31 = vand.u32 4294901760, %v1135_v9 }
  0xb3   : > { %1025 = vmatpush.msrb.mxu1 %v7223_v15  ;;  %978 = vmatpush.msrb.mxu0 %v11827_v25  ;;  %v639_v15 = vld [vmem:[#allocation4 + $0x28] sm:$0xff]  ;;  %v1140_v30 = vand.u32 4294901760, %v7467_v59  ;;  %v636_v25 = vld [vmem:[#allocation4 + $0x10] sm:$0xff] }
  0xb4   : > { %1125 = vmatpush.msrb.mxu3 %v1124_v10  ;;  %v7481_v50 = vand.u32 4294901760, %v639_v15  ;;  %v1147_v10 = vsub.f32 %v7492_v53, %v1146_v54 }
  0xb5   : > { %1027 = vmatpush.msrb.mxu1 %v7243_v12  ;;  %982 = vmatpush.msrb.mxu0 %v11828_v8  ;;  %v1130_v12 = vand.u32 4294901760, %v1129_v43  ;;  %v1141_v48 = vsub.f32 %v7467_v59, %v1140_v30  ;;  %v7523_v8 = vand.u32 4294901760, %v636_v25 }
  0xb6   : > { %v7497_v29 = vsub.f32 %v639_v15, %v7481_v50  ;;  %1062 = vmatpush.msrb.mxu2 %v7481_v50  ;;  %v1158_v15 = vand.u32 4294901760, %v7510_v27  ;;  %v1148_v49 = vand.u32 4294901760, %v1147_v10 }
  0xb7   : > { %1029 = vmatpush.msrb.mxu1 %v7252_v23  ;;  %986 = vmatpush.msrb.mxu0 %v11829_v34  ;;  %v637_v23 = vld [vmem:[#allocation4 + $0x18] sm:$0xff]  ;;  %v1142_v1 = vand.u32 4294901760, %v1141_v48  ;;  %v7537_v52 = vsub.f32 %v636_v25, %v7523_v8 }
  0xb8   : > { %1131 = vmatpush.msrb.mxu3 %v1130_v12  ;;  %v1152_v13 = vand.u32 4294901760, %v7497_v29  ;;  %v7507_v55 = vand.u32 4294901760, %v637_v23  ;;  %1064 = vmatpush.msrb.mxu2 %v7494_v63  ;;  %v1159_v11 = vsub.f32 %v7510_v27, %v1158_v15  ;;  %v7532_v12 = vand.u32 4294901760, %v635_v38 }
  0xb9   : > { %1031 = vmatpush.msrb.mxu1 %v7265_v2  ;;  %990 = vmatpush.msrb.mxu0 %v11830_v44 }
  0xba   : > { %1137 = vmatpush.msrb.mxu3 %v1136_v31  ;;  %v1153_v43 = vsub.f32 %v7497_v29, %v1152_v13  ;;  %1066 = vmatpush.msrb.mxu2 %v7507_v55  ;;  %v7527_v2 = vsub.f32 %v637_v23, %v7507_v55  ;;  %v1160_v34 = vand.u32 4294901760, %v1159_v11  ;;  %v634_v31 = vld [vmem:[#allocation4] sm:$0xff]  ;;  %v1170_v23 = vand.u32 4294901760, %v7537_v52 }
  0xbb   : > { %v7544_v44 = vand.u32 4294901760, %v634_v31 }
  0xbc   : > { %1143 = vmatpush.msrb.mxu3 %v1142_v1  ;;  %v1154_v3 = vand.u32 4294901760, %v1153_v43  ;;  %1068 = vmatpush.msrb.mxu2 %v7523_v8  ;;  %v1164_v9 = vand.u32 4294901760, %v7527_v2  ;;  %v7547_v1 = vsub.f32 %v635_v38, %v7532_v12  ;;  %v1171_v25 = vsub.f32 %v7537_v52, %v1170_v23 }
  0xbe   : > { %1149 = vmatpush.msrb.mxu3 %v1148_v49  ;;  %v1165_v48 = vsub.f32 %v7527_v2, %v1164_v9  ;;  %1070 = vmatpush.msrb.mxu2 %v7532_v12  ;;  %v1176_v43 = vand.u32 4294901760, %v7547_v1  ;;  %v7555_v49 = vsub.f32 %v634_v31, %v7544_v44  ;;  %v1172_v22 = vand.u32 4294901760, %v1171_v25 }
  0xc0   : > { %1155 = vmatpush.msrb.mxu3 %v1154_v3  ;;  %v1166_v10 = vand.u32 4294901760, %v1165_v48  ;;  %1072 = vmatpush.msrb.mxu2 %v7544_v44  ;;  %v1177_v38 = vsub.f32 %v7547_v1, %v1176_v43  ;;  %v1182_v3 = vand.u32 4294901760, %v7555_v49 }
  0xc2   : > { %1161 = vmatpush.msrb.mxu3 %v1160_v34  ;;  %v1178_v48 = vand.u32 4294901760, %v1177_v38  ;;  %v1183_v36 = vsub.f32 %v7555_v49, %v1182_v3 }
  0xc4   : > { %1167 = vmatpush.msrb.mxu3 %v1166_v10  ;;  %v1184_v31 = vand.u32 4294901760, %v1183_v36 }
  0xc5   : > { %v411_v11 = vpop.permute.xlu2 %410 }
  0xc6   : > { %416 = vst.msk [vmem:[#allocation3 + $0x8] sm:$0x1] %vm305_vm5, %v411_v11  ;;  %1173 = vmatpush.msrb.mxu3 %v1172_v22 }
  0xc8   : > { %1179 = vmatpush.msrb.mxu3 %v1178_v48 }
  0xca   : > { %1185 = vmatpush.msrb.mxu3 %v1184_v31 }
  0xcd   : > { %v433_v34 = vpop.permute.xlu2 %432 }
  0xce   : > { %438 = vst.msk [vmem:[#allocation3 + $0x9] sm:$0x1] %vm305_vm5, %v433_v34 }
  0xd3   : > { %v367_v25 = vpop.permute.xlu1 %366 }
  0xd4   : > { %372 = vst.msk [vmem:[#allocation3 + $0x6] sm:$0x1] %vm305_vm5, %v367_v25  ;;  %v323_v6 = vpop.permute.xlu0 %322 }
  0xd5   : > { %328 = vst.msk [vmem:[#allocation3 + $0x4] sm:$0x1] %vm305_vm5, %v323_v6  ;;  %v515_v11 = vpop.permute.xlu2 %514 }
  0xd6   : > { %520 = vst.msk [vmem:[#allocation3 + $0xd] sm:$0x1] %vm305_vm5, %v515_v11  ;;  %v11831_v11 = vand.u32 4294901760, %v7286_v32 }
  0xdb   : > { %v389_v10 = vpop.permute.xlu1 %388 }
  0xdc   : > { %394 = vst.msk [vmem:[#allocation3 + $0x7] sm:$0x1] %vm305_vm5, %v389_v10  ;;  %v345_v38 = vpop.permute.xlu0 %344 }
  0xdd   : > { %350 = vst.msk [vmem:[#allocation3 + $0x5] sm:$0x1] %vm305_vm5, %v345_v38  ;;  %v581_v22 = vpop.permute.xlu2 %580 }
  0xde   : > { %586 = vst.msk [vmem:[#allocation3 + $0x10] sm:$0x1] %vm305_vm5, %v581_v22  ;;  %v11832_v22 = vand.u32 4294901760, %v7302_v56 }
  0xe3   : > { %v493_v36 = vpop.permute.xlu1 %492 }
  0xe4   : > { %498 = vst.msk [vmem:[#allocation3 + $0xc] sm:$0x1] %vm305_vm5, %v493_v36  ;;  %v455_v48 = vpop.permute.xlu0 %454  ;;  %v650_v31 = vld [vmem:[#allocation3 + $0x1] sm:$0xff] }
  0xe5   : > { %460 = vst.msk [vmem:[#allocation3 + $0xa] sm:$0x1] %vm305_vm5, %v455_v48  ;;  %v7574_v6 = vand.u32 4294901760, %v650_v31 }
  0xe7   : > { %815 = vmatmul.f32.vlgmr.msra.gmra.mxu1 %v7574_v6  ;;  %v702_v34 = vsub.f32 %v650_v31, %v7574_v6  ;;  %v632_v31 = vld [vmem:[#allocation3] sm:$0xff] }
  0xe8   : > { %1255 = vmatpush.msra.mxu1 %v7272_v46 }
  0xe9   : > { %873 = vmatmul.f32.vlgmr.msra.gmra.mxu2 %v702_v34  ;;  %v703_v25 = vand.u32 4294901760, %v702_v34 }
  0xea   : > { %1257 = vmatpush.msra.mxu1 %v7274_v19  ;;  %1302 = vmatpush.msra.mxu2 %v11831_v11  ;;  %v1427_v11 = vld [vmem:[#allocation4 + $0x158] sm:$0xff] }
  0xeb   : > { %917 = vmatmul.f32.vlgmr.msra.gmra.mxu3 %v703_v25  ;;  %v559_v10 = vpop.permute.xlu1 %558  ;;  %v704_v38 = vsub.f32 %v702_v34, %v703_v25 }
  0xec   : > { %1259 = vmatpush.msra.mxu1 %v7288_v33  ;;  %1306 = vmatpush.msra.mxu2 %v11832_v22  ;;  %564 = vst.msk [vmem:[#allocation3 + $0xf] sm:$0x1] %vm305_vm5, %v559_v10  ;;  %v537_v36 = vpop.permute.xlu0 %536 }
  0xed   : > { %1373 = vmatpush.msra.mxu3 %v7272_v46  ;;  %542 = vst.msk [vmem:[#allocation3 + $0xe] sm:$0x1] %vm305_vm5, %v537_v36  ;;  %v705_v48 = vand.u32 4294901760, %v704_v38  ;;  %v7599_v46 = vand.u32 4294901760, %v632_v31  ;;  %v7667_v38 = vand.u32 4294901760, %v1427_v11  ;;  %v1426_v36 = vld [vmem:[#allocation4 + $0x150] sm:$0xff] }
  0xee   : > { %1261 = vmatpush.msra.mxu1 %v7308_v45  ;;  %1310 = vmatpush.msra.mxu2 %v1104_v0  ;;  %v1431_v0 = vld [vmem:[#allocation4 + $0x178] sm:$0xff] }
  0xef   : > { %1375 = vmatpush.msra.mxu3 %v7274_v19  ;;  %706 = vmatmul.f32.vlgmr.msra.gmra.mxu0 %v705_v48 }
  0xf0   : > { %1197 = vmatpush.msra.mxu0 %v7286_v32  ;;  %1263 = vmatpush.msra.mxu1 %v7319_v35 }
  0xf1   : > { %1314 = vmatpush.msra.mxu2 %v1110_v7  ;;  %1377 = vmatpush.msra.mxu3 %v7288_v33  ;;  %v7622_v7 = vand.u32 4294901760, %v1431_v0 }
  0xf2   : > { %1200 = vmatpush.msra.mxu0 %v7302_v56  ;;  %1265 = vmatpush.msra.mxu1 %v7396_v39 }
  0xf3   : > { %1318 = vmatpush.msra.mxu2 %v1116_v42  ;;  %1379 = vmatpush.msra.mxu3 %v7308_v45  ;;  %v625_v19 = vpop.permute.xlu1 %624  ;;  %v7616_v45 = vsub.f32 %v632_v31, %v7599_v46  ;;  %v7689_v31 = vsub.f32 %v1427_v11, %v7667_v38 }
  0xf4   : > { %1203 = vmatpush.msra.mxu0 %v7317_v20  ;;  %1267 = vmatpush.msra.mxu1 %v7423_v28  ;;  %630 = vst.msk [vmem:[#allocation3 + $0x12] sm:$0x1] %vm305_vm5, %v625_v19  ;;  %v603_v32 = vpop.permute.xlu0 %602  ;;  %v651_v33 = vld [vmem:[#allocation3 + $0x9] sm:$0xff] }
  0xf5   : > { %1322 = vmatpush.msra.mxu2 %v1122_v17  ;;  %1381 = vmatpush.msra.mxu3 %v7319_v35  ;;  %608 = vst.msk [vmem:[#allocation3 + $0x11] sm:$0x1] %vm305_vm5, %v603_v32  ;;  %v7611_v56 = vand.u32 4294901760, %v651_v33  ;;  %v1430_v35 = vld [vmem:[#allocation4 + $0x170] sm:$0xff]  ;;  %v1075_v42 = vand.u32 4294901760, %v7616_v45  ;;  %v1429_v17 = vld [vmem:[#allocation4 + $0x168] sm:$0xff] }
  0xf6   : > { %1206 = vmatpush.msra.mxu0 %v7336_v16  ;;  %1269 = vmatpush.msra.mxu1 %v7433_v61  ;;  %v633_v34 = vld [vmem:[#allocation3 + $0x8] sm:$0xff]  ;;  %v7642_v25 = vand.u32 4294901760, %v1429_v17 }
  0xf7   : > { %1326 = vmatpush.msra.mxu2 %v1128_v51  ;;  %1383 = vmatpush.msra.mxu3 %v7396_v39  ;;  %v710_v20 = vsub.f32 %v651_v33, %v7611_v56  ;;  %v7631_v39 = vand.u32 4294901760, %v1430_v35 }
  0xf8   : > { %819 = vmatmul.f32.gmra.mxu1 %v7611_v56  ;;  %1209 = vmatpush.msra.mxu0 %v7354_v24  ;;  %v7636_v24 = vsub.f32 %v1431_v0, %v7622_v7  ;;  %v1424_v0 = vld [vmem:[#allocation4 + $0x140] sm:$0xff] }
  0xf9   : > { %1271 = vmatpush.msra.mxu1 %v7446_v21  ;;  %1330 = vmatpush.msra.mxu2 %v1134_v57  ;;  %v711_v16 = vand.u32 4294901760, %v710_v20 }
  0xfa   : > { %1385 = vmatpush.msra.mxu3 %v7423_v28  ;;  %878 = vmatmul.f32.gmra.mxu2 %v710_v20  ;;  %v1428_v28 = vld [vmem:[#allocation4 + $0x160] sm:$0xff] }
  0xfb   : > { %1212 = vmatpush.msra.mxu0 %v7426_v18  ;;  %1273 = vmatpush.msra.mxu1 %v7464_v62  ;;  %v712_v51 = vsub.f32 %v710_v20, %v711_v16  ;;  %v1076_v18 = vsub.f32 %v7616_v45, %v1075_v42  ;;  %v7658_v10 = vand.u32 4294901760, %v1428_v28  ;;  %v1423_v20 = vld [vmem:[#allocation4 + $0x138] sm:$0xff] }
  0xfc   : > { %1334 = vmatpush.msra.mxu2 %v1140_v30  ;;  %1387 = vmatpush.msra.mxu3 %v7433_v61  ;;  %v7651_v30 = vsub.f32 %v1430_v35, %v7631_v39  ;;  %v7653_v61 = vand.u32 4294901760, %v633_v34 }
  0xfd   : > { %923 = vmatmul.f32.gmra.mxu3 %v711_v16  ;;  %1215 = vmatpush.msra.mxu0 %v7436_v4  ;;  %v713_v57 = vand.u32 4294901760, %v712_v51  ;;  %v11622_v4 = vand.u32 4294901760, %v7636_v24 }
  0xfe   : > { %1275 = vmatpush.msra.mxu1 %v7481_v50  ;;  %1338 = vmatpush.msra.mxu2 %v1146_v54  ;;  %v7665_v54 = vsub.f32 %v1429_v17, %v7642_v25  ;;  %v7673_v22 = vsub.f32 %v633_v34, %v7653_v61  ;;  %v1422_v17 = vld [vmem:[#allocation4 + $0x130] sm:$0xff] }
  0xff   : > { %1389 = vmatpush.msra.mxu3 %v7446_v21  ;;  %1218 = vmatpush.msra.mxu0 %v7449_v37  ;;  %v1077_v21 = vand.u32 4294901760, %v1076_v18  ;;  %v11621_v37 = vand.u32 4294901760, %v7651_v30  ;;  %v7750_v18 = vand.u32 4294901760, %v1422_v17 }
 0x100   : > { %1277 = vmatpush.msra.mxu1 %v7494_v63  ;;  %1342 = vmatpush.msra.mxu2 %v1152_v13  ;;  %v7682_v13 = vsub.f32 %v1428_v28, %v7658_v10  ;;  %v11619_v48 = vand.u32 4294901760, %v7665_v54 }
 0x101   : > { %1391 = vmatpush.msra.mxu3 %v7464_v62  ;;  %714 = vmatmul.f32.gmra.mxu0 %v713_v57  ;;  %v1484_v62 = vsub.f32 %v7636_v24, %v11622_v4  ;;  %v1421_v57 = vld [vmem:[#allocation4 + $0x128] sm:$0xff]  ;;  %v1817_v4 = vld [vmem:[#allocation4 + $0x1c0] sm:$0xff] }
 0x102   : > { %1033 = vmatmul.f32.vlgmr.msrb.gmra.mxu1 %v7574_v6  ;;  %1221 = vmatpush.msra.mxu0 %v7467_v59  ;;  %v1425_v59 = vld [vmem:[#allocation4 + $0x148] sm:$0xff]  ;;  %v11618_v32 = vand.u32 4294901760, %v7682_v13 }
 0x103   : > { %1279 = vmatpush.msra.mxu1 %v7507_v55  ;;  %1346 = vmatpush.msra.mxu2 %v1158_v15  ;;  %v7691_v15 = vand.u32 4294901760, %v1426_v36  ;;  %v1485_v19 = vand.u32 4294901760, %v1484_v62  ;;  %v7703_v33 = vand.u32 4294901760, %v1425_v59 }
 0x104   : > { %1393 = vmatpush.msra.mxu3 %v7481_v50  ;;  %1078 = vmatmul.f32.vlgmr.msrb.gmra.mxu2 %v1077_v21  ;;  %v1490_v50 = vsub.f32 %v7651_v30, %v11621_v37  ;;  %v1502_v35 = vsub.f32 %v7682_v13, %v11618_v32 }
 0x105   : > { %1224 = vmatpush.msra.mxu0 %v7492_v53  ;;  %1281 = vmatpush.msra.mxu1 %v7523_v8  ;;  %v1083_v53 = vand.u32 4294901760, %v7673_v22  ;;  %v7730_v16 = vsub.f32 %v1425_v59, %v7703_v33  ;;  %v7770_v59 = vsub.f32 %v1422_v17, %v7750_v18  ;;  %v1417_v17 = vld [vmem:[#allocation4 + $0x108] sm:$0xff] }
 0x106   : > { %1350 = vmatpush.msra.mxu2 %v1164_v9  ;;  %1395 = vmatpush.msra.mxu3 %v7494_v63  ;;  %v1496_v63 = vsub.f32 %v7665_v54, %v11619_v48  ;;  %v7715_v9 = vsub.f32 %v1426_v36, %v7691_v15  ;;  %v1420_v36 = vld [vmem:[#allocation4 + $0x120] sm:$0xff] }
 0x107   : > { %1187 = vmatmul.f32.vlgmr.msrb.gmra.mxu3 %v7599_v46  ;;  %1227 = vmatpush.msra.mxu0 %v7497_v29  ;;  %v11617_v29 = vand.u32 4294901760, %v7689_v31 }
 0x108   : > { %1283 = vmatpush.msra.mxu1 %v7532_v12  ;;  %1354 = vmatpush.msra.mxu2 %v1170_v23  ;;  %v1491_v23 = vand.u32 4294901760, %v1490_v50  ;;  %v11616_v34 = vand.u32 4294901760, %v7715_v9  ;;  %v1419_v50 = vld [vmem:[#allocation4 + $0x118] sm:$0xff] }
 0x109   : > { %1397 = vmatpush.msra.mxu3 %v7507_v55  ;;  %1230 = vmatpush.msra.mxu0 %v7510_v27  ;;  %v1084_v55 = vsub.f32 %v7673_v22, %v1083_v53  ;;  %v7723_v27 = vand.u32 4294901760, %v1424_v0  ;;  %v1508_v51 = vsub.f32 %v7689_v31, %v11617_v29 }
 0x10a   : > { %1285 = vmatpush.msra.mxu1 %v7544_v44  ;;  %1358 = vmatpush.msra.mxu2 %v1176_v43  ;;  %v7734_v43 = vand.u32 4294901760, %v1423_v20  ;;  %v1514_v21 = vsub.f32 %v7715_v9, %v11616_v34 }
 0x10b   : > { %1399 = vmatpush.msra.mxu3 %v7523_v8  ;;  %992 = vmatmul.f32.vlgmr.msrb.gmra.mxu0 %v7574_v6  ;;  %v1497_v8 = vand.u32 4294901760, %v1496_v63  ;;  %v1085_v6 = vand.u32 4294901760, %v1084_v55  ;;  %v7745_v28 = vsub.f32 %v1424_v0, %v7723_v27  ;;  %v1509_v11 = vand.u32 4294901760, %v1508_v51 }
 0x10c   : > { %1486 = vmatpush.msrb.mxu1 %v1485_v19  ;;  %1233 = vmatpush.msra.mxu0 %v7527_v2  ;;  %v1503_v2 = vand.u32 4294901760, %v1502_v35  ;;  %v1515_v0 = vand.u32 4294901760, %v1514_v21  ;;  %v7786_v55 = vand.u32 4294901760, %v1419_v50  ;;  %v11607_v35 = vand.u32 4294901760, %v7770_v59 }
 0x10d   : > { %1037 = vmatmul.f32.gmra.mxu1 %v7611_v56  ;;  %1362 = vmatpush.msra.mxu2 %v1182_v3  ;;  %v11614_v3 = vand.u32 4294901760, %v7730_v16 }
 0x10e   : > { %1401 = vmatpush.msra.mxu3 %v7532_v12  ;;  %1492 = vmatpush.msrb.mxu1 %v1491_v23  ;;  %v7754_v12 = vsub.f32 %v1423_v20, %v7734_v43  ;;  %v1418_v20 = vld [vmem:[#allocation4 + $0x110] sm:$0xff]  ;;  %v1538_v21 = vsub.f32 %v7770_v59, %v11607_v35  ;;  %v1824_v35 = vld [vmem:[#allocation4 + $0x1f8] sm:$0xff] }
 0x10f   : > { %1588 = vmatpush.msrb.mxu2 %v7636_v24  ;;  %1236 = vmatpush.msra.mxu0 %v7537_v52  ;;  %v7760_v52 = vand.u32 4294901760, %v1421_v57  ;;  %v1520_v62 = vsub.f32 %v7730_v16, %v11614_v3 }
 0x110   : > { %1086 = vmatmul.f32.gmra.mxu2 %v1085_v6  ;;  %1403 = vmatpush.msra.mxu3 %v7544_v44  ;;  %v11612_v44 = vand.u32 4294901760, %v7745_v28  ;;  %v11610_v19 = vand.u32 4294901760, %v7754_v12  ;;  %v7800_v6 = vand.u32 4294901760, %v1418_v20 }
 0x111   : > { %1498 = vmatpush.msrb.mxu1 %v1497_v8  ;;  %1591 = vmatpush.msrb.mxu2 %v7651_v30  ;;  %v7779_v63 = vsub.f32 %v1421_v57, %v7760_v52  ;;  %v1416_v57 = vld [vmem:[#allocation4 + $0x100] sm:$0xff] }
 0x112   : > { %1646 = vmatpush.msrb.mxu3 %v7622_v7  ;;  %1239 = vmatpush.msra.mxu0 %v7547_v1  ;;  %v7775_v1 = vand.u32 4294901760, %v1420_v36  ;;  %v1526_v23 = vsub.f32 %v7745_v28, %v11612_v44  ;;  %v1532_v8 = vsub.f32 %v7754_v12, %v11610_v19 }
 0x113   : > { %1191 = vmatmul.f32.gmra.mxu3 %v7653_v61  ;;  %1504 = vmatpush.msrb.mxu1 %v1503_v2  ;;  %v7807_v2 = vsub.f32 %v1419_v50, %v7786_v55  ;;  %v7821_v50 = vand.u32 4294901760, %v1416_v57 }
 0x114   : > { %1594 = vmatpush.msrb.mxu2 %v7665_v54  ;;  %1648 = vmatpush.msrb.mxu3 %v7631_v39  ;;  %v7798_v51 = vsub.f32 %v1420_v36, %v7775_v1  ;;  %v1533_v36 = vand.u32 4294901760, %v1532_v8 }
 0x115   : > { %1242 = vmatpush.msra.mxu0 %v7555_v49  ;;  %1510 = vmatpush.msrb.mxu1 %v1509_v11  ;;  %v1521_v49 = vand.u32 4294901760, %v1520_v62  ;;  %v7809_v11 = vand.u32 4294901760, %v1417_v17 }
 0x116   : > { %1597 = vmatpush.msrb.mxu2 %v7682_v13  ;;  %1650 = vmatpush.msrb.mxu3 %v7642_v25  ;;  %v11608_v62 = vand.u32 4294901760, %v7798_v51 }
 0x117   : > { %1433 = vmatpush.msrb.mxu0 %v7622_v7  ;;  %1289 = vmatmul.f32.vlgmr.msra.gmra.mxu1 %v1075_v42  ;;  %v1527_v42 = vand.u32 4294901760, %v1526_v23  ;;  %v7831_v8 = vsub.f32 %v1417_v17, %v7809_v11 }
 0x118   : > { %996 = vmatmul.f32.gmra.mxu0 %v7611_v56  ;;  %1516 = vmatpush.msrb.mxu1 %v1515_v0  ;;  %v11606_v56 = vand.u32 4294901760, %v7779_v63  ;;  %v7819_v0 = vsub.f32 %v1418_v20, %v7800_v6  ;;  %v1539_v20 = vand.u32 4294901760, %v1538_v21 }
 0x119   : > { %1435 = vmatpush.msrb.mxu0 %v7631_v39  ;;  %1600 = vmatpush.msrb.mxu2 %v7689_v31 }
 0x11a   : > { %1652 = vmatpush.msrb.mxu3 %v7658_v10  ;;  %1364 = vmatmul.f32.vlgmr.msra.gmra.mxu2 %v7599_v46  ;;  %v1544_v23 = vsub.f32 %v7779_v63, %v11606_v56  ;;  %v7841_v56 = vsub.f32 %v1416_v57, %v7821_v50  ;;  %v1823_v57 = vld [vmem:[#allocation4 + $0x1f0] sm:$0xff] }
 0x11b   : > { %1437 = vmatpush.msrb.mxu0 %v7642_v25  ;;  %1522 = vmatpush.msrb.mxu1 %v1521_v49  ;;  %v11609_v49 = vand.u32 4294901760, %v7807_v2  ;;  %v7867_v19 = vand.u32 4294901760, %v1823_v57 }
 0x11c   : > { %1603 = vmatpush.msrb.mxu2 %v7715_v9  ;;  %1654 = vmatpush.msrb.mxu3 %v7667_v38  ;;  %v1545_v17 = vand.u32 4294901760, %v1544_v23  ;;  %v11615_v23 = vand.u32 4294901760, %v7841_v56 }
 0x11d   : > { %1405 = vmatmul.f32.vlgmr.msra.gmra.mxu3 %v7599_v46  ;;  %1439 = vmatpush.msrb.mxu0 %v7658_v10  ;;  %v1550_v46 = vsub.f32 %v7798_v51, %v11608_v62  ;;  %v1556_v21 = vsub.f32 %v7807_v2, %v11609_v49  ;;  %v7859_v62 = vand.u32 4294901760, %v1824_v35  ;;  %v1413_v49 = vld [vmem:[#allocation3 + $0x2] sm:$0xff] }
 0x11e   : > { %1528 = vmatpush.msrb.mxu1 %v1527_v42  ;;  %1606 = vmatpush.msrb.mxu2 %v7730_v16  ;;  %v11611_v42 = vand.u32 4294901760, %v7819_v0 }
 0x11f   : > { %1656 = vmatpush.msrb.mxu3 %v7691_v15  ;;  %1441 = vmatpush.msrb.mxu0 %v7667_v38  ;;  %v7876_v44 = vsub.f32 %v1824_v35, %v7859_v62  ;;  %v1820_v35 = vld [vmem:[#allocation4 + $0x1d8] sm:$0xff] }
 0x120   : > { %1534 = vmatpush.msrb.mxu1 %v1533_v36  ;;  %1609 = vmatpush.msrb.mxu2 %v7745_v28  ;;  %v11613_v36 = vand.u32 4294901760, %v7831_v8 }
 0x121   : > { %1658 = vmatpush.msrb.mxu3 %v7703_v33  ;;  %1245 = vmatmul.f32.vlgmr.msra.gmra.mxu0 %v7616_v45  ;;  %v1551_v45 = vand.u32 4294901760, %v1550_v46  ;;  %v11620_v34 = vand.u32 4294901760, %v7876_v44 }
 0x122   : > { %1295 = vmatmul.f32.gmra.mxu1 %v1083_v53  ;;  %1443 = vmatpush.msrb.mxu0 %v7691_v15  ;;  %v1562_v53 = vsub.f32 %v7819_v0, %v11611_v42  ;;  %v1568_v46 = vsub.f32 %v7831_v8, %v11613_v36  ;;  %v1822_v42 = vld [vmem:[#allocation4 + $0x1e8] sm:$0xff]  ;;  %v7880_v36 = vand.u32 4294901760, %v1413_v49 }
 0x123   : > { %1540 = vmatpush.msrb.mxu1 %v1539_v20  ;;  %1612 = vmatpush.msrb.mxu2 %v7754_v12  ;;  %v1557_v20 = vand.u32 4294901760, %v1556_v21  ;;  %v1574_v21 = vsub.f32 %v7841_v56, %v11615_v23  ;;  %v7883_v3 = vand.u32 4294901760, %v1822_v42 }
 0x124   : > { %1660 = vmatpush.msrb.mxu3 %v7723_v27  ;;  %1368 = vmatmul.f32.gmra.mxu2 %v7653_v61 }
 0x125   : > { %1445 = vmatpush.msrb.mxu0 %v7703_v33  ;;  %1546 = vmatpush.msrb.mxu1 %v1545_v17  ;;  %v1563_v17 = vand.u32 4294901760, %v1562_v53  ;;  %v7886_v53 = vsub.f32 %v1823_v57, %v7867_v19  ;;  %v1575_v23 = vand.u32 4294901760, %v1574_v21  ;;  %v1465_v57 = vsub.f32 %v1413_v49, %v7880_v36  ;;  %v1414_v21 = vld [vmem:[#allocation3 + $0xa] sm:$0xff] }
 0x126   : > { %1615 = vmatpush.msrb.mxu2 %v7770_v59  ;;  %1662 = vmatpush.msrb.mxu3 %v7734_v43  ;;  %v7900_v29 = vsub.f32 %v1822_v42, %v7883_v3  ;;  %v1877_v49 = vsub.f32 %v7876_v44, %v11620_v34  ;;  %v1818_v42 = vld [vmem:[#allocation4 + $0x1c8] sm:$0xff]  ;;  %v7922_v34 = vand.u32 4294901760, %v1414_v21 }
 0x127   : > { %1409 = vmatmul.f32.gmra.mxu3 %v7653_v61  ;;  %1447 = vmatpush.msrb.mxu0 %v7723_v27  ;;  %v1821_v61 = vld [vmem:[#allocation4 + $0x1e0] sm:$0xff]  ;;  %v1466_v48 = vand.u32 4294901760, %v1465_v57  ;;  %v7930_v58 = vand.u32 4294901760, %v1818_v42 }
 0x128   : > { %1552 = vmatpush.msrb.mxu1 %v1551_v45  ;;  %1618 = vmatpush.msrb.mxu2 %v7779_v63  ;;  %v1569_v45 = vand.u32 4294901760, %v1568_v46  ;;  %v1819_v46 = vld [vmem:[#allocation4 + $0x1d0] sm:$0xff]  ;;  %11834 = vst [vmem:[#allocation33_spill] sm:$0xff] %v7922_v34  ;;  %v1878_v41 = vand.u32 4294901760, %v1877_v49  ;;  %v11837_v49 = vand.u32 4294901760, %v7900_v29 }
 0x129   : > { %1664 = vmatpush.msrb.mxu3 %v7750_v18  ;;  %1449 = vmatpush.msrb.mxu0 %v7734_v43  ;;  %v7913_v32 = vand.u32 4294901760, %v1819_v46 }
 0x12a   : > { %1558 = vmatpush.msrb.mxu1 %v1557_v20  ;;  %1621 = vmatpush.msrb.mxu2 %v7798_v51  ;;  %v7892_v20 = vand.u32 4294901760, %v1821_v61 }
 0x12b   : > { %1666 = vmatpush.msrb.mxu3 %v7760_v52  ;;  %1250 = vmatmul.f32.gmra.mxu0 %v7673_v22  ;;  %v11627_v22 = vand.u32 4294901760, %v7886_v53  ;;  %v7935_v14 = vsub.f32 %v1819_v46, %v7913_v32  ;;  %v1473_v46 = vsub.f32 %v1414_v21, %v7922_v34 }
 0x12c   : > { %1451 = vmatpush.msrb.mxu0 %v7750_v18  ;;  %1564 = vmatpush.msrb.mxu1 %v1563_v17  ;;  %v7902_v17 = vand.u32 4294901760, %v1820_v35 }
 0x12d   : > { %1624 = vmatpush.msrb.mxu2 %v7807_v2  ;;  %1668 = vmatpush.msrb.mxu3 %v7775_v1  ;;  %11836 = vst [vmem:[#allocation35_spill] sm:$0xff] %v7935_v14  ;;  %v1474_v26 = vand.u32 4294901760, %v1473_v46 }
 0x12e   : > { %1453 = vmatpush.msrb.mxu0 %v7760_v52  ;;  %1570 = vmatpush.msrb.mxu1 %v1569_v45  ;;  %v7911_v45 = vsub.f32 %v1821_v61, %v7892_v20  ;;  %v7926_v37 = vsub.f32 %v1820_v35, %v7902_v17  ;;  %v1816_v61 = vld [vmem:[#allocation4 + $0x1b8] sm:$0xff]  ;;  %v1467_v35 = vsub.f32 %v1465_v57, %v1466_v48 }
 0x12f   : > { %1627 = vmatpush.msrb.mxu2 %v7819_v0  ;;  %1670 = vmatpush.msrb.mxu3 %v7786_v55 }
 0x130   : > { %1455 = vmatpush.msrb.mxu0 %v7775_v1  ;;  %1576 = vmatpush.msrb.mxu1 %v1575_v23  ;;  %11833 = vst [vmem:[#allocation32_spill] sm:$0xff] %v7911_v45  ;;  %v1883_v23 = vsub.f32 %v7886_v53, %v11627_v22  ;;  %v1889_v22 = vsub.f32 %v7900_v29, %v11837_v49 }
 0x131   : > { %1630 = vmatpush.msrb.mxu2 %v7831_v8  ;;  %1672 = vmatpush.msrb.mxu3 %v7800_v6  ;;  %11835 = vst [vmem:[#allocation34_spill] sm:$0xff] %v7926_v37 }
 0x132   : > { %1578 = vmatmul.f32.vlgmr.msrb.gmra.mxu1 %v7880_v36  ;;  %1457 = vmatpush.msrb.mxu0 %v7786_v55  ;;  %v1884_v60 = vand.u32 4294901760, %v1883_v23  ;;  %v11838_v23 = vand.u32 4294901760, %v7911_v45 }
 0x133   : > { %1764 = vmatpush.msra.mxu1 %v7622_v7  ;;  %1633 = vmatpush.msrb.mxu2 %v7841_v56  ;;  %v7939_v7 = vand.u32 4294901760, %v1817_v4 }
 0x134   : > { %1674 = vmatpush.msrb.mxu3 %v7809_v11  ;;  %1636 = vmatmul.f32.vlgmr.msrb.gmra.mxu2 %v1465_v57  ;;  %v7952_v57 = vand.u32 4294901760, %v1816_v61  ;;  %v1895_v49 = vsub.f32 %v7911_v45, %v11838_v23  ;;  %v11839_v23 = vand.u32 4294901760, %v7926_v37  ;;  %v7976_v45 = vand.u32 4294901760, %v1814_v40 }
 0x135   : > { %1766 = vmatpush.msra.mxu1 %v7631_v39  ;;  %1826 = vmatpush.msra.mxu2 %v7859_v62  ;;  %v7950_v39 = vsub.f32 %v1818_v42, %v7930_v58  ;;  %v1890_v42 = vand.u32 4294901760, %v1889_v22  ;;  %v11840_v22 = vand.u32 4294901760, %v7935_v14 }
 0x136   : > { %1459 = vmatpush.msrb.mxu0 %v7800_v6  ;;  %1676 = vmatpush.msrb.mxu3 %v7821_v50  ;;  %v1901_v21 = vsub.f32 %v7926_v37, %v11839_v23  ;;  %v1812_v23 = vld [vmem:[#allocation4 + $0x198] sm:$0xff]  ;;  %v11841_v37 = vand.u32 4294901760, %v7636_v24 }
 0x137   : > { %1680 = vmatmul.f32.vlgmr.msrb.gmra.mxu3 %v1466_v48  ;;  %1768 = vmatpush.msra.mxu1 %v7642_v25  ;;  %v7962_v25 = vsub.f32 %v1817_v4, %v7939_v7  ;;  %v7964_v48 = vand.u32 4294901760, %v1815_v5  ;;  %v11843_v24 = vand.u32 4294901760, %v7950_v39 }
 0x138   : > { %1828 = vmatpush.msra.mxu2 %v7867_v19  ;;  %1879 = vmatpush.msra.mxu3 %v1878_v41  ;;  %v1468_v41 = vand.u32 4294901760, %v1467_v35  ;;  %v1907_v35 = vsub.f32 %v7935_v14, %v11840_v22  ;;  %v11842_v22 = vand.u32 4294901760, %v7651_v30  ;;  %v8001_v14 = vand.u32 4294901760, %v1812_v23 }
 0x139   : > { %1461 = vmatpush.msrb.mxu0 %v7809_v11  ;;  %1770 = vmatpush.msra.mxu1 %v7658_v10  ;;  %v7974_v10 = vsub.f32 %v1816_v61, %v7952_v57  ;;  %v7987_v61 = vsub.f32 %v1815_v5, %v7964_v48  ;;  %v7999_v5 = vsub.f32 %v1814_v40, %v7976_v45  ;;  %v11844_v30 = vand.u32 4294901760, %v7665_v54 }
 0x13a   : > { %1830 = vmatpush.msra.mxu2 %v7883_v3  ;;  %1885 = vmatpush.msra.mxu3 %v1884_v60  ;;  %v1896_v60 = vand.u32 4294901760, %v1895_v49  ;;  %v1475_v49 = vsub.f32 %v1473_v46, %v1474_v26  ;;  %v11846_v54 = vand.u32 4294901760, %v7682_v13 }
 0x13b   : > { %1463 = vmatpush.msrb.mxu0 %v7821_v50  ;;  %1582 = vmatmul.f32.gmra.mxu1 %v7922_v34  ;;  %v7989_v34 = vand.u32 4294901760, %v1813_v47  ;;  %v11648_v4 = vand.u32 4294901760, %v7974_v10 }
 0x13c   : > { %1469 = vmatmul.f32.vlgmr.msrb.gmra.mxu0 %v1468_v41  ;;  %1772 = vmatpush.msra.mxu1 %v7667_v38  ;;  %v1902_v38 = vand.u32 4294901760, %v1901_v21  ;;  %v1811_v41 = vld [vmem:[#allocation4 + $0x190] sm:$0xff] }
 0x13d   : > { %1693 = vmatpush.msra.mxu0 %v11841_v37  ;;  %1832 = vmatpush.msra.mxu2 %v7892_v20  ;;  %v1913_v37 = vsub.f32 %v7950_v39, %v11843_v24  ;;  %v8013_v40 = vand.u32 4294901760, %v1811_v41  ;;  %v1810_v24 = vld [vmem:[#allocation4 + $0x188] sm:$0xff] }
 0x13e   : > { %1891 = vmatpush.msra.mxu3 %v1890_v42  ;;  %1641 = vmatmul.f32.gmra.mxu2 %v1473_v46  ;;  %v1908_v46 = vand.u32 4294901760, %v1907_v35  ;;  %v1925_v35 = vsub.f32 %v7974_v10, %v11648_v4  ;;  %v1806_v42 = vld [vmem:[#allocation3 + $0x3] sm:$0xff] }
 0x13f   : > { %1697 = vmatpush.msra.mxu0 %v11842_v22  ;;  %1774 = vmatpush.msra.mxu1 %v7691_v15  ;;  %v11845_v15 = vand.u32 4294901760, %v7962_v25  ;;  %v8011_v22 = vsub.f32 %v1813_v47, %v7989_v34  ;;  %v1936_v47 = vand.u32 4294901760, %v7999_v5  ;;  %v8042_v4 = vand.u32 4294901760, %v1806_v42 }
 0x140   : > { %1834 = vmatpush.msra.mxu2 %v7902_v17  ;;  %1897 = vmatpush.msra.mxu3 %v1896_v60  ;;  %v1914_v60 = vand.u32 4294901760, %v1913_v37 }
 0x141   : > { %1686 = vmatmul.f32.gmra.mxu3 %v1474_v26  ;;  %1701 = vmatpush.msra.mxu0 %v11844_v30  ;;  %v1919_v21 = vsub.f32 %v7962_v25, %v11845_v15  ;;  %v1476_v26 = vand.u32 4294901760, %v1475_v49  ;;  %v8024_v30 = vsub.f32 %v1812_v23, %v8001_v14  ;;  %v1809_v15 = vld [vmem:[#allocation4 + $0x180] sm:$0xff]  ;;  %v1942_v37 = vand.u32 4294901760, %v8011_v22 }
 0x142   : > { %1776 = vmatpush.msra.mxu1 %v7703_v33  ;;  %1836 = vmatpush.msra.mxu2 %v7913_v32  ;;  %v8028_v33 = vand.u32 4294901760, %v1810_v24  ;;  %v8035_v23 = vsub.f32 %v1811_v41, %v8013_v40 }
 0x143   : > { %1903 = vmatpush.msra.mxu3 %v1902_v38  ;;  %1705 = vmatpush.msra.mxu0 %v11846_v54  ;;  %v1920_v13 = vand.u32 4294901760, %v1919_v21  ;;  %v11847_v38 = vand.u32 4294901760, %v7987_v61  ;;  %v11848_v54 = vand.u32 4294901760, %v7689_v31  ;;  %v1937_v21 = vsub.f32 %v7999_v5, %v1936_v47 }
 0x144   : > { %1778 = vmatpush.msra.mxu1 %v7723_v27  ;;  %1838 = vmatpush.msra.mxu2 %v7930_v58  ;;  %v8040_v27 = vand.u32 4294901760, %v1809_v15  ;;  %v1948_v41 = vand.u32 4294901760, %v8024_v30  ;;  %v8053_v31 = vsub.f32 %v1810_v24, %v8028_v33 }
 0x145   : > { %1909 = vmatpush.msra.mxu3 %v1908_v46  ;;  %1477 = vmatmul.f32.gmra.mxu0 %v1476_v26  ;;  %v1931_v49 = vsub.f32 %v7987_v61, %v11847_v38  ;;  %v1926_v46 = vand.u32 4294901760, %v1925_v35  ;;  %v11849_v26 = vand.u32 4294901760, %v7715_v9  ;;  %v1954_v35 = vand.u32 4294901760, %v8035_v23 }
 0x146   : > { %1709 = vmatpush.msra.mxu0 %v11848_v54  ;;  %1780 = vmatpush.msra.mxu1 %v7734_v43  ;;  %v11850_v38 = vand.u32 4294901760, %v7730_v16  ;;  %v8064_v9 = vsub.f32 %v1806_v42, %v8042_v4  ;;  %v1938_v24 = vand.u32 4294901760, %v1937_v21  ;;  %v1960_v16 = vand.u32 4294901760, %v8053_v31 }
 0x147   : > { %1840 = vmatpush.msra.mxu2 %v7939_v7  ;;  %1915 = vmatpush.msra.mxu3 %v1914_v60  ;;  %v1932_v43 = vand.u32 4294901760, %v1931_v49  ;;  %v1943_v60 = vsub.f32 %v8011_v22, %v1942_v37  ;;  %v11851_v49 = vand.u32 4294901760, %v7745_v28  ;;  %v1955_v42 = vsub.f32 %v8035_v23, %v1954_v35 }
 0x148   : > { %1713 = vmatpush.msra.mxu0 %v11849_v26  ;;  %1782 = vmatpush.msra.mxu1 %v7750_v18  ;;  %v8067_v18 = vsub.f32 %v1809_v15, %v8040_v27  ;;  %v1807_v15 = vld [vmem:[#allocation3 + $0xb] sm:$0xff]  ;;  %v11852_v54 = vand.u32 4294901760, %v7754_v12  ;;  %v1859_v28 = vand.u32 4294901760, %v8064_v9  ;;  %v11853_v21 = vand.u32 4294901760, %v7770_v59 }
 0x149   : > { %1842 = vmatpush.msra.mxu2 %v7952_v57  ;;  %1921 = vmatpush.msra.mxu3 %v1920_v13  ;;  %v1949_v13 = vsub.f32 %v8024_v30, %v1948_v41  ;;  %v1961_v12 = vsub.f32 %v8053_v31, %v1960_v16  ;;  %v8093_v26 = vand.u32 4294901760, %v1807_v15 }
 0x14a   : > { %1717 = vmatpush.msra.mxu0 %v11850_v38  ;;  %1784 = vmatpush.msra.mxu1 %v7760_v52  ;;  %v1944_v52 = vand.u32 4294901760, %v1943_v60  ;;  %v1860_v59 = vsub.f32 %v8064_v9, %v1859_v28  ;;  %v11855_v60 = vand.u32 4294901760, %v7798_v51 }
 0x14b   : > { %1844 = vmatpush.msra.mxu2 %v7964_v48  ;;  %1927 = vmatpush.msra.mxu3 %v1926_v46  ;;  %v1950_v46 = vand.u32 4294901760, %v1949_v13  ;;  %v8110_v38 = vsub.f32 %v1807_v15, %v8093_v26  ;;  %v11862_v15 = vand.u32 4294901760, %v7841_v56 }
 0x14c   : > { %1721 = vmatpush.msra.mxu0 %v11851_v49  ;;  %1786 = vmatpush.msra.mxu1 %v7775_v1  ;;  %v1966_v1 = vand.u32 4294901760, %v8067_v18  ;;  %v11858_v49 = vand.u32 4294901760, %v7819_v0  ;;  %v11861_v0 = vand.u32 4294901760, %v7900_v29 }
 0x14d   : > { %1846 = vmatpush.msra.mxu2 %v7976_v45  ;;  %1933 = vmatpush.msra.mxu3 %v1932_v43  ;;  %v11854_v43 = vand.u32 4294901760, %v7779_v63  ;;  %v1962_v63 = vand.u32 4294901760, %v1961_v12  ;;  %v1867_v51 = vand.u32 4294901760, %v8110_v38  ;;  %v2215_v12 = vld [vmem:[#allocation4 + $0x268] sm:$0xff] }
 0x14e   : > { %1725 = vmatpush.msra.mxu0 %v11852_v54  ;;  %1788 = vmatpush.msra.mxu1 %v7786_v55  ;;  %v1956_v55 = vand.u32 4294901760, %v1955_v42  ;;  %v11860_v42 = vand.u32 4294901760, %v7831_v8  ;;  %v11863_v54 = vld [vmem:[#allocation33_spill] sm:$0xff]  ;;  %v11864_v8 = vld [vmem:[#allocation32_spill] sm:$0xff] }
 0x14f   : > { %1848 = vmatpush.msra.mxu2 %v7989_v34  ;;  %1939 = vmatpush.msra.mxu3 %v1938_v24  ;;  %v1861_v24 = vand.u32 4294901760, %v1860_v59  ;;  %v8176_v59 = vand.u32 4294901760, %v2215_v12 }
 0x150   : > { %1729 = vmatpush.msra.mxu0 %v11853_v21  ;;  %1790 = vmatpush.msra.mxu1 %v7800_v6  ;;  %v1967_v6 = vsub.f32 %v8067_v18, %v1966_v1 }
 0x151   : > { %1850 = vmatpush.msra.mxu2 %v8001_v14  ;;  %1945 = vmatpush.msra.mxu3 %v1944_v52  ;;  %v1868_v52 = vsub.f32 %v8110_v38, %v1867_v51 }
 0x152   : > { %1733 = vmatpush.msra.mxu0 %v11854_v43  ;;  %1792 = vmatpush.msra.mxu1 %v7809_v11  ;;  %v11856_v11 = vand.u32 4294901760, %v7807_v2  ;;  %v1968_v13 = vand.u32 4294901760, %v1967_v6  ;;  %v11859_v2 = vand.u32 4294901760, %v7886_v53 }
 0x153   : > { %1852 = vmatpush.msra.mxu2 %v8013_v40  ;;  %1951 = vmatpush.msra.mxu3 %v1950_v46  ;;  %v11865_v46 = vand.u32 4294901760, %v11864_v8 }
 0x154   : > { %1737 = vmatpush.msra.mxu0 %v11855_v60  ;;  %1794 = vmatpush.msra.mxu1 %v7821_v50  ;;  %v11857_v50 = vand.u32 4294901760, %v7876_v44 }
 0x155   : > { %1854 = vmatpush.msra.mxu2 %v8028_v33  ;;  %1957 = vmatpush.msra.mxu3 %v1956_v55  ;;  %v11871_v55 = vand.u32 4294901760, %v7962_v25 }
 0x156   : > { %1796 = vmatmul.f32.vlgmr.msra.gmra.mxu1 %v7880_v36  ;;  %1741 = vmatpush.msra.mxu0 %v11856_v11 }
 0x157   : > { %2039 = vmatpush.msrb.mxu1 %v7859_v62  ;;  %1856 = vmatpush.msra.mxu2 %v8040_v27 }
 0x158   : > { %1963 = vmatpush.msra.mxu3 %v1962_v63  ;;  %1862 = vmatmul.f32.vlgmr.msra.gmra.mxu2 %v1861_v24  ;;  %v11873_v63 = vand.u32 4294901760, %v7987_v61  ;;  %v8195_v24 = vsub.f32 %v2215_v12, %v8176_v59  ;;  %v2204_v12 = vld [vmem:[#allocation4 + $0x210] sm:$0xff] }
 0x159   : > { %2041 = vmatpush.msrb.mxu1 %v7867_v19  ;;  %2086 = vmatpush.msrb.mxu2 %v11857_v50  ;;  %v2211_v50 = vld [vmem:[#allocation4 + $0x248] sm:$0xff] }
 0x15a   : > { %1745 = vmatpush.msra.mxu0 %v11858_v49  ;;  %1969 = vmatpush.msra.mxu3 %v1968_v13  ;;  %v2212_v13 = vld [vmem:[#allocation4 + $0x250] sm:$0xff]  ;;  %v2210_v49 = vld [vmem:[#allocation4 + $0x240] sm:$0xff] }
 0x15b   : > { %1971 = vmatmul.f32.vlgmr.msra.gmra.mxu3 %v8042_v4  ;;  %2043 = vmatpush.msrb.mxu1 %v7883_v3 }
 0x15c   : > { %2090 = vmatpush.msrb.mxu2 %v11859_v2  ;;  %2157 = vmatpush.msrb.mxu3 %v7859_v62  ;;  %v1869_v62 = vand.u32 4294901760, %v1868_v52  ;;  %v8244_v52 = vand.u32 4294901760, %v2210_v49 }
 0x15d   : > { %1749 = vmatpush.msra.mxu0 %v11860_v42  ;;  %2045 = vmatpush.msrb.mxu1 %v7892_v20 }
 0x15e   : > { %2094 = vmatpush.msrb.mxu2 %v11861_v0  ;;  %2159 = vmatpush.msrb.mxu3 %v7867_v19  ;;  %v11866_v19 = vld [vmem:[#allocation34_spill] sm:$0xff] }
 0x15f   : > { %1753 = vmatpush.msra.mxu0 %v11862_v15  ;;  %1800 = vmatmul.f32.gmra.mxu1 %v11863_v54  ;;  %v11867_v56 = vand.u32 4294901760, %v11866_v19 }
 0x160   : > { %1755 = vmatmul.f32.vlgmr.msra.gmra.mxu0 %v7880_v36  ;;  %2047 = vmatpush.msrb.mxu1 %v7902_v17  ;;  %v2217_v36 = vld [vmem:[#allocation4 + $0x278] sm:$0xff] }
 0x161   : > { %1981 = vmatpush.msrb.mxu0 %v7876_v44  ;;  %2098 = vmatpush.msrb.mxu2 %v11865_v46  ;;  %v11868_v44 = vld [vmem:[#allocation35_spill] sm:$0xff] }
 0x162   : > { %2161 = vmatpush.msrb.mxu3 %v7883_v3  ;;  %1870 = vmatmul.f32.gmra.mxu2 %v1869_v62  ;;  %v11869_v21 = vand.u32 4294901760, %v11868_v44  ;;  %v2216_v3 = vld [vmem:[#allocation4 + $0x270] sm:$0xff] }
 0x163   : > { %1984 = vmatpush.msrb.mxu0 %v7886_v53  ;;  %2049 = vmatpush.msrb.mxu1 %v7913_v32  ;;  %v8159_v53 = vand.u32 4294901760, %v2217_v36 }
 0x164   : > { %2102 = vmatpush.msrb.mxu2 %v11867_v56  ;;  %2163 = vmatpush.msrb.mxu3 %v7892_v20  ;;  %v11870_v20 = vand.u32 4294901760, %v7950_v39 }
 0x165   : > { %1975 = vmatmul.f32.gmra.mxu3 %v8093_v26  ;;  %1987 = vmatpush.msrb.mxu0 %v7900_v29  ;;  %v8166_v29 = vand.u32 4294901760, %v2216_v3  ;;  %v8174_v43 = vsub.f32 %v2217_v36, %v8159_v53 }
 0x166   : > { %2051 = vmatpush.msrb.mxu1 %v7930_v58  ;;  %2106 = vmatpush.msrb.mxu2 %v11869_v21  ;;  %v2205_v21 = vld [vmem:[#allocation4 + $0x218] sm:$0xff] }
 0x167   : > { %2165 = vmatpush.msrb.mxu3 %v7902_v17  ;;  %1990 = vmatpush.msrb.mxu0 %v11864_v8  ;;  %v2214_v17 = vld [vmem:[#allocation4 + $0x260] sm:$0xff]  ;;  %v8184_v6 = vsub.f32 %v2216_v3, %v8166_v29  ;;  %v11666_v11 = vand.u32 4294901760, %v8174_v43 }
 0x168   : > { %2053 = vmatpush.msrb.mxu1 %v7939_v7  ;;  %2110 = vmatpush.msrb.mxu2 %v11870_v20  ;;  %v8186_v60 = vand.u32 4294901760, %v2214_v17  ;;  %v2206_v8 = vld [vmem:[#allocation4 + $0x220] sm:$0xff] }
 0x169   : > { %2167 = vmatpush.msrb.mxu3 %v7913_v32  ;;  %1759 = vmatmul.f32.gmra.mxu0 %v11863_v54  ;;  %v11872_v32 = vand.u32 4294901760, %v7974_v10  ;;  %v8267_v54 = vsub.f32 %v2210_v49, %v8244_v52 }
 0x16a   : > { %1993 = vmatpush.msrb.mxu0 %v11866_v19  ;;  %2055 = vmatpush.msrb.mxu1 %v7952_v57 }
 0x16b   : > { %2114 = vmatpush.msrb.mxu2 %v11871_v55  ;;  %2169 = vmatpush.msrb.mxu3 %v7930_v58  ;;  %v2213_v58 = vld [vmem:[#allocation4 + $0x258] sm:$0xff]  ;;  %v11657_v36 = vand.u32 4294901760, %v8267_v54 }
 0x16c   : > { %1996 = vmatpush.msrb.mxu0 %v11868_v44  ;;  %2057 = vmatpush.msrb.mxu1 %v7964_v48  ;;  %v8295_v44 = vand.u32 4294901760, %v2206_v8 }
 0x16d   : > { %2118 = vmatpush.msrb.mxu2 %v11872_v32  ;;  %2171 = vmatpush.msrb.mxu3 %v7939_v7  ;;  %v8199_v7 = vand.u32 4294901760, %v2213_v58  ;;  %v8314_v32 = vand.u32 4294901760, %v2205_v21 }
 0x16e   : > { %1999 = vmatpush.msrb.mxu0 %v7950_v39  ;;  %2059 = vmatpush.msrb.mxu1 %v7976_v45  ;;  %v11665_v39 = vand.u32 4294901760, %v8184_v6 }
 0x16f   : > { %2122 = vmatpush.msrb.mxu2 %v11873_v63  ;;  %2173 = vmatpush.msrb.mxu3 %v7952_v57  ;;  %v8206_v57 = vsub.f32 %v2214_v17, %v8186_v60  ;;  %v2312_v17 = vsub.f32 %v8267_v54, %v11657_v36  ;;  %v2203_v63 = vld [vmem:[#allocation4 + $0x208] sm:$0xff] }
 0x170   : > { %2002 = vmatpush.msrb.mxu0 %v7962_v25  ;;  %2061 = vmatpush.msrb.mxu1 %v7989_v34  ;;  %v2270_v25 = vsub.f32 %v8174_v43, %v11666_v11  ;;  %v11901_v11 = vld [vmem:[#allocation28_spill] sm:$0xff] }
 0x171   : > { %2126 = vmatpush.msrb.mxu2 %v1936_v47  ;;  %2175 = vmatpush.msrb.mxu3 %v7964_v48  ;;  %v11664_v48 = vand.u32 4294901760, %v8195_v24  ;;  %v8217_v47 = vand.u32 4294901760, %v2212_v13 }
 0x172   : > { %2005 = vmatpush.msrb.mxu0 %v7974_v10  ;;  %2063 = vmatpush.msrb.mxu1 %v8001_v14  ;;  %v8222_v10 = vsub.f32 %v2213_v58, %v8199_v7  ;;  %v8318_v58 = vsub.f32 %v2206_v8, %v8295_v44 }
 0x173   : > { %2130 = vmatpush.msrb.mxu2 %v1942_v37  ;;  %2177 = vmatpush.msrb.mxu3 %v7976_v45  ;;  %v2276_v45 = vsub.f32 %v8184_v6, %v11665_v39  ;;  %v11661_v37 = vand.u32 4294901760, %v8206_v57  ;;  %v8242_v2 = vsub.f32 %v2212_v13, %v8217_v47  ;;  %v6573_v39 = vld [vmem:[#allocation2 + $0x2] sm:$0x3] }
 0x174   : > { %2008 = vmatpush.msrb.mxu0 %v7987_v61  ;;  %2065 = vmatpush.msrb.mxu1 %v8013_v40  ;;  %v8233_v61 = vand.u32 4294901760, %v2211_v50  ;;  %v11660_v42 = vand.u32 4294901760, %v8222_v10 }
 0x175   : > { %2134 = vmatpush.msrb.mxu2 %v1948_v41  ;;  %2179 = vmatpush.msrb.mxu3 %v7989_v34  ;;  %v2271_v41 = vand.u32 4294901760, %v2270_v25  ;;  %v2282_v34 = vsub.f32 %v8195_v24, %v11664_v48  ;;  %v2288_v0 = vsub.f32 %v8206_v57, %v11661_v37  ;;  %v2202_v25 = vld [vmem:[#allocation4 + $0x200] sm:$0xff]  ;;  %v2605_v37 = vld [vmem:[#allocation4 + $0x2d0] sm:$0xff] }
 0x176   : > { %2011 = vmatpush.msrb.mxu0 %v7999_v5  ;;  %2067 = vmatpush.msrb.mxu1 %v8028_v33  ;;  %v2209_v5 = vld [vmem:[#allocation4 + $0x238] sm:$0xff]  ;;  %v8355_v8 = vand.u32 4294901760, %v2202_v25 }
 0x177   : > { %2138 = vmatpush.msrb.mxu2 %v1954_v35  ;;  %2181 = vmatpush.msrb.mxu3 %v8001_v14  ;;  %v2208_v35 = vld [vmem:[#allocation4 + $0x230] sm:$0xff]  ;;  %v2277_v14 = vand.u32 4294901760, %v2276_v45  ;;  %v8261_v15 = vand.u32 4294901760, %v2209_v5  ;;  %v8335_v45 = vsub.f32 %v2205_v21, %v8314_v32 }
 0x178   : > { %2014 = vmatpush.msrb.mxu0 %v8011_v22  ;;  %2069 = vmatpush.msrb.mxu1 %v8040_v27  ;;  %v8259_v22 = vsub.f32 %v2211_v50, %v8233_v61  ;;  %v8269_v62 = vand.u32 4294901760, %v2208_v35  ;;  %v2313_v50 = vand.u32 4294901760, %v2312_v17 }
 0x179   : > { %2142 = vmatpush.msrb.mxu2 %v1960_v16  ;;  %2183 = vmatpush.msrb.mxu3 %v8013_v40  ;;  %v2283_v40 = vand.u32 4294901760, %v2282_v34  ;;  %v11659_v16 = vand.u32 4294901760, %v8242_v2  ;;  %v8281_v19 = vsub.f32 %v2209_v5, %v8261_v15  ;;  %v11650_v34 = vand.u32 4294901760, %v8318_v58  ;;  %v6568_v5 = vld [vmem:[#allocation2] sm:$0x3] }
 0x17a   : > { %2073 = vmatmul.f32.vlgmr.msrb.gmra.mxu1 %v1859_v28  ;;  %2017 = vmatpush.msrb.mxu0 %v8024_v30  ;;  %v2207_v28 = vld [vmem:[#allocation4 + $0x228] sm:$0xff]  ;;  %v2294_v30 = vsub.f32 %v8222_v10, %v11660_v42  ;;  %v11658_v46 = vand.u32 4294901760, %v8259_v22  ;;  %v11649_v21 = vand.u32 4294901760, %v8335_v45 }
 0x17b   : > { %2272 = vmatpush.msra.mxu1 %v2271_v41  ;;  %2146 = vmatpush.msrb.mxu2 %v1966_v1  ;;  %v2289_v1 = vand.u32 4294901760, %v2288_v0  ;;  %v2300_v56 = vsub.f32 %v8242_v2, %v11659_v16  ;;  %v11656_v3 = vand.u32 4294901760, %v8281_v19  ;;  %v8337_v41 = vand.u32 4294901760, %v2203_v63 }
 0x17c   : > { %2185 = vmatpush.msrb.mxu3 %v8028_v33  ;;  %2148 = vmatmul.f32.vlgmr.msrb.gmra.mxu2 %v8042_v4  ;;  %v8283_v33 = vand.u32 4294901760, %v2207_v28 }
 0x17d   : > { %2278 = vmatpush.msra.mxu1 %v2277_v14  ;;  %2374 = vmatpush.msra.mxu2 %v8174_v43 }
 0x17e   : > { %2020 = vmatpush.msrb.mxu0 %v8035_v23  ;;  %2187 = vmatpush.msrb.mxu3 %v8040_v27  ;;  %v8291_v23 = vsub.f32 %v2208_v35, %v8269_v62  ;;  %v2295_v27 = vand.u32 4294901760, %v2294_v30  ;;  %v8305_v20 = vsub.f32 %v2207_v28, %v8283_v33  ;;  %v11874_v35 = vld [vmem:[#allocation19_spill] sm:$0xff] }
 0x17f   : > { %2189 = vmatmul.f32.vlgmr.msrb.gmra.mxu3 %v8042_v4  ;;  %2284 = vmatpush.msra.mxu1 %v2283_v40  ;;  %v2306_v4 = vsub.f32 %v8259_v22, %v11658_v46  ;;  %v11875_v14 = vrot.slane %v11874_v35, 1  ;;  %v11876_v40 = vrot.slane %v11874_v35, 3  ;;  %v11877_v28 = vrot.slane %v11874_v35, 2 }
 0x180   : > { %2377 = vmatpush.msra.mxu2 %v8184_v6  ;;  %2432 = vmatpush.msra.mxu3 %v8159_v53  ;;  %v11655_v55 = vand.u32 4294901760, %v8291_v23  ;;  %v11652_v13 = vand.u32 4294901760, %v8305_v20 }
 0x181   : > { %2023 = vmatpush.msrb.mxu0 %v8053_v31  ;;  %2290 = vmatpush.msra.mxu1 %v2289_v1  ;;  %v2301_v31 = vand.u32 4294901760, %v2300_v56  ;;  %v338_v0 = vsel %vm296_vm6, %v6568_v5, %v11875_v14  ;;  %v339_v30 = vsel %vm298_vm7, %v11877_v28, %v11876_v40  ;;  %v11881_v5 = vld [vmem:[#allocation16_spill] sm:$0xff]  ;;  %v2610_v28 = vld [vmem:[#allocation4 + $0x2f8] sm:$0xff] }
 0x182   : > { %2380 = vmatpush.msra.mxu2 %v8195_v24  ;;  %2434 = vmatpush.msra.mxu3 %v8166_v29  ;;  %v2324_v49 = vsub.f32 %v8291_v23, %v11655_v55  ;;  %v11882_v35 = vrot.slane %v11881_v5, 1  ;;  %v11883_v14 = vrot.slane %v11881_v5, 3 }
 0x183   : > { %2026 = vmatpush.msrb.mxu0 %v8067_v18  ;;  %2079 = vmatmul.f32.gmra.mxu1 %v1867_v51  ;;  %v8322_v18 = vand.u32 4294901760, %v2204_v12  ;;  %v2307_v51 = vand.u32 4294901760, %v2306_v4  ;;  %v8366_v4 = vsub.f32 %v2203_v63, %v8337_v41 }
 0x184   : > { %2029 = vmatmul.f32.vlgmr.msrb.gmra.mxu0 %v8064_v9  ;;  %2296 = vmatpush.msra.mxu1 %v2295_v27  ;;  %v2318_v9 = vsub.f32 %v8281_v19, %v11656_v3  ;;  %v2330_v27 = vsub.f32 %v8305_v20, %v11652_v13  ;;  %v2606_v3 = vld [vmem:[#allocation4 + $0x2d8] sm:$0xff] }
 0x185   : > { %2219 = vmatpush.msra.mxu0 %v8159_v53  ;;  %2383 = vmatpush.msra.mxu2 %v8206_v57  ;;  %v8353_v1 = vsub.f32 %v2204_v12, %v8322_v18  ;;  %11879 = vst [vmem:[#allocation32_spill] sm:$0xff] %v8366_v4  ;;  %v2325_v12 = vand.u32 4294901760, %v2324_v49  ;;  %v6569_v49 = vld [vmem:[#allocation2] sm:$0x3] }
 0x186   : > { %2436 = vmatpush.msra.mxu3 %v8176_v59  ;;  %2152 = vmatmul.f32.gmra.mxu2 %v8093_v26  ;;  %v2319_v56 = vand.u32 4294901760, %v2318_v9  ;;  %v2331_v63 = vand.u32 4294901760, %v2330_v27 }
 0x187   : > { %2221 = vmatpush.msra.mxu0 %v8166_v29  ;;  %2302 = vmatpush.msra.mxu1 %v2301_v31  ;;  %11878 = vst [vmem:[#allocation33_spill] sm:$0xff] %v8353_v1  ;;  %v2336_v31 = vsub.f32 %v8318_v58, %v11650_v34  ;;  %v11651_v17 = vand.u32 4294901760, %v8353_v1 }
 0x188   : > { %2386 = vmatpush.msra.mxu2 %v8222_v10  ;;  %2438 = vmatpush.msra.mxu3 %v8186_v60 }
 0x189   : > { %2193 = vmatmul.f32.gmra.mxu3 %v8093_v26  ;;  %2223 = vmatpush.msra.mxu0 %v8176_v59  ;;  %v340_v26 = vsel %vm300_vm8, %v338_v0, %v339_v30  ;;  %v11884_v0 = vrot.slane %v11881_v5, 2  ;;  %v2337_v30 = vand.u32 4294901760, %v2336_v31  ;;  %v2348_v27 = vsub.f32 %v8353_v1, %v11651_v17  ;;  %v11885_v5 = vld [vmem:[#allocation22_spill] sm:$0xff] }
 0x18a   : > { %2308 = vmatpush.msra.mxu1 %v2307_v51  ;;  %2389 = vmatpush.msra.mxu2 %v8242_v2  ;;  %v8376_v51 = vsub.f32 %v2202_v25, %v8355_v8  ;;  %v341_v9 = vrot.slane %v340_v26, 1  ;;  %v360_v25 = vsel %vm296_vm6, %v6569_v49, %v11882_v35  ;;  %v6570_v49 = vld [vmem:[#allocation2] sm:$0x3]  ;;  %v11886_v35 = vrot.slane %v11885_v5, 1 }
 0x18b   : > { %2440 = vmatpush.msra.mxu3 %v8199_v7  ;;  %2225 = vmatpush.msra.mxu0 %v8186_v60  ;;  %v361_v40 = vsel %vm298_vm7, %v11884_v0, %v11883_v14  ;;  %v11887_v0 = vrot.slane %v11885_v5, 3  ;;  %v8410_v17 = vand.u32 4294901760, %v2610_v28 }
 0x18c   : > { %2314 = vmatpush.msra.mxu1 %v2313_v50  ;;  %2392 = vmatpush.msra.mxu2 %v8259_v22  ;;  %11880 = vst [vmem:[#allocation34_spill] sm:$0xff] %v8376_v51  ;;  %v2342_v50 = vsub.f32 %v8335_v45, %v11649_v21  ;;  %v11653_v26 = vand.u32 4294901760, %v8376_v51  ;;  %v404_v14 = vsel %vm296_vm6, %v6570_v49, %v11886_v35  ;;  %v343_v21 = vperm.slane %v341_v9, 0  ;;  %v2199_v9 = vld [vmem:[#allocation3 + $0x4] sm:$0xff]  ;;  %v2608_v35 = vld [vmem:[#allocation4 + $0x2e8] sm:$0xff] }
 0x18d   : > { %2442 = vmatpush.msra.mxu3 %v8217_v47  ;;  %2034 = vmatmul.f32.gmra.mxu0 %v8110_v38  ;;  %v11654_v38 = vand.u32 4294901760, %v8366_v4  ;;  %v362_v34 = vsel %vm300_vm8, %v360_v25, %v361_v40  ;;  %v2349_v25 = vand.u32 4294901760, %v2348_v27 }
 0x18e   : > { %2227 = vmatpush.msra.mxu0 %v8199_v7  ;;  %2320 = vmatpush.msra.mxu1 %v2319_v56  ;;  %v2609_v56 = vld [vmem:[#allocation4 + $0x2f0] sm:$0xff]  ;;  %v2343_v13 = vand.u32 4294901760, %v2342_v50  ;;  %v2360_v50 = vsub.f32 %v8376_v51, %v11653_v26  ;;  %v363_v40 = vrot.slane %v362_v34, 1  ;;  %v8439_v34 = vand.u32 4294901760, %v2608_v35 }
 0x18f   : > { %2395 = vmatpush.msra.mxu2 %v8267_v54  ;;  %2444 = vmatpush.msra.mxu3 %v8233_v61  ;;  %v2354_v49 = vsub.f32 %v8366_v4, %v11654_v38 }
 0x190   : > { %2229 = vmatpush.msra.mxu0 %v8217_v47  ;;  %2326 = vmatpush.msra.mxu1 %v2325_v12  ;;  %v11888_v12 = vrot.slane %v11885_v5, 2  ;;  %v8417_v5 = vand.u32 4294901760, %v2609_v56  ;;  %11890 = vst [vmem:[#allocation19_spill] sm:$0xff] %v8439_v34 }
 0x191   : > { %2398 = vmatpush.msra.mxu2 %v8281_v19  ;;  %2446 = vmatpush.msra.mxu3 %v8244_v52 }
 0x192   : > { %v405_v31 = vsel %vm298_vm7, %v11888_v12, %v11887_v0  ;;  %2231 = vmatpush.msra.mxu0 %v8233_v61  ;;  %2332 = vmatpush.msra.mxu1 %v2331_v63  ;;  %v8432_v12 = vand.u32 4294901760, %v2199_v9  ;;  %v8435_v27 = vsub.f32 %v2609_v56, %v8417_v5 }
 0x193   : > { %2401 = vmatpush.msra.mxu2 %v8291_v23  ;;  %2448 = vmatpush.msra.mxu3 %v8261_v15  ;;  %v406_v63 = vsel %vm300_vm8, %v404_v14, %v405_v31  ;;  %v2355_v14 = vand.u32 4294901760, %v2354_v49  ;;  %v2607_v31 = vld [vmem:[#allocation4 + $0x2e0] sm:$0xff]  ;;  %v11891_v49 = vld [vmem:[#allocation25_spill] sm:$0xff] }
 0x194   : > { %2233 = vmatpush.msra.mxu0 %v8244_v52  ;;  %2338 = vmatpush.msra.mxu1 %v2337_v30  ;;  %v8429_v30 = vsub.f32 %v2610_v28, %v8410_v17  ;;  %v407_v0 = vrot.slane %v406_v63, 1  ;;  %11889 = vst [vmem:[#allocation35_spill] sm:$0xff] %v8435_v27  ;;  %v6571_v28 = vld [vmem:[#allocation2] sm:$0x3]  ;;  %v11892_v63 = vrot.slane %v11891_v49, 1  ;;  %v11893_v56 = vrot.slane %v11891_v49, 3 }
 0x195   : > { %2404 = vmatpush.msra.mxu2 %v8305_v20  ;;  %2450 = vmatpush.msra.mxu3 %v8269_v62  ;;  %v11894_v38 = vrot.slane %v11891_v49, 2  ;;  %v8461_v16 = vand.u32 4294901760, %v2607_v31  ;;  %v11662_v42 = vand.u32 4294901760, %v8435_v27 }
 0x196   : > { %346 = vrot.lane.b32.xlu0 %v343_v21, %s6754_s17  ;;  %2235 = vmatpush.msra.mxu0 %v8261_v15  ;;  %v365_v21 = vperm.slane %v363_v40, 0  ;;  %v426_v26 = vsel %vm296_vm6, %v6571_v28, %v11892_v63  ;;  %v11895_v40 = vld [vmem:[#allocation20_spill] sm:$0xff] }
 0x197   : > { %2344 = vmatpush.msra.mxu1 %v2343_v13  ;;  %2407 = vmatpush.msra.mxu2 %v8318_v58  ;;  %v2361_v13 = vand.u32 4294901760, %v2360_v50  ;;  %v427_v55 = vsel %vm298_vm7, %v11894_v38, %v11893_v56  ;;  %v6572_v50 = vld [vmem:[#allocation2 + $0x2] sm:$0x3]  ;;  %v11896_v36 = vrot.slane %v11895_v40, 1  ;;  %v11897_v28 = vrot.slane %v11895_v40, 3 }
 0x198   : > { %2452 = vmatpush.msra.mxu3 %v8283_v33  ;;  %2237 = vmatpush.msra.mxu0 %v8269_v62  ;;  %v11898_v63 = vrot.slane %v11895_v40, 2  ;;  %v409_v38 = vperm.slane %v407_v0, 0  ;;  %v2251_v56 = vsub.f32 %v2199_v9, %v8432_v12  ;;  %v8472_v40 = vand.u32 4294901760, %v2606_v3 }
 0x199   : > { %2350 = vmatpush.msra.mxu1 %v2349_v25  ;;  %2410 = vmatpush.msra.mxu2 %v8335_v45  ;;  %v11663_v25 = vand.u32 4294901760, %v8429_v30  ;;  %v486_v46 = vsel %vm296_vm6, %v6572_v50, %v11896_v36  ;;  %v428_v36 = vsel %vm300_vm8, %v426_v26, %v427_v55  ;;  %v8470_v50 = vsub.f32 %v2608_v35, %v8439_v34 }
 0x19a   : > { %2454 = vmatpush.msra.mxu3 %v8295_v44  ;;  %2239 = vmatpush.msra.mxu0 %v8283_v33  ;;  %v487_v49 = vsel %vm298_vm7, %v11898_v63, %v11897_v28  ;;  %v8482_v55 = vsub.f32 %v2607_v31, %v8461_v16  ;;  %v8484_v26 = vand.u32 4294901760, %v2605_v37  ;;  %v2252_v35 = vand.u32 4294901760, %v2251_v56  ;;  %v2604_v63 = vld [vmem:[#allocation4 + $0x2c8] sm:$0xff] }
 0x19b   : > { %2356 = vmatpush.msra.mxu1 %v2355_v14  ;;  %2413 = vmatpush.msra.mxu2 %v8353_v1  ;;  %11899 = vst [vmem:[#allocation16_spill] sm:$0xff] %v8470_v50  ;;  %v488_v14 = vsel %vm300_vm8, %v486_v46, %v487_v49  ;;  %v2663_v9 = vsub.f32 %v8429_v30, %v11663_v25  ;;  %v429_v0 = vrot.slane %v428_v36, 1  ;;  %v11669_v31 = vand.u32 4294901760, %v8470_v50 }
 0x19c   : > { %2456 = vmatpush.msra.mxu3 %v8314_v32  ;;  %2241 = vmatpush.msra.mxu0 %v8295_v44  ;;  %11900 = vst [vmem:[#allocation22_spill] sm:$0xff] %v8482_v55  ;;  %v2669_v46 = vsub.f32 %v8435_v27, %v11662_v42  ;;  %v8495_v28 = vsub.f32 %v2606_v3, %v8472_v40  ;;  %v8508_v48 = vand.u32 4294901760, %v2604_v63 }
 0x19d   : > { %2362 = vmatpush.msra.mxu1 %v2361_v13  ;;  %2416 = vmatpush.msra.mxu2 %v8366_v4  ;;  %v2200_v13 = vld [vmem:[#allocation3 + $0xc] sm:$0xff]  ;;  %v2664_v49 = vand.u32 4294901760, %v2663_v9  ;;  %v8504_v36 = vsub.f32 %v2605_v37, %v8484_v26  ;;  %v431_v42 = vperm.slane %v429_v0, 0  ;;  %v2253_v25 = vsub.f32 %v2251_v56, %v2252_v35  ;;  %v11905_v4 = vld [vmem:[#allocation17_spill] sm:$0xff] }
 0x19e   : > { %2458 = vmatpush.msra.mxu3 %v8322_v18  ;;  %368 = vrot.lane.b32.xlu1 %v365_v21, %s6751_s20  ;;  %v489_v21 = vrot.slane %v488_v14, 1  ;;  %v2603_v14 = vld [vmem:[#allocation4 + $0x2c0] sm:$0xff]  ;;  %v2670_v3 = vand.u32 4294901760, %v2669_v46  ;;  %v2675_v37 = vsub.f32 %v8470_v50, %v11669_v31  ;;  %v2602_v0 = vld [vmem:[#allocation4 + $0x2b8] sm:$0xff]  ;;  %v11906_v31 = vrot.slane %v11905_v4, 1 }
 0x19f   : > { %412 = vrot.lane.b32.xlu0 %v409_v38, %s6755_s18  ;;  %2364 = vmatmul.f32.vlgmr.msra.gmra.mxu1 %v8432_v12  ;;  %v8500_v38 = vand.u32 4294901760, %v2200_v13  ;;  %v11907_v50 = vrot.slane %v11905_v4, 3  ;;  %v11908_v27 = vrot.slane %v11905_v4, 2  ;;  %v6575_v4 = vld [vmem:[#allocation2 + $0x2] sm:$0x3] }
 0x1a0   : > { %2550 = vmatpush.msrb.mxu1 %v8159_v53  ;;  %2243 = vmatpush.msra.mxu0 %v8314_v32  ;;  %v11902_v53 = vrot.slane %v11901_v11, 1 }
 0x1a1   : > { %2419 = vmatpush.msra.mxu2 %v8376_v51  ;;  %2460 = vmatpush.msra.mxu3 %v8337_v41  ;;  %v6574_v51 = vld [vmem:[#allocation2] sm:$0x3] }
 0x1a2   : > { %2422 = vmatmul.f32.vlgmr.msra.gmra.mxu2 %v2251_v56  ;;  %2552 = vmatpush.msrb.mxu1 %v8166_v29  ;;  %v491_v29 = vperm.slane %v489_v21, 0  ;;  %v508_v46 = vsel %vm296_vm6, %v6573_v39, %v11902_v53  ;;  %v11903_v56 = vrot.slane %v11901_v11, 3  ;;  %v316_v9 = vsel %vm296_vm6, %v6574_v51, %v11906_v31  ;;  %v2601_v51 = vld [vmem:[#allocation4 + $0x2b0] sm:$0xff] }
 0x1a3   : > { %2612 = vmatpush.msrb.mxu2 %v8410_v17  ;;  %2245 = vmatpush.msra.mxu0 %v8322_v18  ;;  %v317_v39 = vsel %vm298_vm7, %v11908_v27, %v11907_v50  ;;  %v11909_v53 = vand.u32 4294901760, %v8482_v55  ;;  %v11910_v27 = vld [vmem:[#allocation23_spill] sm:$0xff] }
 0x1a4   : > { %2462 = vmatpush.msra.mxu3 %v8355_v8  ;;  %2554 = vmatpush.msrb.mxu1 %v8176_v59  ;;  %v11904_v59 = vrot.slane %v11901_v11, 2  ;;  %v2259_v11 = vsub.f32 %v2200_v13, %v8500_v38  ;;  %v11911_v50 = vrot.slane %v11910_v27, 1  ;;  %v11913_v13 = vrot.slane %v11910_v27, 2 }
 0x1a5   : > { %2466 = vmatmul.f32.vlgmr.msra.gmra.mxu3 %v2252_v35  ;;  %2614 = vmatpush.msrb.mxu2 %v8417_v5  ;;  %v8533_v35 = vand.u32 4294901760, %v2603_v14 }
 0x1a6   : > { %v509_v21 = vsel %vm298_vm7, %v11904_v59, %v11903_v56  ;;  %2665 = vmatpush.msrb.mxu3 %v2664_v49  ;;  %2247 = vmatpush.msra.mxu0 %v8337_v41  ;;  %v2681_v56 = vsub.f32 %v8482_v55, %v11909_v53  ;;  %v552_v31 = vsel %vm296_vm6, %v6575_v4, %v11911_v50  ;;  %v11912_v49 = vrot.slane %v11910_v27, 3 }
 0x1a7   : > { %2556 = vmatpush.msrb.mxu1 %v8186_v60  ;;  %2616 = vmatpush.msrb.mxu2 %v8439_v34  ;;  %v8552_v53 = vsub.f32 %v2604_v63, %v8508_v48  ;;  %v8554_v59 = vand.u32 4294901760, %v2602_v0  ;;  %v2254_v60 = vand.u32 4294901760, %v2253_v25  ;;  %v2676_v55 = vand.u32 4294901760, %v2675_v37 }
 0x1a8   : > { %v553_v1 = vsel %vm298_vm7, %v11913_v13, %v11912_v49  ;;  %2671 = vmatpush.msrb.mxu3 %v2670_v3  ;;  %2249 = vmatpush.msra.mxu0 %v8355_v8  ;;  %v510_v34 = vsel %vm300_vm8, %v508_v46, %v509_v21  ;;  %v318_v4 = vsel %vm300_vm8, %v316_v9, %v317_v39  ;;  %v11914_v27 = vand.u32 4294901760, %v8495_v28  ;;  %v2600_v49 = vld [vmem:[#allocation4 + $0x2a8] sm:$0xff] }
 0x1a9   : > { %434 = vrot.lane.b32.xlu1 %v431_v42, %s6757_s22  ;;  %494 = vrot.lane.b32.xlu0 %v491_v29, %s6752_s30  ;;  %v8565_v50 = vsub.f32 %v2603_v14, %v8533_v35  ;;  %v8567_v3 = vand.u32 4294901760, %v2601_v51  ;;  %v2682_v25 = vand.u32 4294901760, %v2681_v56  ;;  %v2260_v37 = vand.u32 4294901760, %v2259_v11  ;;  %v2599_v56 = vld [vmem:[#allocation4 + $0x2a0] sm:$0xff] }
 0x1aa   : > { %v2687_v63 = vsub.f32 %v8495_v28, %v11914_v27  ;;  %2255 = vmatmul.f32.vlgmr.msra.gmra.mxu0 %v2254_v60  ;;  %2368 = vmatmul.f32.gmra.mxu1 %v8500_v38  ;;  %v11915_v9 = vand.u32 4294901760, %v8504_v36  ;;  %v554_v29 = vsel %vm300_vm8, %v552_v31, %v553_v1  ;;  %v11916_v46 = vand.u32 4294901760, %v8174_v43 }
 0x1ab   : > { %2558 = vmatpush.msrb.mxu1 %v8199_v7  ;;  %v511_v14 = vrot.slane %v510_v34, 1  ;;  %v319_v21 = vrot.slane %v318_v4, 1  ;;  %v11680_v39 = vand.u32 4294901760, %v8552_v53  ;;  %v8579_v13 = vsub.f32 %v2602_v0, %v8554_v59  ;;  %2618 = vmatpush.msrb.mxu2 %v8461_v16  ;;  %v2598_v4 = vld [vmem:[#allocation4 + $0x298] sm:$0xff] }
 0x1ac   : > { %v2693_v42 = vsub.f32 %v8504_v36, %v11915_v9  ;;  %2479 = vmatpush.msrb.mxu0 %v11916_v46  ;;  %2677 = vmatpush.msrb.mxu3 %v2676_v55  ;;  %v8582_v60 = vand.u32 4294901760, %v2600_v49  ;;  %v11917_v1 = vand.u32 4294901760, %v8184_v6  ;;  %v2688_v43 = vand.u32 4294901760, %v2687_v63  ;;  %v2597_v46 = vld [vmem:[#allocation4 + $0x290] sm:$0xff] }
 0x1ad   : > { %2427 = vmatmul.f32.gmra.mxu2 %v2259_v11  ;;  %v555_v31 = vrot.slane %v554_v29, 1  ;;  %v11679_v7 = vand.u32 4294901760, %v8565_v50  ;;  %v8588_v34 = vsub.f32 %v2601_v51, %v8567_v3  ;;  %2560 = vmatpush.msrb.mxu1 %v8217_v47  ;;  %v2261_v55 = vsub.f32 %v2259_v11, %v2260_v37  ;;  %v6576_v47 = vld [vmem:[#allocation2] sm:$0x3]  ;;  %v11919_v11 = vld [vmem:[#allocation18_spill] sm:$0xff] }
 0x1ae   : > { %2483 = vmatpush.msrb.mxu0 %v11917_v1  ;;  %2620 = vmatpush.msrb.mxu2 %v8472_v40  ;;  %v2694_v0 = vand.u32 4294901760, %v2693_v42  ;;  %v8592_v27 = vand.u32 4294901760, %v2599_v56  ;;  %v11918_v6 = vand.u32 4294901760, %v8195_v24  ;;  %v513_v63 = vperm.slane %v511_v14, 0 }
 0x1af   : > { %2683 = vmatpush.msrb.mxu3 %v2682_v25  ;;  %v321_v9 = vperm.slane %v319_v21, 0  ;;  %v2699_v51 = vsub.f32 %v8552_v53, %v11680_v39  ;;  %v2710_v29 = vand.u32 4294901760, %v8579_v13  ;;  %2562 = vmatpush.msrb.mxu1 %v8233_v61  ;;  %v11920_v42 = vrot.slane %v11919_v11, 1 }
 0x1b0   : > { %2487 = vmatpush.msrb.mxu0 %v11918_v6  ;;  %2472 = vmatmul.f32.gmra.mxu3 %v2260_v37  ;;  %v11921_v24 = vrot.slane %v11919_v11, 3  ;;  %v11922_v14 = vrot.slane %v11919_v11, 2  ;;  %v8610_v1 = vsub.f32 %v2600_v49, %v8582_v60  ;;  %v8612_v6 = vand.u32 4294901760, %v2598_v4 }
 0x1b1   : > { %v382_v25 = vsel %vm296_vm6, %v6576_v47, %v11920_v42  ;;  %2622 = vmatpush.msrb.mxu2 %v8484_v26  ;;  %2689 = vmatpush.msrb.mxu3 %v2688_v43  ;;  %v557_v61 = vperm.slane %v555_v31, 0  ;;  %v2705_v37 = vsub.f32 %v8565_v50, %v11679_v7  ;;  %v2716_v47 = vand.u32 4294901760, %v8588_v34  ;;  %v2592_v42 = vld [vmem:[#allocation3 + $0x5] sm:$0xff] }
 0x1b2   : > { %v383_v21 = vsel %vm298_vm7, %v11922_v14, %v11921_v24  ;;  %v11923_v11 = vand.u32 4294901760, %v8206_v57  ;;  %2564 = vmatpush.msrb.mxu1 %v8244_v52  ;;  %v8623_v49 = vsub.f32 %v2599_v56, %v8592_v27  ;;  %v8625_v24 = vand.u32 4294901760, %v2597_v46  ;;  %v2596_v14 = vld [vmem:[#allocation4 + $0x288] sm:$0xff]  ;;  %516 = vrot.lane.b32.xlu1 %v513_v63, %s6754_s17 }
 0x1b3   : > { %2624 = vmatpush.msrb.mxu2 %v8508_v48  ;;  %2695 = vmatpush.msrb.mxu3 %v2694_v0  ;;  %v2262_v43 = vand.u32 4294901760, %v2261_v55  ;;  %v2700_v31 = vand.u32 4294901760, %v2699_v51  ;;  %v2711_v7 = vsub.f32 %v8579_v13, %v2710_v29  ;;  %v384_v57 = vsel %vm300_vm8, %v382_v25, %v383_v21 }
 0x1b4   : > { %2491 = vmatpush.msrb.mxu0 %v11923_v11  ;;  %324 = vrot.lane.b32.xlu2 %v321_v9, %s6752_s30  ;;  %v11681_v52 = vand.u32 4294901760, %v8610_v1  ;;  %v8636_v56 = vsub.f32 %v2598_v4, %v8612_v6  ;;  %v2595_v11 = vld [vmem:[#allocation4 + $0x280] sm:$0xff]  ;;  %v8638_v39 = vand.u32 4294901760, %v2592_v42  ;;  %v2706_v0 = vand.u32 4294901760, %v2705_v37 }
 0x1b5   : > { %560 = vrot.lane.b32.xlu0 %v557_v61, %s6753_s16  ;;  %2263 = vmatmul.f32.gmra.mxu0 %v2262_v43  ;;  %v2717_v55 = vsub.f32 %v8588_v34, %v2716_v47  ;;  %v8644_v51 = vand.u32 4294901760, %v2596_v14  ;;  %v11924_v63 = vand.u32 4294901760, %v8222_v10  ;;  %v385_v4 = vrot.slane %v384_v57, 1  ;;  %v6577_v43 = vld [vmem:[#allocation2] sm:$0x3] }
 0x1b6   : > { %2566 = vmatpush.msrb.mxu1 %v8261_v15  ;;  %v2728_v9 = vand.u32 4294901760, %v8623_v49  ;;  %v8651_v25 = vsub.f32 %v2597_v46, %v8625_v24  ;;  %2626 = vmatpush.msrb.mxu2 %v8533_v35  ;;  %v2712_v21 = vand.u32 4294901760, %v2711_v7  ;;  %v8654_v61 = vand.u32 4294901760, %v2595_v11 }
 0x1b7   : > { %2495 = vmatpush.msrb.mxu0 %v11924_v63  ;;  %2701 = vmatpush.msrb.mxu3 %v2700_v31  ;;  %v11925_v37 = vand.u32 4294901760, %v8242_v2  ;;  %v2723_v10 = vsub.f32 %v8610_v1, %v11681_v52  ;;  %v2734_v15 = vand.u32 4294901760, %v8636_v56  ;;  %v8664_v46 = vsub.f32 %v2592_v42, %v8638_v39  ;;  %v11926_v31 = vld [vmem:[#allocation21_spill] sm:$0xff] }
 0x1b8   : > { %2568 = vmatpush.msrb.mxu1 %v8269_v62  ;;  %2628 = vmatpush.msrb.mxu2 %v8554_v59  ;;  %v2718_v7 = vand.u32 4294901760, %v2717_v55  ;;  %v11927_v57 = vrot.slane %v11926_v31, 1  ;;  %v11928_v62 = vrot.slane %v11926_v31, 3  ;;  %v11929_v63 = vrot.slane %v11926_v31, 2 }
 0x1b9   : > { %2499 = vmatpush.msrb.mxu0 %v11925_v37  ;;  %2707 = vmatpush.msrb.mxu3 %v2706_v0  ;;  %v8676_v52 = vsub.f32 %v2596_v14, %v8644_v51  ;;  %v11930_v42 = vand.u32 4294901760, %v8259_v22  ;;  %v387_v0 = vperm.slane %v385_v4, 0  ;;  %v2729_v55 = vsub.f32 %v8623_v49, %v2728_v9 }
 0x1ba   : > { %v448_v2 = vsel %vm296_vm6, %v6577_v43, %v11927_v57  ;;  %v449_v37 = vsel %vm298_vm7, %v11929_v63, %v11928_v62  ;;  %2570 = vmatpush.msrb.mxu1 %v8283_v33  ;;  %v2740_v43 = vand.u32 4294901760, %v8651_v25  ;;  %2630 = vmatpush.msrb.mxu2 %v8567_v3  ;;  %v8687_v31 = vsub.f32 %v2595_v11, %v8654_v61 }
 0x1bb   : > { %2503 = vmatpush.msrb.mxu0 %v11930_v42  ;;  %2713 = vmatpush.msrb.mxu3 %v2712_v21  ;;  %v11931_v14 = vand.u32 4294901760, %v8267_v54  ;;  %v2724_v22 = vand.u32 4294901760, %v2723_v10  ;;  %v2735_v33 = vsub.f32 %v8636_v56, %v2734_v15  ;;  %v450_v4 = vsel %vm300_vm8, %v448_v2, %v449_v37  ;;  %v2593_v2 = vld [vmem:[#allocation3 + $0xd] sm:$0xff] }
 0x1bc   : > { %2572 = vmatpush.msrb.mxu1 %v8295_v44  ;;  %2632 = vmatpush.msrb.mxu2 %v8582_v60  ;;  %v2746_v21 = vand.u32 4294901760, %v8676_v52  ;;  %v2645_v11 = vand.u32 4294901760, %v8664_v46  ;;  %v11932_v54 = vand.u32 4294901760, %v8281_v19  ;;  %v2730_v44 = vand.u32 4294901760, %v2729_v55 }
 0x1bd   : > { %2507 = vmatpush.msrb.mxu0 %v11931_v14  ;;  %2719 = vmatpush.msrb.mxu3 %v2718_v7  ;;  %v2741_v10 = vsub.f32 %v8651_v25, %v2740_v43  ;;  %v451_v57 = vrot.slane %v450_v4, 1  ;;  %v2752_v7 = vand.u32 4294901760, %v8687_v31  ;;  %v11933_v62 = vand.u32 4294901760, %v8291_v23  ;;  %v6578_v23 = vld [vmem:[#allocation2 + $0x2] sm:$0x3] }
 0x1be   : > { %390 = vrot.lane.b32.xlu2 %v387_v0, %s6753_s16  ;;  %2574 = vmatpush.msrb.mxu1 %v8314_v32  ;;  %v2736_v63 = vand.u32 4294901760, %v2735_v33  ;;  %v2747_v19 = vsub.f32 %v8676_v52, %v2746_v21  ;;  %v2646_v32 = vsub.f32 %v8664_v46, %v2645_v11  ;;  %v11934_v37 = vand.u32 4294901760, %v8305_v20  ;;  %v11935_v0 = vld [vmem:[#allocation29_spill] sm:$0xff] }
 0x1bf   : > { %2511 = vmatpush.msrb.mxu0 %v11932_v54  ;;  %2634 = vmatpush.msrb.mxu2 %v8592_v27  ;;  %v2742_v42 = vand.u32 4294901760, %v2741_v10  ;;  %v11936_v55 = vrot.slane %v11935_v0, 1  ;;  %v11937_v14 = vrot.slane %v11935_v0, 3  ;;  %v8728_v4 = vand.u32 4294901760, %v2593_v2  ;;  %v11939_v10 = vld [vmem:[#allocation26_spill] sm:$0xff] }
 0x1c0   : > { %2725 = vmatpush.msrb.mxu3 %v2724_v22  ;;  %2576 = vmatpush.msrb.mxu1 %v8322_v18  ;;  %v11938_v22 = vrot.slane %v11935_v0, 2  ;;  %v453_v20 = vperm.slane %v451_v57, 0  ;;  %v2753_v54 = vsub.f32 %v8687_v31, %v2752_v7  ;;  %v11942_v0 = vrot.slane %v11939_v10, 2 }
 0x1c1   : > { %2515 = vmatpush.msrb.mxu0 %v11933_v62  ;;  %2636 = vmatpush.msrb.mxu2 %v8612_v6  ;;  %v574_v18 = vsel %vm296_vm6, %v6578_v23, %v11936_v55  ;;  %v11940_v62 = vrot.slane %v11939_v10, 1  ;;  %v11941_v23 = vrot.slane %v11939_v10, 3  ;;  %v2748_v57 = vand.u32 4294901760, %v2747_v19  ;;  %v11944_v10 = vld [vmem:[#allocation24_spill] sm:$0xff] }
 0x1c2   : > { %2731 = vmatpush.msrb.mxu3 %v2730_v44  ;;  %v575_v33 = vsel %vm298_vm7, %v11938_v22, %v11937_v14  ;;  %2578 = vmatpush.msrb.mxu1 %v8337_v41  ;;  %v6579_v44 = vld [vmem:[#allocation2 + $0x2] sm:$0x3]  ;;  %v11943_v41 = vand.u32 4294901760, %v8318_v58  ;;  %v11946_v58 = vrot.slane %v11944_v10, 3  ;;  %v2647_v19 = vand.u32 4294901760, %v2646_v32 }
 0x1c3   : > { %2519 = vmatpush.msrb.mxu0 %v11934_v37  ;;  %2638 = vmatpush.msrb.mxu2 %v8625_v24  ;;  %v618_v37 = vsel %vm296_vm6, %v6579_v44, %v11940_v62  ;;  %v619_v55 = vsel %vm298_vm7, %v11942_v0, %v11941_v23  ;;  %v576_v14 = vsel %vm300_vm8, %v574_v18, %v575_v33  ;;  %v6580_v44 = vld [vmem:[#allocation2 + $0x2] sm:$0x3]  ;;  %v11945_v62 = vrot.slane %v11944_v10, 1 }
 0x1c4   : > { %2737 = vmatpush.msrb.mxu3 %v2736_v63  ;;  %2580 = vmatpush.msrb.mxu1 %v8355_v8  ;;  %v620_v22 = vsel %vm300_vm8, %v618_v37, %v619_v55  ;;  %v11947_v23 = vrot.slane %v11944_v10, 2  ;;  %v8761_v18 = vsub.f32 %v2593_v2, %v8728_v4  ;;  %v11948_v33 = vand.u32 4294901760, %v8335_v45  ;;  %v11950_v32 = vld [vmem:[#allocation33_spill] sm:$0xff]  ;;  %v11952_v2 = vld [vmem:[#allocation19_spill] sm:$0xff]  ;;  %v11955_v10 = vld [vmem:[#allocation32_spill] sm:$0xff] }
 0x1c5   : > { %2523 = vmatpush.msrb.mxu0 %v11943_v41  ;;  %2640 = vmatpush.msrb.mxu2 %v8644_v51  ;;  %v530_v63 = vsel %vm296_vm6, %v6580_v44, %v11945_v62  ;;  %v577_v37 = vrot.slane %v576_v14, 1  ;;  %v621_v0 = vrot.slane %v620_v22, 1  ;;  %v11953_v14 = vld [vmem:[#allocation35_spill] sm:$0xff]  ;;  %v11956_v62 = vand.u32 4294901760, %v11955_v10 }
 0x1c6   : > { %2743 = vmatpush.msrb.mxu3 %v2742_v42  ;;  %2582 = vmatmul.f32.vlgmr.msrb.gmra.mxu1 %v8432_v12  ;;  %v531_v8 = vsel %vm298_vm7, %v11947_v23, %v11946_v58  ;;  %v2754_v42 = vand.u32 4294901760, %v2753_v54  ;;  %v11951_v54 = vand.u32 4294901760, %v11950_v32  ;;  %v2653_v45 = vand.u32 4294901760, %v8761_v18 }
 0x1c7   : > { %2825 = vmatpush.msra.mxu1 %v8410_v17  ;;  %456 = vrot.lane.b32.xlu2 %v453_v20, %s6756_s21  ;;  %v532_v55 = vsel %vm300_vm8, %v530_v63, %v531_v8  ;;  %v11949_v20 = vand.u32 4294901760, %v8429_v30  ;;  %v579_v41 = vperm.slane %v577_v37, 0  ;;  %v11954_v22 = vand.u32 4294901760, %v11953_v14  ;;  %v11957_v63 = vld [vmem:[#allocation16_spill] sm:$0xff]  ;;  %v11959_v8 = vld [vmem:[#allocation34_spill] sm:$0xff] }
 0x1c8   : > { %2527 = vmatpush.msrb.mxu0 %v11948_v33  ;;  %2642 = vmatpush.msrb.mxu2 %v8654_v61  ;;  %v623_v44 = vperm.slane %v621_v0, 0  ;;  %v11958_v58 = vand.u32 4294901760, %v11957_v63  ;;  %v2654_v23 = vsub.f32 %v8761_v18, %v2653_v45  ;;  %v3003_v37 = vld [vmem:[#allocation4 + $0x378] sm:$0xff] }
 0x1c9   : > { %2749 = vmatpush.msrb.mxu3 %v2748_v57  ;;  %2648 = vmatmul.f32.vlgmr.msrb.gmra.mxu2 %v2647_v19  ;;  %v533_v57 = vrot.slane %v532_v55, 1  ;;  %v11960_v19 = vand.u32 4294901760, %v11959_v8  ;;  %v8810_v0 = vand.u32 4294901760, %v3003_v37  ;;  %v3002_v55 = vld [vmem:[#allocation4 + $0x370] sm:$0xff]  ;;  %v2997_v8 = vld [vmem:[#allocation4 + $0x348] sm:$0xff] }
 0x1ca   : > { %2827 = vmatpush.msra.mxu1 %v8417_v5  ;;  %2872 = vmatpush.msra.mxu2 %v11949_v20  ;;  %v2655_v33 = vand.u32 4294901760, %v2654_v23  ;;  %v3001_v20 = vld [vmem:[#allocation4 + $0x368] sm:$0xff]  ;;  %v8819_v32 = vand.u32 4294901760, %v3002_v55 }
 0x1cb   : > { %2531 = vmatpush.msrb.mxu0 %v11951_v54  ;;  %2755 = vmatpush.msrb.mxu3 %v2754_v42  ;;  %v8825_v54 = vsub.f32 %v3003_v37, %v8810_v0 }
 0x1cc   : > { %2757 = vmatmul.f32.vlgmr.msrb.gmra.mxu3 %v8638_v39  ;;  %2829 = vmatpush.msra.mxu1 %v11952_v2 }
 0x1cd   : > { %2876 = vmatpush.msra.mxu2 %v11954_v22  ;;  %2943 = vmatpush.msra.mxu3 %v8410_v17  ;;  %v535_v17 = vperm.slane %v533_v57, 0  ;;  %v11697_v10 = vand.u32 4294901760, %v8825_v54 }
 0x1ce   : > { %2535 = vmatpush.msrb.mxu0 %v11956_v62  ;;  %2831 = vmatpush.msra.mxu1 %v8461_v16 }
 0x1cf   : > { %2880 = vmatpush.msra.mxu2 %v11958_v58  ;;  %2945 = vmatpush.msra.mxu3 %v8417_v5  ;;  %v11961_v5 = vld [vmem:[#allocation22_spill] sm:$0xff] }
 0x1d0   : > { %2539 = vmatpush.msrb.mxu0 %v11960_v19  ;;  %582 = vrot.lane.b32.xlu1 %v579_v41, %s6755_s18  ;;  %v11962_v42 = vand.u32 4294901760, %v11961_v5  ;;  %v2998_v58 = vld [vmem:[#allocation4 + $0x350] sm:$0xff] }
 0x1d1   : > { %626 = vrot.lane.b32.xlu0 %v623_v44, %s6756_s21  ;;  %2541 = vmatmul.f32.vlgmr.msrb.gmra.mxu0 %v8432_v12  ;;  %v11963_v12 = vand.u32 4294901760, %v8495_v28  ;;  %v8879_v19 = vand.u32 4294901760, %v2998_v58 }
 0x1d2   : > { %2586 = vmatmul.f32.gmra.mxu1 %v8500_v38  ;;  %2767 = vmatpush.msra.mxu0 %v8429_v30  ;;  %v11964_v30 = vand.u32 4294901760, %v8504_v36 }
 0x1d3   : > { %2833 = vmatpush.msra.mxu1 %v8472_v40  ;;  %2884 = vmatpush.msra.mxu2 %v11962_v42  ;;  %v8904_v42 = vsub.f32 %v2998_v58, %v8879_v19 }
 0x1d4   : > { %2947 = vmatpush.msra.mxu3 %v11952_v2  ;;  %538 = vrot.lane.b32.xlu2 %v535_v17, %s6751_s20  ;;  %v3000_v2 = vld [vmem:[#allocation4 + $0x360] sm:$0xff]  ;;  %v8893_v17 = vand.u32 4294901760, %v2997_v8 }
 0x1d5   : > { %2656 = vmatmul.f32.gmra.mxu2 %v2655_v33  ;;  %2770 = vmatpush.msra.mxu0 %v11953_v14  ;;  %v8847_v44 = vand.u32 4294901760, %v3000_v2  ;;  %v2995_v33 = vld [vmem:[#allocation4 + $0x338] sm:$0xff] }
 0x1d6   : > { %2835 = vmatpush.msra.mxu1 %v8484_v26  ;;  %2888 = vmatpush.msra.mxu2 %v11963_v12  ;;  %v8919_v37 = vsub.f32 %v2997_v8, %v8893_v17  ;;  %v8983_v8 = vpop.f32.mrf.mxu3 }
 0x1d7   : > { %2949 = vmatpush.msra.mxu3 %v8461_v16  ;;  %2773 = vmatpush.msra.mxu0 %v11957_v63  ;;  %v11965_v16 = vand.u32 4294901760, %v8552_v53  ;;  %v11971_v63 = vand.u32 4294901760, %v8610_v1  ;;  %11975 = vst [vmem:[#allocation17_spill] sm:$0xff] %v8983_v8 }
 0x1d8   : > { %2761 = vmatmul.f32.gmra.mxu3 %v8728_v4  ;;  %2837 = vmatpush.msra.mxu1 %v8508_v48 }
 0x1d9   : > { %2892 = vmatpush.msra.mxu2 %v11964_v30  ;;  %2951 = vmatpush.msra.mxu3 %v8472_v40  ;;  %v11966_v40 = vand.u32 4294901760, %v8565_v50  ;;  %v2993_v30 = vld [vmem:[#allocation4 + $0x328] sm:$0xff] }
 0x1da   : > { %2776 = vmatpush.msra.mxu0 %v11961_v5  ;;  %2839 = vmatpush.msra.mxu1 %v8533_v35  ;;  %v2996_v5 = vld [vmem:[#allocation4 + $0x340] sm:$0xff] }
 0x1db   : > { %2896 = vmatpush.msra.mxu2 %v11965_v16  ;;  %2953 = vmatpush.msra.mxu3 %v8484_v26  ;;  %v8829_v26 = vand.u32 4294901760, %v3001_v20 }
 0x1dc   : > { %2545 = vmatmul.f32.gmra.mxu0 %v8500_v38  ;;  %2841 = vmatpush.msra.mxu1 %v8554_v59  ;;  %v6581_v38 = vld [vmem:[#allocation2 + $0x2] sm:$0x3] }
 0x1dd   : > { %2779 = vmatpush.msra.mxu0 %v8495_v28  ;;  %2900 = vmatpush.msra.mxu2 %v11966_v40  ;;  %v11967_v28 = vld [vmem:[#allocation27_spill] sm:$0xff]  ;;  %v8857_v62 = vsub.f32 %v3001_v20, %v8829_v26  ;;  %v11688_v40 = vand.u32 4294901760, %v8919_v37 }
 0x1de   : > { %2955 = vmatpush.msra.mxu3 %v8508_v48  ;;  %2843 = vmatpush.msra.mxu1 %v8567_v3  ;;  %v11968_v41 = vrot.slane %v11967_v28, 1  ;;  %v11969_v14 = vrot.slane %v11967_v28, 3  ;;  %v11970_v22 = vrot.slane %v11967_v28, 2 }
 0x1df   : > { %2782 = vmatpush.msra.mxu0 %v8504_v36  ;;  %2904 = vmatpush.msra.mxu2 %v2710_v29  ;;  %v8845_v36 = vsub.f32 %v3002_v55, %v8819_v32  ;;  %v2999_v29 = vld [vmem:[#allocation4 + $0x358] sm:$0xff] }
 0x1e0   : > { %v596_v57 = vsel %vm296_vm6, %v6581_v38, %v11968_v41  ;;  %v597_v48 = vsel %vm298_vm7, %v11970_v22, %v11969_v14  ;;  %2957 = vmatpush.msra.mxu3 %v8533_v35  ;;  %2845 = vmatpush.msra.mxu1 %v8582_v60  ;;  %v2991_v41 = vld [vmem:[#allocation4 + $0x318] sm:$0xff]  ;;  %v3092_v22 = vsub.f32 %v8919_v37, %v11688_v40 }
 0x1e1   : > { %2785 = vmatpush.msra.mxu0 %v8552_v53  ;;  %2908 = vmatpush.msra.mxu2 %v2716_v47  ;;  %v598_v35 = vsel %vm300_vm8, %v596_v57, %v597_v48  ;;  %v8862_v53 = vand.u32 4294901760, %v2999_v29  ;;  %v8868_v47 = vsub.f32 %v3000_v2, %v8847_v44  ;;  %v8945_v2 = vand.u32 4294901760, %v2993_v30  ;;  %v8953_v57 = vpop.f32.mrf.mxu1  ;;  %v2990_v48 = vld [vmem:[#allocation4 + $0x310] sm:$0xff] }
 0x1e2   : > { %2959 = vmatpush.msra.mxu3 %v8554_v59  ;;  %2847 = vmatpush.msra.mxu1 %v8592_v27  ;;  %v11696_v59 = vand.u32 4294901760, %v8845_v36  ;;  %v599_v23 = vrot.slane %v598_v35, 1  ;;  %11972 = vst [vmem:[#allocation25_spill] sm:$0xff] %v8953_v57  ;;  %v8975_v58 = vand.u32 4294901760, %v2991_v41  ;;  %v3387_v57 = vld [vmem:[#allocation4 + $0x3a8] sm:$0xff] }
 0x1e3   : > { %2788 = vmatpush.msra.mxu0 %v8565_v50  ;;  %2912 = vmatpush.msra.mxu2 %v11971_v63  ;;  %v3056_v50 = vsub.f32 %v8825_v54, %v11697_v10  ;;  %v8973_v63 = vsub.f32 %v2993_v30, %v8945_v2 }
 0x1e4   : > { %2961 = vmatpush.msra.mxu3 %v8567_v3  ;;  %2849 = vmatpush.msra.mxu1 %v8612_v6  ;;  %v11695_v3 = vand.u32 4294901760, %v8857_v62 }
 0x1e5   : > { %2791 = vmatpush.msra.mxu0 %v8579_v13  ;;  %2916 = vmatpush.msra.mxu2 %v2728_v9  ;;  %v8885_v13 = vsub.f32 %v2999_v29, %v8862_v53  ;;  %v11693_v9 = vand.u32 4294901760, %v8868_v47  ;;  %v8967_v29 = vpop.f32.mrf.mxu2 }
 0x1e6   : > { %2963 = vmatpush.msra.mxu3 %v8582_v60  ;;  %2851 = vmatpush.msra.mxu1 %v8625_v24  ;;  %v3062_v60 = vsub.f32 %v8845_v36, %v11696_v59  ;;  %11974 = vst [vmem:[#allocation28_spill] sm:$0xff] %v8967_v29  ;;  %v11989_v59 = vld [vmem:[#allocation30_spill] sm:$0xff] }
 0x1e7   : > { %2794 = vmatpush.msra.mxu0 %v8588_v34  ;;  %2920 = vmatpush.msra.mxu2 %v2734_v15  ;;  %v3057_v34 = vand.u32 4294901760, %v3056_v50  ;;  %v601_v15 = vperm.slane %v599_v23, 0  ;;  %v3074_v12 = vsub.f32 %v8868_v47, %v11693_v9  ;;  %v2989_v23 = vld [vmem:[#allocation4 + $0x308] sm:$0xff]  ;;  %v11990_v10 = vrot.slane %v11989_v59, 1  ;;  %v3388_v29 = vld [vmem:[#allocation4 + $0x3b0] sm:$0xff] }
 0x1e8   : > { %2965 = vmatpush.msra.mxu3 %v8592_v27  ;;  %2853 = vmatpush.msra.mxu1 %v8644_v51  ;;  %v3068_v27 = vsub.f32 %v8857_v62, %v11695_v3  ;;  %v6583_v3 = vld [vmem:[#allocation2 + $0x2] sm:$0x3] }
 0x1e9   : > { %2797 = vmatpush.msra.mxu0 %v8610_v1  ;;  %2924 = vmatpush.msra.mxu2 %v2740_v43  ;;  %v11692_v1 = vand.u32 4294901760, %v8885_v13  ;;  %v8910_v43 = vand.u32 4294901760, %v2996_v5 }
 0x1ea   : > { %2967 = vmatpush.msra.mxu3 %v8612_v6  ;;  %2855 = vmatpush.msra.mxu1 %v8654_v61  ;;  %v3063_v6 = vand.u32 4294901760, %v3062_v60 }
 0x1eb   : > { %2800 = vmatpush.msra.mxu0 %v8623_v49  ;;  %2928 = vmatpush.msra.mxu2 %v2746_v21  ;;  %v2994_v49 = vld [vmem:[#allocation4 + $0x330] sm:$0xff]  ;;  %v8922_v21 = vand.u32 4294901760, %v2995_v33  ;;  %v3080_v55 = vsub.f32 %v8885_v13, %v11692_v1  ;;  %v8934_v16 = vsub.f32 %v2996_v5, %v8910_v43 }
 0x1ec   : > { %2969 = vmatpush.msra.mxu3 %v8625_v24  ;;  %2859 = vmatmul.f32.vlgmr.msra.gmra.mxu1 %v2645_v11  ;;  %v3069_v24 = vand.u32 4294901760, %v3068_v27  ;;  %v11689_v11 = vand.u32 4294901760, %v8904_v42  ;;  %v8936_v20 = vand.u32 4294901760, %v2994_v49  ;;  %v9001_v27 = vsub.f32 %v2991_v41, %v8975_v58 }
 0x1ed   : > { %3058 = vmatpush.msrb.mxu1 %v3057_v34  ;;  %604 = vrot.lane.b32.xlu2 %v601_v15, %s6757_s22  ;;  %v2988_v34 = vld [vmem:[#allocation4 + $0x300] sm:$0xff]  ;;  %v11683_v15 = vand.u32 4294901760, %v8973_v63 }
 0x1ee   : > { %2803 = vmatpush.msra.mxu0 %v8636_v56  ;;  %2932 = vmatpush.msra.mxu2 %v2752_v7  ;;  %v2992_v56 = vld [vmem:[#allocation4 + $0x320] sm:$0xff]  ;;  %v3075_v7 = vand.u32 4294901760, %v3074_v12  ;;  %v3086_v38 = vsub.f32 %v8904_v42, %v11689_v11  ;;  %v8959_v14 = vsub.f32 %v2994_v49, %v8936_v20  ;;  %v9007_v12 = vpop.f32.mrf.mxu1 }
 0x1ef   : > { %2971 = vmatpush.msra.mxu3 %v8644_v51  ;;  %2934 = vmatmul.f32.vlgmr.msra.gmra.mxu2 %v8638_v39  ;;  %v8943_v51 = vsub.f32 %v2995_v33, %v8922_v21  ;;  %v8951_v28 = vand.u32 4294901760, %v2992_v56  ;;  %v9003_v33 = vand.u32 4294901760, %v2989_v23  ;;  %11976 = vst [vmem:[#allocation23_spill] sm:$0xff] %v9007_v12  ;;  %v3116_v41 = vsub.f32 %v8973_v63, %v11683_v15  ;;  %v6582_v15 = vld [vmem:[#allocation2] sm:$0x3] }
 0x1f0   : > { %3064 = vmatpush.msrb.mxu1 %v3063_v6  ;;  %3160 = vmatpush.msrb.mxu2 %v8825_v54  ;;  %v11684_v5 = vand.u32 4294901760, %v8959_v14 }
 0x1f1   : > { %2806 = vmatpush.msra.mxu0 %v8651_v25  ;;  %2973 = vmatpush.msra.mxu3 %v8654_v61  ;;  %v3081_v25 = vand.u32 4294901760, %v3080_v55  ;;  %v11686_v61 = vand.u32 4294901760, %v8934_v16  ;;  %v11685_v35 = vand.u32 4294901760, %v8943_v51  ;;  %v8981_v50 = vsub.f32 %v2992_v56, %v8951_v28 }
 0x1f2   : > { %2975 = vmatmul.f32.vlgmr.msra.gmra.mxu3 %v8638_v39  ;;  %3070 = vmatpush.msrb.mxu1 %v3069_v24  ;;  %v8961_v39 = vpop.f32.mrf.mxu0  ;;  %v3110_v24 = vsub.f32 %v8959_v14, %v11684_v5  ;;  %v9017_v55 = vand.u32 4294901760, %v2988_v34  ;;  %v11981_v5 = vld [vmem:[#allocation31_spill] sm:$0xff] }
 0x1f3   : > { %3163 = vmatpush.msrb.mxu2 %v8845_v36  ;;  %3218 = vmatpush.msrb.mxu3 %v8810_v0  ;;  %11973 = vst [vmem:[#allocation20_spill] sm:$0xff] %v8961_v39  ;;  %v3098_v60 = vsub.f32 %v8934_v16, %v11686_v61  ;;  %v11682_v6 = vand.u32 4294901760, %v8981_v50 }
 0x1f4   : > { %2809 = vmatpush.msra.mxu0 %v8676_v52  ;;  %3076 = vmatpush.msrb.mxu1 %v3075_v7  ;;  %v3087_v52 = vand.u32 4294901760, %v3086_v38  ;;  %v9023_v7 = vpop.f32.mrf.mxu2 }
 0x1f5   : > { %3166 = vmatpush.msrb.mxu2 %v8857_v62  ;;  %3220 = vmatpush.msrb.mxu3 %v8819_v32  ;;  %v3099_v49 = vand.u32 4294901760, %v3098_v60  ;;  %11978 = vst [vmem:[#allocation21_spill] sm:$0xff] %v9023_v7  ;;  %v3390_v7 = vld [vmem:[#allocation4 + $0x3c0] sm:$0xff] }
 0x1f6   : > { %2812 = vmatpush.msra.mxu0 %v8687_v31  ;;  %2865 = vmatmul.f32.gmra.mxu1 %v2653_v45  ;;  %v8990_v31 = vand.u32 4294901760, %v2990_v48  ;;  %v3093_v45 = vand.u32 4294901760, %v3092_v22  ;;  %v9031_v22 = vsub.f32 %v2989_v23, %v9003_v33  ;;  %v3397_v23 = vld [vmem:[#allocation4 + $0x3f8] sm:$0xff] }
 0x1f7   : > { %2815 = vmatmul.f32.vlgmr.msra.gmra.mxu0 %v8664_v46  ;;  %3082 = vmatpush.msrb.mxu1 %v3081_v25  ;;  %v3104_v46 = vsub.f32 %v8943_v51, %v11685_v35  ;;  %v11687_v25 = vand.u32 4294901760, %v9001_v27  ;;  %v9067_v40 = vand.u32 4294901760, %v3397_v23 }
 0x1f8   : > { %3005 = vmatpush.msrb.mxu0 %v8810_v0  ;;  %3169 = vmatpush.msrb.mxu2 %v8868_v47  ;;  %v9015_v30 = vsub.f32 %v2990_v48, %v8990_v31  ;;  %v9038_v48 = vpop.f32.mrf.mxu3 }
 0x1f9   : > { %3222 = vmatpush.msrb.mxu3 %v8829_v26  ;;  %2938 = vmatmul.f32.gmra.mxu2 %v8728_v4  ;;  %v3105_v38 = vand.u32 4294901760, %v3104_v46  ;;  %11979 = vst [vmem:[#allocation29_spill] sm:$0xff] %v9038_v48  ;;  %v3117_v46 = vand.u32 4294901760, %v3116_v41  ;;  %v11984_v41 = vrot.slane %v11981_v5, 2 }
 0x1fa   : > { %3007 = vmatpush.msrb.mxu0 %v8819_v32  ;;  %3088 = vmatpush.msrb.mxu1 %v3087_v52  ;;  %v9019_v56 = vpop.f32.mrf.mxu0  ;;  %v3111_v52 = vand.u32 4294901760, %v3110_v24  ;;  %v11690_v60 = vand.u32 4294901760, %v9015_v30  ;;  %v11691_v24 = vand.u32 4294901760, %v9031_v22 }
 0x1fb   : > { %3172 = vmatpush.msrb.mxu2 %v8885_v13  ;;  %3224 = vmatpush.msrb.mxu3 %v8847_v44  ;;  %11977 = vst [vmem:[#allocation18_spill] sm:$0xff] %v9019_v56  ;;  %v9179_v56 = vand.u32 4294901760, %v3390_v7 }
 0x1fc   : > { %2979 = vmatmul.f32.gmra.mxu3 %v8728_v4  ;;  %3009 = vmatpush.msrb.mxu0 %v8829_v26  ;;  %v3122_v4 = vsub.f32 %v8981_v50, %v11682_v6  ;;  %v3396_v6 = vld [vmem:[#allocation4 + $0x3f0] sm:$0xff] }
 0x1fd   : > { %3094 = vmatpush.msrb.mxu1 %v3093_v45  ;;  %3175 = vmatpush.msrb.mxu2 %v8904_v42  ;;  %v9043_v45 = vsub.f32 %v2988_v34, %v9017_v55 }
 0x1fe   : > { %3226 = vmatpush.msrb.mxu3 %v8862_v53  ;;  %3011 = vmatpush.msrb.mxu0 %v8847_v44  ;;  %v3123_v34 = vand.u32 4294901760, %v3122_v4 }
 0x1ff   : > { %3100 = vmatpush.msrb.mxu1 %v3099_v49  ;;  %3178 = vmatpush.msrb.mxu2 %v8919_v37  ;;  %11980 = vst [vmem:[#allocation26_spill] sm:$0xff] %v9043_v45  ;;  %v3128_v49 = vsub.f32 %v9001_v27, %v11687_v25  ;;  %v3134_v25 = vsub.f32 %v9015_v30, %v11690_v60  ;;  %v11694_v4 = vand.u32 4294901760, %v9043_v45 }
 0x200   : > { %3228 = vmatpush.msrb.mxu3 %v8879_v19  ;;  %2820 = vmatmul.f32.gmra.mxu0 %v8761_v18  ;;  %v11982_v18 = vrot.slane %v11981_v5, 1  ;;  %v9098_v9 = vpop.f32.mrf.mxu3 }
 0x201   : > { %3013 = vmatpush.msrb.mxu0 %v8862_v53  ;;  %3106 = vmatpush.msrb.mxu1 %v3105_v38  ;;  %v11983_v38 = vrot.slane %v11981_v5, 3  ;;  %11988 = vst [vmem:[#allocation35_spill] sm:$0xff] %v9098_v9  ;;  %v470_v9 = vsel %vm296_vm6, %v6583_v3, %v11990_v10  ;;  %v3392_v3 = vld [vmem:[#allocation4 + $0x3d0] sm:$0xff] }
 0x202   : > { %3181 = vmatpush.msrb.mxu2 %v8934_v16  ;;  %3230 = vmatpush.msrb.mxu3 %v8893_v17  ;;  %v297_v35 = vsel %vm296_vm6, %v6582_v15, %v11982_v18  ;;  %v9072_v15 = vpop.f32.mrf.mxu1  ;;  %v3140_v18 = vsub.f32 %v9031_v22, %v11691_v24  ;;  %v9080_v60 = vpop.f32.mrf.mxu0 }
 0x203   : > { %v299_v61 = vsel %vm298_vm7, %v11984_v41, %v11983_v38  ;;  %3015 = vmatpush.msrb.mxu0 %v8879_v19  ;;  %3112 = vmatpush.msrb.mxu1 %v3111_v52  ;;  %11985 = vst [vmem:[#allocation24_spill] sm:$0xff] %v9072_v15  ;;  %v3129_v52 = vand.u32 4294901760, %v3128_v49  ;;  %v2985_v38 = vld [vmem:[#allocation3 + $0x6] sm:$0xff]  ;;  %v9078_v41 = vand.u32 4294901760, %v3396_v6  ;;  %v9092_v49 = vsub.f32 %v3397_v23, %v9067_v40 }
 0x204   : > { %v301_v11 = vsel %vm300_vm8, %v297_v35, %v299_v61  ;;  %3184 = vmatpush.msrb.mxu2 %v8943_v51  ;;  %3232 = vmatpush.msrb.mxu3 %v8910_v43  ;;  %11986 = vst [vmem:[#allocation33_spill] sm:$0xff] %v9080_v60  ;;  %v9085_v61 = vpop.f32.mrf.mxu2  ;;  %v3135_v35 = vand.u32 4294901760, %v3134_v25  ;;  %v9096_v24 = vand.u32 4294901760, %v2985_v38  ;;  %v3141_v25 = vand.u32 4294901760, %v3140_v18  ;;  %v3393_v23 = vld [vmem:[#allocation4 + $0x3d8] sm:$0xff] }
 0x205   : > { %v302_v5 = vrot.slane %v301_v11, 1  ;;  %3017 = vmatpush.msrb.mxu0 %v8893_v17  ;;  %3118 = vmatpush.msrb.mxu1 %v3117_v46  ;;  %v3395_v11 = vld [vmem:[#allocation4 + $0x3e8] sm:$0xff]  ;;  %11987 = vst [vmem:[#allocation19_spill] sm:$0xff] %v9085_v61  ;;  %v3146_v46 = vsub.f32 %v9043_v45, %v11694_v4  ;;  %v9104_v4 = vsub.f32 %v3396_v6, %v9078_v41  ;;  %v11992_v18 = vrot.slane %v11989_v59, 2 }
 0x206   : > { %3187 = vmatpush.msrb.mxu2 %v8959_v14  ;;  %3234 = vmatpush.msrb.mxu3 %v8922_v21  ;;  %v11698_v6 = vand.u32 4294901760, %v9092_v49  ;;  %v3037_v10 = vsub.f32 %v2985_v38, %v9096_v24 }
 0x207   : > { %307 = vst.msk [vmem:[#allocation3 + $0x1b] sm:$0x1] %vm305_vm5, %v302_v5  ;;  %3019 = vmatpush.msrb.mxu0 %v8910_v43  ;;  %3124 = vmatpush.msrb.mxu1 %v3123_v34  ;;  %v3394_v5 = vld [vmem:[#allocation4 + $0x3e0] sm:$0xff]  ;;  %v9101_v34 = vand.u32 4294901760, %v3395_v11 }
 0x208   : > { %3190 = vmatpush.msrb.mxu2 %v8973_v63  ;;  %3236 = vmatpush.msrb.mxu3 %v8936_v20  ;;  %v347_v1 = vpop.permute.xlu0 %346  ;;  %v9119_v15 = vand.u32 4294901760, %v3394_v5 }
 0x209   : > { %3021 = vmatpush.msrb.mxu0 %v8922_v21  ;;  %3130 = vmatpush.msrb.mxu1 %v3129_v52  ;;  %351 = vst.msk [vmem:[#allocation3 + $0x1d] sm:$0x1] %vm305_vm5, %v347_v1  ;;  %v11991_v52 = vrot.slane %v11989_v59, 3  ;;  %v3147_v1 = vand.u32 4294901760, %v3146_v46  ;;  %v9128_v46 = vsub.f32 %v3395_v11, %v9101_v34 }
 0x20a   : > { %3193 = vmatpush.msrb.mxu2 %v8981_v50  ;;  %3238 = vmatpush.msrb.mxu3 %v8945_v2  ;;  %v9135_v38 = vpop.f32.mrf.mxu1  ;;  %v9142_v11 = vsub.f32 %v3394_v5, %v9119_v15  ;;  %v11997_v5 = vand.u32 4294901760, %v9104_v4 }
 0x20b   : > { %v471_v61 = vsel %vm298_vm7, %v11992_v18, %v11991_v52  ;;  %3023 = vmatpush.msrb.mxu0 %v8936_v20  ;;  %3136 = vmatpush.msrb.mxu1 %v3135_v35  ;;  %v9130_v52 = vand.u32 4294901760, %v3393_v23  ;;  %11993 = vst [vmem:[#allocation32_spill] sm:$0xff] %v9135_v38  ;;  %v3391_v18 = vld [vmem:[#allocation4 + $0x3c8] sm:$0xff]  ;;  %v9147_v35 = vpop.f32.mrf.mxu0 }
 0x20c   : > { %v472_v48 = vsel %vm300_vm8, %v470_v9, %v471_v61  ;;  %3196 = vmatpush.msrb.mxu2 %v9001_v27  ;;  %3240 = vmatpush.msrb.mxu3 %v8951_v28  ;;  %v2986_v9 = vld [vmem:[#allocation3 + $0xe] sm:$0xff]  ;;  %11994 = vst [vmem:[#allocation16_spill] sm:$0xff] %v9142_v11  ;;  %v9151_v38 = vpop.f32.mrf.mxu2 }
 0x20d   : > { %v473_v59 = vrot.slane %v472_v48, 1  ;;  %3025 = vmatpush.msrb.mxu0 %v8945_v2  ;;  %3142 = vmatpush.msrb.mxu1 %v3141_v25  ;;  %v3450_v48 = vsub.f32 %v9092_v49, %v11698_v6  ;;  %v9144_v25 = vand.u32 4294901760, %v3392_v3  ;;  %11995 = vst [vmem:[#allocation34_spill] sm:$0xff] %v9147_v35  ;;  %v3456_v6 = vsub.f32 %v9104_v4, %v11997_v5  ;;  %v9170_v5 = vpop.f32.mrf.mxu3 }
 0x20e   : > { %3199 = vmatpush.msrb.mxu2 %v9015_v30  ;;  %3242 = vmatpush.msrb.mxu3 %v8975_v58  ;;  %v325_v61 = vpop.permute.xlu2 %324  ;;  %11996 = vst [vmem:[#allocation22_spill] sm:$0xff] %v9151_v38  ;;  %v9162_v60 = vsub.f32 %v3393_v23, %v9130_v52  ;;  %v9167_v38 = vand.u32 4294901760, %v3391_v18 }
 0x20f   : > { %477 = vst.msk [vmem:[#allocation3 + $0x23] sm:$0x1] %vm305_vm5, %v473_v59  ;;  %3027 = vmatpush.msrb.mxu0 %v8951_v28  ;;  %3148 = vmatpush.msrb.mxu1 %v3147_v1  ;;  %v3038_v59 = vand.u32 4294901760, %v3037_v10  ;;  %v3451_v35 = vand.u32 4294901760, %v3450_v48  ;;  %v9175_v12 = vsub.f32 %v3392_v3, %v9144_v25  ;;  %v12001_v48 = vand.u32 4294901760, %v9128_v46 }
 0x210   : > { %329 = vst.msk [vmem:[#allocation3 + $0x1c] sm:$0x1] %vm305_vm5, %v325_v61  ;;  %3202 = vmatpush.msrb.mxu2 %v9031_v22  ;;  %3244 = vmatpush.msrb.mxu3 %v8990_v31  ;;  %v369_v1 = vpop.permute.xlu1 %368  ;;  %v9158_v61 = vand.u32 4294901760, %v2986_v9 }
 0x211   : > { %3150 = vmatmul.f32.vlgmr.msrb.gmra.mxu1 %v9096_v24  ;;  %3029 = vmatpush.msrb.mxu0 %v8975_v58  ;;  %11999 = vst [vmem:[#allocation31_spill] sm:$0xff] %v9162_v60  ;;  %v413_v8 = vpop.permute.xlu0 %412  ;;  %v3462_v23 = vsub.f32 %v9128_v46, %v12001_v48 }
 0x212   : > { %11998 = vst [vmem:[#allocation27_spill] sm:$0xff] %v9158_v61  ;;  %3336 = vmatpush.msra.mxu1 %v8810_v0  ;;  %3205 = vmatpush.msrb.mxu2 %v9043_v45  ;;  %v3039_v0 = vsub.f32 %v3037_v10, %v3038_v59  ;;  %v3045_v3 = vsub.f32 %v2986_v9, %v9158_v61  ;;  %v12004_v9 = vand.u32 4294901760, %v9162_v60 }
 0x213   : > { %373 = vst.msk [vmem:[#allocation3 + $0x1e] sm:$0x1] %vm305_vm5, %v369_v1  ;;  %3246 = vmatpush.msrb.mxu3 %v9003_v33  ;;  %3208 = vmatmul.f32.vlgmr.msrb.gmra.mxu2 %v3037_v10  ;;  %v3389_v1 = vld [vmem:[#allocation4 + $0x3b8] sm:$0xff] }
 0x214   : > { %417 = vst.msk [vmem:[#allocation3 + $0x20] sm:$0x1] %vm305_vm5, %v413_v8  ;;  %3338 = vmatpush.msra.mxu1 %v8819_v32  ;;  %3399 = vmatpush.msra.mxu2 %v9067_v40  ;;  %v3457_v8 = vand.u32 4294901760, %v3456_v6  ;;  %v9190_v32 = vsub.f32 %v3391_v18, %v9167_v38  ;;  %v9192_v10 = vand.u32 4294901760, %v3389_v1  ;;  %v12002_v6 = vand.u32 4294901760, %v9142_v11 }
 0x215   : > { %12000 = vst [vmem:[#allocation30_spill] sm:$0xff] %v9170_v5  ;;  %3031 = vmatpush.msrb.mxu0 %v8990_v31  ;;  %3248 = vmatpush.msrb.mxu3 %v9017_v55  ;;  %v9204_v18 = vand.u32 4294901760, %v3388_v29  ;;  %v9206_v5 = vpop.f32.mrf.mxu1  ;;  %v3046_v39 = vand.u32 4294901760, %v3045_v3 }
 0x216   : > { %3252 = vmatmul.f32.vlgmr.msrb.gmra.mxu3 %v3038_v59  ;;  %3340 = vmatpush.msra.mxu1 %v8829_v26  ;;  %v3468_v48 = vsub.f32 %v9142_v11, %v12002_v6  ;;  %v9202_v26 = vsub.f32 %v3390_v7, %v9179_v56  ;;  %12003 = vst [vmem:[#allocation36_spill] sm:$0xff] %v9206_v5  ;;  %v3463_v6 = vand.u32 4294901760, %v3462_v23  ;;  %v9213_v7 = vpop.f32.mrf.mxu0  ;;  %v9221_v23 = vand.u32 4294901760, %v3387_v57 }
 0x217   : > { %3401 = vmatpush.msra.mxu2 %v9078_v41  ;;  %3452 = vmatpush.msra.mxu3 %v3451_v35  ;;  %v3040_v35 = vand.u32 4294901760, %v3039_v0  ;;  %v3474_v11 = vsub.f32 %v9162_v60, %v12004_v9  ;;  %12005 = vst [vmem:[#allocation37_spill] sm:$0xff] %v9213_v7  ;;  %v9223_v0 = vpop.f32.mrf.mxu2  ;;  %v3385_v60 = vld [vmem:[#allocation4 + $0x398] sm:$0xff]  ;;  %v9234_v5 = vsub.f32 %v3388_v29, %v9204_v18  ;;  %v12011_v29 = vand.u32 4294901760, %v9190_v32 }
 0x218   : > { %3033 = vmatpush.msrb.mxu0 %v9003_v33  ;;  %3342 = vmatpush.msra.mxu1 %v8847_v44  ;;  %v391_v59 = vpop.permute.xlu2 %390  ;;  %v3386_v44 = vld [vmem:[#allocation4 + $0x3a0] sm:$0xff]  ;;  %12006 = vst [vmem:[#allocation38_spill] sm:$0xff] %v9223_v0  ;;  %v3469_v9 = vand.u32 4294901760, %v3468_v48  ;;  %v9239_v48 = vpop.f32.mrf.mxu3  ;;  %v3047_v0 = vsub.f32 %v3045_v3, %v3046_v39 }
 0x219   : > { %3403 = vmatpush.msra.mxu2 %v9101_v34  ;;  %3458 = vmatpush.msra.mxu3 %v3457_v8  ;;  %395 = vst.msk [vmem:[#allocation3 + $0x1f] sm:$0x1] %vm305_vm5, %v391_v59  ;;  %v9219_v8 = vsub.f32 %v3389_v1, %v9192_v10  ;;  %v12007_v59 = vand.u32 4294901760, %v9175_v12  ;;  %v3486_v1 = vsub.f32 %v9190_v32, %v12011_v29  ;;  %v3383_v29 = vld [vmem:[#allocation4 + $0x388] sm:$0xff] }
 0x21a   : > { %3035 = vmatpush.msrb.mxu0 %v9017_v55  ;;  %3154 = vmatmul.f32.gmra.mxu1 %v9158_v61  ;;  %v12008_v61 = vand.u32 4294901760, %v8825_v54  ;;  %12009 = vst [vmem:[#allocation39_spill] sm:$0xff] %v9239_v48  ;;  %v3384_v54 = vld [vmem:[#allocation4 + $0x390] sm:$0xff]  ;;  %v9250_v48 = vsub.f32 %v3387_v57, %v9221_v23 }
 0x21b   : > { %3041 = vmatmul.f32.vlgmr.msrb.gmra.mxu0 %v3040_v35  ;;  %3344 = vmatpush.msra.mxu1 %v8862_v53  ;;  %v3480_v7 = vsub.f32 %v9175_v12, %v12007_v59  ;;  %v435_v45 = vpop.permute.xlu1 %434  ;;  %v9236_v35 = vand.u32 4294901760, %v3386_v44  ;;  %v495_v53 = vpop.permute.xlu0 %494  ;;  %v3475_v59 = vand.u32 4294901760, %v3474_v11  ;;  %v9264_v57 = vand.u32 4294901760, %v3384_v54 }
 0x21c   : > { %3265 = vmatpush.msra.mxu0 %v12008_v61  ;;  %3405 = vmatpush.msra.mxu2 %v9119_v15  ;;  %439 = vst.msk [vmem:[#allocation3 + $0x21] sm:$0x1] %vm305_vm5, %v435_v45  ;;  %v12010_v61 = vand.u32 4294901760, %v8845_v36  ;;  %v11706_v45 = vand.u32 4294901760, %v9219_v8  ;;  %v12012_v36 = vand.u32 4294901760, %v8857_v62  ;;  %v12014_v62 = vand.u32 4294901760, %v8868_v47 }
 0x21d   : > { %3464 = vmatpush.msra.mxu3 %v3463_v6  ;;  %3213 = vmatmul.f32.gmra.mxu2 %v3045_v3  ;;  %499 = vst.msk [vmem:[#allocation3 + $0x24] sm:$0x1] %vm305_vm5, %v495_v53  ;;  %v9252_v6 = vand.u32 4294901760, %v3385_v60  ;;  %v3481_v11 = vand.u32 4294901760, %v3480_v7  ;;  %v9278_v53 = vpop.f32.mrf.mxu1  ;;  %v9282_v47 = vand.u32 4294901760, %v3383_v29 }
 0x21e   : > { %3269 = vmatpush.msra.mxu0 %v12010_v61  ;;  %3346 = vmatpush.msra.mxu1 %v8879_v19  ;;  %v12013_v19 = vand.u32 4294901760, %v9202_v26  ;;  %v9262_v61 = vsub.f32 %v3386_v44, %v9236_v35  ;;  %12015 = vst [vmem:[#allocation40_spill] sm:$0xff] %v9278_v53 }
 0x21f   : > { %3407 = vmatpush.msra.mxu2 %v9130_v52  ;;  %3470 = vmatpush.msra.mxu3 %v3469_v9  ;;  %v3487_v9 = vand.u32 4294901760, %v3486_v1 }
 0x220   : > { %3258 = vmatmul.f32.gmra.mxu3 %v3046_v39  ;;  %3273 = vmatpush.msra.mxu0 %v12012_v36  ;;  %v3492_v3 = vsub.f32 %v9202_v26, %v12013_v19  ;;  %v3048_v39 = vand.u32 4294901760, %v3047_v0  ;;  %v3498_v36 = vsub.f32 %v9219_v8, %v11706_v45  ;;  %v9275_v19 = vsub.f32 %v3385_v60, %v9252_v6  ;;  %v9284_v0 = vpop.f32.mrf.mxu0  ;;  %v9293_v45 = vpop.f32.mrf.mxu2 }
 0x221   : > { %3348 = vmatpush.msra.mxu1 %v8893_v17  ;;  %3409 = vmatpush.msra.mxu2 %v9144_v25  ;;  %v457_v7 = vpop.permute.xlu2 %456  ;;  %v3382_v17 = vld [vmem:[#allocation4 + $0x380] sm:$0xff]  ;;  %12016 = vst [vmem:[#allocation41_spill] sm:$0xff] %v9284_v0 }
 0x222   : > { %3476 = vmatpush.msra.mxu3 %v3475_v59  ;;  %3277 = vmatpush.msra.mxu0 %v12014_v62  ;;  %461 = vst.msk [vmem:[#allocation3 + $0x22] sm:$0x1] %vm305_vm5, %v457_v7  ;;  %v3493_v1 = vand.u32 4294901760, %v3492_v3  ;;  %v12017_v59 = vand.u32 4294901760, %v9234_v5  ;;  %v9291_v62 = vsub.f32 %v3384_v54, %v9264_v57  ;;  %v9298_v44 = vand.u32 4294901760, %v3382_v17  ;;  %v9305_v7 = vpop.f32.mrf.mxu3 }
 0x223   : > { %3350 = vmatpush.msra.mxu1 %v8910_v43  ;;  %3411 = vmatpush.msra.mxu2 %v9167_v38  ;;  %12018 = vst [vmem:[#allocation42_spill] sm:$0xff] %v9293_v45  ;;  %v12019_v43 = vand.u32 4294901760, %v8885_v13  ;;  %v12020_v3 = vand.u32 4294901760, %v9250_v48  ;;  %v12022_v13 = vand.u32 4294901760, %v8904_v42  ;;  %v12024_v42 = vand.u32 4294901760, %v8919_v37  ;;  %v4176_v45 = vld [vmem:[#allocation4 + $0x4c0] sm:$0xff] }
 0x224   : > { %3482 = vmatpush.msra.mxu3 %v3481_v11  ;;  %3049 = vmatmul.f32.gmra.mxu0 %v3048_v39  ;;  %v3504_v60 = vsub.f32 %v9234_v5, %v12017_v59  ;;  %v3499_v11 = vand.u32 4294901760, %v3498_v36  ;;  %v517_v59 = vpop.permute.xlu1 %516  ;;  %12021 = vst [vmem:[#allocation43_spill] sm:$0xff] %v9305_v7  ;;  %v3527_v54 = vand.u32 4294901760, %v9291_v62 }
 0x225   : > { %3281 = vmatpush.msra.mxu0 %v12019_v43  ;;  %3352 = vmatpush.msra.mxu1 %v8922_v21  ;;  %v3510_v39 = vsub.f32 %v9250_v48, %v12020_v3  ;;  %v9311_v21 = vsub.f32 %v3383_v29, %v9282_v47  ;;  %521 = vst.msk [vmem:[#allocation3 + $0x25] sm:$0x1] %vm305_vm5, %v517_v59  ;;  %v12023_v43 = vand.u32 4294901760, %v9262_v61  ;;  %v9330_v59 = vpop.f32.mrf.mxu1 }
 0x226   : > { %3413 = vmatpush.msra.mxu2 %v9179_v56  ;;  %3488 = vmatpush.msra.mxu3 %v3487_v9  ;;  %v3505_v36 = vand.u32 4294901760, %v3504_v60  ;;  %12026 = vst [vmem:[#allocation44_spill] sm:$0xff] %v9330_v59  ;;  %v4174_v59 = vld [vmem:[#allocation4 + $0x4b0] sm:$0xff] }
 0x227   : > { %3285 = vmatpush.msra.mxu0 %v12022_v13  ;;  %3354 = vmatpush.msra.mxu1 %v8936_v20  ;;  %v561_v9 = vpop.permute.xlu0 %560  ;;  %v3516_v3 = vsub.f32 %v9262_v61, %v12023_v43  ;;  %v9324_v20 = vsub.f32 %v3382_v17, %v9298_v44  ;;  %v3511_v29 = vand.u32 4294901760, %v3510_v39  ;;  %v12027_v13 = vand.u32 4294901760, %v8934_v16 }
 0x228   : > { %3415 = vmatpush.msra.mxu2 %v9192_v10  ;;  %3494 = vmatpush.msra.mxu3 %v3493_v1  ;;  %565 = vst.msk [vmem:[#allocation3 + $0x27] sm:$0x1] %vm305_vm5, %v561_v9  ;;  %v12025_v1 = vand.u32 4294901760, %v9275_v19  ;;  %v3533_v37 = vand.u32 4294901760, %v9311_v21  ;;  %v9342_v39 = vpop.f32.mrf.mxu2  ;;  %v12030_v9 = vand.u32 4294901760, %v8943_v51 }
 0x229   : > { %3289 = vmatpush.msra.mxu0 %v12024_v42  ;;  %3356 = vmatpush.msra.mxu1 %v8945_v2  ;;  %v9336_v2 = vpop.f32.mrf.mxu0  ;;  %v3517_v17 = vand.u32 4294901760, %v3516_v3  ;;  %12029 = vst [vmem:[#allocation46_spill] sm:$0xff] %v9342_v39  ;;  %v11709_v16 = vand.u32 4294901760, %v9324_v20  ;;  %v12032_v3 = vand.u32 4294901760, %v8959_v14  ;;  %v12033_v42 = vand.u32 4294901760, %v8973_v63  ;;  %v4175_v39 = vld [vmem:[#allocation4 + $0x4b8] sm:$0xff] }
 0x22a   : > { %3417 = vmatpush.msra.mxu2 %v9204_v18  ;;  %3500 = vmatpush.msra.mxu3 %v3499_v11  ;;  %v3522_v60 = vsub.f32 %v9275_v19, %v12025_v1  ;;  %12028 = vst [vmem:[#allocation45_spill] sm:$0xff] %v9336_v2  ;;  %v3528_v11 = vsub.f32 %v9291_v62, %v3527_v54  ;;  %v4173_v2 = vld [vmem:[#allocation4 + $0x4a8] sm:$0xff] }
 0x22b   : > { %3293 = vmatpush.msra.mxu0 %v12027_v13  ;;  %3358 = vmatpush.msra.mxu1 %v8951_v28  ;;  %v3534_v51 = vsub.f32 %v9311_v21, %v3533_v37  ;;  %v3540_v14 = vsub.f32 %v9324_v20, %v11709_v16 }
 0x22c   : > { %3419 = vmatpush.msra.mxu2 %v9221_v23  ;;  %3506 = vmatpush.msra.mxu3 %v3505_v36  ;;  %v3523_v28 = vand.u32 4294901760, %v3522_v60  ;;  %v9349_v36 = vpop.f32.mrf.mxu3 }
 0x22d   : > { %3297 = vmatpush.msra.mxu0 %v12030_v9  ;;  %3360 = vmatpush.msra.mxu1 %v8975_v58  ;;  %12031 = vst [vmem:[#allocation47_spill] sm:$0xff] %v9349_v36  ;;  %v3529_v58 = vand.u32 4294901760, %v3528_v11  ;;  %v3535_v1 = vand.u32 4294901760, %v3534_v51  ;;  %v9370_v63 = vpop.f32.mrf.mxu1  ;;  %v3541_v60 = vand.u32 4294901760, %v3540_v14  ;;  %v12042_v9 = vand.u32 4294901760, %v9104_v4  ;;  %v12048_v14 = vld [vmem:[#allocation27_spill] sm:$0xff] }
 0x22e   : > { %3421 = vmatpush.msra.mxu2 %v9236_v35  ;;  %3512 = vmatpush.msra.mxu3 %v3511_v29  ;;  %v539_v43 = vpop.permute.xlu2 %538  ;;  %v12034_v29 = vand.u32 4294901760, %v8981_v50  ;;  %12035 = vst [vmem:[#allocation48_spill] sm:$0xff] %v9370_v63 }
 0x22f   : > { %3301 = vmatpush.msra.mxu0 %v12032_v3  ;;  %3362 = vmatpush.msra.mxu1 %v8990_v31  ;;  %543 = vst.msk [vmem:[#allocation3 + $0x26] sm:$0x1] %vm305_vm5, %v539_v43  ;;  %v3379_v31 = vld [vmem:[#allocation3 + $0x18] sm:$0xff]  ;;  %v12043_v43 = vand.u32 4294901760, %v9031_v22  ;;  %v12044_v3 = vand.u32 4294901760, %v9128_v46 }
 0x230   : > { %3423 = vmatpush.msra.mxu2 %v9252_v6  ;;  %3518 = vmatpush.msra.mxu3 %v3517_v17  ;;  %v9375_v13 = vand.u32 4294901760, %v3379_v31  ;;  %v9381_v50 = vpop.f32.mrf.mxu2 }
 0x231   : > { %3305 = vmatpush.msra.mxu0 %v12033_v42  ;;  %3364 = vmatpush.msra.mxu1 %v9003_v33  ;;  %v12036_v33 = vand.u32 4294901760, %v9001_v27  ;;  %v9377_v17 = vpop.f32.mrf.mxu0  ;;  %12038 = vst [vmem:[#allocation50_spill] sm:$0xff] %v9381_v50  ;;  %v12040_v27 = vand.u32 4294901760, %v9015_v30 }
 0x232   : > { %3425 = vmatpush.msra.mxu2 %v9264_v57  ;;  %3524 = vmatpush.msra.mxu3 %v3523_v28  ;;  %12037 = vst [vmem:[#allocation49_spill] sm:$0xff] %v9377_v17  ;;  %v9393_v28 = vsub.f32 %v3379_v31, %v9375_v13 }
 0x233   : > { %3309 = vmatpush.msra.mxu0 %v12034_v29  ;;  %3366 = vmatpush.msra.mxu1 %v9017_v55  ;;  %v12039_v55 = vand.u32 4294901760, %v9092_v49 }
 0x234   : > { %3427 = vmatpush.msra.mxu2 %v9282_v47  ;;  %3530 = vmatpush.msra.mxu3 %v3529_v58  ;;  %v9388_v11 = vpop.f32.mrf.mxu3  ;;  %v12046_v58 = vld [vmem:[#allocation26_spill] sm:$0xff] }
 0x235   : > { %3368 = vmatmul.f32.vlgmr.msra.gmra.mxu1 %v9096_v24  ;;  %3313 = vmatpush.msra.mxu0 %v12036_v33  ;;  %12041 = vst [vmem:[#allocation51_spill] sm:$0xff] %v9388_v11  ;;  %v9403_v51 = vpop.f32.mrf.mxu1  ;;  %v12047_v42 = vand.u32 4294901760, %v12046_v58 }
 0x236   : > { %3612 = vmatpush.msrb.mxu1 %v9067_v40  ;;  %3429 = vmatpush.msra.mxu2 %v9298_v44  ;;  %v3380_v30 = vld [vmem:[#allocation3 + $0x20] sm:$0xff]  ;;  %12045 = vst [vmem:[#allocation52_spill] sm:$0xff] %v9403_v51 }
 0x237   : > { %3536 = vmatpush.msra.mxu3 %v3535_v1  ;;  %3317 = vmatpush.msra.mxu0 %v12040_v27  ;;  %v9413_v22 = vand.u32 4294901760, %v3380_v30  ;;  %v12056_v27 = vand.u32 4294901760, %v9175_v12 }
 0x238   : > { %3659 = vmatpush.msrb.mxu2 %v12039_v55  ;;  %3614 = vmatpush.msrb.mxu1 %v9078_v41  ;;  %v9415_v29 = vpop.f32.mrf.mxu2 }
 0x239   : > { %3542 = vmatpush.msra.mxu3 %v3541_v60  ;;  %3321 = vmatpush.msra.mxu0 %v12043_v43  ;;  %v9409_v31 = vpop.f32.mrf.mxu0  ;;  %12050 = vst [vmem:[#allocation27_spill] sm:$0xff] %v9415_v29 }
 0x23a   : > { %3663 = vmatpush.msrb.mxu2 %v12042_v9  ;;  %3616 = vmatpush.msrb.mxu1 %v9101_v34  ;;  %12049 = vst [vmem:[#allocation26_spill] sm:$0xff] %v9409_v31  ;;  %v3790_v9 = vld [vmem:[#allocation4 + $0x478] sm:$0xff] }
 0x23b   : > { %3730 = vmatpush.msrb.mxu3 %v9067_v40  ;;  %3325 = vmatpush.msra.mxu0 %v12047_v42  ;;  %v11711_v40 = vand.u32 4294901760, %v9393_v28  ;;  %v3788_v42 = vld [vmem:[#allocation4 + $0x468] sm:$0xff] }
 0x23c   : > { %3667 = vmatpush.msrb.mxu2 %v12044_v3  ;;  %3618 = vmatpush.msrb.mxu1 %v9119_v15  ;;  %v9422_v33 = vpop.f32.mrf.mxu3 }
 0x23d   : > { %3732 = vmatpush.msrb.mxu3 %v9078_v41  ;;  %3372 = vmatmul.f32.gmra.mxu1 %v12048_v14  ;;  %v12051_v41 = vld [vmem:[#allocation16_spill] sm:$0xff]  ;;  %v3433_v55 = vsub.f32 %v9393_v28, %v11711_v40 }
 0x23e   : > { %3327 = vmatmul.f32.vlgmr.msra.gmra.mxu0 %v9096_v24  ;;  %3620 = vmatpush.msrb.mxu1 %v9130_v52  ;;  %v12052_v1 = vand.u32 4294901760, %v12051_v41  ;;  %12053 = vst [vmem:[#allocation16_spill] sm:$0xff] %v9422_v33  ;;  %v12054_v24 = vld [vmem:[#allocation31_spill] sm:$0xff] }
 0x23f   : > { %3554 = vmatpush.msrb.mxu0 %v9092_v49  ;;  %3734 = vmatpush.msrb.mxu3 %v9101_v34  ;;  %v12055_v60 = vand.u32 4294901760, %v12054_v24  ;;  %v9433_v49 = vsub.f32 %v3380_v30, %v9413_v22  ;;  %v3434_v43 = vand.u32 4294901760, %v3433_v55  ;;  %v9448_v30 = vand.u32 4294901760, %v3790_v9 }
 0x240   : > { %3671 = vmatpush.msrb.mxu2 %v12052_v1  ;;  %3622 = vmatpush.msrb.mxu1 %v9144_v25  ;;  %v12060_v1 = vand.u32 4294901760, %v9202_v26 }
 0x241   : > { %3557 = vmatpush.msrb.mxu0 %v9104_v4  ;;  %3736 = vmatpush.msrb.mxu3 %v9119_v15  ;;  %v12057_v15 = vand.u32 4294901760, %v9190_v32  ;;  %v11707_v3 = vand.u32 4294901760, %v9433_v49 }
 0x242   : > { %3675 = vmatpush.msrb.mxu2 %v12055_v60  ;;  %3624 = vmatpush.msrb.mxu1 %v9167_v38  ;;  %v583_v34 = vpop.permute.xlu1 %582  ;;  %v12062_v60 = vand.u32 4294901760, %v9219_v8 }
 0x243   : > { %3560 = vmatpush.msrb.mxu0 %v9128_v46  ;;  %587 = vst.msk [vmem:[#allocation3 + $0x28] sm:$0x1] %vm305_vm5, %v583_v34  ;;  %v627_v4 = vpop.permute.xlu0 %626  ;;  %3738 = vmatpush.msrb.mxu3 %v9130_v52  ;;  %v3789_v46 = vld [vmem:[#allocation4 + $0x470] sm:$0xff]  ;;  %v9450_v52 = vpop.f32.mrf.mxu1  ;;  %v3441_v55 = vsub.f32 %v9433_v49, %v11707_v3  ;;  %v9474_v34 = vand.u32 4294901760, %v3788_v42 }
 0x244   : > { %3679 = vmatpush.msrb.mxu2 %v12056_v27  ;;  %3626 = vmatpush.msrb.mxu1 %v9179_v56  ;;  %631 = vst.msk [vmem:[#allocation3 + $0x2a] sm:$0x1] %vm305_vm5, %v627_v4  ;;  %v9476_v27 = vpop.f32.mrf.mxu3 }
 0x245   : > { %3563 = vmatpush.msrb.mxu0 %v12051_v41  ;;  %3740 = vmatpush.msrb.mxu3 %v9144_v25  ;;  %12058 = vst [vmem:[#allocation31_spill] sm:$0xff] %v9450_v52  ;;  %v9454_v41 = vpop.f32.mrf.mxu0  ;;  %v9460_v25 = vand.u32 4294901760, %v3789_v46  ;;  %v3780_v52 = vld [vmem:[#allocation4 + $0x428] sm:$0xff] }
 0x246   : > { %3683 = vmatpush.msrb.mxu2 %v12057_v15  ;;  %3331 = vmatmul.f32.gmra.mxu0 %v12048_v14  ;;  %12059 = vst [vmem:[#allocation53_spill] sm:$0xff] %v9454_v41  ;;  %v9462_v14 = vpop.f32.mrf.mxu2  ;;  %v3786_v15 = vld [vmem:[#allocation4 + $0x458] sm:$0xff] }
 0x247   : > { %3566 = vmatpush.msrb.mxu0 %v12054_v24  ;;  %3628 = vmatpush.msrb.mxu1 %v9192_v10  ;;  %v605_v58 = vpop.permute.xlu2 %604  ;;  %12061 = vst [vmem:[#allocation54_spill] sm:$0xff] %v9462_v14  ;;  %v3787_v24 = vld [vmem:[#allocation4 + $0x460] sm:$0xff] }
 0x248   : > { %3687 = vmatpush.msrb.mxu2 %v12060_v1  ;;  %3742 = vmatpush.msrb.mxu3 %v9167_v38  ;;  %609 = vst.msk [vmem:[#allocation3 + $0x29] sm:$0x1] %vm305_vm5, %v605_v58  ;;  %v9472_v38 = vsub.f32 %v3790_v9, %v9448_v30  ;;  %v9485_v4 = vand.u32 4294901760, %v3787_v24  ;;  %v12064_v9 = vand.u32 4294901760, %v9234_v5  ;;  %v12066_v58 = vand.u32 4294901760, %v9250_v48 }
 0x249   : > { %3435 = vmatmul.f32.vlgmr.msra.gmra.mxu2 %v3434_v43  ;;  %3569 = vmatpush.msrb.mxu0 %v9175_v12  ;;  %12063 = vst [vmem:[#allocation55_spill] sm:$0xff] %v9476_v27  ;;  %v9483_v12 = vsub.f32 %v3789_v46, %v9460_v25  ;;  %v9494_v43 = vsub.f32 %v3788_v42, %v9474_v34  ;;  %v9501_v1 = vand.u32 4294901760, %v3786_v15 }
 0x24a   : > { %3630 = vmatpush.msrb.mxu1 %v9204_v18  ;;  %3691 = vmatpush.msrb.mxu2 %v12062_v60  ;;  %v9509_v42 = vsub.f32 %v3787_v24, %v9485_v4 }
 0x24b   : > { %3744 = vmatpush.msrb.mxu3 %v9179_v56  ;;  %3572 = vmatpush.msrb.mxu0 %v9190_v32  ;;  %v3442_v56 = vand.u32 4294901760, %v3441_v55  ;;  %v11708_v32 = vand.u32 4294901760, %v9472_v38  ;;  %v9496_v46 = vpop.f32.mrf.mxu1 }
 0x24c   : > { %3544 = vmatmul.f32.vlgmr.msra.gmra.mxu3 %v9375_v13  ;;  %3632 = vmatpush.msrb.mxu1 %v9221_v23  ;;  %12065 = vst [vmem:[#allocation56_spill] sm:$0xff] %v9496_v46  ;;  %v9523_v24 = vpop.f32.mrf.mxu3 }
 0x24d   : > { %3695 = vmatpush.msrb.mxu2 %v12064_v9  ;;  %3746 = vmatpush.msrb.mxu3 %v9192_v10  ;;  %v3785_v10 = vld [vmem:[#allocation4 + $0x450] sm:$0xff]  ;;  %v9503_v60 = vpop.f32.mrf.mxu0  ;;  %v12069_v9 = vand.u32 4294901760, %v9262_v61  ;;  %12070 = vst [vmem:[#allocation59_spill] sm:$0xff] %v9523_v24 }
 0x24e   : > { %3575 = vmatpush.msrb.mxu0 %v9202_v26  ;;  %3634 = vmatpush.msrb.mxu1 %v9236_v35  ;;  %12067 = vst [vmem:[#allocation57_spill] sm:$0xff] %v9503_v60  ;;  %v11710_v26 = vand.u32 4294901760, %v9483_v12  ;;  %v9511_v55 = vpop.f32.mrf.mxu2  ;;  %v9521_v3 = vand.u32 4294901760, %v3785_v10 }
 0x24f   : > { %3699 = vmatpush.msrb.mxu2 %v12066_v58  ;;  %3748 = vmatpush.msrb.mxu3 %v9204_v18  ;;  %12068 = vst [vmem:[#allocation58_spill] sm:$0xff] %v9511_v55  ;;  %v3784_v18 = vld [vmem:[#allocation4 + $0x448] sm:$0xff]  ;;  %v11712_v58 = vand.u32 4294901760, %v9494_v43 }
 0x250   : > { %3578 = vmatpush.msrb.mxu0 %v9219_v8  ;;  %3636 = vmatpush.msrb.mxu1 %v9252_v6  ;;  %v3843_v8 = vsub.f32 %v9472_v38, %v11708_v32  ;;  %v11713_v32 = vand.u32 4294901760, %v9509_v42  ;;  %v9537_v16 = vand.u32 4294901760, %v3784_v18  ;;  %v3776_v55 = vld [vmem:[#allocation4 + $0x408] sm:$0xff] }
 0x251   : > { %3703 = vmatpush.msrb.mxu2 %v12069_v9  ;;  %3750 = vmatpush.msrb.mxu3 %v9221_v23  ;;  %v12071_v9 = vand.u32 4294901760, %v9275_v19  ;;  %v9529_v23 = vsub.f32 %v3786_v15, %v9501_v1  ;;  %v9548_v15 = vsub.f32 %v3785_v10, %v9521_v3  ;;  %v9655_v14 = vand.u32 4294901760, %v3776_v55 }
 0x252   : > { %3443 = vmatmul.f32.gmra.mxu2 %v3442_v56  ;;  %3581 = vmatpush.msrb.mxu0 %v9234_v5  ;;  %v3783_v56 = vld [vmem:[#allocation4 + $0x440] sm:$0xff]  ;;  %v3849_v5 = vsub.f32 %v9483_v12, %v11710_v26  ;;  %v3782_v26 = vld [vmem:[#allocation4 + $0x438] sm:$0xff]  ;;  %v9562_v10 = vsub.f32 %v3784_v18, %v9537_v16 }
 0x253   : > { %3638 = vmatpush.msrb.mxu1 %v9264_v57  ;;  %3707 = vmatpush.msrb.mxu2 %v12071_v9  ;;  %v9550_v9 = vand.u32 4294901760, %v3783_v56  ;;  %v9569_v40 = vand.u32 4294901760, %v3782_v26 }
 0x254   : > { %3752 = vmatpush.msrb.mxu3 %v9236_v35  ;;  %3584 = vmatpush.msrb.mxu0 %v9250_v48  ;;  %v3844_v35 = vand.u32 4294901760, %v3843_v8  ;;  %v3855_v48 = vsub.f32 %v9494_v43, %v11712_v58  ;;  %v3781_v8 = vld [vmem:[#allocation4 + $0x430] sm:$0xff]  ;;  %v9564_v58 = vpop.f32.mrf.mxu1  ;;  %v9590_v18 = vpop.f32.mrf.mxu3 }
 0x255   : > { %3548 = vmatmul.f32.gmra.mxu3 %v9413_v22  ;;  %3640 = vmatpush.msrb.mxu1 %v9282_v47  ;;  %12072 = vst [vmem:[#allocation60_spill] sm:$0xff] %v9564_v58 }
 0x256   : > { %3711 = vmatpush.msrb.mxu2 %v3527_v54  ;;  %3754 = vmatpush.msrb.mxu3 %v9252_v6  ;;  %v3850_v6 = vand.u32 4294901760, %v3849_v5  ;;  %v3861_v54 = vsub.f32 %v9509_v42, %v11713_v32  ;;  %v3856_v5 = vand.u32 4294901760, %v3855_v48  ;;  %v9577_v32 = vsub.f32 %v3783_v56, %v9550_v9  ;;  %v9579_v58 = vpop.f32.mrf.mxu2  ;;  %12078 = vst [vmem:[#allocation63_spill] sm:$0xff] %v9590_v18  ;;  %v3778_v56 = vld [vmem:[#allocation4 + $0x418] sm:$0xff] }
 0x257   : > { %3587 = vmatpush.msrb.mxu0 %v9262_v61  ;;  %3642 = vmatpush.msrb.mxu1 %v9298_v44  ;;  %v12073_v61 = vand.u32 4294901760, %v9393_v28  ;;  %12076 = vst [vmem:[#allocation62_spill] sm:$0xff] %v9579_v58  ;;  %v9597_v58 = vand.u32 4294901760, %v3780_v52  ;;  %v9623_v18 = vand.u32 4294901760, %v3778_v56 }
 0x258   : > { %3715 = vmatpush.msrb.mxu2 %v3533_v37  ;;  %3756 = vmatpush.msrb.mxu3 %v9264_v57  ;;  %v9571_v37 = vpop.f32.mrf.mxu0  ;;  %v12075_v57 = vand.u32 4294901760, %v9324_v20  ;;  %v3862_v48 = vand.u32 4294901760, %v3861_v54  ;;  %v12084_v24 = vand.u32 4294901760, %v9577_v32 }
 0x259   : > { %3646 = vmatmul.f32.vlgmr.msrb.gmra.mxu1 %v12073_v61  ;;  %3590 = vmatpush.msrb.mxu0 %v9275_v19  ;;  %12074 = vst [vmem:[#allocation61_spill] sm:$0xff] %v9571_v37  ;;  %v12077_v19 = vand.u32 4294901760, %v9529_v23  ;;  %v9586_v61 = vand.u32 4294901760, %v3781_v8 }
 0x25a   : > { %3845 = vmatpush.msra.mxu1 %v3844_v35  ;;  %3719 = vmatpush.msrb.mxu2 %v12075_v57  ;;  %v3779_v57 = vld [vmem:[#allocation4 + $0x420] sm:$0xff]  ;;  %v3885_v37 = vsub.f32 %v9577_v32, %v12084_v24 }
 0x25b   : > { %3758 = vmatpush.msrb.mxu3 %v9282_v47  ;;  %3721 = vmatmul.f32.vlgmr.msrb.gmra.mxu2 %v9375_v13  ;;  %v3867_v35 = vsub.f32 %v9529_v23, %v12077_v19  ;;  %v9595_v47 = vsub.f32 %v3782_v26, %v9569_v40  ;;  %v9609_v26 = vand.u32 4294901760, %v3779_v57 }
 0x25c   : > { %3851 = vmatpush.msra.mxu1 %v3850_v6  ;;  %3947 = vmatpush.msra.mxu2 %v9472_v38  ;;  %v12079_v6 = vand.u32 4294901760, %v9548_v15  ;;  %v9615_v19 = vpop.f32.mrf.mxu1  ;;  %v9644_v24 = vpop.f32.mrf.mxu3 }
 0x25d   : > { %3593 = vmatpush.msrb.mxu0 %v9291_v62  ;;  %3760 = vmatpush.msrb.mxu3 %v9298_v44  ;;  %v3868_v44 = vand.u32 4294901760, %v3867_v35  ;;  %v9607_v62 = vsub.f32 %v3781_v8, %v9586_v61  ;;  %12081 = vst [vmem:[#allocation64_spill] sm:$0xff] %v9615_v19  ;;  %v9621_v8 = vsub.f32 %v3780_v52, %v9597_v58 }
 0x25e   : > { %3762 = vmatmul.f32.vlgmr.msrb.gmra.mxu3 %v9375_v13  ;;  %3857 = vmatpush.msra.mxu1 %v3856_v5  ;;  %v3873_v54 = vsub.f32 %v9548_v15, %v12079_v6  ;;  %v12080_v13 = vand.u32 4294901760, %v9562_v10  ;;  %v3777_v6 = vld [vmem:[#allocation4 + $0x410] sm:$0xff]  ;;  %v9633_v27 = vpop.f32.mrf.mxu2  ;;  %v9638_v35 = vsub.f32 %v3779_v57, %v9609_v26  ;;  %12086 = vst [vmem:[#allocation67_spill] sm:$0xff] %v9644_v24 }
 0x25f   : > { %3950 = vmatpush.msra.mxu2 %v9483_v12  ;;  %4005 = vmatpush.msra.mxu3 %v9448_v30  ;;  %12085 = vst [vmem:[#allocation66_spill] sm:$0xff] %v9633_v27  ;;  %v9653_v52 = vsub.f32 %v3778_v56, %v9623_v18  ;;  %v12088_v24 = vand.u32 4294901760, %v9607_v62 }
 0x260   : > { %3596 = vmatpush.msrb.mxu0 %v9311_v21  ;;  %3863 = vmatpush.msra.mxu1 %v3862_v48  ;;  %v3879_v5 = vsub.f32 %v9562_v10, %v12080_v13  ;;  %v9625_v21 = vpop.f32.mrf.mxu0  ;;  %v12083_v48 = vand.u32 4294901760, %v9433_v49  ;;  %v3874_v13 = vand.u32 4294901760, %v3873_v54 }
 0x261   : > { %3953 = vmatpush.msra.mxu2 %v9494_v43  ;;  %4007 = vmatpush.msra.mxu3 %v9460_v25  ;;  %12082 = vst [vmem:[#allocation65_spill] sm:$0xff] %v9625_v21  ;;  %v3897_v41 = vsub.f32 %v9607_v62, %v12088_v24 }
 0x262   : > { %3599 = vmatpush.msrb.mxu0 %v9324_v20  ;;  %3652 = vmatmul.f32.gmra.mxu1 %v12083_v48  ;;  %v9640_v20 = vand.u32 4294901760, %v3777_v6  ;;  %v3880_v54 = vand.u32 4294901760, %v3879_v5  ;;  %v3775_v48 = vld [vmem:[#allocation4 + $0x400] sm:$0xff]  ;;  %v3886_v5 = vand.u32 4294901760, %v3885_v37 }
 0x263   : > { %3602 = vmatmul.f32.vlgmr.msrb.gmra.mxu0 %v9393_v28  ;;  %3869 = vmatpush.msra.mxu1 %v3868_v44  ;;  %v12087_v28 = vand.u32 4294901760, %v9595_v47  ;;  %v9667_v56 = vand.u32 4294901760, %v3775_v48 }
 0x264   : > { %3792 = vmatpush.msra.mxu0 %v9448_v30  ;;  %3956 = vmatpush.msra.mxu2 %v9509_v42  ;;  %v9665_v57 = vsub.f32 %v3777_v6, %v9640_v20  ;;  %v3898_v6 = vand.u32 4294901760, %v3897_v41  ;;  %v9704_v51 = vpop.f32.mrf.mxu3 }
 0x265   : > { %4009 = vmatpush.msra.mxu3 %v9474_v34  ;;  %3725 = vmatmul.f32.gmra.mxu2 %v9413_v22  ;;  %v3891_v44 = vsub.f32 %v9595_v47, %v12087_v28  ;;  %v9677_v28 = vsub.f32 %v3776_v55, %v9655_v14  ;;  %v9689_v24 = vsub.f32 %v3775_v48, %v9667_v56 }
 0x266   : > { %3794 = vmatpush.msra.mxu0 %v9460_v25  ;;  %3875 = vmatpush.msra.mxu1 %v3874_v13  ;;  %v12089_v13 = vand.u32 4294901760, %v9621_v8  ;;  %12095 = vst [vmem:[#allocation71_spill] sm:$0xff] %v9704_v51 }
 0x267   : > { %3959 = vmatpush.msra.mxu2 %v9529_v23  ;;  %4011 = vmatpush.msra.mxu3 %v9485_v4  ;;  %v3892_v37 = vand.u32 4294901760, %v3891_v44  ;;  %v12097_v51 = vand.u32 4294901760, %v9677_v28 }
 0x268   : > { %3766 = vmatmul.f32.gmra.mxu3 %v9413_v22  ;;  %3796 = vmatpush.msra.mxu0 %v9474_v34  ;;  %v3903_v27 = vsub.f32 %v9621_v8, %v12089_v13  ;;  %v9681_v22 = vpop.f32.mrf.mxu1  ;;  %v9691_v55 = vpop.f32.mrf.mxu0 }
 0x269   : > { %3881 = vmatpush.msra.mxu1 %v3880_v54  ;;  %3962 = vmatpush.msra.mxu2 %v9548_v15  ;;  %12090 = vst [vmem:[#allocation68_spill] sm:$0xff] %v9681_v22  ;;  %v12091_v54 = vand.u32 4294901760, %v9638_v35  ;;  %v4183_v22 = vld [vmem:[#allocation4 + $0x4f8] sm:$0xff] }
 0x26a   : > { %4013 = vmatpush.msra.mxu3 %v9501_v1  ;;  %3798 = vmatpush.msra.mxu0 %v9485_v4  ;;  %12092 = vst [vmem:[#allocation69_spill] sm:$0xff] %v9691_v55  ;;  %v3904_v41 = vand.u32 4294901760, %v3903_v27  ;;  %v4182_v55 = vld [vmem:[#allocation4 + $0x4f0] sm:$0xff] }
 0x26b   : > { %3887 = vmatpush.msra.mxu1 %v3886_v5  ;;  %3965 = vmatpush.msra.mxu2 %v9562_v10  ;;  %v3909_v44 = vsub.f32 %v9638_v35, %v12091_v54  ;;  %v9695_v5 = vpop.f32.mrf.mxu2  ;;  %v12094_v54 = vand.u32 4294901760, %v9653_v52  ;;  %v9719_v46 = vand.u32 4294901760, %v4182_v55 }
 0x26c   : > { %4015 = vmatpush.msra.mxu3 %v9521_v3  ;;  %3607 = vmatmul.f32.gmra.mxu0 %v9433_v49  ;;  %12093 = vst [vmem:[#allocation70_spill] sm:$0xff] %v9695_v5 }
 0x26d   : > { %3800 = vmatpush.msra.mxu0 %v9501_v1  ;;  %3893 = vmatpush.msra.mxu1 %v3892_v37  ;;  %v3915_v13 = vsub.f32 %v9653_v52, %v12094_v54  ;;  %v3910_v49 = vand.u32 4294901760, %v3909_v44  ;;  %v12096_v37 = vand.u32 4294901760, %v9665_v57  ;;  %v9711_v54 = vand.u32 4294901760, %v4183_v22  ;;  %v3772_v44 = vld [vmem:[#allocation3 + $0x19] sm:$0xff] }
 0x26e   : > { %3968 = vmatpush.msra.mxu2 %v9577_v32  ;;  %4017 = vmatpush.msra.mxu3 %v9537_v16  ;;  %v9736_v21 = vand.u32 4294901760, %v3772_v44 }
 0x26f   : > { %3802 = vmatpush.msra.mxu0 %v9521_v3  ;;  %3899 = vmatpush.msra.mxu1 %v3898_v6  ;;  %v3921_v27 = vsub.f32 %v9665_v57, %v12096_v37  ;;  %v3916_v48 = vand.u32 4294901760, %v3915_v13  ;;  %v3927_v6 = vsub.f32 %v9677_v28, %v12097_v51  ;;  %v4181_v37 = vld [vmem:[#allocation4 + $0x4e8] sm:$0xff]  ;;  %v12099_v13 = vand.u32 4294901760, %v9689_v24 }
 0x270   : > { %3971 = vmatpush.msra.mxu2 %v9595_v47  ;;  %4019 = vmatpush.msra.mxu3 %v9550_v9  ;;  %v9723_v5 = vpop.f32.mrf.mxu1  ;;  %v9730_v51 = vsub.f32 %v4183_v22, %v9711_v54  ;;  %v9732_v19 = vpop.f32.mrf.mxu0  ;;  %v9744_v22 = vsub.f32 %v4182_v55, %v9719_v46  ;;  %v3824_v55 = vsub.f32 %v3772_v44, %v9736_v21 }
 0x271   : > { %3804 = vmatpush.msra.mxu0 %v9537_v16  ;;  %3905 = vmatpush.msra.mxu1 %v3904_v41  ;;  %12098 = vst [vmem:[#allocation72_spill] sm:$0xff] %v9723_v5  ;;  %v3922_v11 = vand.u32 4294901760, %v3921_v27  ;;  %v3933_v41 = vsub.f32 %v9689_v24, %v12099_v13  ;;  %v4180_v5 = vld [vmem:[#allocation4 + $0x4e0] sm:$0xff]  ;;  %v9741_v27 = vand.u32 4294901760, %v4181_v37  ;;  %v4179_v13 = vld [vmem:[#allocation4 + $0x4d8] sm:$0xff] }
 0x272   : > { %3974 = vmatpush.msra.mxu2 %v9607_v62  ;;  %4021 = vmatpush.msra.mxu3 %v9569_v40  ;;  %12100 = vst [vmem:[#allocation73_spill] sm:$0xff] %v9732_v19  ;;  %v9748_v19 = vpop.f32.mrf.mxu3  ;;  %v11714_v7 = vand.u32 4294901760, %v9730_v51  ;;  %v3825_v50 = vand.u32 4294901760, %v3824_v55 }
 0x273   : > { %3806 = vmatpush.msra.mxu0 %v9550_v9  ;;  %3911 = vmatpush.msra.mxu1 %v3910_v49  ;;  %v9738_v31 = vpop.f32.mrf.mxu2  ;;  %v3928_v49 = vand.u32 4294901760, %v3927_v6  ;;  %12102 = vst [vmem:[#allocation75_spill] sm:$0xff] %v9748_v19  ;;  %v4178_v6 = vld [vmem:[#allocation4 + $0x4d0] sm:$0xff]  ;;  %v9760_v60 = vsub.f32 %v4181_v37, %v9741_v27  ;;  %v4177_v37 = vld [vmem:[#allocation4 + $0x4c8] sm:$0xff] }
 0x274   : > { %3977 = vmatpush.msra.mxu2 %v9621_v8  ;;  %4023 = vmatpush.msra.mxu3 %v9586_v61  ;;  %12101 = vst [vmem:[#allocation74_spill] sm:$0xff] %v9738_v31  ;;  %v3934_v31 = vand.u32 4294901760, %v3933_v41  ;;  %v3773_v41 = vld [vmem:[#allocation3 + $0x21] sm:$0xff]  ;;  %v4236_v44 = vsub.f32 %v9730_v51, %v11714_v7  ;;  %v9773_v19 = vand.u32 4294901760, %v4178_v6 }
 0x275   : > { %3808 = vmatpush.msra.mxu0 %v9569_v40  ;;  %3917 = vmatpush.msra.mxu1 %v3916_v48  ;;  %v9752_v48 = vand.u32 4294901760, %v4180_v5  ;;  %v12112_v33 = vand.u32 4294901760, %v9760_v60 }
 0x276   : > { %3980 = vmatpush.msra.mxu2 %v9638_v35  ;;  %4025 = vmatpush.msra.mxu3 %v9597_v58 }
 0x277   : > { %3810 = vmatpush.msra.mxu0 %v9586_v61  ;;  %3923 = vmatpush.msra.mxu1 %v3922_v11  ;;  %v9762_v11 = vand.u32 4294901760, %v4179_v13 }
 0x278   : > { %3983 = vmatpush.msra.mxu2 %v9653_v52  ;;  %4027 = vmatpush.msra.mxu3 %v9609_v26  ;;  %v9777_v36 = vpop.f32.mrf.mxu1  ;;  %v9790_v63 = vpop.f32.mrf.mxu0 }
 0x279   : > { %3812 = vmatpush.msra.mxu0 %v9597_v58  ;;  %3929 = vmatpush.msra.mxu1 %v3928_v49  ;;  %v9771_v49 = vsub.f32 %v4180_v5, %v9752_v48  ;;  %12104 = vst [vmem:[#allocation77_spill] sm:$0xff] %v9777_v36  ;;  %v9784_v5 = vand.u32 4294901760, %v3773_v41  ;;  %v9788_v29 = vsub.f32 %v4179_v13, %v9762_v11  ;;  %v9794_v36 = vand.u32 4294901760, %v4177_v37 }
 0x27a   : > { %3986 = vmatpush.msra.mxu2 %v9665_v57  ;;  %4029 = vmatpush.msra.mxu3 %v9623_v18  ;;  %12108 = vst [vmem:[#allocation80_spill] sm:$0xff] %v9790_v63  ;;  %v9801_v13 = vsub.f32 %v4178_v6, %v9773_v19  ;;  %v9805_v63 = vand.u32 4294901760, %v4176_v45  ;;  %v9807_v53 = vpop.f32.mrf.mxu3  ;;  %v4248_v6 = vsub.f32 %v9760_v60, %v12112_v33 }
 0x27b   : > { %3814 = vmatpush.msra.mxu0 %v9609_v26  ;;  %3935 = vmatpush.msra.mxu1 %v3934_v31  ;;  %12103 = vst [vmem:[#allocation76_spill] sm:$0xff] %v9771_v49  ;;  %v12105_v31 = vand.u32 4294901760, %v9744_v22  ;;  %v9796_v17 = vpop.f32.mrf.mxu2 }
 0x27c   : > { %3989 = vmatpush.msra.mxu2 %v9677_v28  ;;  %4031 = vmatpush.msra.mxu3 %v9640_v20  ;;  %12106 = vst [vmem:[#allocation78_spill] sm:$0xff] %v9784_v5 }
 0x27d   : > { %3937 = vmatmul.f32.vlgmr.msra.gmra.mxu1 %v9736_v21  ;;  %3816 = vmatpush.msra.mxu0 %v9623_v18  ;;  %v4242_v7 = vsub.f32 %v9744_v22, %v12105_v31  ;;  %12107 = vst [vmem:[#allocation79_spill] sm:$0xff] %v9788_v29  ;;  %v4237_v31 = vand.u32 4294901760, %v4236_v44 }
 0x27e   : > { %4123 = vmatpush.msrb.mxu1 %v9448_v30  ;;  %3992 = vmatpush.msra.mxu2 %v9689_v24  ;;  %12109 = vst [vmem:[#allocation81_spill] sm:$0xff] %v9796_v17  ;;  %v3826_v30 = vsub.f32 %v3824_v55, %v3825_v50  ;;  %v3832_v17 = vsub.f32 %v3773_v41, %v9784_v5  ;;  %v12115_v41 = vand.u32 4294901760, %v9788_v29 }
 0x27f   : > { %4033 = vmatpush.msra.mxu3 %v9655_v14  ;;  %3995 = vmatmul.f32.vlgmr.msra.gmra.mxu2 %v3824_v55  ;;  %12110 = vst [vmem:[#allocation82_spill] sm:$0xff] %v9801_v13  ;;  %v4243_v44 = vand.u32 4294901760, %v4242_v7  ;;  %v9818_v55 = vsub.f32 %v4177_v37, %v9794_v36  ;;  %v12113_v7 = vand.u32 4294901760, %v9771_v49 }
 0x280   : > { %4125 = vmatpush.msrb.mxu1 %v9460_v25  ;;  %4185 = vmatpush.msrb.mxu2 %v9711_v54  ;;  %12111 = vst [vmem:[#allocation83_spill] sm:$0xff] %v9807_v53  ;;  %v9820_v53 = vand.u32 4294901760, %v4175_v39  ;;  %v9834_v37 = vpop.f32.mrf.mxu1  ;;  %v4249_v25 = vand.u32 4294901760, %v4248_v6  ;;  %v4260_v0 = vsub.f32 %v9788_v29, %v12115_v41  ;;  %v12118_v41 = vand.u32 4294901760, %v9801_v13 }
 0x281   : > { %3818 = vmatpush.msra.mxu0 %v9640_v20  ;;  %4035 = vmatpush.msra.mxu3 %v9667_v56  ;;  %v4254_v33 = vsub.f32 %v9771_v49, %v12113_v7  ;;  %12114 = vst [vmem:[#allocation84_spill] sm:$0xff] %v9834_v37  ;;  %v3833_v7 = vand.u32 4294901760, %v3832_v17  ;;  %v4172_v49 = vld [vmem:[#allocation4 + $0x4a0] sm:$0xff] }
 0x282   : > { %4039 = vmatmul.f32.vlgmr.msra.gmra.mxu3 %v3825_v50  ;;  %4127 = vmatpush.msrb.mxu1 %v9474_v34  ;;  %v9830_v50 = vsub.f32 %v4176_v45, %v9805_v63  ;;  %v9832_v34 = vand.u32 4294901760, %v4174_v59  ;;  %v9842_v45 = vpop.f32.mrf.mxu0  ;;  %v9846_v37 = vsub.f32 %v4175_v39, %v9820_v53  ;;  %v4266_v29 = vsub.f32 %v9801_v13, %v12118_v41  ;;  %v4170_v41 = vld [vmem:[#allocation4 + $0x490] sm:$0xff] }
 0x283   : > { %4187 = vmatpush.msrb.mxu2 %v9719_v46  ;;  %4238 = vmatpush.msrb.mxu3 %v4237_v31  ;;  %v3827_v31 = vand.u32 4294901760, %v3826_v30  ;;  %12116 = vst [vmem:[#allocation85_spill] sm:$0xff] %v9842_v45  ;;  %v9851_v30 = vpop.f32.mrf.mxu2  ;;  %v4255_v6 = vand.u32 4294901760, %v4254_v33  ;;  %v12119_v45 = vand.u32 4294901760, %v9472_v38  ;;  %v4261_v33 = vand.u32 4294901760, %v4260_v0 }
 0x284   : > { %3820 = vmatpush.msra.mxu0 %v9655_v14  ;;  %4129 = vmatpush.msrb.mxu1 %v9485_v4  ;;  %12117 = vst [vmem:[#allocation86_spill] sm:$0xff] %v9851_v30  ;;  %v9861_v4 = vsub.f32 %v4174_v59, %v9832_v34  ;;  %v3834_v30 = vsub.f32 %v3832_v17, %v3833_v7  ;;  %v12121_v13 = vand.u32 4294901760, %v9483_v12  ;;  %v12122_v38 = vand.u32 4294901760, %v9818_v55  ;;  %v4169_v59 = vld [vmem:[#allocation4 + $0x488] sm:$0xff] }
 0x285   : > { %4189 = vmatpush.msrb.mxu2 %v9741_v27  ;;  %4244 = vmatpush.msrb.mxu3 %v4243_v44  ;;  %v9848_v44 = vand.u32 4294901760, %v4173_v2  ;;  %v4267_v0 = vand.u32 4294901760, %v4266_v29 }
 0x286   : > { %3822 = vmatpush.msra.mxu0 %v9667_v56  ;;  %3941 = vmatmul.f32.gmra.mxu1 %v9784_v5  ;;  %v4171_v5 = vld [vmem:[#allocation4 + $0x498] sm:$0xff]  ;;  %v3835_v29 = vand.u32 4294901760, %v3834_v30 }
 0x287   : > { %3828 = vmatmul.f32.vlgmr.msra.gmra.mxu0 %v3827_v31  ;;  %4131 = vmatpush.msrb.mxu1 %v9501_v1  ;;  %v9863_v31 = vand.u32 4294901760, %v4172_v49  ;;  %v9865_v1 = vpop.f32.mrf.mxu3  ;;  %v9875_v39 = vsub.f32 %v4173_v2, %v9848_v44  ;;  %v9889_v2 = vand.u32 4294901760, %v4170_v41 }
 0x288   : > { %4052 = vmatpush.msrb.mxu0 %v12119_v45  ;;  %4191 = vmatpush.msrb.mxu2 %v9752_v48  ;;  %12120 = vst [vmem:[#allocation87_spill] sm:$0xff] %v9865_v1  ;;  %v4272_v45 = vsub.f32 %v9818_v55, %v12122_v38  ;;  %v4165_v1 = vld [vmem:[#allocation3 + $0x1a] sm:$0xff] }
 0x289   : > { %4250 = vmatpush.msrb.mxu3 %v4249_v25  ;;  %4000 = vmatmul.f32.gmra.mxu2 %v3832_v17  ;;  %v9877_v25 = vand.u32 4294901760, %v4171_v5  ;;  %v12123_v17 = vand.u32 4294901760, %v9494_v43  ;;  %v9887_v38 = vsub.f32 %v4172_v49, %v9863_v31  ;;  %v12125_v43 = vand.u32 4294901760, %v9509_v42 }
 0x28a   : > { %4056 = vmatpush.msrb.mxu0 %v12121_v13  ;;  %4133 = vmatpush.msrb.mxu1 %v9521_v3  ;;  %v12124_v3 = vand.u32 4294901760, %v9830_v50  ;;  %v4168_v13 = vld [vmem:[#allocation4 + $0x480] sm:$0xff]  ;;  %v9906_v42 = vand.u32 4294901760, %v4169_v59  ;;  %v9908_v30 = vpop.f32.mrf.mxu0 }
 0x28b   : > { %4193 = vmatpush.msrb.mxu2 %v9762_v11  ;;  %4256 = vmatpush.msrb.mxu3 %v4255_v6  ;;  %v12126_v6 = vand.u32 4294901760, %v9846_v37  ;;  %v9920_v49 = vpop.f32.mrf.mxu2 }
 0x28c   : > { %4045 = vmatmul.f32.gmra.mxu3 %v3833_v7  ;;  %4060 = vmatpush.msrb.mxu0 %v12123_v17  ;;  %v4278_v12 = vsub.f32 %v9830_v50, %v12124_v3  ;;  %v4273_v7 = vand.u32 4294901760, %v4272_v45  ;;  %v9900_v3 = vsub.f32 %v4171_v5, %v9877_v25  ;;  %v12127_v45 = vand.u32 4294901760, %v9861_v4 }
 0x28d   : > { %4135 = vmatpush.msrb.mxu1 %v9537_v16  ;;  %4195 = vmatpush.msrb.mxu2 %v9773_v19  ;;  %v4284_v17 = vsub.f32 %v9846_v37, %v12126_v6  ;;  %v9902_v16 = vpop.f32.mrf.mxu1  ;;  %v9915_v6 = vsub.f32 %v4170_v41, %v9889_v2 }
 0x28e   : > { %4262 = vmatpush.msrb.mxu3 %v4261_v33  ;;  %4064 = vmatpush.msrb.mxu0 %v12125_v43  ;;  %v4279_v33 = vand.u32 4294901760, %v4278_v12  ;;  %v4290_v5 = vsub.f32 %v9861_v4, %v12127_v45  ;;  %v12129_v45 = vand.u32 4294901760, %v9875_v39 }
 0x28f   : > { %4137 = vmatpush.msrb.mxu1 %v9550_v9  ;;  %4197 = vmatpush.msrb.mxu2 %v9794_v36  ;;  %v12128_v9 = vand.u32 4294901760, %v9529_v23  ;;  %v4285_v12 = vand.u32 4294901760, %v4284_v17  ;;  %v12130_v23 = vand.u32 4294901760, %v9548_v15  ;;  %v12131_v17 = vand.u32 4294901760, %v9887_v38 }
 0x290   : > { %4268 = vmatpush.msrb.mxu3 %v4267_v0  ;;  %3836 = vmatmul.f32.gmra.mxu0 %v3835_v29  ;;  %v9922_v0 = vand.u32 4294901760, %v4168_v13  ;;  %v9924_v29 = vand.u32 4294901760, %v4165_v1  ;;  %v4296_v41 = vsub.f32 %v9875_v39, %v12129_v45  ;;  %v11723_v43 = vand.u32 4294901760, %v9915_v6 }
 0x291   : > { %4068 = vmatpush.msrb.mxu0 %v12128_v9  ;;  %4139 = vmatpush.msrb.mxu1 %v9569_v40  ;;  %v9934_v40 = vpop.f32.mrf.mxu3  ;;  %v9937_v9 = vsub.f32 %v4169_v59, %v9906_v42  ;;  %v4302_v45 = vsub.f32 %v9887_v38, %v12131_v17  ;;  %v12132_v15 = vand.u32 4294901760, %v9562_v10  ;;  %v12134_v17 = vand.u32 4294901760, %v9577_v32 }
 0x292   : > { %4199 = vmatpush.msrb.mxu2 %v9805_v63  ;;  %4274 = vmatpush.msrb.mxu3 %v4273_v7  ;;  %v4291_v7 = vand.u32 4294901760, %v4290_v5  ;;  %v9951_v59 = vsub.f32 %v4168_v13, %v9922_v0  ;;  %v12133_v5 = vand.u32 4294901760, %v9900_v3  ;;  %v4314_v13 = vsub.f32 %v9915_v6, %v11723_v43 }
 0x293   : > { %4072 = vmatpush.msrb.mxu0 %v12130_v23  ;;  %4141 = vmatpush.msrb.mxu1 %v9586_v61  ;;  %v9948_v61 = vsub.f32 %v4165_v1, %v9924_v29  ;;  %v4319_v10 = vand.u32 4294901760, %v9937_v9  ;;  %v4303_v1 = vand.u32 4294901760, %v4302_v45  ;;  %v12136_v45 = vand.u32 4294901760, %v9607_v62 }
 0x294   : > { %4201 = vmatpush.msrb.mxu2 %v9820_v53  ;;  %4280 = vmatpush.msrb.mxu3 %v4279_v33  ;;  %v4297_v33 = vand.u32 4294901760, %v4296_v41  ;;  %v4308_v23 = vsub.f32 %v9900_v3, %v12133_v5  ;;  %v4166_v41 = vld [vmem:[#allocation3 + $0x22] sm:$0xff] }
 0x295   : > { %4076 = vmatpush.msrb.mxu0 %v12132_v15  ;;  %4143 = vmatpush.msrb.mxu1 %v9597_v58  ;;  %v3151_v58 = vpop.f32.mrf.mxu1  ;;  %v12135_v15 = vand.u32 4294901760, %v9595_v47  ;;  %v4218_v32 = vand.u32 4294901760, %v9948_v61  ;;  %v4320_v47 = vsub.f32 %v9937_v9, %v4319_v10 }
 0x296   : > { %4203 = vmatpush.msrb.mxu2 %v9832_v34  ;;  %4286 = vmatpush.msrb.mxu3 %v4285_v12 }
 0x297   : > { %4080 = vmatpush.msrb.mxu0 %v12134_v17  ;;  %4145 = vmatpush.msrb.mxu1 %v9609_v26  ;;  %v4325_v26 = vand.u32 4294901760, %v9951_v59  ;;  %v3209_v17 = vpop.f32.mrf.mxu2  ;;  %v4219_v62 = vsub.f32 %v9948_v61, %v4218_v32 }
 0x298   : > { %4205 = vmatpush.msrb.mxu2 %v9848_v44  ;;  %4292 = vmatpush.msrb.mxu3 %v4291_v7  ;;  %v3042_v12 = vpop.f32.mrf.mxu0  ;;  %v4309_v7 = vand.u32 4294901760, %v4308_v23 }
 0x299   : > { %4084 = vmatpush.msrb.mxu0 %v12135_v15  ;;  %4147 = vmatpush.msrb.mxu1 %v9623_v18  ;;  %v3152_v5 = vadd.f32 %v3151_v58, %v3042_v12  ;;  %v9977_v15 = vand.u32 4294901760, %v4166_v41  ;;  %v3253_v43 = vpop.f32.mrf.mxu3  ;;  %v4315_v58 = vand.u32 4294901760, %v4314_v13  ;;  %v4220_v13 = vand.u32 4294901760, %v4219_v62 }
 0x29a   : > { %4207 = vmatpush.msrb.mxu2 %v9863_v31  ;;  %4298 = vmatpush.msrb.mxu3 %v4297_v33  ;;  %v12137_v33 = vand.u32 4294901760, %v9621_v8  ;;  %v4321_v8 = vand.u32 4294901760, %v4320_v47 }
 0x29b   : > { %4088 = vmatpush.msrb.mxu0 %v12136_v45  ;;  %4149 = vmatpush.msrb.mxu1 %v9640_v20  ;;  %v3210_v18 = vadd.f32 %v3209_v17, %v3152_v5  ;;  %v4326_v20 = vsub.f32 %v9951_v59, %v4325_v26  ;;  %v12141_v45 = vand.u32 4294901760, %v9665_v57 }
 0x29c   : > { %4209 = vmatpush.msrb.mxu2 %v9877_v25  ;;  %4304 = vmatpush.msrb.mxu3 %v4303_v1  ;;  %v12138_v1 = vand.u32 4294901760, %v9638_v35 }
 0x29d   : > { %4092 = vmatpush.msrb.mxu0 %v12137_v33  ;;  %4151 = vmatpush.msrb.mxu1 %v9655_v14  ;;  %v9989_v23 = vadd.f32 %v3253_v43, %v3210_v18  ;;  %v9996_v14 = vsub.f32 %v4166_v41, %v9977_v15  ;;  %v12139_v43 = vand.u32 4294901760, %v9653_v52  ;;  %v4327_v12 = vand.u32 4294901760, %v4326_v20  ;;  %v3155_v5 = vpop.f32.mrf.mxu1  ;;  %v12143_v33 = vld [vmem:[#allocation25_spill] sm:$0xff] }
 0x29e   : > { %4211 = vmatpush.msrb.mxu2 %v9889_v2  ;;  %4310 = vmatpush.msrb.mxu3 %v4309_v7  ;;  %v12140_v7 = vand.u32 4294901760, %v9730_v51  ;;  %v12144_v20 = vand.u32 4294901760, %v9744_v22 }
 0x29f   : > { %4096 = vmatpush.msrb.mxu0 %v12138_v1  ;;  %4153 = vmatpush.msrb.mxu1 %v9667_v56  ;;  %v4226_v56 = vand.u32 4294901760, %v9996_v14  ;;  %v12145_v1 = vand.u32 4294901760, %v9677_v28 }
 0x2a0   : > { %4213 = vmatpush.msrb.mxu2 %v9906_v42  ;;  %4316 = vmatpush.msrb.mxu3 %v4315_v58  ;;  %v3214_v41 = vpop.f32.mrf.mxu2  ;;  %v12142_v58 = vld [vmem:[#allocation20_spill] sm:$0xff] }
 0x2a1   : > { %4155 = vmatmul.f32.vlgmr.msrb.gmra.mxu1 %v9736_v21  ;;  %4100 = vmatpush.msrb.mxu0 %v12139_v43  ;;  %v3050_v17 = vpop.f32.mrf.mxu0  ;;  %v817_v62 = vadd.f32 %v12143_v33, %v12142_v58  ;;  %v4227_v57 = vsub.f32 %v9996_v14, %v4226_v56  ;;  %v12147_v43 = vand.u32 4294901760, %v9689_v24 }
 0x2a2   : > { %4398 = vmatpush.msra.mxu1 %v9711_v54  ;;  %4215 = vmatpush.msrb.mxu2 %v9922_v0  ;;  %v3156_v35 = vadd.f32 %v3155_v5, %v3050_v17  ;;  %v12150_v5 = vld [vmem:[#allocation18_spill] sm:$0xff]  ;;  %v12151_v17 = vld [vmem:[#allocation23_spill] sm:$0xff] }
 0x2a3   : > { %4322 = vmatpush.msrb.mxu3 %v4321_v8  ;;  %4221 = vmatmul.f32.vlgmr.msrb.gmra.mxu2 %v4220_v13  ;;  %v3259_v47 = vpop.f32.mrf.mxu3  ;;  %v12146_v8 = vand.u32 4294901760, %v9760_v60  ;;  %v12148_v13 = vld [vmem:[#allocation78_spill] sm:$0xff]  ;;  %v4228_v28 = vand.u32 4294901760, %v4227_v57 }
 0x2a4   : > { %4400 = vmatpush.msra.mxu1 %v9719_v46  ;;  %4445 = vmatpush.msra.mxu2 %v12140_v7  ;;  %v3215_v52 = vadd.f32 %v3214_v41, %v3156_v35  ;;  %v821_v35 = vadd.f32 %v12151_v17, %v12150_v5  ;;  %v12152_v41 = vld [vmem:[#allocation76_spill] sm:$0xff]  ;;  %v12165_v17 = vand.u32 4294901760, %v9830_v50 }
 0x2a5   : > { %4104 = vmatpush.msrb.mxu0 %v12141_v45  ;;  %4328 = vmatpush.msrb.mxu3 %v4327_v12  ;;  %v12153_v7 = vand.u32 4294901760, %v12152_v41  ;;  %v4573_v5 = vld [vmem:[#allocation4 + $0x560] sm:$0xff] }
 0x2a6   : > { %4330 = vmatmul.f32.vlgmr.msrb.gmra.mxu3 %v9924_v29  ;;  %4402 = vmatpush.msra.mxu1 %v9741_v27  ;;  %v10012_v18 = vadd.f32 %v3259_v47, %v3215_v52  ;;  %v12155_v52 = vld [vmem:[#allocation21_spill] sm:$0xff] }
 0x2a7   : > { %4449 = vmatpush.msra.mxu2 %v12144_v20  ;;  %4516 = vmatpush.msra.mxu3 %v9711_v54  ;;  %v12149_v54 = vld [vmem:[#allocation28_spill] sm:$0xff]  ;;  %v880_v45 = vadd.f32 %v12155_v52, %v821_v35  ;;  %v12166_v35 = vand.u32 4294901760, %v9846_v37 }
 0x2a8   : > { %4108 = vmatpush.msrb.mxu0 %v12145_v1  ;;  %4404 = vmatpush.msra.mxu1 %v9752_v48  ;;  %v875_v12 = vadd.f32 %v12149_v54, %v817_v62  ;;  %v4575_v62 = vld [vmem:[#allocation4 + $0x570] sm:$0xff]  ;;  %v4574_v1 = vld [vmem:[#allocation4 + $0x568] sm:$0xff] }
 0x2a9   : > { %4453 = vmatpush.msra.mxu2 %v12146_v8  ;;  %4518 = vmatpush.msra.mxu3 %v9719_v46  ;;  %v12154_v46 = vld [vmem:[#allocation17_spill] sm:$0xff]  ;;  %v10063_v8 = vand.u32 4294901760, %v4575_v62  ;;  %v12164_v54 = vld [vmem:[#allocation34_spill] sm:$0xff] }
 0x2aa   : > { %4112 = vmatpush.msrb.mxu0 %v12147_v43  ;;  %4159 = vmatmul.f32.gmra.mxu1 %v12148_v13  ;;  %v919_v24 = vadd.f32 %v12154_v46, %v875_v12  ;;  %v12163_v43 = vld [vmem:[#allocation24_spill] sm:$0xff] }
 0x2ab   : > { %4114 = vmatmul.f32.vlgmr.msrb.gmra.mxu0 %v9736_v21  ;;  %4406 = vmatpush.msra.mxu1 %v9762_v11  ;;  %v12156_v21 = vld [vmem:[#allocation79_spill] sm:$0xff] }
 0x2ac   : > { %4340 = vmatpush.msra.mxu0 %v9730_v51  ;;  %4457 = vmatpush.msra.mxu2 %v12153_v7  ;;  %v12157_v47 = vand.u32 4294901760, %v12156_v21  ;;  %v4576_v51 = vld [vmem:[#allocation4 + $0x578] sm:$0xff] }
 0x2ad   : > { %4520 = vmatpush.msra.mxu3 %v9741_v27  ;;  %4229 = vmatmul.f32.gmra.mxu2 %v4228_v28  ;;  %v12158_v27 = vld [vmem:[#allocation33_spill] sm:$0xff]  ;;  %v10055_v20 = vand.u32 4294901760, %v4576_v51  ;;  %v10083_v28 = vsub.f32 %v4575_v62, %v10063_v8  ;;  %v12167_v7 = vld [vmem:[#allocation19_spill] sm:$0xff] }
 0x2ae   : > { %4343 = vmatpush.msra.mxu0 %v9744_v22  ;;  %4408 = vmatpush.msra.mxu1 %v9773_v19  ;;  %v994_v58 = vadd.f32 %v12158_v27, %v919_v24  ;;  %v12159_v22 = vld [vmem:[#allocation82_spill] sm:$0xff]  ;;  %v12168_v24 = vld [vmem:[#allocation32_spill] sm:$0xff] }
 0x2af   : > { %4461 = vmatpush.msra.mxu2 %v12157_v47  ;;  %4522 = vmatpush.msra.mxu3 %v9752_v48  ;;  %v12160_v33 = vand.u32 4294901760, %v12159_v22  ;;  %v12161_v48 = vld [vmem:[#allocation29_spill] sm:$0xff] }
 0x2b0   : > { %4334 = vmatmul.f32.gmra.mxu3 %v9977_v15  ;;  %4346 = vmatpush.msra.mxu0 %v9760_v60  ;;  %v925_v57 = vadd.f32 %v12161_v48, %v880_v45  ;;  %v12162_v60 = vand.u32 4294901760, %v9818_v55  ;;  %v12169_v45 = vand.u32 4294901760, %v9861_v4  ;;  %v4571_v27 = vld [vmem:[#allocation4 + $0x550] sm:$0xff] }
 0x2b1   : > { %4410 = vmatpush.msra.mxu1 %v9794_v36  ;;  %4465 = vmatpush.msra.mxu2 %v12160_v33  ;;  %v12172_v48 = vld [vmem:[#allocation22_spill] sm:$0xff] }
 0x2b2   : > { %4524 = vmatpush.msra.mxu3 %v9762_v11  ;;  %4349 = vmatpush.msra.mxu0 %v12152_v41  ;;  %v1035_v11 = vadd.f32 %v12163_v43, %v994_v58  ;;  %v998_v12 = vadd.f32 %v12164_v54, %v925_v57  ;;  %v10085_v41 = vand.u32 4294901760, %v4573_v5  ;;  %v3369_v47 = vpop.f32.mrf.mxu1  ;;  %v12170_v58 = vand.u32 4294901760, %v9875_v39  ;;  %v12174_v54 = vld [vmem:[#allocation37_spill] sm:$0xff] }
 0x2b3   : > { %4412 = vmatpush.msra.mxu1 %v9805_v63  ;;  %4469 = vmatpush.msra.mxu2 %v12162_v60  ;;  %v4570_v60 = vld [vmem:[#allocation4 + $0x548] sm:$0xff] }
 0x2b4   : > { %4526 = vmatpush.msra.mxu3 %v9773_v19  ;;  %4118 = vmatmul.f32.gmra.mxu0 %v12148_v13  ;;  %v10073_v19 = vsub.f32 %v4576_v51, %v10055_v20  ;;  %v10075_v13 = vand.u32 4294901760, %v4574_v1  ;;  %v1080_v46 = vadd.f32 %v12167_v7, %v1035_v11  ;;  %v1039_v52 = vadd.f32 %v12168_v24, %v998_v12 }
 0x2b5   : > { %4352 = vmatpush.msra.mxu0 %v12156_v21  ;;  %4414 = vmatpush.msra.mxu1 %v9820_v53  ;;  %v10123_v11 = vand.u32 4294901760, %v4571_v27  ;;  %v10138_v7 = vand.u32 4294901760, %v4570_v60 }
 0x2b6   : > { %4473 = vmatpush.msra.mxu2 %v12165_v17  ;;  %4528 = vmatpush.msra.mxu3 %v9794_v36  ;;  %v4572_v36 = vld [vmem:[#allocation4 + $0x558] sm:$0xff]  ;;  %v10096_v21 = vsub.f32 %v4574_v1, %v10075_v13  ;;  %v1088_v57 = vadd.f32 %v12172_v48, %v1039_v52  ;;  %v12173_v1 = vand.u32 4294901760, %v9887_v38 }
 0x2b7   : > { %4355 = vmatpush.msra.mxu0 %v12159_v22  ;;  %4416 = vmatpush.msra.mxu1 %v9832_v34  ;;  %v10100_v51 = vand.u32 4294901760, %v4572_v36  ;;  %v10107_v22 = vsub.f32 %v4573_v5, %v10085_v41  ;;  %v12176_v5 = vand.u32 4294901760, %v9900_v3  ;;  %v10150_v52 = vsub.f32 %v4571_v27, %v10123_v11 }
 0x2b8   : > { %4477 = vmatpush.msra.mxu2 %v12166_v35  ;;  %4530 = vmatpush.msra.mxu3 %v9805_v63  ;;  %v11733_v63 = vand.u32 4294901760, %v10073_v19  ;;  %v10166_v48 = vsub.f32 %v4570_v60, %v10138_v7 }
 0x2b9   : > { %4358 = vmatpush.msra.mxu0 %v9818_v55  ;;  %4418 = vmatpush.msra.mxu1 %v9848_v44  ;;  %v10129_v12 = vsub.f32 %v4572_v36, %v10100_v51  ;;  %v11728_v35 = vand.u32 4294901760, %v10107_v22  ;;  %v12178_v36 = vand.u32 4294901760, %v9915_v6  ;;  %12179 = vst [vmem:[#allocation25_spill] sm:$0xff] %v10150_v52 }
 0x2ba   : > { %4481 = vmatpush.msra.mxu2 %v12169_v45  ;;  %4532 = vmatpush.msra.mxu3 %v9820_v53  ;;  %v11732_v53 = vand.u32 4294901760, %v10083_v28  ;;  %12182 = vst [vmem:[#allocation78_spill] sm:$0xff] %v10166_v48 }
 0x2bb   : > { %4361 = vmatpush.msra.mxu0 %v9830_v50  ;;  %4420 = vmatpush.msra.mxu1 %v9863_v31  ;;  %v3328_v55 = vpop.f32.mrf.mxu0  ;;  %v12171_v50 = vld [vmem:[#allocation35_spill] sm:$0xff]  ;;  %12175 = vst [vmem:[#allocation20_spill] sm:$0xff] %v10129_v12 }
 0x2bc   : > { %4485 = vmatpush.msra.mxu2 %v12170_v58  ;;  %4534 = vmatpush.msra.mxu3 %v9832_v34  ;;  %v3329_v33 = vadd.f32 %v3328_v55, %v9989_v23  ;;  %v1189_v62 = vadd.f32 %v12171_v50, %v1080_v46  ;;  %v4629_v34 = vsub.f32 %v10073_v19, %v11733_v63  ;;  %v11729_v23 = vand.u32 4294901760, %v10096_v21  ;;  %v12180_v55 = vld [vmem:[#allocation36_spill] sm:$0xff]  ;;  %v12181_v58 = vld [vmem:[#allocation41_spill] sm:$0xff] }
 0x2bd   : > { %4364 = vmatpush.msra.mxu0 %v9846_v37  ;;  %4422 = vmatpush.msra.mxu1 %v9877_v25  ;;  %v4635_v17 = vsub.f32 %v10083_v28, %v11732_v53 }
 0x2be   : > { %4489 = vmatpush.msra.mxu2 %v12173_v1  ;;  %4536 = vmatpush.msra.mxu3 %v9848_v44  ;;  %v10121_v43 = vadd.f32 %v3369_v47, %v3329_v33  ;;  %v1247_v37 = vadd.f32 %v12174_v54, %v1189_v62  ;;  %v4569_v44 = vld [vmem:[#allocation4 + $0x540] sm:$0xff]  ;;  %v4641_v24 = vsub.f32 %v10096_v21, %v11729_v23  ;;  %v4568_v47 = vld [vmem:[#allocation4 + $0x538] sm:$0xff]  ;;  %v12183_v1 = vld [vmem:[#allocation45_spill] sm:$0xff] }
 0x2bf   : > { %4367 = vmatpush.msra.mxu0 %v9861_v4  ;;  %4424 = vmatpush.msra.mxu1 %v9889_v2  ;;  %v12177_v4 = vld [vmem:[#allocation30_spill] sm:$0xff]  ;;  %v10152_v45 = vand.u32 4294901760, %v4569_v44  ;;  %v4636_v27 = vand.u32 4294901760, %v4635_v17  ;;  %v4647_v62 = vsub.f32 %v10107_v22, %v11728_v35  ;;  %v4566_v17 = vld [vmem:[#allocation4 + $0x528] sm:$0xff] }
 0x2c0   : > { %4493 = vmatpush.msra.mxu2 %v12176_v5  ;;  %4538 = vmatpush.msra.mxu3 %v9863_v31  ;;  %v1193_v46 = vadd.f32 %v12177_v4, %v1088_v57  ;;  %v4630_v31 = vand.u32 4294901760, %v4629_v34  ;;  %v4567_v57 = vld [vmem:[#allocation4 + $0x530] sm:$0xff]  ;;  %v12184_v34 = vld [vmem:[#allocation44_spill] sm:$0xff]  ;;  %v4642_v60 = vand.u32 4294901760, %v4641_v24 }
 0x2c1   : > { %4370 = vmatpush.msra.mxu0 %v9875_v39  ;;  %4426 = vmatpush.msra.mxu1 %v9906_v42  ;;  %v1291_v39 = vadd.f32 %v12180_v55, %v1247_v37  ;;  %v1580_v54 = vadd.f32 %v12184_v34, %v12183_v1  ;;  %v11726_v37 = vand.u32 4294901760, %v10150_v52  ;;  %v12186_v4 = vld [vmem:[#allocation40_spill] sm:$0xff]  ;;  %v12188_v55 = vld [vmem:[#allocation46_spill] sm:$0xff] }
 0x2c2   : > { %4497 = vmatpush.msra.mxu2 %v12178_v36  ;;  %4540 = vmatpush.msra.mxu3 %v9877_v25  ;;  %v1252_v33 = vadd.f32 %v12181_v58, %v1193_v46  ;;  %v11727_v25 = vand.u32 4294901760, %v10129_v12  ;;  %v12187_v46 = vld [vmem:[#allocation38_spill] sm:$0xff]  ;;  %v4565_v24 = vld [vmem:[#allocation4 + $0x520] sm:$0xff] }
 0x2c3   : > { %4373 = vmatpush.msra.mxu0 %v9887_v38  ;;  %4428 = vmatpush.msra.mxu1 %v9922_v0  ;;  %v3332_v50 = vpop.f32.mrf.mxu0  ;;  %v1366_v36 = vadd.f32 %v12187_v46, %v1291_v39  ;;  %v1638_v58 = vadd.f32 %v12188_v55, %v1580_v54  ;;  %v12191_v39 = vld [vmem:[#allocation48_spill] sm:$0xff]  ;;  %v12192_v1 = vld [vmem:[#allocation42_spill] sm:$0xff]  ;;  %v10216_v54 = vand.u32 4294901760, %v4565_v24 }
 0x2c4   : > { %4501 = vmatpush.msra.mxu2 %v4319_v10  ;;  %4542 = vmatpush.msra.mxu3 %v9889_v2  ;;  %v3333_v38 = vadd.f32 %v3332_v50, %v10012_v18  ;;  %v3373_v2 = vpop.f32.mrf.mxu1  ;;  %v10174_v10 = vand.u32 4294901760, %v4568_v47  ;;  %v10180_v18 = vsub.f32 %v4569_v44, %v10152_v45  ;;  %v4648_v44 = vand.u32 4294901760, %v4647_v62  ;;  %v12190_v50 = vld [vmem:[#allocation49_spill] sm:$0xff] }
 0x2c5   : > { %4432 = vmatmul.f32.vlgmr.msra.gmra.mxu1 %v4218_v32  ;;  %4376 = vmatpush.msra.mxu0 %v9900_v3  ;;  %v1297_v32 = vadd.f32 %v12186_v4, %v1252_v33  ;;  %v4653_v3 = vsub.f32 %v10129_v12, %v11727_v25  ;;  %v10201_v33 = vand.u32 4294901760, %v4566_v17  ;;  %v4659_v62 = vsub.f32 %v10150_v52, %v11726_v37  ;;  %v12196_v4 = vld [vmem:[#allocation16_spill] sm:$0xff]  ;;  %v4563_v55 = vld [vmem:[#allocation4 + $0x510] sm:$0xff]  ;;  %v12208_v25 = vld [vmem:[#allocation75_spill] sm:$0xff] }
 0x2c6   : > { %4631 = vmatpush.msrb.mxu1 %v4630_v31  ;;  %4505 = vmatpush.msra.mxu2 %v4325_v26  ;;  %12185 = vst [vmem:[#allocation28_spill] sm:$0xff] %v10180_v18  ;;  %v10182_v5 = vadd.f32 %v3373_v2, %v3333_v38  ;;  %v10190_v26 = vand.u32 4294901760, %v4567_v57  ;;  %v11724_v31 = vand.u32 4294901760, %v10166_v48  ;;  %v11725_v38 = vand.u32 4294901760, %v10180_v18 }
 0x2c7   : > { %4544 = vmatpush.msra.mxu3 %v9906_v42  ;;  %4507 = vmatmul.f32.vlgmr.msra.gmra.mxu2 %v9924_v29  ;;  %v10199_v42 = vsub.f32 %v4568_v47, %v10174_v10  ;;  %v4654_v47 = vand.u32 4294901760, %v4653_v3  ;;  %v12197_v3 = vld [vmem:[#allocation47_spill] sm:$0xff] }
 0x2c8   : > { %4637 = vmatpush.msrb.mxu1 %v4636_v27  ;;  %4733 = vmatpush.msrb.mxu2 %v10073_v19  ;;  %v1584_v27 = vadd.f32 %v12191_v39, %v12190_v50  ;;  %v10214_v34 = vsub.f32 %v4567_v57, %v10190_v26  ;;  %v1682_v50 = vadd.f32 %v12197_v3, %v1638_v58  ;;  %v4660_v58 = vand.u32 4294901760, %v4659_v62  ;;  %v4562_v3 = vld [vmem:[#allocation4 + $0x508] sm:$0xff]  ;;  %v12202_v62 = vld [vmem:[#allocation26_spill] sm:$0xff] }
 0x2c9   : > { %4379 = vmatpush.msra.mxu0 %v9915_v6  ;;  %4546 = vmatpush.msra.mxu3 %v9922_v0  ;;  %12189 = vst [vmem:[#allocation18_spill] sm:$0xff] %v10199_v42  ;;  %v4564_v6 = vld [vmem:[#allocation4 + $0x518] sm:$0xff]  ;;  %v1370_v0 = vadd.f32 %v12192_v1, %v1297_v32  ;;  %v4665_v32 = vsub.f32 %v10166_v48, %v11724_v31  ;;  %v11730_v57 = vand.u32 4294901760, %v10199_v42  ;;  %v12200_v1 = vld [vmem:[#allocation57_spill] sm:$0xff] }
 0x2ca   : > { %4548 = vmatmul.f32.vlgmr.msra.gmra.mxu3 %v9924_v29  ;;  %4643 = vmatpush.msrb.mxu1 %v4642_v60  ;;  %12193 = vst [vmem:[#allocation23_spill] sm:$0xff] %v10214_v34  ;;  %v12194_v29 = vld [vmem:[#allocation39_spill] sm:$0xff]  ;;  %v10234_v39 = vand.u32 4294901760, %v4564_v6 }
 0x2cb   : > { %4736 = vmatpush.msrb.mxu2 %v10083_v28  ;;  %4791 = vmatpush.msrb.mxu3 %v10055_v20  ;;  %v10219_v2 = vadd.f32 %v12194_v29, %v1366_v36  ;;  %v12195_v60 = vld [vmem:[#allocation27_spill] sm:$0xff]  ;;  %v10232_v36 = vsub.f32 %v4566_v17, %v10201_v33 }
 0x2cc   : > { %v1973_v46 = vadd.f32 %v12196_v4, %v12195_v60  ;;  %4382 = vmatpush.msra.mxu0 %v9937_v9  ;;  %4649 = vmatpush.msrb.mxu1 %v4648_v44  ;;  %v12199_v9 = vld [vmem:[#allocation50_spill] sm:$0xff]  ;;  %v4671_v60 = vsub.f32 %v10180_v18, %v11725_v38  ;;  %v3436_v4 = vpop.f32.mrf.mxu2  ;;  %v12201_v17 = vld [vmem:[#allocation43_spill] sm:$0xff]  ;;  %v12204_v38 = vld [vmem:[#allocation64_spill] sm:$0xff] }
 0x2cd   : > { %4739 = vmatpush.msrb.mxu2 %v10096_v21  ;;  %4793 = vmatpush.msrb.mxu3 %v10063_v8  ;;  %12198 = vst [vmem:[#allocation76_spill] sm:$0xff] %v10232_v36  ;;  %v1643_v44 = vadd.f32 %v12199_v9, %v1584_v27  ;;  %v10245_v31 = vadd.f32 %v12201_v17, %v1370_v0  ;;  %v11731_v27 = vand.u32 4294901760, %v10214_v34  ;;  %v4666_v0 = vand.u32 4294901760, %v4665_v32 }
 0x2ce   : > { %v2031_v29 = vadd.f32 %v12200_v1, %v1973_v46  ;;  %4385 = vmatpush.msra.mxu0 %v9951_v59  ;;  %4438 = vmatmul.f32.gmra.mxu1 %v4226_v56  ;;  %v10250_v59 = vsub.f32 %v4565_v24, %v10216_v54  ;;  %v10252_v56 = vand.u32 4294901760, %v4563_v55  ;;  %v1757_v9 = vadd.f32 %v12202_v62, %v1682_v50  ;;  %v12203_v1 = vld [vmem:[#allocation65_spill] sm:$0xff]  ;;  %v12205_v62 = vld [vmem:[#allocation51_spill] sm:$0xff] }
 0x2cf   : > { %4388 = vmatmul.f32.vlgmr.msra.gmra.mxu0 %v9948_v61  ;;  %4655 = vmatpush.msrb.mxu1 %v4654_v47  ;;  %v3545_v46 = vpop.f32.mrf.mxu3  ;;  %v2366_v37 = vadd.f32 %v12204_v38, %v12203_v1  ;;  %v4561_v47 = vld [vmem:[#allocation4 + $0x500] sm:$0xff]  ;;  %v4677_v24 = vsub.f32 %v10199_v42, %v11730_v57  ;;  %v11734_v50 = vand.u32 4294901760, %v10232_v36  ;;  %v10268_v38 = vsub.f32 %v4564_v6, %v10234_v39  ;;  %v12207_v1 = vld [vmem:[#allocation74_spill] sm:$0xff] }
 0x2d0   : > { %4578 = vmatpush.msrb.mxu0 %v10055_v20  ;;  %4742 = vmatpush.msrb.mxu2 %v10107_v22  ;;  %v10259_v61 = vadd.f32 %v3545_v46, %v3436_v4  ;;  %v10270_v17 = vand.u32 4294901760, %v4562_v3  ;;  %v1688_v32 = vadd.f32 %v12205_v62, %v1643_v44  ;;  %v12206_v4 = vld [vmem:[#allocation56_spill] sm:$0xff]  ;;  %v2759_v35 = vadd.f32 %v12208_v25, %v12207_v1 }
 0x2d1   : > { %4795 = vmatpush.msrb.mxu3 %v10075_v13  ;;  %4511 = vmatmul.f32.gmra.mxu2 %v9977_v15  ;;  %v2075_v46 = vadd.f32 %v12206_v4, %v2031_v29  ;;  %v4672_v23 = vand.u32 4294901760, %v4671_v60  ;;  %v4683_v6 = vsub.f32 %v10214_v34, %v11731_v27  ;;  %v11735_v57 = vand.u32 4294901760, %v10250_v59  ;;  %v12209_v25 = vld [vmem:[#allocation52_spill] sm:$0xff]  ;;  %v12210_v4 = vld [vmem:[#allocation66_spill] sm:$0xff]  ;;  %v12211_v60 = vld [vmem:[#allocation85_spill] sm:$0xff] }
 0x2d2   : > { %4580 = vmatpush.msrb.mxu0 %v10063_v8  ;;  %4661 = vmatpush.msrb.mxu1 %v4660_v58  ;;  %v10284_v44 = vsub.f32 %v4563_v55, %v10252_v56  ;;  %v10286_v29 = vand.u32 4294901760, %v4561_v47  ;;  %v1798_v62 = vadd.f32 %v12209_v25, %v1757_v9  ;;  %v2424_v58 = vadd.f32 %v12210_v4, %v2366_v37  ;;  %v12212_v37 = vld [vmem:[#allocation53_spill] sm:$0xff]  ;;  %v12214_v4 = vld [vmem:[#allocation55_spill] sm:$0xff] }
 0x2d3   : > { %4745 = vmatpush.msrb.mxu2 %v10129_v12  ;;  %4797 = vmatpush.msrb.mxu3 %v10085_v41  ;;  %v2817_v1 = vadd.f32 %v12211_v60, %v2759_v35  ;;  %v4678_v27 = vand.u32 4294901760, %v4677_v24  ;;  %v4689_v55 = vsub.f32 %v10232_v36, %v11734_v50  ;;  %v10299_v9 = vsub.f32 %v4562_v3, %v10270_v17  ;;  %v12213_v35 = vld [vmem:[#allocation54_spill] sm:$0xff] }
 0x2d4   : > { %4552 = vmatmul.f32.gmra.mxu3 %v9977_v15  ;;  %4582 = vmatpush.msrb.mxu0 %v10075_v13  ;;  %v1761_v25 = vadd.f32 %v12212_v37, %v1688_v32  ;;  %v1977_v15 = vadd.f32 %v12214_v4, %v12213_v35  ;;  %v12215_v60 = vld [vmem:[#allocation58_spill] sm:$0xff]  ;;  %v4695_v3 = vsub.f32 %v10250_v59, %v11735_v57  ;;  %v12216_v37 = vld [vmem:[#allocation61_spill] sm:$0xff] }
 0x2d5   : > { %4667 = vmatpush.msrb.mxu1 %v4666_v0  ;;  %4748 = vmatpush.msrb.mxu2 %v10150_v52  ;;  %v2150_v63 = vadd.f32 %v12215_v60, %v2075_v46  ;;  %v4684_v0 = vand.u32 4294901760, %v4683_v6  ;;  %v10313_v32 = vsub.f32 %v4561_v47, %v10286_v29  ;;  %v12217_v46 = vld [vmem:[#allocation67_spill] sm:$0xff]  ;;  %v12218_v60 = vld [vmem:[#allocation84_spill] sm:$0xff]  ;;  %v4690_v57 = vand.u32 4294901760, %v4689_v55 }
 0x2d6   : > { %4799 = vmatpush.msrb.mxu3 %v10100_v51  ;;  %4584 = vmatpush.msrb.mxu0 %v10085_v41  ;;  %v2036_v35 = vadd.f32 %v12216_v37, %v1977_v15  ;;  %v2468_v4 = vadd.f32 %v12217_v46, %v2424_v58  ;;  %v2861_v50 = vadd.f32 %v12218_v60, %v2817_v1  ;;  %v4969_v6 = vld [vmem:[#allocation4 + $0x5f8] sm:$0xff]  ;;  %v12219_v47 = vand.u32 4294901760, %v10268_v38  ;;  %v12221_v46 = vld [vmem:[#allocation69_spill] sm:$0xff]  ;;  %v12222_v60 = vld [vmem:[#allocation68_spill] sm:$0xff] }
 0x2d7   : > { %4673 = vmatpush.msrb.mxu1 %v4672_v23  ;;  %4751 = vmatpush.msrb.mxu2 %v10166_v48  ;;  %v3444_v23 = vpop.f32.mrf.mxu2  ;;  %v12220_v1 = vld [vmem:[#allocation59_spill] sm:$0xff]  ;;  %v12223_v48 = vld [vmem:[#allocation73_spill] sm:$0xff]  ;;  %v4696_v55 = vand.u32 4294901760, %v4695_v3  ;;  %v12228_v15 = vld [vmem:[#allocation86_spill] sm:$0xff] }
 0x2d8   : > { %4801 = vmatpush.msrb.mxu3 %v10123_v11  ;;  %4393 = vmatmul.f32.gmra.mxu0 %v9996_v14  ;;  %v3549_v53 = vpop.f32.mrf.mxu3  ;;  %v4701_v24 = vsub.f32 %v10268_v38, %v12219_v47  ;;  %v2191_v37 = vadd.f32 %v12220_v1, %v2150_v63  ;;  %v2370_v14 = vadd.f32 %v12222_v60, %v12221_v46  ;;  %v12224_v47 = vand.u32 4294901760, %v10284_v44  ;;  %v12225_v1 = vld [vmem:[#allocation60_spill] sm:$0xff] }
 0x2d9   : > { %4586 = vmatpush.msrb.mxu0 %v10100_v51  ;;  %4679 = vmatpush.msrb.mxu1 %v4678_v27  ;;  %v10325_v58 = vadd.f32 %v3549_v53, %v3444_v23  ;;  %v2543_v52 = vadd.f32 %v12223_v48, %v2468_v4  ;;  %v4968_v27 = vld [vmem:[#allocation4 + $0x5f0] sm:$0xff]  ;;  %v10338_v23 = vand.u32 4294901760, %v4969_v6  ;;  %v2081_v46 = vadd.f32 %v12225_v1, %v2036_v35  ;;  %v12227_v4 = vld [vmem:[#allocation83_spill] sm:$0xff] }
 0x2da   : > { %4754 = vmatpush.msrb.mxu2 %v10180_v18  ;;  %4803 = vmatpush.msrb.mxu3 %v10138_v7  ;;  %v4707_v53 = vsub.f32 %v10284_v44, %v12224_v47  ;;  %v12226_v48 = vld [vmem:[#allocation81_spill] sm:$0xff]  ;;  %v2936_v18 = vadd.f32 %v12228_v15, %v2861_v50  ;;  %v4702_v3 = vand.u32 4294901760, %v4701_v24  ;;  %v12229_v47 = vand.u32 4294901760, %v10299_v9  ;;  %v12231_v50 = vld [vmem:[#allocation72_spill] sm:$0xff] }
 0x2db   : > { %4588 = vmatpush.msrb.mxu0 %v10123_v11  ;;  %4685 = vmatpush.msrb.mxu1 %v4684_v0  ;;  %v2763_v60 = vadd.f32 %v12227_v4, %v12226_v48  ;;  %v1804_v0 = vadd.f32 %v1798_v62, %v10219_v2  ;;  %v4558_v35 = vld [vmem:[#allocation3 + $0x1b] sm:$0xff]  ;;  %v10351_v1 = vand.u32 4294901760, %v4968_v27  ;;  %v12230_v48 = vld [vmem:[#allocation70_spill] sm:$0xff]  ;;  %v2584_v15 = vadd.f32 %v12231_v50, %v2543_v52 }
 0x2dc   : > { %4757 = vmatpush.msrb.mxu2 %v10199_v42  ;;  %4805 = vmatpush.msrb.mxu3 %v10152_v45  ;;  %v4713_v63 = vsub.f32 %v10299_v9, %v12229_v47  ;;  %v2429_v4 = vadd.f32 %v12230_v48, %v2370_v14  ;;  %v4967_v2 = vld [vmem:[#allocation4 + $0x5e8] sm:$0xff]  ;;  %v4708_v24 = vand.u32 4294901760, %v4707_v53  ;;  %v12233_v47 = vand.u32 4294901760, %v10313_v32  ;;  %v12235_v48 = vld [vmem:[#allocation87_spill] sm:$0xff] }
 0x2dd   : > { %4590 = vmatpush.msrb.mxu0 %v10138_v7  ;;  %4691 = vmatpush.msrb.mxu1 %v4690_v57  ;;  %v2822_v42 = vadd.f32 %v9908_v30, %v2763_v60  ;;  %v12232_v57 = vld [vmem:[#allocation31_spill] sm:$0xff]  ;;  %v10364_v14 = vsub.f32 %v4969_v6, %v10338_v23  ;;  %v2197_v52 = vadd.f32 %v2191_v37, %v1804_v0  ;;  %v12234_v30 = vld [vmem:[#allocation62_spill] sm:$0xff]  ;;  %v10373_v6 = vand.u32 4294901760, %v4967_v2 }
 0x2de   : > { %4760 = vmatpush.msrb.mxu2 %v10214_v34  ;;  %4807 = vmatpush.msrb.mxu3 %v10174_v10  ;;  %v1802_v62 = vadd.f32 %v12232_v57, %v1761_v25  ;;  %v4719_v12 = vsub.f32 %v10313_v32, %v12233_v47  ;;  %v2154_v60 = vadd.f32 %v12234_v30, %v2081_v46  ;;  %v10370_v25 = vand.u32 4294901760, %v4558_v35  ;;  %v3647_v47 = vpop.f32.mrf.mxu1  ;;  %v12236_v46 = vld [vmem:[#allocation71_spill] sm:$0xff] }
 0x2df   : > { %4592 = vmatpush.msrb.mxu0 %v10152_v45  ;;  %4697 = vmatpush.msrb.mxu1 %v4696_v55  ;;  %v2977_v50 = vadd.f32 %v12235_v48, %v2936_v18  ;;  %v4966_v55 = vld [vmem:[#allocation4 + $0x5e0] sm:$0xff]  ;;  %v4714_v57 = vand.u32 4294901760, %v4713_v63  ;;  %v10376_v37 = vsub.f32 %v4968_v27, %v10351_v1  ;;  %v2474_v0 = vadd.f32 %v12236_v46, %v2429_v4 }
 0x2e0   : > { %4763 = vmatpush.msrb.mxu2 %v10232_v36  ;;  %4809 = vmatpush.msrb.mxu3 %v10190_v26  ;;  %v3603_v53 = vpop.f32.mrf.mxu0  ;;  %v2590_v30 = vadd.f32 %v2584_v15, %v2197_v52  ;;  %v2867_v48 = vadd.f32 %v9902_v16, %v2822_v42  ;;  %v4965_v36 = vld [vmem:[#allocation4 + $0x5d8] sm:$0xff]  ;;  %v4720_v63 = vand.u32 4294901760, %v4719_v12  ;;  %v10385_v27 = vand.u32 4294901760, %v4966_v55  ;;  %v4964_v42 = vld [vmem:[#allocation4 + $0x5d0] sm:$0xff] }
 0x2e1   : > { %4594 = vmatpush.msrb.mxu0 %v10174_v10  ;;  %4703 = vmatpush.msrb.mxu1 %v4702_v3  ;;  %v3604_v18 = vadd.f32 %v3603_v53, %v10259_v61  ;;  %v11744_v3 = vand.u32 4294901760, %v10364_v14  ;;  %v3722_v61 = vpop.f32.mrf.mxu2  ;;  %v12237_v53 = vld [vmem:[#allocation80_spill] sm:$0xff]  ;;  %v10391_v16 = vsub.f32 %v4558_v35, %v10370_v25  ;;  %v11743_v12 = vand.u32 4294901760, %v10376_v37  ;;  %v12238_v46 = vld [vmem:[#allocation63_spill] sm:$0xff] }
 0x2e2   : > { %4766 = vmatpush.msrb.mxu2 %v10250_v59  ;;  %4811 = vmatpush.msrb.mxu3 %v10201_v33  ;;  %v2547_v4 = vadd.f32 %v12237_v53, %v2474_v0  ;;  %v2983_v15 = vadd.f32 %v2977_v50, %v2590_v30  ;;  %v10396_v52 = vsub.f32 %v4967_v2, %v10373_v6  ;;  %v3763_v50 = vpop.f32.mrf.mxu3 }
 0x2e3   : > { %4596 = vmatpush.msrb.mxu0 %v10190_v26  ;;  %4709 = vmatpush.msrb.mxu1 %v4708_v24  ;;  %v3648_v34 = vadd.f32 %v3647_v47, %v3604_v18  ;;  %v4559_v24 = vld [vmem:[#allocation3 + $0x23] sm:$0xff]  ;;  %v10398_v18 = vand.u32 4294901760, %v4965_v36  ;;  %v2195_v0 = vadd.f32 %v12238_v46, %v2154_v60  ;;  %v2940_v30 = vadd.f32 %v9920_v49, %v2867_v48  ;;  %v4963_v49 = vld [vmem:[#allocation4 + $0x5c8] sm:$0xff] }
 0x2e4   : > { %4769 = vmatpush.msrb.mxu2 %v10268_v38  ;;  %4813 = vmatpush.msrb.mxu3 %v10216_v54  ;;  %v3376_v35 = vadd.f32 %v10121_v43, %v2983_v15  ;;  %v10410_v2 = vsub.f32 %v4966_v55, %v10385_v27  ;;  %v10412_v60 = vand.u32 4294901760, %v4964_v42  ;;  %v1805_v48 = vadd.f32 %v1802_v62, %v10245_v31  ;;  %v4962_v15 = vld [vmem:[#allocation4 + $0x5c0] sm:$0xff] }
 0x2e5   : > { %4598 = vmatpush.msrb.mxu0 %v10201_v33  ;;  %4715 = vmatpush.msrb.mxu1 %v4714_v57  ;;  %v3723_v47 = vadd.f32 %v3722_v61, %v3648_v34  ;;  %v5022_v34 = vsub.f32 %v10364_v14, %v11744_v3  ;;  %v12239_v61 = vld [vmem:[#allocation77_spill] sm:$0xff]  ;;  %v4611_v43 = vand.u32 4294901760, %v10391_v16  ;;  %v5028_v55 = vsub.f32 %v10376_v37, %v11743_v12 }
 0x2e6   : > { %4772 = vmatpush.msrb.mxu2 %v10284_v44  ;;  %4815 = vmatpush.msrb.mxu3 %v10234_v39  ;;  %v2588_v53 = vadd.f32 %v12239_v61, %v2547_v4  ;;  %v11745_v31 = vand.u32 4294901760, %v10396_v52  ;;  %v10430_v4 = vsub.f32 %v4965_v36, %v10398_v18  ;;  %v2981_v46 = vadd.f32 %v9934_v40, %v2940_v30  ;;  %v3653_v36 = vpop.f32.mrf.mxu1  ;;  %v4961_v40 = vld [vmem:[#allocation4 + $0x5b8] sm:$0xff] }
 0x2e7   : > { %4600 = vmatpush.msrb.mxu0 %v10216_v54  ;;  %4721 = vmatpush.msrb.mxu1 %v4720_v63  ;;  %v3764_v57 = vadd.f32 %v3763_v50, %v3723_v47  ;;  %v10419_v63 = vand.u32 4294901760, %v4559_v24  ;;  %v2198_v50 = vadd.f32 %v2195_v0, %v1805_v48  ;;  %v10435_v61 = vand.u32 4294901760, %v4963_v49 }
 0x2e8   : > { %4775 = vmatpush.msrb.mxu2 %v10299_v9  ;;  %4817 = vmatpush.msrb.mxu3 %v10252_v56  ;;  %v10442_v0 = vsub.f32 %v4964_v42, %v10412_v60  ;;  %v5034_v42 = vsub.f32 %v10396_v52, %v11745_v31 }
 0x2e9   : > { %4723 = vmatmul.f32.vlgmr.msrb.gmra.mxu1 %v10370_v25  ;;  %4602 = vmatpush.msrb.mxu0 %v10234_v39  ;;  %v10427_v62 = vadd.f32 %v3764_v57, %v3376_v35  ;;  %v3608_v47 = vpop.f32.mrf.mxu0  ;;  %v5023_v35 = vand.u32 4294901760, %v5022_v34  ;;  %v11746_v57 = vand.u32 4294901760, %v10410_v2  ;;  %v2591_v30 = vadd.f32 %v2588_v53, %v2198_v50  ;;  %v4960_v50 = vld [vmem:[#allocation4 + $0x5b0] sm:$0xff] }
 0x2ea   : > { %4909 = vmatpush.msra.mxu1 %v10055_v20  ;;  %4778 = vmatpush.msrb.mxu2 %v10313_v32  ;;  %v3609_v12 = vadd.f32 %v3608_v47, %v10325_v58  ;;  %v4612_v20 = vsub.f32 %v10391_v16, %v4611_v43  ;;  %v10447_v58 = vand.u32 4294901760, %v4962_v15  ;;  %v5029_v34 = vand.u32 4294901760, %v5028_v55  ;;  %v3726_v47 = vpop.f32.mrf.mxu2  ;;  %v4958_v55 = vld [vmem:[#allocation4 + $0x5a0] sm:$0xff] }
 0x2eb   : > { %4819 = vmatpush.msrb.mxu3 %v10270_v17  ;;  %4781 = vmatmul.f32.vlgmr.msrb.gmra.mxu2 %v10391_v16  ;;  %v4618_v53 = vsub.f32 %v4559_v24, %v10419_v63  ;;  %v2984_v3 = vadd.f32 %v2981_v46, %v2591_v30  ;;  %v10458_v16 = vsub.f32 %v4963_v49, %v10435_v61  ;;  %v3767_v31 = vpop.f32.mrf.mxu3  ;;  %v4959_v46 = vld [vmem:[#allocation4 + $0x5a8] sm:$0xff]  ;;  %v10473_v30 = vand.u32 4294901760, %v4960_v50 }
 0x2ec   : > { %4911 = vmatpush.msra.mxu1 %v10063_v8  ;;  %4971 = vmatpush.msra.mxu2 %v10338_v23  ;;  %v3654_v48 = vadd.f32 %v3653_v36, %v3609_v12  ;;  %v11747_v8 = vand.u32 4294901760, %v10430_v4  ;;  %v10460_v36 = vand.u32 4294901760, %v4961_v40  ;;  %v5040_v24 = vsub.f32 %v10410_v2, %v11746_v57 }
 0x2ed   : > { %4604 = vmatpush.msrb.mxu0 %v10252_v56  ;;  %4821 = vmatpush.msrb.mxu3 %v10286_v29  ;;  %v3377_v49 = vadd.f32 %v10182_v5, %v2984_v3 }
 0x2ee   : > { %4825 = vmatmul.f32.vlgmr.msrb.gmra.mxu3 %v4611_v43  ;;  %4913 = vmatpush.msra.mxu1 %v10075_v13  ;;  %v3727_v12 = vadd.f32 %v3726_v47, %v3654_v48  ;;  %v10470_v13 = vsub.f32 %v4962_v15, %v10447_v58  ;;  %v5035_v48 = vand.u32 4294901760, %v5034_v42  ;;  %v4619_v47 = vand.u32 4294901760, %v4618_v53  ;;  %v4957_v42 = vld [vmem:[#allocation4 + $0x598] sm:$0xff] }
 0x2ef   : > { %4973 = vmatpush.msra.mxu2 %v10351_v1  ;;  %5024 = vmatpush.msra.mxu3 %v5023_v35  ;;  %v4613_v35 = vand.u32 4294901760, %v4612_v20  ;;  %v5046_v57 = vsub.f32 %v10430_v4, %v11747_v8  ;;  %v10485_v3 = vsub.f32 %v4961_v40, %v10460_v36  ;;  %v5041_v15 = vand.u32 4294901760, %v5040_v24 }
 0x2f0   : > { %4606 = vmatpush.msrb.mxu0 %v10270_v17  ;;  %4915 = vmatpush.msra.mxu1 %v10085_v41  ;;  %v3768_v43 = vadd.f32 %v3767_v31, %v3727_v12  ;;  %v11749_v41 = vand.u32 4294901760, %v10458_v16  ;;  %v10487_v31 = vand.u32 4294901760, %v4959_v46  ;;  %v12240_v20 = vand.u32 4294901760, %v10442_v0 }
 0x2f1   : > { %4975 = vmatpush.msra.mxu2 %v10373_v6  ;;  %5030 = vmatpush.msra.mxu3 %v5029_v34  ;;  %v12241_v12 = vand.u32 4294901760, %v10073_v19  ;;  %v10498_v40 = vsub.f32 %v4960_v50, %v10473_v30  ;;  %v4620_v24 = vsub.f32 %v4618_v53, %v4619_v47  ;;  %v10512_v8 = vand.u32 4294901760, %v4957_v42 }
 0x2f2   : > { %4608 = vmatpush.msrb.mxu0 %v10286_v29  ;;  %4727 = vmatmul.f32.gmra.mxu1 %v10419_v63  ;;  %v10482_v5 = vadd.f32 %v3768_v43, %v3377_v49  ;;  %v5052_v34 = vsub.f32 %v10442_v0, %v12240_v20  ;;  %v11748_v49 = vand.u32 4294901760, %v10470_v13  ;;  %v10500_v43 = vand.u32 4294901760, %v4958_v55 }
 0x2f3   : > { %4614 = vmatmul.f32.vlgmr.msrb.gmra.mxu0 %v4613_v35  ;;  %4917 = vmatpush.msra.mxu1 %v10100_v51  ;;  %v5047_v51 = vand.u32 4294901760, %v5046_v57  ;;  %v4956_v35 = vld [vmem:[#allocation4 + $0x590] sm:$0xff]  ;;  %v12242_v20 = vand.u32 4294901760, %v10083_v28  ;;  %v5058_v19 = vsub.f32 %v10458_v16, %v11749_v41  ;;  %v10510_v50 = vsub.f32 %v4959_v46, %v10487_v31 }
 0x2f4   : > { %4838 = vmatpush.msra.mxu0 %v12241_v12  ;;  %4977 = vmatpush.msra.mxu2 %v10385_v27  ;;  %v11750_v12 = vand.u32 4294901760, %v10485_v3  ;;  %v5053_v57 = vand.u32 4294901760, %v5052_v34  ;;  %v12243_v28 = vand.u32 4294901760, %v10096_v21  ;;  %v10524_v46 = vand.u32 4294901760, %v4956_v35  ;;  %v4951_v41 = vld [vmem:[#allocation3 + $0x1c] sm:$0xff] }
 0x2f5   : > { %5036 = vmatpush.msra.mxu3 %v5035_v48  ;;  %4786 = vmatmul.f32.gmra.mxu2 %v4618_v53  ;;  %v11751_v53 = vand.u32 4294901760, %v10498_v40  ;;  %v10522_v48 = vsub.f32 %v4958_v55, %v10500_v43  ;;  %v12244_v21 = vand.u32 4294901760, %v10107_v22  ;;  %v11752_v55 = vand.u32 4294901760, %v10510_v50 }
 0x2f6   : > { %4842 = vmatpush.msra.mxu0 %v12242_v20  ;;  %4919 = vmatpush.msra.mxu1 %v10123_v11  ;;  %v5064_v11 = vsub.f32 %v10470_v13, %v11748_v49  ;;  %v4955_v20 = vld [vmem:[#allocation4 + $0x588] sm:$0xff]  ;;  %v5070_v34 = vsub.f32 %v10485_v3, %v11750_v12  ;;  %v4954_v49 = vld [vmem:[#allocation4 + $0x580] sm:$0xff]  ;;  %v10553_v12 = vand.u32 4294901760, %v4951_v41 }
 0x2f7   : > { %4979 = vmatpush.msra.mxu2 %v10398_v18  ;;  %5042 = vmatpush.msra.mxu3 %v5041_v15  ;;  %v5059_v15 = vand.u32 4294901760, %v5058_v19  ;;  %v12245_v19 = vld [vmem:[#allocation20_spill] sm:$0xff] }
 0x2f8   : > { %4831 = vmatmul.f32.gmra.mxu3 %v4619_v47  ;;  %4846 = vmatpush.msra.mxu0 %v12243_v28  ;;  %v4621_v47 = vand.u32 4294901760, %v4620_v24  ;;  %v10535_v28 = vsub.f32 %v4957_v42, %v10512_v8  ;;  %v5065_v22 = vand.u32 4294901760, %v5064_v11  ;;  %v11754_v24 = vand.u32 4294901760, %v10522_v48 }
 0x2f9   : > { %4921 = vmatpush.msra.mxu1 %v10138_v7  ;;  %4981 = vmatpush.msra.mxu2 %v10412_v60  ;;  %v10539_v7 = vand.u32 4294901760, %v4955_v20  ;;  %v10546_v42 = vsub.f32 %v4956_v35, %v10524_v46  ;;  %v5082_v11 = vsub.f32 %v10510_v50, %v11752_v55 }
 0x2fa   : > { %5048 = vmatpush.msra.mxu3 %v5047_v51  ;;  %4850 = vmatpush.msra.mxu0 %v12244_v21  ;;  %v5076_v51 = vsub.f32 %v10498_v40, %v11751_v53  ;;  %v12246_v21 = vand.u32 4294901760, %v12245_v19  ;;  %v11753_v35 = vand.u32 4294901760, %v10535_v28 }
 0x2fb   : > { %4923 = vmatpush.msra.mxu1 %v10152_v45  ;;  %4983 = vmatpush.msra.mxu2 %v10435_v61  ;;  %v10551_v45 = vand.u32 4294901760, %v4954_v49 }
 0x2fc   : > { %5054 = vmatpush.msra.mxu3 %v5053_v57  ;;  %4622 = vmatmul.f32.gmra.mxu0 %v4621_v47  ;;  %v5071_v57 = vand.u32 4294901760, %v5070_v34  ;;  %v12247_v47 = vld [vmem:[#allocation25_spill] sm:$0xff]  ;;  %v5077_v19 = vand.u32 4294901760, %v5076_v51  ;;  %v11755_v34 = vand.u32 4294901760, %v10546_v42  ;;  %v12251_v51 = vld [vmem:[#allocation28_spill] sm:$0xff] }
 0x2fd   : > { %4854 = vmatpush.msra.mxu0 %v12246_v21  ;;  %4925 = vmatpush.msra.mxu1 %v10174_v10  ;;  %v12248_v53 = vand.u32 4294901760, %v12247_v47  ;;  %v10564_v10 = vsub.f32 %v4955_v20, %v10539_v7  ;;  %v12249_v21 = vld [vmem:[#allocation78_spill] sm:$0xff]  ;;  %v5083_v20 = vand.u32 4294901760, %v5082_v11  ;;  %v12252_v47 = vand.u32 4294901760, %v12251_v51 }
 0x2fe   : > { %4985 = vmatpush.msra.mxu2 %v10447_v58  ;;  %5060 = vmatpush.msra.mxu3 %v5059_v15  ;;  %v5088_v15 = vsub.f32 %v10522_v48, %v11754_v24  ;;  %v12250_v55 = vand.u32 4294901760, %v12249_v21  ;;  %v4952_v11 = vld [vmem:[#allocation3 + $0x24] sm:$0xff] }
 0x2ff   : > { %4858 = vmatpush.msra.mxu0 %v12248_v53  ;;  %4927 = vmatpush.msra.mxu1 %v10190_v26  ;;  %v10575_v26 = vsub.f32 %v4951_v41, %v10553_v12  ;;  %v10578_v53 = vsub.f32 %v4954_v49, %v10551_v45  ;;  %v12253_v21 = vld [vmem:[#allocation18_spill] sm:$0xff] }
 0x300   : > { %4987 = vmatpush.msra.mxu2 %v10460_v36  ;;  %5066 = vmatpush.msra.mxu3 %v5065_v22  ;;  %v5094_v22 = vsub.f32 %v10535_v28, %v11753_v35  ;;  %v5089_v49 = vand.u32 4294901760, %v5088_v15  ;;  %v12254_v35 = vand.u32 4294901760, %v12253_v21  ;;  %v12255_v15 = vld [vmem:[#allocation23_spill] sm:$0xff]  ;;  %v12257_v21 = vand.u32 4294901760, %v10564_v10 }
 0x301   : > { %4862 = vmatpush.msra.mxu0 %v12250_v55  ;;  %4929 = vmatpush.msra.mxu1 %v10201_v33  ;;  %v3938_v33 = vpop.f32.mrf.mxu1  ;;  %v5100_v55 = vsub.f32 %v10546_v42, %v11755_v34  ;;  %v5111_v51 = vand.u32 4294901760, %v10578_v53  ;;  %v12256_v41 = vand.u32 4294901760, %v12255_v15  ;;  %v10604_v34 = vand.u32 4294901760, %v4952_v11 }
 0x302   : > { %4989 = vmatpush.msra.mxu2 %v10473_v30  ;;  %5072 = vmatpush.msra.mxu3 %v5071_v57  ;;  %v3996_v24 = vpop.f32.mrf.mxu2 }
 0x303   : > { %4866 = vmatpush.msra.mxu0 %v12252_v47  ;;  %4931 = vmatpush.msra.mxu1 %v10216_v54 }
 0x304   : > { %4991 = vmatpush.msra.mxu2 %v10487_v31  ;;  %5078 = vmatpush.msra.mxu3 %v5077_v19  ;;  %v3829_v57 = vpop.f32.mrf.mxu0  ;;  %v5095_v19 = vand.u32 4294901760, %v5094_v22  ;;  %v12260_v22 = vand.u32 4294901760, %v10575_v26 }
 0x305   : > { %4870 = vmatpush.msra.mxu0 %v12254_v35  ;;  %4933 = vmatpush.msra.mxu1 %v10234_v39  ;;  %v3939_v47 = vadd.f32 %v3938_v33, %v3829_v57  ;;  %v5106_v35 = vsub.f32 %v10564_v10, %v12257_v21  ;;  %v4040_v54 = vpop.f32.mrf.mxu3  ;;  %v5101_v33 = vand.u32 4294901760, %v5100_v55  ;;  %v12258_v57 = vld [vmem:[#allocation76_spill] sm:$0xff] }
 0x306   : > { %4993 = vmatpush.msra.mxu2 %v10500_v43  ;;  %5084 = vmatpush.msra.mxu3 %v5083_v20  ;;  %v12259_v20 = vand.u32 4294901760, %v12258_v57 }
 0x307   : > { %4874 = vmatpush.msra.mxu0 %v12256_v41  ;;  %4935 = vmatpush.msra.mxu1 %v10252_v56  ;;  %v3997_v39 = vadd.f32 %v3996_v24, %v3939_v47  ;;  %v5005_v56 = vsub.f32 %v10575_v26, %v12260_v22  ;;  %v5112_v24 = vsub.f32 %v10578_v53, %v5111_v51  ;;  %v5107_v55 = vand.u32 4294901760, %v5106_v35 }
 0x308   : > { %4995 = vmatpush.msra.mxu2 %v10512_v8  ;;  %5090 = vmatpush.msra.mxu3 %v5089_v49  ;;  %v12261_v49 = vand.u32 4294901760, %v10250_v59  ;;  %v12263_v35 = vand.u32 4294901760, %v10364_v14 }
 0x309   : > { %4878 = vmatpush.msra.mxu0 %v12259_v20  ;;  %4937 = vmatpush.msra.mxu1 %v10270_v17  ;;  %v10616_v41 = vadd.f32 %v4040_v54, %v3997_v39  ;;  %v10623_v17 = vsub.f32 %v4952_v11, %v10604_v34  ;;  %v12262_v54 = vand.u32 4294901760, %v10268_v38  ;;  %v5006_v47 = vand.u32 4294901760, %v5005_v56 }
 0x30a   : > { %4997 = vmatpush.msra.mxu2 %v10524_v46  ;;  %5096 = vmatpush.msra.mxu3 %v5095_v19  ;;  %v5113_v15 = vand.u32 4294901760, %v5112_v24  ;;  %v3942_v19 = vpop.f32.mrf.mxu1  ;;  %v12264_v39 = vand.u32 4294901760, %v10284_v44  ;;  %v12265_v20 = vand.u32 4294901760, %v10376_v37  ;;  %v12266_v44 = vand.u32 4294901760, %v10299_v9 }
 0x30b   : > { %4882 = vmatpush.msra.mxu0 %v12261_v49  ;;  %4939 = vmatpush.msra.mxu1 %v10286_v29  ;;  %v5012_v29 = vand.u32 4294901760, %v10623_v17  ;;  %v12267_v56 = vand.u32 4294901760, %v10396_v52  ;;  %v12268_v24 = vand.u32 4294901760, %v10313_v32  ;;  %v12269_v9 = vand.u32 4294901760, %v10410_v2 }
 0x30c   : > { %4999 = vmatpush.msra.mxu2 %v10539_v7  ;;  %5102 = vmatpush.msra.mxu3 %v5101_v33  ;;  %v4001_v11 = vpop.f32.mrf.mxu2  ;;  %v12270_v32 = vand.u32 4294901760, %v10430_v4 }
 0x30d   : > { %4941 = vmatmul.f32.vlgmr.msra.gmra.mxu1 %v10370_v25  ;;  %4886 = vmatpush.msra.mxu0 %v12262_v54  ;;  %v3837_v21 = vpop.f32.mrf.mxu0  ;;  %v5013_v22 = vsub.f32 %v10623_v17, %v5012_v29  ;;  %v12275_v54 = vand.u32 4294901760, %v10498_v40 }
 0x30e   : > { %5184 = vmatpush.msrb.mxu1 %v10338_v23  ;;  %5001 = vmatpush.msra.mxu2 %v10551_v45  ;;  %v3943_v59 = vadd.f32 %v3942_v19, %v3837_v21 }
 0x30f   : > { %5108 = vmatpush.msra.mxu3 %v5107_v55  ;;  %5007 = vmatmul.f32.vlgmr.msra.gmra.mxu2 %v5006_v47  ;;  %v4046_v33 = vpop.f32.mrf.mxu3 }
 0x310   : > { %5186 = vmatpush.msrb.mxu1 %v10351_v1  ;;  %5231 = vmatpush.msrb.mxu2 %v12263_v35  ;;  %v4002_v38 = vadd.f32 %v4001_v11, %v3943_v59 }
 0x311   : > { %4890 = vmatpush.msra.mxu0 %v12264_v39  ;;  %5114 = vmatpush.msra.mxu3 %v5113_v15  ;;  %v5357_v15 = vld [vmem:[#allocation4 + $0x650] sm:$0xff]  ;;  %v12277_v39 = vand.u32 4294901760, %v10522_v48 }
 0x312   : > { %5116 = vmatmul.f32.vlgmr.msra.gmra.mxu3 %v10553_v12  ;;  %5188 = vmatpush.msrb.mxu1 %v10373_v6  ;;  %v10639_v57 = vadd.f32 %v4046_v33, %v4002_v38  ;;  %v5356_v38 = vld [vmem:[#allocation4 + $0x648] sm:$0xff] }
 0x313   : > { %5235 = vmatpush.msrb.mxu2 %v12265_v20  ;;  %5302 = vmatpush.msrb.mxu3 %v10338_v23  ;;  %v5014_v23 = vand.u32 4294901760, %v5013_v22  ;;  %v10733_v20 = vand.u32 4294901760, %v5357_v15 }
 0x314   : > { %4894 = vmatpush.msra.mxu0 %v12266_v44  ;;  %5190 = vmatpush.msrb.mxu1 %v10385_v27  ;;  %v5355_v44 = vld [vmem:[#allocation4 + $0x640] sm:$0xff] }
 0x315   : > { %5239 = vmatpush.msrb.mxu2 %v12267_v56  ;;  %5304 = vmatpush.msrb.mxu3 %v10351_v1  ;;  %v5362_v1 = vld [vmem:[#allocation4 + $0x678] sm:$0xff] }
 0x316   : > { %4898 = vmatpush.msra.mxu0 %v12268_v24  ;;  %4945 = vmatmul.f32.gmra.mxu1 %v10419_v63 }
 0x317   : > { %4900 = vmatmul.f32.vlgmr.msra.gmra.mxu0 %v10370_v25  ;;  %5192 = vmatpush.msrb.mxu1 %v10398_v18  ;;  %v5361_v25 = vld [vmem:[#allocation4 + $0x670] sm:$0xff] }
 0x318   : > { %5126 = vmatpush.msrb.mxu0 %v10364_v14  ;;  %5243 = vmatpush.msrb.mxu2 %v12269_v9  ;;  %v12271_v14 = vand.u32 4294901760, %v10442_v0  ;;  %v12279_v9 = vand.u32 4294901760, %v10546_v42 }
 0x319   : > { %5306 = vmatpush.msrb.mxu3 %v10373_v6  ;;  %5015 = vmatmul.f32.gmra.mxu2 %v5014_v23  ;;  %v10674_v6 = vand.u32 4294901760, %v5362_v1  ;;  %v10749_v23 = vand.u32 4294901760, %v5356_v38 }
 0x31a   : > { %5129 = vmatpush.msrb.mxu0 %v10376_v37  ;;  %5194 = vmatpush.msrb.mxu1 %v10412_v60  ;;  %v12272_v37 = vand.u32 4294901760, %v10458_v16 }
 0x31b   : > { %5247 = vmatpush.msrb.mxu2 %v12270_v32  ;;  %5308 = vmatpush.msrb.mxu3 %v10385_v27  ;;  %v5360_v27 = vld [vmem:[#allocation4 + $0x668] sm:$0xff]  ;;  %v10689_v49 = vsub.f32 %v5362_v1, %v10674_v6  ;;  %v10763_v1 = vsub.f32 %v5357_v15, %v10733_v20 }
 0x31c   : > { %5120 = vmatmul.f32.gmra.mxu3 %v10604_v34  ;;  %5132 = vmatpush.msrb.mxu0 %v10396_v52  ;;  %v10681_v52 = vand.u32 4294901760, %v5361_v25  ;;  %v10691_v55 = vand.u32 4294901760, %v5360_v27 }
 0x31d   : > { %5196 = vmatpush.msrb.mxu1 %v10435_v61  ;;  %5251 = vmatpush.msrb.mxu2 %v12271_v14  ;;  %v10765_v14 = vand.u32 4294901760, %v5355_v44 }
 0x31e   : > { %5310 = vmatpush.msrb.mxu3 %v10398_v18  ;;  %5135 = vmatpush.msrb.mxu0 %v10410_v2  ;;  %v5359_v18 = vld [vmem:[#allocation4 + $0x660] sm:$0xff]  ;;  %v12273_v2 = vand.u32 4294901760, %v10470_v13  ;;  %v10710_v47 = vsub.f32 %v5360_v27, %v10691_v55  ;;  %v4156_v19 = vpop.f32.mrf.mxu1  ;;  %v10777_v27 = vsub.f32 %v5356_v38, %v10749_v23 }
 0x31f   : > { %5198 = vmatpush.msrb.mxu1 %v10447_v58  ;;  %5255 = vmatpush.msrb.mxu2 %v12272_v37  ;;  %v10788_v15 = vsub.f32 %v5355_v44, %v10765_v14 }
 0x320   : > { %5312 = vmatpush.msrb.mxu3 %v10412_v60  ;;  %4904 = vmatmul.f32.gmra.mxu0 %v10419_v63  ;;  %v12274_v60 = vand.u32 4294901760, %v10485_v3  ;;  %v10699_v63 = vsub.f32 %v5361_v25, %v10681_v52  ;;  %v11770_v33 = vand.u32 4294901760, %v10710_v47  ;;  %v12280_v25 = vand.u32 4294901760, %v10564_v10 }
 0x321   : > { %5138 = vmatpush.msrb.mxu0 %v10430_v4  ;;  %5200 = vmatpush.msrb.mxu1 %v10460_v36  ;;  %v10701_v4 = vand.u32 4294901760, %v5359_v18  ;;  %v11764_v44 = vand.u32 4294901760, %v10788_v15 }
 0x322   : > { %5259 = vmatpush.msrb.mxu2 %v12273_v2  ;;  %5314 = vmatpush.msrb.mxu3 %v10435_v61  ;;  %v5358_v61 = vld [vmem:[#allocation4 + $0x658] sm:$0xff]  ;;  %v5427_v32 = vsub.f32 %v10710_v47, %v11770_v33 }
 0x323   : > { %5141 = vmatpush.msrb.mxu0 %v10442_v0  ;;  %5202 = vmatpush.msrb.mxu1 %v10473_v30  ;;  %v11772_v0 = vand.u32 4294901760, %v10689_v49  ;;  %v10721_v21 = vsub.f32 %v5359_v18, %v10701_v4  ;;  %v5353_v18 = vld [vmem:[#allocation4 + $0x630] sm:$0xff] }
 0x324   : > { %5263 = vmatpush.msrb.mxu2 %v12274_v60  ;;  %5316 = vmatpush.msrb.mxu3 %v10447_v58  ;;  %v10714_v58 = vand.u32 4294901760, %v5358_v61 }
 0x325   : > { %5144 = vmatpush.msrb.mxu0 %v10458_v16  ;;  %5204 = vmatpush.msrb.mxu1 %v10487_v31  ;;  %v12276_v16 = vand.u32 4294901760, %v10510_v50  ;;  %v11768_v24 = vand.u32 4294901760, %v10721_v21 }
 0x326   : > { %5267 = vmatpush.msrb.mxu2 %v12275_v54  ;;  %5318 = vmatpush.msrb.mxu3 %v10460_v36  ;;  %v11771_v36 = vand.u32 4294901760, %v10699_v63  ;;  %v4222_v11 = vpop.f32.mrf.mxu2  ;;  %v11766_v54 = vand.u32 4294901760, %v10763_v1 }
 0x327   : > { %5147 = vmatpush.msrb.mxu0 %v10470_v13  ;;  %5206 = vmatpush.msrb.mxu1 %v10500_v43  ;;  %v5433_v37 = vsub.f32 %v10721_v21, %v11768_v24 }
 0x328   : > { %5271 = vmatpush.msrb.mxu2 %v12276_v16  ;;  %5320 = vmatpush.msrb.mxu3 %v10473_v30  ;;  %v4115_v59 = vpop.f32.mrf.mxu0  ;;  %v5415_v30 = vsub.f32 %v10689_v49, %v11772_v0  ;;  %v5421_v56 = vsub.f32 %v10699_v63, %v11771_v36 }
 0x329   : > { %5150 = vmatpush.msrb.mxu0 %v10485_v3  ;;  %5208 = vmatpush.msrb.mxu1 %v10512_v8  ;;  %v4116_v13 = vadd.f32 %v4115_v59, %v10616_v41  ;;  %v4331_v35 = vpop.f32.mrf.mxu3  ;;  %v10740_v41 = vsub.f32 %v5358_v61, %v10714_v58  ;;  %v4160_v61 = vpop.f32.mrf.mxu1 }
 0x32a   : > { %5275 = vmatpush.msrb.mxu2 %v12277_v39  ;;  %5322 = vmatpush.msrb.mxu3 %v10487_v31  ;;  %v10735_v3 = vadd.f32 %v4331_v35, %v4222_v11  ;;  %v12278_v31 = vand.u32 4294901760, %v10535_v28  ;;  %v5434_v11 = vand.u32 4294901760, %v5433_v37  ;;  %v11765_v35 = vand.u32 4294901760, %v10777_v27 }
 0x32b   : > { %5153 = vmatpush.msrb.mxu0 %v10498_v40  ;;  %5210 = vmatpush.msrb.mxu1 %v10524_v46  ;;  %v4157_v22 = vadd.f32 %v4156_v19, %v4116_v13  ;;  %v5352_v19 = vld [vmem:[#allocation4 + $0x628] sm:$0xff] }
 0x32c   : > { %5279 = vmatpush.msrb.mxu2 %v12278_v31  ;;  %5324 = vmatpush.msrb.mxu3 %v10500_v43  ;;  %v5416_v43 = vand.u32 4294901760, %v5415_v30  ;;  %v10807_v30 = vand.u32 4294901760, %v5352_v19  ;;  %v5350_v31 = vld [vmem:[#allocation4 + $0x618] sm:$0xff] }
 0x32d   : > { %5156 = vmatpush.msrb.mxu0 %v10510_v50  ;;  %5212 = vmatpush.msrb.mxu1 %v10539_v7  ;;  %v10754_v40 = vadd.f32 %v4157_v22, %v10427_v62  ;;  %v5354_v50 = vld [vmem:[#allocation4 + $0x638] sm:$0xff]  ;;  %v11767_v62 = vand.u32 4294901760, %v10740_v41  ;;  %v5445_v22 = vsub.f32 %v10763_v1, %v11766_v54 }
 0x32e   : > { %5283 = vmatpush.msrb.mxu2 %v12279_v9  ;;  %5326 = vmatpush.msrb.mxu3 %v10512_v8  ;;  %v5422_v8 = vand.u32 4294901760, %v5421_v56  ;;  %v10782_v2 = vand.u32 4294901760, %v5354_v50  ;;  %v5451_v9 = vsub.f32 %v10777_v27, %v11765_v35 }
 0x32f   : > { %5159 = vmatpush.msrb.mxu0 %v10522_v48  ;;  %5214 = vmatpush.msrb.mxu1 %v10551_v45  ;;  %v12281_v48 = vand.u32 4294901760, %v10575_v26 }
 0x330   : > { %5287 = vmatpush.msrb.mxu2 %v12280_v25  ;;  %5328 = vmatpush.msrb.mxu3 %v10524_v46  ;;  %v5428_v46 = vand.u32 4294901760, %v5427_v32  ;;  %v4230_v59 = vpop.f32.mrf.mxu2  ;;  %v10805_v39 = vsub.f32 %v5354_v50, %v10782_v2  ;;  %v10832_v32 = vsub.f32 %v5352_v19, %v10807_v30  ;;  %v10834_v50 = vand.u32 4294901760, %v5350_v31 }
 0x331   : > { %5218 = vmatmul.f32.vlgmr.msrb.gmra.mxu1 %v12281_v48  ;;  %5162 = vmatpush.msrb.mxu0 %v10535_v28  ;;  %v4119_v60 = vpop.f32.mrf.mxu0  ;;  %v5439_v28 = vsub.f32 %v10740_v41, %v11767_v62  ;;  %v5457_v25 = vsub.f32 %v10788_v15, %v11764_v44 }
 0x332   : > { %5417 = vmatpush.msra.mxu1 %v5416_v43  ;;  %5291 = vmatpush.msrb.mxu2 %v5111_v51  ;;  %v4120_v16 = vadd.f32 %v4119_v60, %v10639_v57  ;;  %v10796_v51 = vand.u32 4294901760, %v5353_v18  ;;  %v5349_v43 = vld [vmem:[#allocation4 + $0x610] sm:$0xff]  ;;  %v11760_v60 = vand.u32 4294901760, %v10832_v32 }
 0x333   : > { %5330 = vmatpush.msrb.mxu3 %v10539_v7  ;;  %5293 = vmatmul.f32.vlgmr.msrb.gmra.mxu2 %v10553_v12  ;;  %v4335_v13 = vpop.f32.mrf.mxu3  ;;  %v5351_v7 = vld [vmem:[#allocation4 + $0x620] sm:$0xff]  ;;  %v10847_v48 = vand.u32 4294901760, %v5349_v43 }
 0x334   : > { %5423 = vmatpush.msra.mxu1 %v5422_v8  ;;  %5519 = vmatpush.msra.mxu2 %v10689_v49  ;;  %v4161_v57 = vadd.f32 %v4160_v61, %v4120_v16  ;;  %v10800_v38 = vadd.f32 %v4335_v13, %v4230_v59  ;;  %v5348_v8 = vld [vmem:[#allocation4 + $0x608] sm:$0xff]  ;;  %v5458_v16 = vand.u32 4294901760, %v5457_v25 }
 0x335   : > { %5165 = vmatpush.msrb.mxu0 %v10546_v42  ;;  %5332 = vmatpush.msrb.mxu3 %v10551_v45  ;;  %v5440_v42 = vand.u32 4294901760, %v5439_v28  ;;  %v10820_v45 = vsub.f32 %v5353_v18, %v10796_v51  ;;  %v10860_v61 = vand.u32 4294901760, %v5348_v8  ;;  %v10870_v59 = vsub.f32 %v5349_v43, %v10847_v48  ;;  %v5755_v43 = vld [vmem:[#allocation4 + $0x6f8] sm:$0xff] }
 0x336   : > { %5334 = vmatmul.f32.vlgmr.msrb.gmra.mxu3 %v10553_v12  ;;  %5429 = vmatpush.msra.mxu1 %v5428_v46  ;;  %v10815_v56 = vadd.f32 %v4161_v57, %v10482_v5  ;;  %v10822_v12 = vand.u32 4294901760, %v5351_v7  ;;  %v11763_v5 = vand.u32 4294901760, %v10805_v39  ;;  %v10858_v46 = vsub.f32 %v5350_v31, %v10834_v50 }
 0x337   : > { %5522 = vmatpush.msra.mxu2 %v10699_v63  ;;  %5577 = vmatpush.msra.mxu3 %v10674_v6  ;;  %v11762_v37 = vand.u32 4294901760, %v10820_v45  ;;  %v5475_v57 = vsub.f32 %v10832_v32, %v11760_v60 }
 0x338   : > { %5168 = vmatpush.msrb.mxu0 %v10564_v10  ;;  %5435 = vmatpush.msra.mxu1 %v5434_v11  ;;  %v5446_v10 = vand.u32 4294901760, %v5445_v22  ;;  %v10845_v18 = vsub.f32 %v5351_v7, %v10822_v12  ;;  %v11758_v7 = vand.u32 4294901760, %v10858_v46  ;;  %v10882_v22 = vsub.f32 %v5348_v8, %v10860_v61 }
 0x339   : > { %5525 = vmatpush.msra.mxu2 %v10710_v47  ;;  %5579 = vmatpush.msra.mxu3 %v10681_v52  ;;  %v5469_v19 = vsub.f32 %v10820_v45, %v11762_v37  ;;  %v5751_v37 = vld [vmem:[#allocation4 + $0x6d8] sm:$0xff] }
 0x33a   : > { %5171 = vmatpush.msrb.mxu0 %v10578_v53  ;;  %5224 = vmatmul.f32.gmra.mxu1 %v5012_v29  ;;  %v5452_v53 = vand.u32 4294901760, %v5451_v9  ;;  %v5347_v29 = vld [vmem:[#allocation4 + $0x600] sm:$0xff]  ;;  %v11759_v28 = vand.u32 4294901760, %v10845_v18  ;;  %12282 = vst [vmem:[#allocation17_spill] sm:$0xff] %v10882_v22  ;;  %v5487_v25 = vsub.f32 %v10858_v46, %v11758_v7  ;;  %v11757_v8 = vand.u32 4294901760, %v10882_v22 }
 0x33b   : > { %5174 = vmatmul.f32.vlgmr.msrb.gmra.mxu0 %v10575_v26  ;;  %5441 = vmatpush.msra.mxu1 %v5440_v42  ;;  %v5463_v26 = vsub.f32 %v10805_v39, %v11763_v5  ;;  %v10872_v13 = vand.u32 4294901760, %v5347_v29  ;;  %v11756_v42 = vand.u32 4294901760, %v10870_v59  ;;  %v5752_v7 = vld [vmem:[#allocation4 + $0x6e0] sm:$0xff]  ;;  %v10952_v62 = vand.u32 4294901760, %v5751_v37 }
 0x33c   : > { %5364 = vmatpush.msra.mxu0 %v10674_v6  ;;  %5528 = vmatpush.msra.mxu2 %v10721_v21  ;;  %v5481_v31 = vsub.f32 %v10845_v18, %v11759_v28 }
 0x33d   : > { %5581 = vmatpush.msra.mxu3 %v10691_v55  ;;  %5297 = vmatmul.f32.gmra.mxu2 %v10604_v34  ;;  %v5464_v11 = vand.u32 4294901760, %v5463_v26  ;;  %v10892_v9 = vsub.f32 %v5347_v29, %v10872_v13  ;;  %v5493_v29 = vsub.f32 %v10870_v59, %v11756_v42 }
 0x33e   : > { %5366 = vmatpush.msra.mxu0 %v10681_v52  ;;  %5447 = vmatpush.msra.mxu1 %v5446_v10  ;;  %v5476_v10 = vand.u32 4294901760, %v5475_v57  ;;  %v5344_v57 = vld [vmem:[#allocation3 + $0x1d] sm:$0xff] }
 0x33f   : > { %5531 = vmatpush.msra.mxu2 %v10740_v41  ;;  %5583 = vmatpush.msra.mxu3 %v10701_v4  ;;  %12283 = vst [vmem:[#allocation21_spill] sm:$0xff] %v10892_v9  ;;  %v11761_v26 = vand.u32 4294901760, %v10892_v9  ;;  %v5494_v42 = vand.u32 4294901760, %v5493_v29 }
 0x340   : > { %5338 = vmatmul.f32.gmra.mxu3 %v10604_v34  ;;  %5368 = vmatpush.msra.mxu0 %v10691_v55  ;;  %v5470_v34 = vand.u32 4294901760, %v5469_v19  ;;  %v5488_v19 = vand.u32 4294901760, %v5487_v25 }
 0x341   : > { %5453 = vmatpush.msra.mxu1 %v5452_v53  ;;  %5534 = vmatpush.msra.mxu2 %v10763_v1  ;;  %v5754_v53 = vld [vmem:[#allocation4 + $0x6f0] sm:$0xff] }
 0x342   : > { %5585 = vmatpush.msra.mxu3 %v10714_v58  ;;  %5370 = vmatpush.msra.mxu0 %v10701_v4  ;;  %v4433_v29 = vpop.f32.mrf.mxu1 }
 0x343   : > { %5459 = vmatpush.msra.mxu1 %v5458_v16  ;;  %5537 = vmatpush.msra.mxu2 %v10777_v27  ;;  %v10908_v16 = vand.u32 4294901760, %v5755_v43 }
 0x344   : > { %5587 = vmatpush.msra.mxu3 %v10733_v20  ;;  %5179 = vmatmul.f32.gmra.mxu0 %v10623_v17  ;;  %v5482_v17 = vand.u32 4294901760, %v5481_v31  ;;  %v5753_v31 = vld [vmem:[#allocation4 + $0x6e8] sm:$0xff] }
 0x345   : > { %5372 = vmatpush.msra.mxu0 %v10714_v58  ;;  %5465 = vmatpush.msra.mxu1 %v5464_v11  ;;  %v5499_v11 = vsub.f32 %v10882_v22, %v11757_v8  ;;  %v10925_v25 = vsub.f32 %v5755_v43, %v10908_v16  ;;  %v10929_v8 = vand.u32 4294901760, %v5344_v57  ;;  %v10932_v60 = vand.u32 4294901760, %v5753_v31 }
 0x346   : > { %5540 = vmatpush.msra.mxu2 %v10788_v15  ;;  %5589 = vmatpush.msra.mxu3 %v10749_v23 }
 0x347   : > { %5374 = vmatpush.msra.mxu0 %v10733_v20  ;;  %5471 = vmatpush.msra.mxu1 %v5470_v34  ;;  %v10916_v34 = vand.u32 4294901760, %v5754_v53 }
 0x348   : > { %5543 = vmatpush.msra.mxu2 %v10805_v39  ;;  %5591 = vmatpush.msra.mxu3 %v10765_v14 }
 0x349   : > { %5376 = vmatpush.msra.mxu0 %v10749_v23  ;;  %5477 = vmatpush.msra.mxu1 %v5476_v10  ;;  %v5505_v10 = vsub.f32 %v10892_v9, %v11761_v26  ;;  %v10935_v26 = vsub.f32 %v5754_v53, %v10916_v34 }
 0x34a   : > { %5546 = vmatpush.msra.mxu2 %v10820_v45  ;;  %5593 = vmatpush.msra.mxu3 %v10782_v2  ;;  %v4508_v35 = vpop.f32.mrf.mxu2 }
 0x34b   : > { %5378 = vmatpush.msra.mxu0 %v10765_v14  ;;  %5483 = vmatpush.msra.mxu1 %v5482_v17  ;;  %v5500_v17 = vand.u32 4294901760, %v5499_v11  ;;  %v5506_v5 = vand.u32 4294901760, %v5505_v10  ;;  %v10942_v11 = vand.u32 4294901760, %v5752_v7  ;;  %v11773_v53 = vand.u32 4294901760, %v10935_v26 }
 0x34c   : > { %5549 = vmatpush.msra.mxu2 %v10832_v32  ;;  %5595 = vmatpush.msra.mxu3 %v10796_v51  ;;  %v4389_v28 = vpop.f32.mrf.mxu0  ;;  %v10950_v10 = vsub.f32 %v5753_v31, %v10932_v60 }
 0x34d   : > { %5380 = vmatpush.msra.mxu0 %v10782_v2  ;;  %5489 = vmatpush.msra.mxu1 %v5488_v19  ;;  %v4390_v43 = vadd.f32 %v4389_v28, %v10735_v3  ;;  %v11769_v19 = vand.u32 4294901760, %v10925_v25  ;;  %v5396_v3 = vsub.f32 %v5344_v57, %v10929_v8  ;;  %v5750_v28 = vld [vmem:[#allocation4 + $0x6d0] sm:$0xff] }
 0x34e   : > { %5552 = vmatpush.msra.mxu2 %v10845_v18  ;;  %5597 = vmatpush.msra.mxu3 %v10807_v30  ;;  %12284 = vst [vmem:[#allocation79_spill] sm:$0xff] %v10950_v10 }
 0x34f   : > { %5382 = vmatpush.msra.mxu0 %v10796_v51  ;;  %5495 = vmatpush.msra.mxu1 %v5494_v42  ;;  %v4434_v44 = vadd.f32 %v4433_v29, %v4390_v43  ;;  %v5345_v42 = vld [vmem:[#allocation3 + $0x25] sm:$0xff]  ;;  %v4549_v29 = vpop.f32.mrf.mxu3  ;;  %v5808_v57 = vsub.f32 %v10925_v25, %v11769_v19  ;;  %v10963_v43 = vand.u32 4294901760, %v5750_v28  ;;  %v5748_v19 = vld [vmem:[#allocation4 + $0x6c0] sm:$0xff] }
 0x350   : > { %5555 = vmatpush.msra.mxu2 %v10858_v46  ;;  %5599 = vmatpush.msra.mxu3 %v10822_v12  ;;  %v10967_v24 = vand.u32 4294901760, %v5345_v42 }
 0x351   : > { %5384 = vmatpush.msra.mxu0 %v10807_v30  ;;  %5501 = vmatpush.msra.mxu1 %v5500_v17  ;;  %v4509_v54 = vadd.f32 %v4508_v35, %v4434_v44  ;;  %v10961_v17 = vsub.f32 %v5752_v7, %v10942_v11  ;;  %v5749_v35 = vld [vmem:[#allocation4 + $0x6c8] sm:$0xff]  ;;  %v5397_v44 = vand.u32 4294901760, %v5396_v3 }
 0x352   : > { %5558 = vmatpush.msra.mxu2 %v10870_v59  ;;  %5601 = vmatpush.msra.mxu3 %v10834_v50  ;;  %v10983_v36 = vand.u32 4294901760, %v5749_v35 }
 0x353   : > { %5386 = vmatpush.msra.mxu0 %v10822_v12  ;;  %5507 = vmatpush.msra.mxu1 %v5506_v5  ;;  %12285 = vst [vmem:[#allocation33_spill] sm:$0xff] %v10961_v17  ;;  %v4550_v31 = vadd.f32 %v4549_v29, %v4509_v54  ;;  %v5814_v5 = vsub.f32 %v10935_v26, %v11773_v53  ;;  %v5809_v53 = vand.u32 4294901760, %v5808_v57  ;;  %v4439_v54 = vpop.f32.mrf.mxu1 }
 0x354   : > { %5561 = vmatpush.msra.mxu2 %v10882_v22  ;;  %5603 = vmatpush.msra.mxu3 %v10847_v48  ;;  %v10979_v29 = vsub.f32 %v5751_v37, %v10952_v62  ;;  %v10989_v37 = vsub.f32 %v5750_v28, %v10963_v43  ;;  %v5404_v28 = vsub.f32 %v5345_v42, %v10967_v24  ;;  %v5746_v22 = vld [vmem:[#allocation4 + $0x6b0] sm:$0xff] }
 0x355   : > { %5509 = vmatmul.f32.vlgmr.msra.gmra.mxu1 %v10929_v8  ;;  %5388 = vmatpush.msra.mxu0 %v10834_v50  ;;  %v10976_v7 = vadd.f32 %v4550_v31, %v10754_v40  ;;  %v4394_v33 = vpop.f32.mrf.mxu0  ;;  %v5747_v31 = vld [vmem:[#allocation4 + $0x6b8] sm:$0xff] }
 0x356   : > { %12287 = vst [vmem:[#allocation29_spill] sm:$0xff] %v10979_v29  ;;  %5695 = vmatpush.msrb.mxu1 %v10674_v6  ;;  %5564 = vmatpush.msra.mxu2 %v10892_v9  ;;  %v4395_v0 = vadd.f32 %v4394_v33, %v10800_v38  ;;  %v5398_v6 = vsub.f32 %v5396_v3, %v5397_v44  ;;  %v5815_v33 = vand.u32 4294901760, %v5814_v5  ;;  %v12288_v38 = vand.u32 4294901760, %v10950_v10 }
 0x357   : > { %12286 = vst [vmem:[#allocation82_spill] sm:$0xff] %v10976_v7  ;;  %5605 = vmatpush.msra.mxu3 %v10860_v61  ;;  %5567 = vmatmul.f32.vlgmr.msra.gmra.mxu2 %v5396_v3  ;;  %v10993_v7 = vand.u32 4294901760, %v5748_v19  ;;  %v12289_v5 = vand.u32 4294901760, %v10961_v17  ;;  %v4553_v40 = vpop.f32.mrf.mxu3 }
 0x358   : > { %5697 = vmatpush.msrb.mxu1 %v10681_v52  ;;  %5757 = vmatpush.msrb.mxu2 %v10908_v16  ;;  %v4440_v9 = vadd.f32 %v4439_v54, %v4395_v0  ;;  %v5820_v57 = vsub.f32 %v10950_v10, %v12288_v38  ;;  %v4512_v52 = vpop.f32.mrf.mxu2  ;;  %v11004_v0 = vsub.f32 %v5749_v35, %v10983_v36  ;;  %v11006_v54 = vand.u32 4294901760, %v5747_v31  ;;  %v5745_v10 = vld [vmem:[#allocation4 + $0x6a8] sm:$0xff] }
 0x359   : > { %5390 = vmatpush.msra.mxu0 %v10847_v48  ;;  %5607 = vmatpush.msra.mxu3 %v10872_v13  ;;  %v5826_v42 = vsub.f32 %v10961_v17, %v12289_v5  ;;  %v11018_v35 = vand.u32 4294901760, %v5746_v22  ;;  %v12290_v5 = vand.u32 4294901760, %v10979_v29  ;;  %v5744_v17 = vld [vmem:[#allocation4 + $0x6a0] sm:$0xff] }
 0x35a   : > { %5611 = vmatmul.f32.vlgmr.msra.gmra.mxu3 %v5397_v44  ;;  %5699 = vmatpush.msrb.mxu1 %v10691_v55  ;;  %v4513_v3 = vadd.f32 %v4512_v52, %v4440_v9  ;;  %v11016_v55 = vsub.f32 %v5748_v19, %v10993_v7  ;;  %v5821_v44 = vand.u32 4294901760, %v5820_v57  ;;  %v5405_v52 = vand.u32 4294901760, %v5404_v28 }
 0x35b   : > { %5759 = vmatpush.msrb.mxu2 %v10916_v34  ;;  %5810 = vmatpush.msrb.mxu3 %v5809_v53  ;;  %v5399_v53 = vand.u32 4294901760, %v5398_v6  ;;  %v5832_v38 = vsub.f32 %v10979_v29, %v12290_v5  ;;  %v11033_v6 = vand.u32 4294901760, %v5745_v10  ;;  %v12291_v57 = vand.u32 4294901760, %v10989_v37  ;;  %v5743_v5 = vld [vmem:[#allocation4 + $0x698] sm:$0xff] }
 0x35c   : > { %5392 = vmatpush.msra.mxu0 %v10860_v61  ;;  %5701 = vmatpush.msrb.mxu1 %v10701_v4  ;;  %v4554_v9 = vadd.f32 %v4553_v40, %v4513_v3  ;;  %v11782_v4 = vand.u32 4294901760, %v11004_v0  ;;  %v11031_v40 = vsub.f32 %v5747_v31, %v11006_v54  ;;  %v12292_v29 = vand.u32 4294901760, %v10689_v49 }
 0x35d   : > { %5761 = vmatpush.msrb.mxu2 %v10932_v60  ;;  %5816 = vmatpush.msrb.mxu3 %v5815_v33  ;;  %v5827_v33 = vand.u32 4294901760, %v5826_v42  ;;  %v5838_v3 = vsub.f32 %v10989_v37, %v12291_v57  ;;  %v11044_v31 = vsub.f32 %v5746_v22, %v11018_v35  ;;  %v5406_v42 = vsub.f32 %v5404_v28, %v5405_v52 }
 0x35e   : > { %5394 = vmatpush.msra.mxu0 %v10872_v13  ;;  %5513 = vmatmul.f32.gmra.mxu1 %v10967_v24  ;;  %v11028_v19 = vadd.f32 %v4554_v9, %v10815_v56  ;;  %v11046_v9 = vand.u32 4294901760, %v5744_v17  ;;  %v12293_v57 = vand.u32 4294901760, %v10699_v63  ;;  %v5844_v49 = vsub.f32 %v11004_v0, %v11782_v4  ;;  %v5741_v4 = vld [vmem:[#allocation4 + $0x688] sm:$0xff] }
 0x35f   : > { %5400 = vmatmul.f32.vlgmr.msra.gmra.mxu0 %v5399_v53  ;;  %5703 = vmatpush.msrb.mxu1 %v10714_v58  ;;  %v5833_v58 = vand.u32 4294901760, %v5832_v38  ;;  %v5742_v53 = vld [vmem:[#allocation4 + $0x690] sm:$0xff]  ;;  %v11056_v22 = vsub.f32 %v5745_v10, %v11033_v6  ;;  %v11058_v56 = vand.u32 4294901760, %v5743_v5  ;;  %v12294_v63 = vand.u32 4294901760, %v10710_v47 }
 0x360   : > { %5624 = vmatpush.msrb.mxu0 %v12292_v29  ;;  %5763 = vmatpush.msrb.mxu2 %v10942_v11  ;;  %v11783_v29 = vand.u32 4294901760, %v11031_v40  ;;  %v11070_v10 = vand.u32 4294901760, %v5742_v53  ;;  %v12296_v47 = vand.u32 4294901760, %v10721_v21 }
 0x361   : > { %5822 = vmatpush.msrb.mxu3 %v5821_v44  ;;  %5572 = vmatmul.f32.gmra.mxu2 %v5404_v28  ;;  %v5839_v28 = vand.u32 4294901760, %v5838_v3  ;;  %v5737_v44 = vld [vmem:[#allocation3 + $0x1e] sm:$0xff] }
 0x362   : > { %5628 = vmatpush.msrb.mxu0 %v12293_v57  ;;  %5705 = vmatpush.msrb.mxu1 %v10733_v20  ;;  %v12295_v20 = vand.u32 4294901760, %v11016_v55  ;;  %v11068_v57 = vsub.f32 %v5744_v17, %v11046_v9  ;;  %v5856_v3 = vsub.f32 %v11031_v40, %v11783_v29  ;;  %v5867_v17 = vand.u32 4294901760, %v11056_v22 }
 0x363   : > { %5765 = vmatpush.msrb.mxu2 %v10952_v62  ;;  %5828 = vmatpush.msrb.mxu3 %v5827_v33  ;;  %v5845_v33 = vand.u32 4294901760, %v5844_v49  ;;  %v11099_v29 = vand.u32 4294901760, %v5737_v44 }
 0x364   : > { %5617 = vmatmul.f32.gmra.mxu3 %v5405_v52  ;;  %5632 = vmatpush.msrb.mxu0 %v12294_v63  ;;  %v5850_v38 = vsub.f32 %v11016_v55, %v12295_v20  ;;  %v5407_v52 = vand.u32 4294901760, %v5406_v42  ;;  %v11081_v63 = vsub.f32 %v5743_v5, %v11058_v56  ;;  %v5740_v20 = vld [vmem:[#allocation4 + $0x680] sm:$0xff]  ;;  %v5873_v49 = vand.u32 4294901760, %v11068_v57 }
 0x365   : > { %5707 = vmatpush.msrb.mxu1 %v10749_v23  ;;  %5767 = vmatpush.msrb.mxu2 %v10963_v43  ;;  %v11085_v23 = vand.u32 4294901760, %v5741_v4  ;;  %v11092_v5 = vsub.f32 %v5742_v53, %v11070_v10 }
 0x366   : > { %5834 = vmatpush.msrb.mxu3 %v5833_v58  ;;  %5636 = vmatpush.msrb.mxu0 %v12296_v47  ;;  %v5851_v21 = vand.u32 4294901760, %v5850_v38  ;;  %v12297_v58 = vand.u32 4294901760, %v11044_v31  ;;  %v12298_v47 = vand.u32 4294901760, %v10740_v41  ;;  %v5868_v38 = vsub.f32 %v11056_v22, %v5867_v17 }
 0x367   : > { %5709 = vmatpush.msrb.mxu1 %v10765_v14  ;;  %5769 = vmatpush.msrb.mxu2 %v10983_v36  ;;  %v11097_v14 = vand.u32 4294901760, %v5740_v20  ;;  %v5879_v53 = vand.u32 4294901760, %v11081_v63  ;;  %v11110_v41 = vsub.f32 %v5741_v4, %v11085_v23 }
 0x368   : > { %5840 = vmatpush.msrb.mxu3 %v5839_v28  ;;  %5408 = vmatmul.f32.gmra.mxu0 %v5407_v52  ;;  %v5862_v42 = vsub.f32 %v11044_v31, %v12297_v58  ;;  %v5857_v28 = vand.u32 4294901760, %v5856_v3  ;;  %v12299_v52 = vand.u32 4294901760, %v10763_v1  ;;  %v5885_v3 = vand.u32 4294901760, %v11092_v5 }
 0x369   : > { %5640 = vmatpush.msrb.mxu0 %v12298_v47  ;;  %5711 = vmatpush.msrb.mxu1 %v10782_v2  ;;  %v12300_v58 = vand.u32 4294901760, %v10777_v27  ;;  %v11121_v1 = vsub.f32 %v5737_v44, %v11099_v29  ;;  %v5869_v4 = vand.u32 4294901760, %v5868_v38  ;;  %v4724_v27 = vpop.f32.mrf.mxu1  ;;  %v12302_v38 = vand.u32 4294901760, %v10805_v39 }
 0x36a   : > { %5771 = vmatpush.msrb.mxu2 %v10993_v7  ;;  %5846 = vmatpush.msrb.mxu3 %v5845_v33  ;;  %v5863_v2 = vand.u32 4294901760, %v5862_v42  ;;  %v5874_v33 = vsub.f32 %v11068_v57, %v5873_v49  ;;  %v12301_v42 = vand.u32 4294901760, %v10788_v15 }
 0x36b   : > { %5644 = vmatpush.msrb.mxu0 %v12299_v52  ;;  %5713 = vmatpush.msrb.mxu1 %v10796_v51  ;;  %v11124_v51 = vsub.f32 %v5740_v20, %v11097_v14  ;;  %v5886_v20 = vsub.f32 %v11092_v5, %v5885_v3  ;;  %v5790_v15 = vand.u32 4294901760, %v11121_v1 }
 0x36c   : > { %5773 = vmatpush.msrb.mxu2 %v11006_v54  ;;  %5852 = vmatpush.msrb.mxu3 %v5851_v21  ;;  %v5880_v21 = vsub.f32 %v11081_v63, %v5879_v53  ;;  %v5875_v44 = vand.u32 4294901760, %v5874_v33  ;;  %v12303_v33 = vand.u32 4294901760, %v10820_v45 }
 0x36d   : > { %5648 = vmatpush.msrb.mxu0 %v12300_v58  ;;  %5715 = vmatpush.msrb.mxu1 %v10807_v30  ;;  %v5891_v30 = vand.u32 4294901760, %v11110_v41  ;;  %v5791_v45 = vsub.f32 %v11121_v1, %v5790_v15 }
 0x36e   : > { %5775 = vmatpush.msrb.mxu2 %v11018_v35  ;;  %5858 = vmatpush.msrb.mxu3 %v5857_v28  ;;  %v5738_v28 = vld [vmem:[#allocation3 + $0x26] sm:$0xff]  ;;  %v4782_v58 = vpop.f32.mrf.mxu2 }
 0x36f   : > { %5652 = vmatpush.msrb.mxu0 %v12301_v42  ;;  %5717 = vmatpush.msrb.mxu1 %v10822_v12  ;;  %v5897_v12 = vand.u32 4294901760, %v11124_v51  ;;  %v5892_v39 = vsub.f32 %v11110_v41, %v5891_v30  ;;  %v11150_v42 = vand.u32 4294901760, %v5738_v28 }
 0x370   : > { %5777 = vmatpush.msrb.mxu2 %v11033_v6  ;;  %5864 = vmatpush.msrb.mxu3 %v5863_v2  ;;  %v4615_v47 = vpop.f32.mrf.mxu0  ;;  %v5881_v2 = vand.u32 4294901760, %v5880_v21 }
 0x371   : > { %5656 = vmatpush.msrb.mxu0 %v12302_v38  ;;  %5719 = vmatpush.msrb.mxu1 %v10834_v50  ;;  %v4725_v52 = vadd.f32 %v4724_v27, %v4615_v47  ;;  %v4826_v38 = vpop.f32.mrf.mxu3  ;;  %v5887_v27 = vand.u32 4294901760, %v5886_v20  ;;  %v12306_v20 = vand.u32 4294901760, %v10858_v46  ;;  %v5792_v47 = vand.u32 4294901760, %v5791_v45  ;;  %v12310_v45 = vld [vmem:[#allocation17_spill] sm:$0xff] }
 0x372   : > { %5779 = vmatpush.msrb.mxu2 %v11046_v9  ;;  %5870 = vmatpush.msrb.mxu3 %v5869_v4  ;;  %v12304_v4 = vand.u32 4294901760, %v10832_v32  ;;  %v5893_v32 = vand.u32 4294901760, %v5892_v39  ;;  %v12308_v39 = vand.u32 4294901760, %v10870_v59  ;;  %v12311_v59 = vand.u32 4294901760, %v12310_v45 }
 0x373   : > { %5660 = vmatpush.msrb.mxu0 %v12303_v33  ;;  %5721 = vmatpush.msrb.mxu1 %v10847_v48  ;;  %v4783_v50 = vadd.f32 %v4782_v58, %v4725_v52  ;;  %v5898_v48 = vsub.f32 %v11124_v51, %v5897_v12  ;;  %v4728_v58 = vpop.f32.mrf.mxu1  ;;  %v12307_v33 = vand.u32 4294901760, %v10925_v25 }
 0x374   : > { %5781 = vmatpush.msrb.mxu2 %v11058_v56  ;;  %5876 = vmatpush.msrb.mxu3 %v5875_v44  ;;  %v12305_v44 = vand.u32 4294901760, %v10845_v18 }
 0x375   : > { %5664 = vmatpush.msrb.mxu0 %v12304_v4  ;;  %5723 = vmatpush.msrb.mxu1 %v10860_v61  ;;  %v11162_v21 = vadd.f32 %v4826_v38, %v4783_v50  ;;  %v11169_v61 = vsub.f32 %v5738_v28, %v11150_v42  ;;  %v5899_v52 = vand.u32 4294901760, %v5898_v48  ;;  %v12312_v48 = vld [vmem:[#allocation79_spill] sm:$0xff] }
 0x376   : > { %5783 = vmatpush.msrb.mxu2 %v11070_v10  ;;  %5882 = vmatpush.msrb.mxu3 %v5881_v2 }
 0x377   : > { %5668 = vmatpush.msrb.mxu0 %v12305_v44  ;;  %5725 = vmatpush.msrb.mxu1 %v10872_v13  ;;  %v5798_v13 = vand.u32 4294901760, %v11169_v61  ;;  %v12313_v44 = vand.u32 4294901760, %v12312_v48 }
 0x378   : > { %5785 = vmatpush.msrb.mxu2 %v11085_v23  ;;  %5888 = vmatpush.msrb.mxu3 %v5887_v27  ;;  %v4787_v28 = vpop.f32.mrf.mxu2  ;;  %v12309_v27 = vand.u32 4294901760, %v10935_v26 }
 0x379   : > { %5727 = vmatmul.f32.vlgmr.msrb.gmra.mxu1 %v10929_v8  ;;  %5672 = vmatpush.msrb.mxu0 %v12306_v20  ;;  %v4623_v2 = vpop.f32.mrf.mxu0  ;;  %v5799_v4 = vsub.f32 %v11169_v61, %v5798_v13 }
 0x37a   : > { %5970 = vmatpush.msra.mxu1 %v10908_v16  ;;  %5787 = vmatpush.msrb.mxu2 %v11097_v14  ;;  %v4729_v18 = vadd.f32 %v4728_v58, %v4623_v2 }
 0x37b   : > { %5894 = vmatpush.msrb.mxu3 %v5893_v32  ;;  %5793 = vmatmul.f32.vlgmr.msrb.gmra.mxu2 %v5792_v47  ;;  %v4832_v50 = vpop.f32.mrf.mxu3  ;;  %v12314_v32 = vld [vmem:[#allocation21_spill] sm:$0xff] }
 0x37c   : > { %5972 = vmatpush.msra.mxu1 %v10916_v34  ;;  %6017 = vmatpush.msra.mxu2 %v12307_v33  ;;  %v4788_v46 = vadd.f32 %v4787_v28, %v4729_v18  ;;  %v12315_v20 = vand.u32 4294901760, %v12314_v32  ;;  %v12316_v47 = vld [vmem:[#allocation33_spill] sm:$0xff] }
 0x37d   : > { %5676 = vmatpush.msrb.mxu0 %v12308_v39  ;;  %5900 = vmatpush.msrb.mxu3 %v5899_v52  ;;  %v12317_v52 = vand.u32 4294901760, %v12316_v47 }
 0x37e   : > { %5902 = vmatmul.f32.vlgmr.msrb.gmra.mxu3 %v11099_v29  ;;  %5974 = vmatpush.msra.mxu1 %v10932_v60  ;;  %v11185_v38 = vadd.f32 %v4832_v50, %v4788_v46 }
 0x37f   : > { %6021 = vmatpush.msra.mxu2 %v12309_v27  ;;  %6088 = vmatpush.msra.mxu3 %v10908_v16  ;;  %v5800_v16 = vand.u32 4294901760, %v5799_v4 }
 0x380   : > { %5680 = vmatpush.msrb.mxu0 %v12311_v59  ;;  %5976 = vmatpush.msra.mxu1 %v10942_v11 }
 0x381   : > { %6025 = vmatpush.msra.mxu2 %v12313_v44  ;;  %6090 = vmatpush.msra.mxu3 %v10916_v34  ;;  %v12318_v34 = vld [vmem:[#allocation29_spill] sm:$0xff] }
 0x382   : > { %5684 = vmatpush.msrb.mxu0 %v12315_v20  ;;  %5731 = vmatmul.f32.gmra.mxu1 %v10967_v24  ;;  %v12319_v58 = vand.u32 4294901760, %v12318_v34 }
 0x383   : > { %5686 = vmatmul.f32.vlgmr.msrb.gmra.mxu0 %v10929_v8  ;;  %5978 = vmatpush.msra.mxu1 %v10952_v62  ;;  %v12320_v8 = vand.u32 4294901760, %v10989_v37 }
 0x384   : > { %5912 = vmatpush.msra.mxu0 %v10925_v25  ;;  %6029 = vmatpush.msra.mxu2 %v12317_v52 }
 0x385   : > { %6092 = vmatpush.msra.mxu3 %v10932_v60  ;;  %5801 = vmatmul.f32.gmra.mxu2 %v5800_v16  ;;  %v12321_v60 = vand.u32 4294901760, %v11004_v0 }
 0x386   : > { %5915 = vmatpush.msra.mxu0 %v10935_v26  ;;  %5980 = vmatpush.msra.mxu1 %v10963_v43  ;;  %v12322_v26 = vand.u32 4294901760, %v11016_v55 }
 0x387   : > { %6033 = vmatpush.msra.mxu2 %v12319_v58  ;;  %6094 = vmatpush.msra.mxu3 %v10942_v11 }
 0x388   : > { %5906 = vmatmul.f32.gmra.mxu3 %v11150_v42  ;;  %5918 = vmatpush.msra.mxu0 %v12312_v48 }
 0x389   : > { %5982 = vmatpush.msra.mxu1 %v10983_v36  ;;  %6037 = vmatpush.msra.mxu2 %v12320_v8 }
 0x38a   : > { %6096 = vmatpush.msra.mxu3 %v10952_v62  ;;  %5921 = vmatpush.msra.mxu0 %v12316_v47  ;;  %v12323_v62 = vand.u32 4294901760, %v11031_v40  ;;  %v4942_v25 = vpop.f32.mrf.mxu1 }
 0x38b   : > { %5984 = vmatpush.msra.mxu1 %v10993_v7  ;;  %6041 = vmatpush.msra.mxu2 %v12321_v60 }
 0x38c   : > { %6098 = vmatpush.msra.mxu3 %v10963_v43  ;;  %5690 = vmatmul.f32.gmra.mxu0 %v10967_v24  ;;  %v12324_v24 = vand.u32 4294901760, %v11044_v31 }
 0x38d   : > { %5924 = vmatpush.msra.mxu0 %v12318_v34  ;;  %5986 = vmatpush.msra.mxu1 %v11006_v54 }
 0x38e   : > { %6045 = vmatpush.msra.mxu2 %v12322_v26  ;;  %6100 = vmatpush.msra.mxu3 %v10983_v36 }
 0x38f   : > { %5927 = vmatpush.msra.mxu0 %v10989_v37  ;;  %5988 = vmatpush.msra.mxu1 %v11018_v35 }
 0x390   : > { %6049 = vmatpush.msra.mxu2 %v12323_v62  ;;  %6102 = vmatpush.msra.mxu3 %v10993_v7  ;;  %v12325_v7 = vld [vmem:[#allocation82_spill] sm:$0xff] }
 0x391   : > { %5930 = vmatpush.msra.mxu0 %v11004_v0  ;;  %5990 = vmatpush.msra.mxu1 %v11033_v6 }
 0x392   : > { %6053 = vmatpush.msra.mxu2 %v12324_v24  ;;  %6104 = vmatpush.msra.mxu3 %v11006_v54 }
 0x393   : > { %5933 = vmatpush.msra.mxu0 %v11016_v55  ;;  %5992 = vmatpush.msra.mxu1 %v11046_v9  ;;  %v4946_v55 = vpop.f32.mrf.mxu1 }
 0x394   : > { %6057 = vmatpush.msra.mxu2 %v5867_v17  ;;  %6106 = vmatpush.msra.mxu3 %v11018_v35  ;;  %v4901_v36 = vpop.f32.mrf.mxu0 }
 0x395   : > { %5936 = vmatpush.msra.mxu0 %v11031_v40  ;;  %5994 = vmatpush.msra.mxu1 %v11058_v56  ;;  %v4902_v11 = vadd.f32 %v4901_v36, %v11162_v21 }
 0x396   : > { %6061 = vmatpush.msra.mxu2 %v5873_v49  ;;  %6108 = vmatpush.msra.mxu3 %v11033_v6  ;;  %v5008_v6 = vpop.f32.mrf.mxu2 }
 0x397   : > { %5939 = vmatpush.msra.mxu0 %v11044_v31  ;;  %5996 = vmatpush.msra.mxu1 %v11070_v10  ;;  %v4943_v43 = vadd.f32 %v4942_v25, %v4902_v11 }
 0x398   : > { %6065 = vmatpush.msra.mxu2 %v5879_v53  ;;  %6110 = vmatpush.msra.mxu3 %v11046_v9 }
 0x399   : > { %5942 = vmatpush.msra.mxu0 %v11056_v22  ;;  %5998 = vmatpush.msra.mxu1 %v11085_v23  ;;  %v11259_v37 = vadd.f32 %v4943_v43, %v12325_v7 }
 0x39a   : > { %6069 = vmatpush.msra.mxu2 %v5885_v3  ;;  %6112 = vmatpush.msra.mxu3 %v11058_v56  ;;  %v5117_v56 = vpop.f32.mrf.mxu3 }
 0x39b   : > { %5945 = vmatpush.msra.mxu0 %v11068_v57  ;;  %6000 = vmatpush.msra.mxu1 %v11097_v14  ;;  %v5118_v21 = vadd.f32 %v5117_v56, %v5008_v6 }
 0x39c   : > { %6073 = vmatpush.msra.mxu2 %v5891_v30  ;;  %6114 = vmatpush.msra.mxu3 %v11070_v10 }
 0x39d   : > { %6004 = vmatmul.f32.vlgmr.msra.gmra.mxu1 %v5790_v15  ;;  %5948 = vmatpush.msra.mxu0 %v11081_v63  ;;  %v4905_v0 = vpop.f32.mrf.mxu0 }
 0x39e   : > { %6077 = vmatpush.msra.mxu2 %v5897_v12  ;;  %6116 = vmatpush.msra.mxu3 %v11085_v23  ;;  %v4906_v54 = vadd.f32 %v4905_v0, %v11185_v38  ;;  %v5016_v31 = vpop.f32.mrf.mxu2 }
 0x39f   : > { %6079 = vmatmul.f32.vlgmr.msra.gmra.mxu2 %v11099_v29  ;;  %5951 = vmatpush.msra.mxu0 %v11092_v5 }
 0x3a0   : > { %6118 = vmatpush.msra.mxu3 %v11097_v14  ;;  %v4947_v35 = vadd.f32 %v4946_v55, %v4906_v54 }
 0x3a1   : > { %6120 = vmatmul.f32.vlgmr.msra.gmra.mxu3 %v11099_v29  ;;  %5954 = vmatpush.msra.mxu0 %v11110_v41 }
 0x3a2   : > { %v11282_v40 = vadd.f32 %v4947_v35, %v11028_v19  ;;  %v5121_v9 = vpop.f32.mrf.mxu3 }
 0x3a3   : > { %5957 = vmatpush.msra.mxu0 %v11124_v51  ;;  %v5122_v39 = vadd.f32 %v5121_v9, %v5016_v31 }
 0x3a4   : > { %5960 = vmatmul.f32.vlgmr.msra.gmra.mxu0 %v11121_v1 }
 0x3a5   : > { %6010 = vmatmul.f32.gmra.mxu1 %v5798_v13 }
 0x3a7   : > { %6083 = vmatmul.f32.gmra.mxu2 %v11150_v42 }
 0x3a9   : > { %6124 = vmatmul.f32.gmra.mxu3 %v11150_v42 }
 0x3ac   : > { %5965 = vmatmul.f32.gmra.mxu0 %v11169_v61 }
 0x3ae   : > { %v5219_v29 = vpop.f32.mrf.mxu1 }
 0x3b6   : > { %v5294_v22 = vpop.f32.mrf.mxu2 }
 0x3b7   : > { %v5225_v10 = vpop.f32.mrf.mxu1 }
 0x3b8   : > { %v5175_v19 = vpop.f32.mrf.mxu0 }
 0x3b9   : > { %v5335_v57 = vpop.f32.mrf.mxu3  ;;  %v5176_v61 = vadd.f32 %v5175_v19, %v5118_v21 }
 0x3bb   : > { %v5220_v28 = vadd.f32 %v5219_v29, %v5176_v61  ;;  %v12326_v61 = vlaneseq }
 0x3bd   : > { %v5295_v38 = vadd.f32 %v5294_v22, %v5220_v28  ;;  %vm11295_vm13 = vcmp.lt.s32.totalorder %v12326_v61, 16  ;;  %vm11323_vm3 = vcmp.ge.s32.totalorder %v12326_v61, 16  ;;  %vm11328_vm4 = vcmp.lt.s32.totalorder %v12326_v61, 32 }
 0x3be   : > { %vm6180_vm5 = vmand %vm11323_vm3, %vm11328_vm4  ;;  %vm11343_vm6 = vcmp.ge.s32.totalorder %v12326_v61, 32  ;;  %vm11348_vm7 = vcmp.lt.s32.totalorder %v12326_v61, 48  ;;  %vm11353_vm8 = vcmp.ge.s32.totalorder %v12326_v61, 48  ;;  %vm11418_vm0 = vcmp.lt.s32.totalorder %v12326_v61, 112 }
 0x3bf   : > { %v5336_v20 = vadd.f32 %v5335_v57, %v5295_v38 }
 0x3c0   : > { %v5298_v63 = vpop.f32.mrf.mxu2 }
 0x3c1   : > { %v5180_v17 = vpop.f32.mrf.mxu0  ;;  %v5342_v26 = vadd.f32 %v5336_v20, %v11259_v37 }
 0x3c2   : > { %v5181_v27 = vadd.f32 %v5180_v17, %v5122_v39 }
 0x3c3   : > { %v5339_v23 = vpop.f32.mrf.mxu3 }
 0x3c4   : > { %v5226_v16 = vadd.f32 %v5225_v10, %v5181_v27 }
 0x3c6   : > { %v5299_v62 = vadd.f32 %v5298_v63, %v5226_v16 }
 0x3c8   : > { %v5340_v54 = vadd.f32 %v5339_v23, %v5299_v62 }
 0x3ca   : > { %v5343_v19 = vadd.f32 %v5340_v54, %v11282_v40 }
 0x3d2   : > { %v5510_v49 = vpop.f32.mrf.mxu1 }
 0x3da   : > { %v5568_v14 = vpop.f32.mrf.mxu2 }
 0x3db   : > { %v5514_v41 = vpop.f32.mrf.mxu1 }
 0x3dc   : > { %v5401_v5 = vpop.f32.mrf.mxu0 }
 0x3dd   : > { %v5612_v53 = vpop.f32.mrf.mxu3  ;;  %v5511_v2 = vadd.f32 %v5510_v49, %v5401_v5 }
 0x3df   : > { %v5569_v33 = vadd.f32 %v5568_v14, %v5511_v2 }
 0x3e1   : > { %v5613_v4 = vadd.f32 %v5612_v53, %v5569_v33 }
 0x3e4   : > { %v5573_v1 = vpop.f32.mrf.mxu2 }
 0x3e5   : > { %v5409_v3 = vpop.f32.mrf.mxu0 }
 0x3e6   : > { %v5515_v45 = vadd.f32 %v5514_v41, %v5409_v3 }
 0x3e7   : > { %v5618_v51 = vpop.f32.mrf.mxu3 }
 0x3e8   : > { %v5574_v47 = vadd.f32 %v5573_v1, %v5515_v45 }
 0x3ea   : > { %v5619_v24 = vadd.f32 %v5618_v51, %v5574_v47 }
 0x3f6   : > { %v5728_v30 = vpop.f32.mrf.mxu1 }
 0x3fe   : > { %v5794_v12 = vpop.f32.mrf.mxu2 }
 0x3ff   : > { %v5732_v18 = vpop.f32.mrf.mxu1 }
 0x400   : > { %v5687_v15 = vpop.f32.mrf.mxu0 }
 0x401   : > { %v5903_v42 = vpop.f32.mrf.mxu3  ;;  %v5688_v59 = vadd.f32 %v5687_v15, %v5613_v4 }
 0x402   : > { %v5904_v48 = vadd.f32 %v5903_v42, %v5794_v12 }
 0x403   : > { %v5729_v58 = vadd.f32 %v5728_v30, %v5688_v59 }
 0x405   : > { %v5735_v43 = vadd.f32 %v5729_v58, %v5342_v26 }
 0x408   : > { %v5802_v46 = vpop.f32.mrf.mxu2 }
 0x409   : > { %v5691_v13 = vpop.f32.mrf.mxu0 }
 0x40a   : > { %v5692_v25 = vadd.f32 %v5691_v13, %v5619_v24 }
 0x40b   : > { %v5907_v50 = vpop.f32.mrf.mxu3 }
 0x40c   : > { %v5908_v11 = vadd.f32 %v5907_v50, %v5802_v46  ;;  %v5733_v56 = vadd.f32 %v5732_v18, %v5692_v25 }
 0x40e   : > { %v5736_v57 = vadd.f32 %v5733_v56, %v5343_v19 }
 0x41a   : > { %v6005_v44 = vpop.f32.mrf.mxu1 }
 0x421   : > { %v5961_v32 = vpop.f32.mrf.mxu0 }
 0x422   : > { %v5962_v52 = vadd.f32 %v5961_v32, %v5904_v48  ;;  %v6080_v34 = vpop.f32.mrf.mxu2  ;;  %v6011_v6 = vpop.f32.mrf.mxu1 }
 0x424   : > { %v6006_v8 = vadd.f32 %v6005_v44, %v5962_v52  ;;  %v6121_v60 = vpop.f32.mrf.mxu3 }
 0x426   : > { %v6081_v36 = vadd.f32 %v6080_v34, %v6006_v8  ;;  %v6294_v8 = vld [vmem:[%s6880_s11] sm:$0xff]  ;;  %s6320_s11 = scalar_lea.sflag [#allocation11], %s6874_s5 }
 0x428   : > { %v6122_v7 = vadd.f32 %v6121_v60, %v6081_v36 }
 0x429   : > { %v5966_v0 = vpop.f32.mrf.mxu0 }
 0x42a   : > { %v6128_v55 = vadd.f32 %v6122_v7, %v5735_v43  ;;  %v5967_v35 = vadd.f32 %v5966_v0, %v5908_v11  ;;  %v6084_v29 = vpop.f32.mrf.mxu2 }
 0x42c   : > { %v6477_v31 = vmul.f32 -1.442695, %v6128_v55  ;;  %v6012_v9 = vadd.f32 %v6011_v6, %v5967_v35  ;;  %v6125_v22 = vpop.f32.mrf.mxu3 }
 0x42e   : > { %6560 = vpow2.f32 %v6477_v31  ;;  %v6085_v37 = vadd.f32 %v6084_v29, %v6012_v9 }
 0x430   : > { %v6126_v10 = vadd.f32 %v6125_v22, %v6085_v37 }
 0x432   : > { %v6129_v17 = vadd.f32 %v6126_v10, %v5736_v57 }
 0x434   : > { %v6561_v63 = vpop.eup %6560  ;;  %v6478_v49 = vmul.f32 -1.442695, %v6129_v17 }
 0x435   : > { %v6136_v5 = vadd.f32 1.0, %v6561_v63 }
 0x436   : > { %6562 = vpow2.f32 %v6478_v49 }
 0x437   : > { %6564 = vrcp.f32 %v6136_v5  ;;  %v6149_v1 = vand.u32 2147483648, %v6136_v5  ;;  %v6147_v51 = vand.u32 2147483647, %v6136_v5  ;;  %vm6143_vm10 = vweird.f32 %v6136_v5 }
 0x439   : > { %v6150_v12 = vor.u32 1.1754944e-38, %v6149_v1  ;;  %vm6148_vm12 = vcmp.eq.f32.partialorder %v6147_v51, 8.507059e+37 }
 0x43c   : > { %v6563_v23 = vpop.eup %6562 }
 0x43d   : > { %v6565_v14 = vpop.eup %6564  ;;  %v6137_v53 = vadd.f32 1.0, %v6563_v23 }
 0x43e   : > { %v6139_v41 = vmul.f32 %v6565_v14, %v6136_v5  ;;  %vm6144_vm9 = vweird.f32 %v6565_v14 }
 0x43f   : > { %6566 = vrcp.f32 %v6137_v53  ;;  %vm6145_vm11 = vmor %vm6143_vm10, %vm6144_vm9  ;;  %v6164_v28 = vand.u32 2147483648, %v6137_v53  ;;  %v6162_v46 = vand.u32 2147483647, %v6137_v53  ;;  %vm6158_vm15 = vweird.f32 %v6137_v53 }
 0x440   : > { %v6140_v3 = vsub.f32 1.0, %v6139_v41  ;;  %vm11358_vm9 = vcmp.lt.s32.totalorder %v12326_v61, 64  ;;  %vm6190_vm10 = vmand %vm11343_vm6, %vm11348_vm7  ;;  %vm6239_vm6 = vcmp.lt.s32.totalorder %v12326_v61, 128 }
 0x441   : > { %v6165_v50 = vor.u32 1.1754944e-38, %v6164_v28  ;;  %vm6163_vm2 = vcmp.eq.f32.partialorder %v6162_v46, 8.507059e+37  ;;  %vm12353_vm3 = vmand %vm11353_vm8, %vm11358_vm9 }
 0x442   : > { %v6141_v40 = vmul.f32 %v6565_v14, %v6140_v3 }
 0x444   : > { %v6142_v30 = vadd.f32 %v6565_v14, %v6141_v40 }
 0x445   : > { %v6567_v15 = vpop.eup %6566 }
 0x446   : > { %v6146_v42 = vsel %vm6145_vm11, %v6565_v14, %v6142_v30  ;;  %v6154_v21 = vmul.f32 %v6567_v15, %v6137_v53  ;;  %vm6159_vm14 = vweird.f32 %v6567_v15  ;;  %vm11786_vm11 = vmand %vm11353_vm8, %vm11358_vm9 }
 0x447   : > { %v6151_v18 = vsel %vm6148_vm12, %v6150_v12, %v6146_v42  ;;  %vm6160_vm1 = vmor %vm6158_vm15, %vm6159_vm14  ;;  %vm11383_vm12 = vcmp.ge.s32.totalorder %v12326_v61, 64  ;;  %vm11403_vm15 = vcmp.ge.s32.totalorder %v12326_v61, 80 }
 0x448   : > { %6172 = vst [vmem:[#allocation1] sm:$0xff] %v6151_v18  ;;  %v6155_v13 = vsub.f32 1.0, %v6154_v21 }
 0x449   : > { %6170 = vst.msk [vmem:[%s11299_s24] sm:$0x1] %vm11295_vm13, %v6151_v18 }
 0x44a   : > { %v6156_v33 = vmul.f32 %v6567_v15, %v6155_v13 }
 0x44c   : > { %v6157_v39 = vadd.f32 %v6567_v15, %v6156_v33 }
 0x44e   : > { %v6161_v38 = vsel %vm6160_vm1, %v6567_v15, %v6157_v39  ;;  %vm11408_vm1 = vcmp.lt.s32.totalorder %v12326_v61, 96 }
 0x44f   : > { %v6174_v27 = vld [vmem:[#allocation1 + $0x1] ss:$9 sm:$0xff]  ;;  %v6166_v4 = vsel %vm6163_vm2, %v6165_v50, %v6161_v38  ;;  %vm11413_vm2 = vcmp.ge.s32.totalorder %v12326_v61, 96 }
 0x450   : > { %6182 = vst [vmem:[#allocation1] sm:$0xff] %v6151_v18  ;;  %6175 = vrot.lane.b32.xlu1 %v6174_v27, %s6756_s21 }
 0x451   : > { %6242 = vst.msk [vmem:[%s11299_s24 + $0x1] sm:$0x1] %vm11295_vm13, %v6166_v4  ;;  %vm11388_vm13 = vcmp.lt.s32.totalorder %v12326_v61, 80 }
 0x452   : > { %vm11785_vm14 = vmand %vm11383_vm12, %vm11388_vm13 }
 0x453   : > { %vm12354_vm4 = vmand %vm11383_vm12, %vm11388_vm13 }
 0x457   : > { %v6184_v45 = vld [vmem:[#allocation1 + $0x2] ss:$9 sm:$0xff] }
 0x458   : > { %6192 = vst [vmem:[#allocation1] sm:$0xff] %v6151_v18  ;;  %6185 = vrot.lane.b32.xlu0 %v6184_v45, %s6757_s22 }
 0x45f   : > { %v6194_v59 = vld [vmem:[#allocation1 + $0x3] ss:$9 sm:$0xff] }
 0x460   : > { %6202 = vst [vmem:[#allocation1] sm:$0xff] %v6151_v18  ;;  %6195 = vrot.lane.b32.xlu2 %v6194_v59, %s6755_s18 }
 0x467   : > { %v6204_v48 = vld [vmem:[#allocation1 + $0x4] ss:$9 sm:$0xff] }
 0x468   : > { %6205 = vrot.lane.b32.xlu1 %v6204_v48, %s6753_s16  ;;  %6212 = vst [vmem:[#allocation1] sm:$0xff] %v6151_v18 }
 0x46f   : > { %v6214_v44 = vld [vmem:[#allocation1 + $0x5] ss:$9 sm:$0xff] }
 0x470   : > { %6215 = vrot.lane.b32.xlu0 %v6214_v44, %s6751_s20  ;;  %6222 = vst [vmem:[#allocation1] sm:$0xff] %v6151_v18 }
 0x477   : > { %v6224_v32 = vld [vmem:[#allocation1 + $0x6] ss:$9 sm:$0xff] }
 0x478   : > { %6225 = vrot.lane.b32.xlu2 %v6224_v32, %s6754_s17  ;;  %6232 = vst [vmem:[#allocation1] sm:$0xff] %v6151_v18 }
 0x47f   : > { %v6234_v20 = vld [vmem:[#allocation1 + $0x7] ss:$9 sm:$0xff] }
 0x480   : > { %6244 = vst [vmem:[#allocation1] sm:$0xff] %v6166_v4 }
 0x487   : > { %v6246_v16 = vld [vmem:[#allocation1 + $0x1] ss:$9 sm:$0xff] }
 0x488   : > { %6247 = vrot.lane.b32.xlu2 %v6246_v16, %s6756_s21  ;;  %6251 = vst [vmem:[#allocation1] sm:$0xff] %v6166_v4 }
 0x48f   : > { %v6253_v47 = vld [vmem:[#allocation1 + $0x2] ss:$9 sm:$0xff] }
 0x490   : > { %6254 = vrot.lane.b32.xlu1 %v6253_v47, %s6757_s22  ;;  %6258 = vst [vmem:[#allocation1] sm:$0xff] %v6166_v4 }
 0x497   : > { %v6260_v52 = vld [vmem:[#allocation1 + $0x3] ss:$9 sm:$0xff] }
 0x498   : > { %6261 = vrot.lane.b32.xlu0 %v6260_v52, %s6755_s18  ;;  %6265 = vst [vmem:[#allocation1] sm:$0xff] %v6166_v4  ;;  %s6664_s18 = scalar_lea.hbm %s11528_s3, 4 }
 0x49f   : > { %v6267_v34 = vld [vmem:[#allocation1 + $0x4] ss:$9 sm:$0xff] }
 0x4a0   : > { %6268 = vrot.lane.b32.xlu2 %v6267_v34, %s6753_s16  ;;  %6272 = vst [vmem:[#allocation1] sm:$0xff] %v6166_v4 }
 0x4a7   : > { %v6274_v58 = vld [vmem:[#allocation1 + $0x5] ss:$9 sm:$0xff] }
 0x4a8   : > { %6275 = vrot.lane.b32.xlu1 %v6274_v58, %s6751_s20  ;;  %6279 = vst [vmem:[#allocation1] sm:$0xff] %v6166_v4  ;;  %s6658_s20 = sshra.s32 %s6350_s10, 4  ;;  %s6659_s20 = int_to_ptr.hbm [resolvable:$true] %s6658_s20 }
 0x4a9   : > { %p6665_p12 = scmp.lt.s32.totalorder %s6659_s20, %s11528_s3 }
 0x4af   : > { %v6281_v60 = vld [vmem:[#allocation1 + $0x6] ss:$9 sm:$0xff] }
 0x4b0   : > { %6235 = vrot.lane.b32.xlu1 %v6234_v20, %s6752_s30  ;;  %6282 = vrot.lane.b32.xlu0 %v6281_v60, %s6754_s17  ;;  %6286 = vst [vmem:[#allocation1] sm:$0xff] %v6166_v4 }
 0x4b1   : > { %6301 = vst [vmem:[#allocation1] ss:$2 sm:$0xff] %v6294_v8 }
 0x4b7   : > { %v6288_v26 = vld [vmem:[#allocation1 + $0x7] ss:$9 sm:$0xff] }
 0x4b8   : > { %6289 = vrot.lane.b32.xlu2 %v6288_v26, %s6752_s30  ;;  %s6660_s30 = scalar_lea.hbm %s6659_s20, 2 }
 0x4b9   : > { %p6661_p1 = scmp.ne.s32.totalorder %s6659_s20, %s6660_s30  ;;  %p6666_p8 = scmp.lt.s32.totalorder %s6664_s18, %s6660_s30 }
 0x4ba   : > { %v6196_v54 = vpop.permute.xlu2 %6195 }
 0x4bb   : > { %p6662_p3 = pnand %p6661_p1, %p6839_p13  ;;  %p6667_p7 = por %p6666_p8, %p6665_p12 }
 0x4bd   : > { %p6663_p5 = pneg %p6662_p3 }
 0x4bf   : > { %p6668_p9 = pnand %p6667_p7, %p6663_p5 }
 0x4c2   : > { %v6176_v36 = vpop.permute.xlu1 %6175 }
 0x4c3   : > { %6181 = vst.msk [vmem:[%s11299_s24] sm:$0x1] %vm6180_vm5, %v6176_v36 }
 0x4ca   : > { %v6186_v0 = vpop.permute.xlu0 %6185 }
 0x4cb   : > { %6191 = vst.msk [vmem:[%s11299_s24] sm:$0x1] %vm6190_vm10, %v6186_v0 }
 0x4cc   : > { %6201 = vst.msk [vmem:[%s11299_s24] sm:$0x1] %vm11786_vm11, %v6196_v54  ;;  %vm6230_vm11 = vmand %vm11413_vm2, %vm11418_vm0 }
 0x4d2   : > { %v6226_v6 = vpop.permute.xlu2 %6225 }
 0x4da   : > { %v6206_v56 = vpop.permute.xlu1 %6205 }
 0x4db   : > { %6211 = vst.msk [vmem:[%s11299_s24] sm:$0x1] %vm11785_vm14, %v6206_v56  ;;  %vm6220_vm14 = vmand %vm11403_vm15, %vm11408_vm1 }
 0x4e2   : > { %v6216_v37 = vpop.permute.xlu0 %6215  ;;  %v6248_v22 = vpop.permute.xlu2 %6247 }
 0x4e3   : > { %6221 = vst.msk [vmem:[%s11299_s24] sm:$0x1] %vm6220_vm14, %v6216_v37 }
 0x4e4   : > { %6250 = vst.msk [vmem:[%s11299_s24 + $0x1] sm:$0x1] %vm6180_vm5, %v6248_v22  ;;  %vm6238_vm5 = vcmp.ge.s32.totalorder %v12326_v61, 112 }
 0x4e5   : > { %6231 = vst.msk [vmem:[%s11299_s24] sm:$0x1] %vm6230_vm11, %v6226_v6  ;;  %vm6240_vm7 = vmand %vm6238_vm5, %vm6239_vm6 }
 0x4fa   : > { %v6269_v17 = vpop.permute.xlu2 %6268 }
 0x502   : > { %v6255_v57 = vpop.permute.xlu1 %6254 }
 0x503   : > { %6257 = vst.msk [vmem:[%s11299_s24 + $0x1] sm:$0x1] %vm6190_vm10, %v6255_v57 }
 0x50a   : > { %v6262_v10 = vpop.permute.xlu0 %6261 }
 0x50b   : > { %6264 = vst.msk [vmem:[%s11299_s24 + $0x1] sm:$0x1] %vm12353_vm3, %v6262_v10 }
 0x50c   : > { %6271 = vst.msk [vmem:[%s11299_s24 + $0x1] sm:$0x1] %vm12354_vm4, %v6269_v17 }
 0x512   : > { %v6290_v23 = vpop.permute.xlu2 %6289 }
 0x51a   : > { %v6276_v63 = vpop.permute.xlu1 %6275 }
 0x51b   : > { %6278 = vst.msk [vmem:[%s11299_s24 + $0x1] sm:$0x1] %vm6220_vm14, %v6276_v63 }
 0x522   : > { %v6236_v49 = vpop.permute.xlu1 %6235  ;;  %v6283_v5 = vpop.permute.xlu0 %6282 }
 0x523   : > { %6241 = vst.msk [vmem:[%s11299_s24] sm:$0x1] %vm6240_vm7, %v6236_v49 }
 0x524   : > { %6285 = vst.msk [vmem:[%s11299_s24 + $0x1] sm:$0x1] %vm6230_vm11, %v6283_v5 }
 0x525   : > { %6292 = vst.msk [vmem:[%s11299_s24 + $0x1] sm:$0x1] %vm6240_vm7, %v6290_v23 }
 0x526   : > { %6671 = shalt.err (!%p6668_p9)
}
 0x527   : > { %6495 = dma.vmem_to_hbm [thread:$0]  (%p6839_p13), %s6348_s8, 32, %s6350_s10, %s6320_s11   ;;  %v6303_v53 = vld.sshfl [vmem:[#allocation1 + $0x8] sm:$0xff pattern:$0x75316420]  ;;  %vm12355_vm0 = vcmask 1043456  }
 0x528   : > { %s6487_s23 = sshll.u32 %s6803_s19, 3  ;;  %s209_s7 = scalar_lea.vmem [#allocation9], %s6474_s9  ;;  %v6302_v40 = vld.sshfl [vmem:[#allocation1] sm:$0xff pattern:$0x75316420] }
 0x529   : > { %s6331_s28 = scalar_lea.hbm %s11527_s2, %s6487_s23  ;;  %s6333_s20 = sshll.u32 %s209_s7, 4  ;;  %s6334_s20 = int_to_ptr.vmem [resolvable:$true] %s6333_s20 }
 0x52a   : > { %s6335_s30 = sshll.u32 %s6331_s28, 4  ;;  %s6315_s19 = scalar_lea.sflag [#allocation6], %s6874_s5  ;;  %s6336_s30 = int_to_ptr.hbm [resolvable:$true] %s6335_s30 }
 0x52b   : > { %s6692_s11 = scalar_lea.hbm %s11527_s2, 16 }
 0x52c   : > { %v6293_v14 = vld [vmem:[%s11299_s24] sm:$0x3]  ;;  %s6686_s24 = sshra.s32 %s6336_s30, 4  ;;  %s6687_s24 = int_to_ptr.hbm [resolvable:$true] %s6686_s24 }
 0x52d   : > { %v6296_v41 = vperm.slane %v6293_v14, 0  ;;  %v6297_v3 = vperm.slane %v6293_v14, 1  ;;  %s6688_s8 = scalar_lea.hbm %s6687_s24, 8  ;;  %p6693_p2 = scmp.lt.s32.totalorder %s6687_s24, %s11527_s2 }
 0x52e   : > { %p6689_p10 = scmp.ne.s32.totalorder %s6687_s24, %s6688_s8  ;;  %p6694_p6 = scmp.lt.s32.totalorder %s6692_s11, %s6688_s8 }
 0x52f   : > { %v6307_v1 = vmul.f32 %v6303_v53, %v6297_v3  ;;  %v6306_v51 = vmul.f32 %v6302_v40, %v6296_v41 }
 0x530   : > { %p6690_p11 = pnand %p6689_p10, %p6839_p13  ;;  %p6695_p1 = por %p6694_p6, %p6693_p2 }
 0x531   : > { %v6310_v30 = vrot.slane %v6307_v1, 4 }
 0x532   : > { %p6691_p0 = pneg %p6690_p11 }
 0x533   : > { %v6311_v15 = vsel %vm12355_vm0, %v6306_v51, %v6310_v30 }
 0x534   : > { %6313 = vst [vmem:[%s209_s7] sm:$0xff] %v6311_v15  ;;  %p6696_p3 = pnand %p6695_p1, %p6691_p0 }
 0x536   : > { %6699 = shalt.err (!%p6696_p3)
}
 0x537   : > { %6494 = dma.vmem_to_hbm [thread:$0]  (%p6839_p13), %s6334_s20, 128, %s6336_s30, %s6315_s19  }
 0x538 PF: > { %s6361_s5 = sand.u32 1, %s6734_s12   ;;  %p12356_p5 = scmp.ge.s32.totalorder %s6746_s15, 2 }
 0x539   : > { %s6362_s18 = scalar_lea.sflag [#allocation6], %s6361_s5 }
 0x53a   : > { %p6507_p12 = pnand %p12356_p5, %p6844_p4 }
 0x53c   : > { %p6508_p8 = pneg %p6507_p12 }
 0x53e   : > { %6725 = dma.done.wait (%p6508_p8), %s6362_s18, 128  }
 0x53f   : > { %6727 = vsyncadd (%p6508_p8), %s6362_s18, 4294967168  ;;  %s6372_s21 = scalar_lea.sflag [#allocation11], %s6361_s5 }
 0x540   : > { %6729 = dma.done.wait (%p6508_p8), %s6372_s21, 32  }
 0x541   : > { %6731 = vsyncadd (%p6508_p8), %s6372_s21, 4294967264  ;;  %p21_p13 = scmp.ge.s32.totalorder %s6819_s26, 4   ;;  %s12357_s12 = smov %s6738_s13 }
 0x542   : > { %s12358_s13 = smov %s6742_s14  ;;  %s12359_s14 = smov %s6831_s29 }
 0x543   : > { %s12360_s15 = smov %s6819_s26  ;;  %23 = sbr.rel (!%p21_p13) target bundleno = 8 (0x8), region = 124 }
 0x548   :  { %6378 = vsyncpa [#allocation5], 1 }
 0x549   :  { %6380 = vsyncpa [#allocation5 + $0x1], 1 }
 0x54a   :  { %6381 = vsyncpa [#allocation8], 1 }
 0x54b   :  { %6383 = vsyncpa [#allocation8 + $0x1], 1 }
 0x54c   :  { %6384 = vsyncpa [#allocation6], 1 }
 0x54d   :  { %6386 = vsyncpa [#allocation6 + $0x1], 1 }
 0x54e   :  { %6387 = vsyncpa [#allocation11], 1 }
 0x54f   :  { %6389 = vsyncpa [#allocation11 + $0x1], 1 }

</bundles_post_ra>
